<compile_context>
chip_gen: v7x
topology: tpu7x:2x2x1
jax: 0.10.0
libtpu: 0.0.40
codegen_flags: <defaults>
</compile_context>

<pallas_src>
import functools

import jax
import jax.numpy as jnp
from jax import lax
from jax.experimental import pallas as pl
from jax.experimental.pallas import tpu as pltpu


_TAPS = tuple((dy, dx) for dy in range(3) for dx in range(3))  # t = dy*3 + dx


def _res_path_fused_kernel(x_ref, wA_ref, bA_ref, wB_ref, bB_ref, out_ref,
                           act_ref, patch_ref,
                           *, H, W, Wp, M, Cout, Cmax, num_steps):
    """All res_path conv-pair stages for one batch element, fully in VMEM.

    x_ref     : (H*W, Cmax)        channels-last input (channels zero-padded)
    wA_ref    : (9*Cmax, 2*Cout)   stage-0 combined weights  [conv3x3 | conv1x1]
    bA_ref    : (1, 2*Cout)        stage-0 combined biases
    wB_ref    : (9*Cmax, 2*Cout)   stage>=1 combined weights (shared)
    bB_ref    : (1, 2*Cout)
    out_ref   : (H*(W+2), Cout)    result in the "padded rows" layout
    act_ref   : (pad_rows, Cmax)   zero-padded activation scratch (VMEM)
    patch_ref : (M, 9*Cmax)        im2col scratch (VMEM)
    """
    # Zero the padded activation (halo rows/cols stay zero for every stage),
    # then scatter the input image rows into the interior.
    act_ref[...] = jnp.zeros_like(act_ref)
    for y in range(H):
        act_ref[pl.ds((y + 1) * Wp + 1, W), :] = x_ref[pl.ds(y * W, W), :]

    # In the padded-rows layout, row r corresponds to output pixel
    # (r // Wp, r % Wp); columns >= W are wrap-around garbage and are masked to
    # zero (they become the zero halo of the next stage).
    col = lax.broadcasted_iota(jnp.int32, (M, 1), 0) % Wp
    valid = col < W

    def conv_pair(w_ref, b_ref):
        # im2col: nine sublane-offset 2-D slices (no reshapes), ONE MXU matmul.
        for t, (dy, dx) in enumerate(_TAPS):
            patch_ref[:, t * Cmax:(t + 1) * Cmax] = (
                act_ref[pl.ds(dy * Wp + dx, M), :])
        y2 = jnp.dot(patch_ref[...], w_ref[...],
                     preferred_element_type=jnp.float32) + b_ref[...]
        z = (jnp.maximum(y2[:, :Cout], 0.0) +          # relu(conv3x3 + b3)
             jnp.maximum(y2[:, Cout:2 * Cout], 0.0))   # + relu(conv1x1 + b1)
        return jnp.where(valid, z, 0.0)

    z = conv_pair(wA_ref, bA_ref)
    for _ in range(num_steps - 1):
        # Feed the stage result back as the next stage's (already padded) input.
        act_ref[pl.ds(Wp + 1, M), 0:Cout] = z
        z = conv_pair(wB_ref, bB_ref)

    out_ref[...] = z.astype(out_ref.dtype)


def num_extra_steps(path_number):
    n = 0
    if path_number <= 3:
        n += 1
    if path_number <= 2:
        n += 1
    if path_number <= 1:
        n += 1
    return n


def _pack_step_weights(w3, b3, w1, b1, cin, cout, cmax):
    """Build the combined (9*cmax, 2*cout) RHS: 3x3 taps | 1x1 in the centre tap."""
    w3p = jnp.zeros((9, cmax, cout), jnp.float32).at[:, :cin, :].set(w3)
    w1p = jnp.zeros((9, cmax, cout), jnp.float32).at[4, :cin, :].set(w1)
    rhs = jnp.concatenate(
        [w3p.reshape(9 * cmax, cout), w1p.reshape(9 * cmax, cout)], axis=1)
    bias = jnp.concatenate([b3, b1], axis=1)          # (1, 2*cout)
    return rhs, bias


def res_path_forward(x_nchw, params, path_number):
    """Full res_path forward.  Input/output are NCHW (PyTorch convention)."""
    if path_number > 4:
        return x_nchw                      # module returns the input unchanged

    N, Cin, H, W = x_nchw.shape
    Cout = params["w3_1"].shape[-1]
    Cmax = max(Cin, Cout)
    Wp = W + 2
    M = H * Wp
    num_steps = 1 + num_extra_steps(path_number)

    # NCHW -> channels-last (N, H*W, Cmax); zero-pad extra channel columns.
    x_cl = jnp.transpose(x_nchw, (0, 2, 3, 1)).reshape(N, H * W, Cin)
    if Cin < Cmax:
        x_cl = jnp.pad(x_cl, ((0, 0), (0, 0), (0, Cmax - Cin)))

    wA, bA = _pack_step_weights(params["w3_1"], params["b3_1"],
                                params["w1_3"], params["b1_3"],
                                Cin, Cout, Cmax)
    wB, bB = _pack_step_weights(params["w3_2"], params["b3_2"],
                                params["w1_4"], params["b1_4"],
                                Cout, Cout, Cmax)

    # +2 rows so the (dy=2, dx=2) tap slice stays in bounds; round to sublanes.
    pad_rows = (((H + 2) * Wp + 2) + 7) // 8 * 8

    kernel = functools.partial(
        _res_path_fused_kernel, H=H, W=W, Wp=Wp, M=M,
        Cout=Cout, Cmax=Cmax, num_steps=num_steps)

    out_padded = pl.pallas_call(
        kernel,
        out_shape=jax.ShapeDtypeStruct((N, M, Cout), x_nchw.dtype),
        grid_spec=pltpu.PrefetchScalarGridSpec(
            num_scalar_prefetch=0,
            grid=(N,),
            in_specs=[
                pl.BlockSpec((None, H * W, Cmax), lambda n: (n, 0, 0)),
                pl.BlockSpec((9 * Cmax, 2 * Cout), lambda n: (0, 0)),
                pl.BlockSpec((1, 2 * Cout), lambda n: (0, 0)),
                pl.BlockSpec((9 * Cmax, 2 * Cout), lambda n: (0, 0)),
                pl.BlockSpec((1, 2 * Cout), lambda n: (0, 0)),
            ],
            out_specs=pl.BlockSpec((None, M, Cout), lambda n: (n, 0, 0)),
            scratch_shapes=[
                pltpu.VMEM((pad_rows, Cmax), jnp.float32),   # padded activation
                pltpu.VMEM((M, 9 * Cmax), jnp.float32),      # im2col patch
            ],
        ),
        compiler_params=pltpu.CompilerParams(
            dimension_semantics=("parallel",)),
    )(x_cl, wA, bA, wB, bB)

    # Drop the two halo columns of each row block and convert to NCHW once.
    out = out_padded.reshape(N, H, Wp, Cout)[:, :, :W, :]
    return jnp.transpose(out, (0, 3, 1, 2))


# ----- pure-JAX reference (for correctness check only) ------------------------
def _ref_step(x, w3, b3, w1, b1):
    cin, cout = w3.shape[1], w3.shape[2]
    w3h = w3.reshape(3, 3, cin, cout)                       # HWIO
    c3 = lax.conv_general_dilated(
        x, w3h, (1, 1), "SAME",
        dimension_numbers=("NHWC", "HWIO", "NHWC")) + b3[0]
    c1 = lax.conv_general_dilated(
        x, w1[None, None], (1, 1), "SAME",
        dimension_numbers=("NHWC", "HWIO", "NHWC")) + b1[0]
    return jnp.maximum(c3, 0.0) + jnp.maximum(c1, 0.0)


def res_path_reference(x_nchw, params, path_number):
    res = jnp.transpose(x_nchw, (0, 2, 3, 1))
    if path_number <= 4:
        res = _ref_step(res, params["w3_1"], params["b3_1"],
                        params["w1_3"], params["b1_3"])
        for _ in range(num_extra_steps(path_number)):
            res = _ref_step(res, params["w3_2"], params["b3_2"],
                            params["w1_4"], params["b1_4"])
    return jnp.transpose(res, (0, 3, 1, 2))


def init_params(key, in_size, filter_size):
    ks = jax.random.split(key, 8)
    s = 0.1
    return {
        # cnn1: Conv2d(in_size, filter_size, 3, 1, 1)   (tap-major: t = dy*3+dx)
        "w3_1": s * jax.random.normal(ks[0], (9, in_size, filter_size), jnp.float32),
        "b3_1": s * jax.random.normal(ks[1], (1, filter_size), jnp.float32),
        # cnn2: Conv2d(filter_size, filter_size, 3, 1, 1)
        "w3_2": s * jax.random.normal(ks[2], (9, filter_size, filter_size), jnp.float32),
        "b3_2": s * jax.random.normal(ks[3], (1, filter_size), jnp.float32),
        # cnn3: Conv2d(in_size, filter_size, 1, 1, 0)
        "w1_3": s * jax.random.normal(ks[4], (in_size, filter_size), jnp.float32),
        "b1_3": s * jax.random.normal(ks[5], (1, filter_size), jnp.float32),
        # cnn4: Conv2d(filter_size, filter_size, 1, 1, 0)
        "w1_4": s * jax.random.normal(ks[6], (filter_size, filter_size), jnp.float32),
        "b1_4": s * jax.random.normal(ks[7], (1, filter_size), jnp.float32),
    }


if __name__ == "__main__":
    key = jax.random.PRNGKey(0)
    kx, kp = jax.random.split(key)

    # small shapes consistent with the module
    batch, in_size, filter_size, spatial = 2, 4, 8, 16
    path_number = 2  # -> 3 fused conv-pair stages

    x = jax.random.normal(kx, (batch, in_size, spatial, spatial), jnp.float32)  # NCHW
    params = init_params(kp, in_size, filter_size)

    fwd = jax.jit(functools.partial(res_path_forward, path_number=path_number))
    out = jax.block_until_ready(fwd(x, params))

    ref = res_path_reference(x, params, path_number)
    assert out.shape == (batch, filter_size, spatial, spatial), out.shape
    err = float(jnp.max(jnp.abs(out - ref)))
    assert jnp.allclose(out, ref, atol=2e-4, rtol=2e-4), err

    print("KERNEL_OK")
</pallas_src>

<mosaic_0001>
module attributes {stable_mosaic.version = 11 : i64} {
  func.func @_res_path_fused_kernel(%arg0: i32, %arg1: memref<1x256x8xf32, #tpu.memory_space<vmem>>, %arg2: memref<72x16xf32, #tpu.memory_space<vmem>>, %arg3: memref<1x16xf32, #tpu.memory_space<vmem>>, %arg4: memref<72x16xf32, #tpu.memory_space<vmem>>, %arg5: memref<1x16xf32, #tpu.memory_space<vmem>>, %arg6: memref<1x288x8xf32, #tpu.memory_space<vmem>>, %arg7: memref<328x8xf32, #tpu.memory_space<vmem>>, %arg8: memref<288x72xf32, #tpu.memory_space<vmem>>) attributes {dimension_semantics = [#tpu.dimension_semantics<parallel>], iteration_bounds = array<i64: 2>, scalar_prefetch = 0 : i64, scratch_operands = 2 : i64, tpu.core_type = #tpu.core_type<tc>, window_params = [{transform_indices = @transform_0, window_bounds = array<i64: 1, 256, 8>}, {pipeline_mode = #tpu.pipeline_mode<synchronous>, transform_indices = @transform_1, window_bounds = array<i64: 72, 16>}, {pipeline_mode = #tpu.pipeline_mode<synchronous>, transform_indices = @transform_2, window_bounds = array<i64: 1, 16>}, {pipeline_mode = #tpu.pipeline_mode<synchronous>, transform_indices = @transform_3, window_bounds = array<i64: 72, 16>}, {pipeline_mode = #tpu.pipeline_mode<synchronous>, transform_indices = @transform_4, window_bounds = array<i64: 1, 16>}, {transform_indices = @transform_5, window_bounds = array<i64: 1, 288, 8>}]} {
    %cst = arith.constant 0.000000e+00 : f32
    %0 = vector.broadcast %cst : f32 to vector<328x8xf32>
    %c0 = arith.constant 0 : index
    %c0_0 = arith.constant 0 : index
    %1 = vector.load %arg7[%c0, %c0_0] : memref<328x8xf32, #tpu.memory_space<vmem>>, vector<328x8xf32>
    tpu.vector_store %arg7[%c0, %c0_0], %0 {strides = array<i32>} : memref<328x8xf32, #tpu.memory_space<vmem>>, vector<328x8xf32>,
    %c0_1 = arith.constant 0 : index
    %c0_2 = arith.constant 0 : index
    %c0_3 = arith.constant 0 : index
    %2 = vector.load %arg1[%c0_1, %c0_2, %c0_3] : memref<1x256x8xf32, #tpu.memory_space<vmem>>, vector<1x16x8xf32>
    %3 = vector.shape_cast %2 : vector<1x16x8xf32> to vector<16x8xf32>
    %c19 = arith.constant 19 : index
    %c0_4 = arith.constant 0 : index
    %4 = vector.load %arg7[%c19, %c0_4] : memref<328x8xf32, #tpu.memory_space<vmem>>, vector<16x8xf32>
    tpu.vector_store %arg7[%c19, %c0_4], %3 {strides = array<i32>} : memref<328x8xf32, #tpu.memory_space<vmem>>, vector<16x8xf32>,
    %c0_5 = arith.constant 0 : index
    %c16 = arith.constant 16 : index
    %c0_6 = arith.constant 0 : index
    %5 = vector.load %arg1[%c0_5, %c16, %c0_6] : memref<1x256x8xf32, #tpu.memory_space<vmem>>, vector<1x16x8xf32>
    %6 = vector.shape_cast %5 : vector<1x16x8xf32> to vector<16x8xf32>
    %c37 = arith.constant 37 : index
    %c0_7 = arith.constant 0 : index
    %7 = vector.load %arg7[%c37, %c0_7] : memref<328x8xf32, #tpu.memory_space<vmem>>, vector<16x8xf32>
    tpu.vector_store %arg7[%c37, %c0_7], %6 {strides = array<i32>} : memref<328x8xf32, #tpu.memory_space<vmem>>, vector<16x8xf32>,
    %c0_8 = arith.constant 0 : index
    %c32 = arith.constant 32 : index
    %c0_9 = arith.constant 0 : index
    %8 = vector.load %arg1[%c0_8, %c32, %c0_9] : memref<1x256x8xf32, #tpu.memory_space<vmem>>, vector<1x16x8xf32>
    %9 = vector.shape_cast %8 : vector<1x16x8xf32> to vector<16x8xf32>
    %c55 = arith.constant 55 : index
    %c0_10 = arith.constant 0 : index
    %10 = vector.load %arg7[%c55, %c0_10] : memref<328x8xf32, #tpu.memory_space<vmem>>, vector<16x8xf32>
    tpu.vector_store %arg7[%c55, %c0_10], %9 {strides = array<i32>} : memref<328x8xf32, #tpu.memory_space<vmem>>, vector<16x8xf32>,
    %c0_11 = arith.constant 0 : index
    %c48 = arith.constant 48 : index
    %c0_12 = arith.constant 0 : index
    %11 = vector.load %arg1[%c0_11, %c48, %c0_12] : memref<1x256x8xf32, #tpu.memory_space<vmem>>, vector<1x16x8xf32>
    %12 = vector.shape_cast %11 : vector<1x16x8xf32> to vector<16x8xf32>
    %c73 = arith.constant 73 : index
    %c0_13 = arith.constant 0 : index
    %13 = vector.load %arg7[%c73, %c0_13] : memref<328x8xf32, #tpu.memory_space<vmem>>, vector<16x8xf32>
    tpu.vector_store %arg7[%c73, %c0_13], %12 {strides = array<i32>} : memref<328x8xf32, #tpu.memory_space<vmem>>, vector<16x8xf32>,
    %c0_14 = arith.constant 0 : index
    %c64 = arith.constant 64 : index
    %c0_15 = arith.constant 0 : index
    %14 = vector.load %arg1[%c0_14, %c64, %c0_15] : memref<1x256x8xf32, #tpu.memory_space<vmem>>, vector<1x16x8xf32>
    %15 = vector.shape_cast %14 : vector<1x16x8xf32> to vector<16x8xf32>
    %c91 = arith.constant 91 : index
    %c0_16 = arith.constant 0 : index
    %16 = vector.load %arg7[%c91, %c0_16] : memref<328x8xf32, #tpu.memory_space<vmem>>, vector<16x8xf32>
    tpu.vector_store %arg7[%c91, %c0_16], %15 {strides = array<i32>} : memref<328x8xf32, #tpu.memory_space<vmem>>, vector<16x8xf32>,
    %c0_17 = arith.constant 0 : index
    %c80 = arith.constant 80 : index
    %c0_18 = arith.constant 0 : index
    %17 = vector.load %arg1[%c0_17, %c80, %c0_18] : memref<1x256x8xf32, #tpu.memory_space<vmem>>, vector<1x16x8xf32>
    %18 = vector.shape_cast %17 : vector<1x16x8xf32> to vector<16x8xf32>
    %c109 = arith.constant 109 : index
    %c0_19 = arith.constant 0 : index
    %19 = vector.load %arg7[%c109, %c0_19] : memref<328x8xf32, #tpu.memory_space<vmem>>, vector<16x8xf32>
    tpu.vector_store %arg7[%c109, %c0_19], %18 {strides = array<i32>} : memref<328x8xf32, #tpu.memory_space<vmem>>, vector<16x8xf32>,
    %c0_20 = arith.constant 0 : index
    %c96 = arith.constant 96 : index
    %c0_21 = arith.constant 0 : index
    %20 = vector.load %arg1[%c0_20, %c96, %c0_21] : memref<1x256x8xf32, #tpu.memory_space<vmem>>, vector<1x16x8xf32>
    %21 = vector.shape_cast %20 : vector<1x16x8xf32> to vector<16x8xf32>
    %c127 = arith.constant 127 : index
    %c0_22 = arith.constant 0 : index
    %22 = vector.load %arg7[%c127, %c0_22] : memref<328x8xf32, #tpu.memory_space<vmem>>, vector<16x8xf32>
    tpu.vector_store %arg7[%c127, %c0_22], %21 {strides = array<i32>} : memref<328x8xf32, #tpu.memory_space<vmem>>, vector<16x8xf32>,
    %c0_23 = arith.constant 0 : index
    %c112 = arith.constant 112 : index
    %c0_24 = arith.constant 0 : index
    %23 = vector.load %arg1[%c0_23, %c112, %c0_24] : memref<1x256x8xf32, #tpu.memory_space<vmem>>, vector<1x16x8xf32>
    %24 = vector.shape_cast %23 : vector<1x16x8xf32> to vector<16x8xf32>
    %c145 = arith.constant 145 : index
    %c0_25 = arith.constant 0 : index
    %25 = vector.load %arg7[%c145, %c0_25] : memref<328x8xf32, #tpu.memory_space<vmem>>, vector<16x8xf32>
    tpu.vector_store %arg7[%c145, %c0_25], %24 {strides = array<i32>} : memref<328x8xf32, #tpu.memory_space<vmem>>, vector<16x8xf32>,
    %c0_26 = arith.constant 0 : index
    %c128 = arith.constant 128 : index
    %c0_27 = arith.constant 0 : index
    %26 = vector.load %arg1[%c0_26, %c128, %c0_27] : memref<1x256x8xf32, #tpu.memory_space<vmem>>, vector<1x16x8xf32>
    %27 = vector.shape_cast %26 : vector<1x16x8xf32> to vector<16x8xf32>
    %c163 = arith.constant 163 : index
    %c0_28 = arith.constant 0 : index
    %28 = vector.load %arg7[%c163, %c0_28] : memref<328x8xf32, #tpu.memory_space<vmem>>, vector<16x8xf32>
    tpu.vector_store %arg7[%c163, %c0_28], %27 {strides = array<i32>} : memref<328x8xf32, #tpu.memory_space<vmem>>, vector<16x8xf32>,
    %c0_29 = arith.constant 0 : index
    %c144 = arith.constant 144 : index
    %c0_30 = arith.constant 0 : index
    %29 = vector.load %arg1[%c0_29, %c144, %c0_30] : memref<1x256x8xf32, #tpu.memory_space<vmem>>, vector<1x16x8xf32>
    %30 = vector.shape_cast %29 : vector<1x16x8xf32> to vector<16x8xf32>
    %c181 = arith.constant 181 : index
    %c0_31 = arith.constant 0 : index
    %31 = vector.load %arg7[%c181, %c0_31] : memref<328x8xf32, #tpu.memory_space<vmem>>, vector<16x8xf32>
    tpu.vector_store %arg7[%c181, %c0_31], %30 {strides = array<i32>} : memref<328x8xf32, #tpu.memory_space<vmem>>, vector<16x8xf32>,
    %c0_32 = arith.constant 0 : index
    %c160 = arith.constant 160 : index
    %c0_33 = arith.constant 0 : index
    %32 = vector.load %arg1[%c0_32, %c160, %c0_33] : memref<1x256x8xf32, #tpu.memory_space<vmem>>, vector<1x16x8xf32>
    %33 = vector.shape_cast %32 : vector<1x16x8xf32> to vector<16x8xf32>
    %c199 = arith.constant 199 : index
    %c0_34 = arith.constant 0 : index
    %34 = vector.load %arg7[%c199, %c0_34] : memref<328x8xf32, #tpu.memory_space<vmem>>, vector<16x8xf32>
    tpu.vector_store %arg7[%c199, %c0_34], %33 {strides = array<i32>} : memref<328x8xf32, #tpu.memory_space<vmem>>, vector<16x8xf32>,
    %c0_35 = arith.constant 0 : index
    %c176 = arith.constant 176 : index
    %c0_36 = arith.constant 0 : index
    %35 = vector.load %arg1[%c0_35, %c176, %c0_36] : memref<1x256x8xf32, #tpu.memory_space<vmem>>, vector<1x16x8xf32>
    %36 = vector.shape_cast %35 : vector<1x16x8xf32> to vector<16x8xf32>
    %c217 = arith.constant 217 : index
    %c0_37 = arith.constant 0 : index
    %37 = vector.load %arg7[%c217, %c0_37] : memref<328x8xf32, #tpu.memory_space<vmem>>, vector<16x8xf32>
    tpu.vector_store %arg7[%c217, %c0_37], %36 {strides = array<i32>} : memref<328x8xf32, #tpu.memory_space<vmem>>, vector<16x8xf32>,
    %c0_38 = arith.constant 0 : index
    %c192 = arith.constant 192 : index
    %c0_39 = arith.constant 0 : index
    %38 = vector.load %arg1[%c0_38, %c192, %c0_39] : memref<1x256x8xf32, #tpu.memory_space<vmem>>, vector<1x16x8xf32>
    %39 = vector.shape_cast %38 : vector<1x16x8xf32> to vector<16x8xf32>
    %c235 = arith.constant 235 : index
    %c0_40 = arith.constant 0 : index
    %40 = vector.load %arg7[%c235, %c0_40] : memref<328x8xf32, #tpu.memory_space<vmem>>, vector<16x8xf32>
    tpu.vector_store %arg7[%c235, %c0_40], %39 {strides = array<i32>} : memref<328x8xf32, #tpu.memory_space<vmem>>, vector<16x8xf32>,
    %c0_41 = arith.constant 0 : index
    %c208 = arith.constant 208 : index
    %c0_42 = arith.constant 0 : index
    %41 = vector.load %arg1[%c0_41, %c208, %c0_42] : memref<1x256x8xf32, #tpu.memory_space<vmem>>, vector<1x16x8xf32>
    %42 = vector.shape_cast %41 : vector<1x16x8xf32> to vector<16x8xf32>
    %c253 = arith.constant 253 : index
    %c0_43 = arith.constant 0 : index
    %43 = vector.load %arg7[%c253, %c0_43] : memref<328x8xf32, #tpu.memory_space<vmem>>, vector<16x8xf32>
    tpu.vector_store %arg7[%c253, %c0_43], %42 {strides = array<i32>} : memref<328x8xf32, #tpu.memory_space<vmem>>, vector<16x8xf32>,
    %c0_44 = arith.constant 0 : index
    %c224 = arith.constant 224 : index
    %c0_45 = arith.constant 0 : index
    %44 = vector.load %arg1[%c0_44, %c224, %c0_45] : memref<1x256x8xf32, #tpu.memory_space<vmem>>, vector<1x16x8xf32>
    %45 = vector.shape_cast %44 : vector<1x16x8xf32> to vector<16x8xf32>
    %c271 = arith.constant 271 : index
    %c0_46 = arith.constant 0 : index
    %46 = vector.load %arg7[%c271, %c0_46] : memref<328x8xf32, #tpu.memory_space<vmem>>, vector<16x8xf32>
    tpu.vector_store %arg7[%c271, %c0_46], %45 {strides = array<i32>} : memref<328x8xf32, #tpu.memory_space<vmem>>, vector<16x8xf32>,
    %c0_47 = arith.constant 0 : index
    %c240 = arith.constant 240 : index
    %c0_48 = arith.constant 0 : index
    %47 = vector.load %arg1[%c0_47, %c240, %c0_48] : memref<1x256x8xf32, #tpu.memory_space<vmem>>, vector<1x16x8xf32>
    %48 = vector.shape_cast %47 : vector<1x16x8xf32> to vector<16x8xf32>
    %c289 = arith.constant 289 : index
    %c0_49 = arith.constant 0 : index
    %49 = vector.load %arg7[%c289, %c0_49] : memref<328x8xf32, #tpu.memory_space<vmem>>, vector<16x8xf32>
    tpu.vector_store %arg7[%c289, %c0_49], %48 {strides = array<i32>} : memref<328x8xf32, #tpu.memory_space<vmem>>, vector<16x8xf32>,
    %50 = tpu.iota {dimensions = array<i32: 0>} : vector<288x1xi32>
    %c18_i32 = arith.constant 18 : i32
    %c0_i32 = arith.constant 0 : i32
    %51 = arith.cmpi eq, %c18_i32, %c0_i32 : i32
    %c1_i32 = arith.constant 1 : i32
    %52 = arith.select %51, %c1_i32, %c18_i32 : i32
    %53 = vector.broadcast %52 : i32 to vector<288x1xi32>
    %54 = arith.remsi %50, %53 : vector<288x1xi32>
    %c0_i32_50 = arith.constant 0 : i32
    %55 = vector.broadcast %c0_i32_50 : i32 to vector<288x1xi32>
    %56 = arith.cmpi ne, %54, %55 : vector<288x1xi32>
    %c0_i32_51 = arith.constant 0 : i32
    %57 = vector.broadcast %c0_i32_51 : i32 to vector<288x1xi32>
    %58 = arith.cmpi slt, %54, %57 : vector<288x1xi32>
    %c0_i32_52 = arith.constant 0 : i32
    %59 = arith.cmpi slt, %52, %c0_i32_52 : i32
    %60 = vector.broadcast %59 : i1 to vector<288x1xi1>
    %61 = vector.broadcast %60 : vector<288x1xi1> to vector<288x1xi1>
    %62 = arith.xori %58, %61 : vector<288x1xi1>
    %63 = arith.andi %62, %56 : vector<288x1xi1>
    %64 = vector.broadcast %52 : i32 to vector<288x1xi32>
    %65 = arith.addi %54, %64 : vector<288x1xi32>
    %66 = arith.select %63, %65, %54 : vector<288x1xi1>, vector<288x1xi32>
    %c16_i32 = arith.constant 16 : i32
    %67 = vector.broadcast %c16_i32 : i32 to vector<288x1xi32>
    %68 = arith.cmpi slt, %66, %67 : vector<288x1xi32>
    %c0_53 = arith.constant 0 : index
    %c0_54 = arith.constant 0 : index
    %69 = vector.load %arg7[%c0_53, %c0_54] : memref<328x8xf32, #tpu.memory_space<vmem>>, vector<288x8xf32>
    %c0_55 = arith.constant 0 : index
    %c0_56 = arith.constant 0 : index
    %70 = vector.load %arg8[%c0_55, %c0_56] : memref<288x72xf32, #tpu.memory_space<vmem>>, vector<288x8xf32>
    tpu.vector_store %arg8[%c0_55, %c0_56], %69 {strides = array<i32>} : memref<288x72xf32, #tpu.memory_space<vmem>>, vector<288x8xf32>,
    %c1 = arith.constant 1 : index
    %c0_57 = arith.constant 0 : index
    %71 = vector.load %arg7[%c1, %c0_57] : memref<328x8xf32, #tpu.memory_space<vmem>>, vector<288x8xf32>
    %c0_58 = arith.constant 0 : index
    %c8 = arith.constant 8 : index
    %72 = vector.load %arg8[%c0_58, %c8] : memref<288x72xf32, #tpu.memory_space<vmem>>, vector<288x8xf32>
    tpu.vector_store %arg8[%c0_58, %c8], %71 {strides = array<i32>} : memref<288x72xf32, #tpu.memory_space<vmem>>, vector<288x8xf32>,
    %c2 = arith.constant 2 : index
    %c0_59 = arith.constant 0 : index
    %73 = vector.load %arg7[%c2, %c0_59] : memref<328x8xf32, #tpu.memory_space<vmem>>, vector<288x8xf32>
    %c0_60 = arith.constant 0 : index
    %c16_61 = arith.constant 16 : index
    %74 = vector.load %arg8[%c0_60, %c16_61] : memref<288x72xf32, #tpu.memory_space<vmem>>, vector<288x8xf32>
    tpu.vector_store %arg8[%c0_60, %c16_61], %73 {strides = array<i32>} : memref<288x72xf32, #tpu.memory_space<vmem>>, vector<288x8xf32>,
    %c18 = arith.constant 18 : index
    %c0_62 = arith.constant 0 : index
    %75 = vector.load %arg7[%c18, %c0_62] : memref<328x8xf32, #tpu.memory_space<vmem>>, vector<288x8xf32>
    %c0_63 = arith.constant 0 : index
    %c24 = arith.constant 24 : index
    %76 = vector.load %arg8[%c0_63, %c24] : memref<288x72xf32, #tpu.memory_space<vmem>>, vector<288x8xf32>
    tpu.vector_store %arg8[%c0_63, %c24], %75 {strides = array<i32>} : memref<288x72xf32, #tpu.memory_space<vmem>>, vector<288x8xf32>,
    %c19_64 = arith.constant 19 : index
    %c0_65 = arith.constant 0 : index
    %77 = vector.load %arg7[%c19_64, %c0_65] : memref<328x8xf32, #tpu.memory_space<vmem>>, vector<288x8xf32>
    %c0_66 = arith.constant 0 : index
    %c32_67 = arith.constant 32 : index
    %78 = vector.load %arg8[%c0_66, %c32_67] : memref<288x72xf32, #tpu.memory_space<vmem>>, vector<288x8xf32>
    tpu.vector_store %arg8[%c0_66, %c32_67], %77 {strides = array<i32>} : memref<288x72xf32, #tpu.memory_space<vmem>>, vector<288x8xf32>,
    %c20 = arith.constant 20 : index
    %c0_68 = arith.constant 0 : index
    %79 = vector.load %arg7[%c20, %c0_68] : memref<328x8xf32, #tpu.memory_space<vmem>>, vector<288x8xf32>
    %c0_69 = arith.constant 0 : index
    %c40 = arith.constant 40 : index
    %80 = vector.load %arg8[%c0_69, %c40] : memref<288x72xf32, #tpu.memory_space<vmem>>, vector<288x8xf32>
    tpu.vector_store %arg8[%c0_69, %c40], %79 {strides = array<i32>} : memref<288x72xf32, #tpu.memory_space<vmem>>, vector<288x8xf32>,
    %c36 = arith.constant 36 : index
    %c0_70 = arith.constant 0 : index
    %81 = vector.load %arg7[%c36, %c0_70] : memref<328x8xf32, #tpu.memory_space<vmem>>, vector<288x8xf32>
    %c0_71 = arith.constant 0 : index
    %c48_72 = arith.constant 48 : index
    %82 = vector.load %arg8[%c0_71, %c48_72] : memref<288x72xf32, #tpu.memory_space<vmem>>, vector<288x8xf32>
    tpu.vector_store %arg8[%c0_71, %c48_72], %81 {strides = array<i32>} : memref<288x72xf32, #tpu.memory_space<vmem>>, vector<288x8xf32>,
    %c37_73 = arith.constant 37 : index
    %c0_74 = arith.constant 0 : index
    %83 = vector.load %arg7[%c37_73, %c0_74] : memref<328x8xf32, #tpu.memory_space<vmem>>, vector<288x8xf32>
    %c0_75 = arith.constant 0 : index
    %c56 = arith.constant 56 : index
    %84 = vector.load %arg8[%c0_75, %c56] : memref<288x72xf32, #tpu.memory_space<vmem>>, vector<288x8xf32>
    tpu.vector_store %arg8[%c0_75, %c56], %83 {strides = array<i32>} : memref<288x72xf32, #tpu.memory_space<vmem>>, vector<288x8xf32>,
    %c38 = arith.constant 38 : index
    %c0_76 = arith.constant 0 : index
    %85 = vector.load %arg7[%c38, %c0_76] : memref<328x8xf32, #tpu.memory_space<vmem>>, vector<288x8xf32>
    %c0_77 = arith.constant 0 : index
    %c64_78 = arith.constant 64 : index
    %86 = vector.load %arg8[%c0_77, %c64_78] : memref<288x72xf32, #tpu.memory_space<vmem>>, vector<288x8xf32>
    tpu.vector_store %arg8[%c0_77, %c64_78], %85 {strides = array<i32>} : memref<288x72xf32, #tpu.memory_space<vmem>>, vector<288x8xf32>,
    %c0_79 = arith.constant 0 : index
    %c0_80 = arith.constant 0 : index
    %87 = vector.load %arg8[%c0_79, %c0_80] : memref<288x72xf32, #tpu.memory_space<vmem>>, vector<288x72xf32>
    %c0_81 = arith.constant 0 : index
    %c0_82 = arith.constant 0 : index
    %88 = vector.load %arg2[%c0_81, %c0_82] : memref<72x16xf32, #tpu.memory_space<vmem>>, vector<72x16xf32>
    %cst_83 = arith.constant dense<0.000000e+00> : vector<288x16xf32>
    %89 = tpu.matmul %87, %88, %cst_83 {dimension_numbers = #tpu.dot_dimension_numbers<[1], [0], [0], [1], [0, 0, 1, 1], [], []>} : vector<288x72xf32>, vector<72x16xf32>, vector<288x16xf32> -> vector<288x16xf32>
    %c0_84 = arith.constant 0 : index
    %c0_85 = arith.constant 0 : index
    %90 = vector.load %arg3[%c0_84, %c0_85] : memref<1x16xf32, #tpu.memory_space<vmem>>, vector<1x16xf32>
    %91 = vector.broadcast %90 : vector<1x16xf32> to vector<288x16xf32>
    %92 = arith.addf %89, %91 : vector<288x16xf32>
    %93 = vector.extract_strided_slice %92 {offsets = [0, 0], sizes = [288, 8], strides = [1, 1]} : vector<288x16xf32> to vector<288x8xf32>
    %cst_86 = arith.constant 0.000000e+00 : f32
    %94 = vector.broadcast %cst_86 : f32 to vector<288x8xf32>
    %95 = arith.maximumf %93, %94 : vector<288x8xf32>
    %96 = vector.extract_strided_slice %92 {offsets = [0, 8], sizes = [288, 8], strides = [1, 1]} : vector<288x16xf32> to vector<288x8xf32>
    %cst_87 = arith.constant 0.000000e+00 : f32
    %97 = vector.broadcast %cst_87 : f32 to vector<288x8xf32>
    %98 = arith.maximumf %96, %97 : vector<288x8xf32>
    %99 = arith.addf %95, %98 : vector<288x8xf32>
    %cst_88 = arith.constant 0.000000e+00 : f32
    %100 = vector.shape_cast %68 : vector<288x1xi1> to vector<288x1xi1>
    %101 = vector.broadcast %100 : vector<288x1xi1> to vector<288x8xi1>
    %102 = vector.broadcast %cst_88 : f32 to vector<288x8xf32>
    %103 = arith.select %101, %99, %102 : vector<288x8xi1>, vector<288x8xf32>
    %c19_89 = arith.constant 19 : index
    %c0_90 = arith.constant 0 : index
    %104 = vector.load %arg7[%c19_89, %c0_90] : memref<328x8xf32, #tpu.memory_space<vmem>>, vector<288x8xf32>
    tpu.vector_store %arg7[%c19_89, %c0_90], %103 {strides = array<i32>} : memref<328x8xf32, #tpu.memory_space<vmem>>, vector<288x8xf32>,
    %c0_91 = arith.constant 0 : index
    %c0_92 = arith.constant 0 : index
    %105 = vector.load %arg7[%c0_91, %c0_92] : memref<328x8xf32, #tpu.memory_space<vmem>>, vector<288x8xf32>
    %c0_93 = arith.constant 0 : index
    %c0_94 = arith.constant 0 : index
    %106 = vector.load %arg8[%c0_93, %c0_94] : memref<288x72xf32, #tpu.memory_space<vmem>>, vector<288x8xf32>
    tpu.vector_store %arg8[%c0_93, %c0_94], %105 {strides = array<i32>} : memref<288x72xf32, #tpu.memory_space<vmem>>, vector<288x8xf32>,
    %c1_95 = arith.constant 1 : index
    %c0_96 = arith.constant 0 : index
    %107 = vector.load %arg7[%c1_95, %c0_96] : memref<328x8xf32, #tpu.memory_space<vmem>>, vector<288x8xf32>
    %c0_97 = arith.constant 0 : index
    %c8_98 = arith.constant 8 : index
    %108 = vector.load %arg8[%c0_97, %c8_98] : memref<288x72xf32, #tpu.memory_space<vmem>>, vector<288x8xf32>
    tpu.vector_store %arg8[%c0_97, %c8_98], %107 {strides = array<i32>} : memref<288x72xf32, #tpu.memory_space<vmem>>, vector<288x8xf32>,
    %c2_99 = arith.constant 2 : index
    %c0_100 = arith.constant 0 : index
    %109 = vector.load %arg7[%c2_99, %c0_100] : memref<328x8xf32, #tpu.memory_space<vmem>>, vector<288x8xf32>
    %c0_101 = arith.constant 0 : index
    %c16_102 = arith.constant 16 : index
    %110 = vector.load %arg8[%c0_101, %c16_102] : memref<288x72xf32, #tpu.memory_space<vmem>>, vector<288x8xf32>
    tpu.vector_store %arg8[%c0_101, %c16_102], %109 {strides = array<i32>} : memref<288x72xf32, #tpu.memory_space<vmem>>, vector<288x8xf32>,
    %c18_103 = arith.constant 18 : index
    %c0_104 = arith.constant 0 : index
    %111 = vector.load %arg7[%c18_103, %c0_104] : memref<328x8xf32, #tpu.memory_space<vmem>>, vector<288x8xf32>
    %c0_105 = arith.constant 0 : index
    %c24_106 = arith.constant 24 : index
    %112 = vector.load %arg8[%c0_105, %c24_106] : memref<288x72xf32, #tpu.memory_space<vmem>>, vector<288x8xf32>
    tpu.vector_store %arg8[%c0_105, %c24_106], %111 {strides = array<i32>} : memref<288x72xf32, #tpu.memory_space<vmem>>, vector<288x8xf32>,
    %c19_107 = arith.constant 19 : index
    %c0_108 = arith.constant 0 : index
    %113 = vector.load %arg7[%c19_107, %c0_108] : memref<328x8xf32, #tpu.memory_space<vmem>>, vector<288x8xf32>
    %c0_109 = arith.constant 0 : index
    %c32_110 = arith.constant 32 : index
    %114 = vector.load %arg8[%c0_109, %c32_110] : memref<288x72xf32, #tpu.memory_space<vmem>>, vector<288x8xf32>
    tpu.vector_store %arg8[%c0_109, %c32_110], %113 {strides = array<i32>} : memref<288x72xf32, #tpu.memory_space<vmem>>, vector<288x8xf32>,
    %c20_111 = arith.constant 20 : index
    %c0_112 = arith.constant 0 : index
    %115 = vector.load %arg7[%c20_111, %c0_112] : memref<328x8xf32, #tpu.memory_space<vmem>>, vector<288x8xf32>
    %c0_113 = arith.constant 0 : index
    %c40_114 = arith.constant 40 : index
    %116 = vector.load %arg8[%c0_113, %c40_114] : memref<288x72xf32, #tpu.memory_space<vmem>>, vector<288x8xf32>
    tpu.vector_store %arg8[%c0_113, %c40_114], %115 {strides = array<i32>} : memref<288x72xf32, #tpu.memory_space<vmem>>, vector<288x8xf32>,
    %c36_115 = arith.constant 36 : index
    %c0_116 = arith.constant 0 : index
    %117 = vector.load %arg7[%c36_115, %c0_116] : memref<328x8xf32, #tpu.memory_space<vmem>>, vector<288x8xf32>
    %c0_117 = arith.constant 0 : index
    %c48_118 = arith.constant 48 : index
    %118 = vector.load %arg8[%c0_117, %c48_118] : memref<288x72xf32, #tpu.memory_space<vmem>>, vector<288x8xf32>
    tpu.vector_store %arg8[%c0_117, %c48_118], %117 {strides = array<i32>} : memref<288x72xf32, #tpu.memory_space<vmem>>, vector<288x8xf32>,
    %c37_119 = arith.constant 37 : index
    %c0_120 = arith.constant 0 : index
    %119 = vector.load %arg7[%c37_119, %c0_120] : memref<328x8xf32, #tpu.memory_space<vmem>>, vector<288x8xf32>
    %c0_121 = arith.constant 0 : index
    %c56_122 = arith.constant 56 : index
    %120 = vector.load %arg8[%c0_121, %c56_122] : memref<288x72xf32, #tpu.memory_space<vmem>>, vector<288x8xf32>
    tpu.vector_store %arg8[%c0_121, %c56_122], %119 {strides = array<i32>} : memref<288x72xf32, #tpu.memory_space<vmem>>, vector<288x8xf32>,
    %c38_123 = arith.constant 38 : index
    %c0_124 = arith.constant 0 : index
    %121 = vector.load %arg7[%c38_123, %c0_124] : memref<328x8xf32, #tpu.memory_space<vmem>>, vector<288x8xf32>
    %c0_125 = arith.constant 0 : index
    %c64_126 = arith.constant 64 : index
    %122 = vector.load %arg8[%c0_125, %c64_126] : memref<288x72xf32, #tpu.memory_space<vmem>>, vector<288x8xf32>
    tpu.vector_store %arg8[%c0_125, %c64_126], %121 {strides = array<i32>} : memref<288x72xf32, #tpu.memory_space<vmem>>, vector<288x8xf32>,
    %c0_127 = arith.constant 0 : index
    %c0_128 = arith.constant 0 : index
    %123 = vector.load %arg8[%c0_127, %c0_128] : memref<288x72xf32, #tpu.memory_space<vmem>>, vector<288x72xf32>
    %c0_129 = arith.constant 0 : index
    %c0_130 = arith.constant 0 : index
    %124 = vector.load %arg4[%c0_129, %c0_130] : memref<72x16xf32, #tpu.memory_space<vmem>>, vector<72x16xf32>
    %cst_131 = arith.constant dense<0.000000e+00> : vector<288x16xf32>
    %125 = tpu.matmul %123, %124, %cst_131 {dimension_numbers = #tpu.dot_dimension_numbers<[1], [0], [0], [1], [0, 0, 1, 1], [], []>} : vector<288x72xf32>, vector<72x16xf32>, vector<288x16xf32> -> vector<288x16xf32>
    %c0_132 = arith.constant 0 : index
    %c0_133 = arith.constant 0 : index
    %126 = vector.load %arg5[%c0_132, %c0_133] : memref<1x16xf32, #tpu.memory_space<vmem>>, vector<1x16xf32>
    %127 = vector.broadcast %126 : vector<1x16xf32> to vector<288x16xf32>
    %128 = arith.addf %125, %127 : vector<288x16xf32>
    %129 = vector.extract_strided_slice %128 {offsets = [0, 0], sizes = [288, 8], strides = [1, 1]} : vector<288x16xf32> to vector<288x8xf32>
    %cst_134 = arith.constant 0.000000e+00 : f32
    %130 = vector.broadcast %cst_134 : f32 to vector<288x8xf32>
    %131 = arith.maximumf %129, %130 : vector<288x8xf32>
    %132 = vector.extract_strided_slice %128 {offsets = [0, 8], sizes = [288, 8], strides = [1, 1]} : vector<288x16xf32> to vector<288x8xf32>
    %cst_135 = arith.constant 0.000000e+00 : f32
    %133 = vector.broadcast %cst_135 : f32 to vector<288x8xf32>
    %134 = arith.maximumf %132, %133 : vector<288x8xf32>
    %135 = arith.addf %131, %134 : vector<288x8xf32>
    %cst_136 = arith.constant 0.000000e+00 : f32
    %136 = vector.shape_cast %68 : vector<288x1xi1> to vector<288x1xi1>
    %137 = vector.broadcast %136 : vector<288x1xi1> to vector<288x8xi1>
    %138 = vector.broadcast %cst_136 : f32 to vector<288x8xf32>
    %139 = arith.select %137, %135, %138 : vector<288x8xi1>, vector<288x8xf32>
    %c19_137 = arith.constant 19 : index
    %c0_138 = arith.constant 0 : index
    %140 = vector.load %arg7[%c19_137, %c0_138] : memref<328x8xf32, #tpu.memory_space<vmem>>, vector<288x8xf32>
    tpu.vector_store %arg7[%c19_137, %c0_138], %139 {strides = array<i32>} : memref<328x8xf32, #tpu.memory_space<vmem>>, vector<288x8xf32>,
    %c0_139 = arith.constant 0 : index
    %c0_140 = arith.constant 0 : index
    %141 = vector.load %arg7[%c0_139, %c0_140] : memref<328x8xf32, #tpu.memory_space<vmem>>, vector<288x8xf32>
    %c0_141 = arith.constant 0 : index
    %c0_142 = arith.constant 0 : index
    %142 = vector.load %arg8[%c0_141, %c0_142] : memref<288x72xf32, #tpu.memory_space<vmem>>, vector<288x8xf32>
    tpu.vector_store %arg8[%c0_141, %c0_142], %141 {strides = array<i32>} : memref<288x72xf32, #tpu.memory_space<vmem>>, vector<288x8xf32>,
    %c1_143 = arith.constant 1 : index
    %c0_144 = arith.constant 0 : index
    %143 = vector.load %arg7[%c1_143, %c0_144] : memref<328x8xf32, #tpu.memory_space<vmem>>, vector<288x8xf32>
    %c0_145 = arith.constant 0 : index
    %c8_146 = arith.constant 8 : index
    %144 = vector.load %arg8[%c0_145, %c8_146] : memref<288x72xf32, #tpu.memory_space<vmem>>, vector<288x8xf32>
    tpu.vector_store %arg8[%c0_145, %c8_146], %143 {strides = array<i32>} : memref<288x72xf32, #tpu.memory_space<vmem>>, vector<288x8xf32>,
    %c2_147 = arith.constant 2 : index
    %c0_148 = arith.constant 0 : index
    %145 = vector.load %arg7[%c2_147, %c0_148] : memref<328x8xf32, #tpu.memory_space<vmem>>, vector<288x8xf32>
    %c0_149 = arith.constant 0 : index
    %c16_150 = arith.constant 16 : index
    %146 = vector.load %arg8[%c0_149, %c16_150] : memref<288x72xf32, #tpu.memory_space<vmem>>, vector<288x8xf32>
    tpu.vector_store %arg8[%c0_149, %c16_150], %145 {strides = array<i32>} : memref<288x72xf32, #tpu.memory_space<vmem>>, vector<288x8xf32>,
    %c18_151 = arith.constant 18 : index
    %c0_152 = arith.constant 0 : index
    %147 = vector.load %arg7[%c18_151, %c0_152] : memref<328x8xf32, #tpu.memory_space<vmem>>, vector<288x8xf32>
    %c0_153 = arith.constant 0 : index
    %c24_154 = arith.constant 24 : index
    %148 = vector.load %arg8[%c0_153, %c24_154] : memref<288x72xf32, #tpu.memory_space<vmem>>, vector<288x8xf32>
    tpu.vector_store %arg8[%c0_153, %c24_154], %147 {strides = array<i32>} : memref<288x72xf32, #tpu.memory_space<vmem>>, vector<288x8xf32>,
    %c19_155 = arith.constant 19 : index
    %c0_156 = arith.constant 0 : index
    %149 = vector.load %arg7[%c19_155, %c0_156] : memref<328x8xf32, #tpu.memory_space<vmem>>, vector<288x8xf32>
    %c0_157 = arith.constant 0 : index
    %c32_158 = arith.constant 32 : index
    %150 = vector.load %arg8[%c0_157, %c32_158] : memref<288x72xf32, #tpu.memory_space<vmem>>, vector<288x8xf32>
    tpu.vector_store %arg8[%c0_157, %c32_158], %149 {strides = array<i32>} : memref<288x72xf32, #tpu.memory_space<vmem>>, vector<288x8xf32>,
    %c20_159 = arith.constant 20 : index
    %c0_160 = arith.constant 0 : index
    %151 = vector.load %arg7[%c20_159, %c0_160] : memref<328x8xf32, #tpu.memory_space<vmem>>, vector<288x8xf32>
    %c0_161 = arith.constant 0 : index
    %c40_162 = arith.constant 40 : index
    %152 = vector.load %arg8[%c0_161, %c40_162] : memref<288x72xf32, #tpu.memory_space<vmem>>, vector<288x8xf32>
    tpu.vector_store %arg8[%c0_161, %c40_162], %151 {strides = array<i32>} : memref<288x72xf32, #tpu.memory_space<vmem>>, vector<288x8xf32>,
    %c36_163 = arith.constant 36 : index
    %c0_164 = arith.constant 0 : index
    %153 = vector.load %arg7[%c36_163, %c0_164] : memref<328x8xf32, #tpu.memory_space<vmem>>, vector<288x8xf32>
    %c0_165 = arith.constant 0 : index
    %c48_166 = arith.constant 48 : index
    %154 = vector.load %arg8[%c0_165, %c48_166] : memref<288x72xf32, #tpu.memory_space<vmem>>, vector<288x8xf32>
    tpu.vector_store %arg8[%c0_165, %c48_166], %153 {strides = array<i32>} : memref<288x72xf32, #tpu.memory_space<vmem>>, vector<288x8xf32>,
    %c37_167 = arith.constant 37 : index
    %c0_168 = arith.constant 0 : index
    %155 = vector.load %arg7[%c37_167, %c0_168] : memref<328x8xf32, #tpu.memory_space<vmem>>, vector<288x8xf32>
    %c0_169 = arith.constant 0 : index
    %c56_170 = arith.constant 56 : index
    %156 = vector.load %arg8[%c0_169, %c56_170] : memref<288x72xf32, #tpu.memory_space<vmem>>, vector<288x8xf32>
    tpu.vector_store %arg8[%c0_169, %c56_170], %155 {strides = array<i32>} : memref<288x72xf32, #tpu.memory_space<vmem>>, vector<288x8xf32>,
    %c38_171 = arith.constant 38 : index
    %c0_172 = arith.constant 0 : index
    %157 = vector.load %arg7[%c38_171, %c0_172] : memref<328x8xf32, #tpu.memory_space<vmem>>, vector<288x8xf32>
    %c0_173 = arith.constant 0 : index
    %c64_174 = arith.constant 64 : index
    %158 = vector.load %arg8[%c0_173, %c64_174] : memref<288x72xf32, #tpu.memory_space<vmem>>, vector<288x8xf32>
    tpu.vector_store %arg8[%c0_173, %c64_174], %157 {strides = array<i32>} : memref<288x72xf32, #tpu.memory_space<vmem>>, vector<288x8xf32>,
    %c0_175 = arith.constant 0 : index
    %c0_176 = arith.constant 0 : index
    %159 = vector.load %arg8[%c0_175, %c0_176] : memref<288x72xf32, #tpu.memory_space<vmem>>, vector<288x72xf32>
    %c0_177 = arith.constant 0 : index
    %c0_178 = arith.constant 0 : index
    %160 = vector.load %arg4[%c0_177, %c0_178] : memref<72x16xf32, #tpu.memory_space<vmem>>, vector<72x16xf32>
    %cst_179 = arith.constant dense<0.000000e+00> : vector<288x16xf32>
    %161 = tpu.matmul %159, %160, %cst_179 {dimension_numbers = #tpu.dot_dimension_numbers<[1], [0], [0], [1], [0, 0, 1, 1], [], []>} : vector<288x72xf32>, vector<72x16xf32>, vector<288x16xf32> -> vector<288x16xf32>
    %c0_180 = arith.constant 0 : index
    %c0_181 = arith.constant 0 : index
    %162 = vector.load %arg5[%c0_180, %c0_181] : memref<1x16xf32, #tpu.memory_space<vmem>>, vector<1x16xf32>
    %163 = vector.broadcast %162 : vector<1x16xf32> to vector<288x16xf32>
    %164 = arith.addf %161, %163 : vector<288x16xf32>
    %165 = vector.extract_strided_slice %164 {offsets = [0, 0], sizes = [288, 8], strides = [1, 1]} : vector<288x16xf32> to vector<288x8xf32>
    %cst_182 = arith.constant 0.000000e+00 : f32
    %166 = vector.broadcast %cst_182 : f32 to vector<288x8xf32>
    %167 = arith.maximumf %165, %166 : vector<288x8xf32>
    %168 = vector.extract_strided_slice %164 {offsets = [0, 8], sizes = [288, 8], strides = [1, 1]} : vector<288x16xf32> to vector<288x8xf32>
    %cst_183 = arith.constant 0.000000e+00 : f32
    %169 = vector.broadcast %cst_183 : f32 to vector<288x8xf32>
    %170 = arith.maximumf %168, %169 : vector<288x8xf32>
    %171 = arith.addf %167, %170 : vector<288x8xf32>
    %cst_184 = arith.constant 0.000000e+00 : f32
    %172 = vector.shape_cast %68 : vector<288x1xi1> to vector<288x1xi1>
    %173 = vector.broadcast %172 : vector<288x1xi1> to vector<288x8xi1>
    %174 = vector.broadcast %cst_184 : f32 to vector<288x8xf32>
    %175 = arith.select %173, %171, %174 : vector<288x8xi1>, vector<288x8xf32>
    %c0_185 = arith.constant 0 : index
    %c0_186 = arith.constant 0 : index
    %c0_187 = arith.constant 0 : index
    %176 = vector.load %arg6[%c0_185, %c0_186, %c0_187] : memref<1x288x8xf32, #tpu.memory_space<vmem>>, vector<1x288x8xf32>
    %177 = vector.shape_cast %176 : vector<1x288x8xf32> to vector<288x8xf32>
    %178 = vector.shape_cast %175 : vector<288x8xf32> to vector<1x288x8xf32>
    tpu.vector_store %arg6[%c0_185, %c0_186, %c0_187], %178 {strides = array<i32>} : memref<1x288x8xf32, #tpu.memory_space<vmem>>, vector<1x288x8xf32>,
    return
  }
  func.func @transform_0(%arg0: i32) -> (i32, i32, i32) {
    %c0_i32 = arith.constant 0 : i32
    %c0_i32_0 = arith.constant 0 : i32
    %c0_i32_1 = arith.constant 0 : i32
    return %arg0, %c0_i32, %c0_i32_0 : i32, i32, i32
  }
  func.func @transform_1(%arg0: i32) -> (i32, i32) {
    %c0_i32 = arith.constant 0 : i32
    %c0_i32_0 = arith.constant 0 : i32
    %c0_i32_1 = arith.constant 0 : i32
    return %c0_i32, %c0_i32_0 : i32, i32
  }
  func.func @transform_2(%arg0: i32) -> (i32, i32) {
    %c0_i32 = arith.constant 0 : i32
    %c0_i32_0 = arith.constant 0 : i32
    %c0_i32_1 = arith.constant 0 : i32
    return %c0_i32, %c0_i32_0 : i32, i32
  }
  func.func @transform_3(%arg0: i32) -> (i32, i32) {
    %c0_i32 = arith.constant 0 : i32
    %c0_i32_0 = arith.constant 0 : i32
    %c0_i32_1 = arith.constant 0 : i32
    return %c0_i32, %c0_i32_0 : i32, i32
  }
  func.func @transform_4(%arg0: i32) -> (i32, i32) {
    %c0_i32 = arith.constant 0 : i32
    %c0_i32_0 = arith.constant 0 : i32
    %c0_i32_1 = arith.constant 0 : i32
    return %c0_i32, %c0_i32_0 : i32, i32
  }
  func.func @transform_5(%arg0: i32) -> (i32, i32, i32) {
    %c0_i32 = arith.constant 0 : i32
    %c0_i32_0 = arith.constant 0 : i32
    %c0_i32_1 = arith.constant 0 : i32
    return %arg0, %c0_i32, %c0_i32_0 : i32, i32, i32
  }
}

</mosaic_0001>

<bundles_post_ra>
// kernel: res_path_forward.1
= control target key start
LH: loop header
LB: loop body
LE: loop exit
PB: predicated region body
PF: predicated region fallthrough
CT: control target
= control target key end

     0   :  { %s9265_s18 = smov 0   ;;  %s14642_s0 = inlined_call_operand.vmem [shape: f32[2,256,8], index: 0, kind: input, shape index: {}]   ;;  %s14643_s1 = inlined_call_operand.vmem [shape: f32[72,16], index: 1, kind: input, shape index: {}]   ;;  %s14644_s2 = inlined_call_operand.vmem [shape: f32[1,16], index: 2, kind: input, shape index: {}]   ;;  %s14645_s3 = inlined_call_operand.vmem [shape: f32[72,16], index: 3, kind: input, shape index: {}]   ;;  %s14646_s4 = inlined_call_operand.vmem [shape: f32[1,16], index: 4, kind: input, shape index: {}]   ;;  %s14647_s5 = inlined_call_operand.vmem [shape: f32[2,288,8], index: 5, kind: output, shape index: {}]  }
   0x1 LB: > { %s8595_s19 = sadd.s32 4294967295, %s9223_s18   ;;  %p8599_p0 = scmp.ge.s32.totalorder %s9223_s18, 1  ;;  %s9223_s18 = sphi %s9265_s18, %s15_s18  }
   0x2   : > { %p187_p1 = scmp.lt.s32.totalorder %s9223_s18, 3 }
   0x4   : > { %p188_p2 = pnand %p8599_p0, %p187_p1 }
   0x6   : > { %191 = sbr.rel (%p188_p2) target bundleno = 3039 (0xbdf), region = 40 }
   0xd   : > { %vm14714_vm0 = vcmask 64512   ;;  %p9275_p3 = scmp.lt.s32.totalorder %s8595_s19, 1  ;;  %v9225_v0 = vmov 0.0   ;;  %s9226_s25 = smov 8   ;;  %vm14713_vm1 = vcmask 130112   ;;  %vm14712_vm2 = vcmask 195712  }
   0xe   : > { %226 = vst.msk [vmem:[#allocation2] sm:$0xff] %vm14714_vm0, %v9225_v0  ;;  %227 = vst.msk [vmem:[#allocation2 + $0x8] sm:$0xff] %vm14714_vm0, %v9225_v0  ;;  %s9227_s26 = smov 16   ;;  %s9228_s27 = smov 24   ;;  %vm14700_vm3 = vcmask 261312   ;;  %vm14698_vm4 = vcmask 326912  }
   0xf   : > { %228 = vst.msk [vmem:[#allocation2 + $0x10] sm:$0xff] %vm14714_vm0, %v9225_v0  ;;  %229 = vst.msk [vmem:[#allocation2 + $0x18] sm:$0xff] %vm14714_vm0, %v9225_v0  ;;  %s15977_s19 = smov (!%p9275_p3, %s8595_s19), 1  ;;  %s9229_s28 = smov 32   ;;  %vm14696_vm5 = vcmask 392512   ;;  %vm14695_vm6 = vcmask 458112  }
  0x10   : > { %230 = vst.msk [vmem:[#allocation2 + $0x20] sm:$0xff] %vm14714_vm0, %v9225_v0  ;;  %231 = vst.msk [vmem:[#allocation2 + $0x28] sm:$0xff] %vm14714_vm0, %v9225_v0  ;;  %s8716_s21 = sshll.u32 %s15977_s19, 8  ;;  %s9230_s29 = smov 40   ;;  %vm14693_vm7 = vcmask 523712   ;;  %vm14692_vm8 = vcmask 589312  }
  0x11   : > { %232 = vst.msk [vmem:[#allocation2 + $0x30] sm:$0xff] %vm14714_vm0, %v9225_v0  ;;  %233 = vst.msk [vmem:[#allocation2 + $0x38] sm:$0xff] %vm14714_vm0, %v9225_v0  ;;  %s9330_s24 = scalar_lea.vmem %s14642_s0, %s8716_s21  ;;  %s9231_s30 = smov 48   ;;  %vm14691_vm9 = vcmask 588800  }
  0x12   : > { %234 = vst.msk [vmem:[#allocation2 + $0x40] sm:$0xff] %vm14714_vm0, %v9225_v0  ;;  %235 = vst.msk [vmem:[#allocation2 + $0x48] sm:$0xff] %vm14714_vm0, %v9225_v0  ;;  %v267_v1 = vld [vmem:[%s9330_s24] sm:$0xff]  ;;  %v268_v2 = vld [vmem:[%s9330_s24 + $0x8] sm:$0xff]  ;;  %s9232_s6 = smov 56   ;;  %s9233_s9 = smov 64  }
  0x13   : > { %236 = vst.msk [vmem:[#allocation2 + $0x50] sm:$0xff] %vm14714_vm0, %v9225_v0  ;;  %237 = vst.msk [vmem:[#allocation2 + $0x58] sm:$0xff] %vm14714_vm0, %v9225_v0  ;;  %v271_v3 = vld [vmem:[%s9330_s24 + $0x10] sm:$0xff]  ;;  %v272_v4 = vld [vmem:[%s9330_s24 + $0x18] sm:$0xff]  ;;  %s9234_s12 = smov 120  }
  0x14   : > { %238 = vst.msk [vmem:[#allocation2 + $0x60] sm:$0xff] %vm14714_vm0, %v9225_v0  ;;  %239 = vst.msk [vmem:[#allocation2 + $0x68] sm:$0xff] %vm14714_vm0, %v9225_v0  ;;  %v275_v5 = vld [vmem:[%s9330_s24 + $0x20] sm:$0xff]  ;;  %v276_v6 = vld [vmem:[%s9330_s24 + $0x28] sm:$0xff] }
  0x15   : > { %240 = vst.msk [vmem:[#allocation2 + $0x70] sm:$0xff] %vm14714_vm0, %v9225_v0  ;;  %241 = vst.msk [vmem:[#allocation2 + $0x78] sm:$0xff] %vm14714_vm0, %v9225_v0  ;;  %v1052_v7 = vld [vmem:[#allocation2 + $0x1] sm:$0xff]  ;;  %v279_v9 = vld [vmem:[%s9330_s24 + $0x30] sm:$0xff] }
  0x16   : > { %242 = vst.msk [vmem:[#allocation2 + $0x80] sm:$0xff] %vm14714_vm0, %v9225_v0  ;;  %243 = vst.msk [vmem:[#allocation2 + $0x88] sm:$0xff] %vm14714_vm0, %v9225_v0  ;;  %v1053_v8 = vld [vmem:[#allocation2 + $0x9] sm:$0xff]  ;;  %1124 = vrot.lane.b32.xlu0 %v1052_v7, %s9226_s25  ;;  %v280_v10 = vld [vmem:[%s9330_s24 + $0x38] sm:$0xff] }
  0x17   : > { %244 = vst.msk [vmem:[#allocation2 + $0x90] sm:$0xff] %vm14714_vm0, %v9225_v0  ;;  %245 = vst.msk [vmem:[#allocation2 + $0x98] sm:$0xff] %vm14714_vm0, %v9225_v0  ;;  %v283_v11 = vld [vmem:[%s9330_s24 + $0x40] sm:$0xff]  ;;  %v284_v12 = vld [vmem:[%s9330_s24 + $0x48] sm:$0xff] }
  0x18   : > { %246 = vst.msk [vmem:[#allocation2 + $0xa0] sm:$0xff] %vm14714_vm0, %v9225_v0  ;;  %247 = vst.msk [vmem:[#allocation2 + $0xa8] sm:$0xff] %vm14714_vm0, %v9225_v0  ;;  %v287_v13 = vld [vmem:[%s9330_s24 + $0x50] sm:$0xff]  ;;  %v288_v14 = vld [vmem:[%s9330_s24 + $0x58] sm:$0xff] }
  0x19   : > { %248 = vst.msk [vmem:[#allocation2 + $0xb0] sm:$0xff] %vm14714_vm0, %v9225_v0  ;;  %249 = vst.msk [vmem:[#allocation2 + $0xb8] sm:$0xff] %vm14714_vm0, %v9225_v0  ;;  %v291_v15 = vld [vmem:[%s9330_s24 + $0x60] sm:$0xff]  ;;  %v292_v16 = vld [vmem:[%s9330_s24 + $0x68] sm:$0xff] }
  0x1a   : > { %250 = vst.msk [vmem:[#allocation2 + $0xc0] sm:$0xff] %vm14714_vm0, %v9225_v0  ;;  %251 = vst.msk [vmem:[#allocation2 + $0xc8] sm:$0xff] %vm14714_vm0, %v9225_v0  ;;  %v295_v17 = vld [vmem:[%s9330_s24 + $0x70] sm:$0xff]  ;;  %v296_v18 = vld [vmem:[%s9330_s24 + $0x78] sm:$0xff]  ;;  %1126 = vrot.lane.b32.xlu0 %v1053_v8, %s9226_s25 }
  0x1b   : > { %252 = vst.msk [vmem:[#allocation2 + $0xd0] sm:$0xff] %vm14714_vm0, %v9225_v0  ;;  %253 = vst.msk [vmem:[#allocation2 + $0xd8] sm:$0xff] %vm14714_vm0, %v9225_v0  ;;  %v299_v19 = vld [vmem:[%s9330_s24 + $0x80] sm:$0xff]  ;;  %v300_v20 = vld [vmem:[%s9330_s24 + $0x88] sm:$0xff] }
  0x1c   : > { %254 = vst.msk [vmem:[#allocation2 + $0xe0] sm:$0xff] %vm14714_vm0, %v9225_v0  ;;  %255 = vst.msk [vmem:[#allocation2 + $0xe8] sm:$0xff] %vm14714_vm0, %v9225_v0  ;;  %v303_v21 = vld [vmem:[%s9330_s24 + $0x90] sm:$0xff]  ;;  %v304_v22 = vld [vmem:[%s9330_s24 + $0x98] sm:$0xff] }
  0x1d   : > { %256 = vst.msk [vmem:[#allocation2 + $0xf0] sm:$0xff] %vm14714_vm0, %v9225_v0  ;;  %257 = vst.msk [vmem:[#allocation2 + $0xf8] sm:$0xff] %vm14714_vm0, %v9225_v0  ;;  %v307_v23 = vld [vmem:[%s9330_s24 + $0xa0] sm:$0xff]  ;;  %v308_v24 = vld [vmem:[%s9330_s24 + $0xa8] sm:$0xff] }
  0x1e   : > { %258 = vst.msk [vmem:[#allocation2 + $0x100] sm:$0xff] %vm14714_vm0, %v9225_v0  ;;  %259 = vst.msk [vmem:[#allocation2 + $0x108] sm:$0xff] %vm14714_vm0, %v9225_v0  ;;  %v311_v28 = vld [vmem:[%s9330_s24 + $0xb0] sm:$0xff]  ;;  %v312_v32 = vld [vmem:[%s9330_s24 + $0xb8] sm:$0xff] }
  0x1f   : > { %260 = vst.msk [vmem:[#allocation2 + $0x110] sm:$0xff] %vm14714_vm0, %v9225_v0  ;;  %261 = vst.msk [vmem:[#allocation2 + $0x118] sm:$0xff] %vm14714_vm0, %v9225_v0  ;;  %v315_v33 = vld [vmem:[%s9330_s24 + $0xc0] sm:$0xff]  ;;  %v316_v34 = vld [vmem:[%s9330_s24 + $0xc8] sm:$0xff] }
  0x20   : > { %262 = vst.msk [vmem:[#allocation2 + $0x120] sm:$0xff] %vm14714_vm0, %v9225_v0  ;;  %263 = vst.msk [vmem:[#allocation2 + $0x128] sm:$0xff] %vm14714_vm0, %v9225_v0  ;;  %v319_v35 = vld [vmem:[%s9330_s24 + $0xd0] sm:$0xff]  ;;  %v320_v37 = vld [vmem:[%s9330_s24 + $0xd8] sm:$0xff] }
  0x21   : > { %264 = vst.msk [vmem:[#allocation2 + $0x130] sm:$0xff] %vm14714_vm0, %v9225_v0  ;;  %265 = vst.msk [vmem:[#allocation2 + $0x138] sm:$0xff] %vm14714_vm0, %v9225_v0  ;;  %v323_v38 = vld [vmem:[%s9330_s24 + $0xe0] sm:$0xff]  ;;  %v324_v39 = vld [vmem:[%s9330_s24 + $0xe8] sm:$0xff] }
  0x22   : > { %266 = vst.msk [vmem:[#allocation2 + $0x140] sm:$0xff] %vm14714_vm0, %v9225_v0  ;;  %269 = vst.msk [vmem:[#allocation2 + $0x13] sm:$0xff] %vm14714_vm0, %v267_v1  ;;  %v980_v45 = vld [vmem:[#allocation2] sm:$0xff]  ;;  %v981_v48 = vld [vmem:[#allocation2 + $0x8] sm:$0xff] }
  0x23   : > { %270 = vst.msk [vmem:[#allocation2 + $0x1b] sm:$0xff] %vm14714_vm0, %v268_v2  ;;  %273 = vst.msk [vmem:[#allocation2 + $0x25] sm:$0xff] %vm14714_vm0, %v271_v3  ;;  %v327_v1 = vld [vmem:[%s9330_s24 + $0xf0] sm:$0xff] }
  0x24   : > { %274 = vst.msk [vmem:[#allocation2 + $0x2d] sm:$0xff] %vm14714_vm0, %v272_v4  ;;  %277 = vst.msk [vmem:[#allocation2 + $0x37] sm:$0xff] %vm14714_vm0, %v275_v5 }
  0x25   : > { %278 = vst.msk [vmem:[#allocation2 + $0x3f] sm:$0xff] %vm14714_vm0, %v276_v6  ;;  %281 = vst.msk [vmem:[#allocation2 + $0x49] sm:$0xff] %vm14714_vm0, %v279_v9 }
  0x26   : > { %282 = vst.msk [vmem:[#allocation2 + $0x51] sm:$0xff] %vm14714_vm0, %v280_v10  ;;  %285 = vst.msk [vmem:[#allocation2 + $0x5b] sm:$0xff] %vm14714_vm0, %v283_v11 }
  0x27   : > { %286 = vst.msk [vmem:[#allocation2 + $0x63] sm:$0xff] %vm14714_vm0, %v284_v12  ;;  %289 = vst.msk [vmem:[#allocation2 + $0x6d] sm:$0xff] %vm14714_vm0, %v287_v13 }
  0x28   : > { %290 = vst.msk [vmem:[#allocation2 + $0x75] sm:$0xff] %vm14714_vm0, %v288_v14  ;;  %293 = vst.msk [vmem:[#allocation2 + $0x7f] sm:$0xff] %vm14714_vm0, %v291_v15 }
  0x29   : > { %294 = vst.msk [vmem:[#allocation2 + $0x87] sm:$0xff] %vm14714_vm0, %v292_v16  ;;  %297 = vst.msk [vmem:[#allocation2 + $0x91] sm:$0xff] %vm14714_vm0, %v295_v17  ;;  %v1054_v25 = vld [vmem:[#allocation2 + $0x11] sm:$0xff] }
  0x2a   : > { %298 = vst.msk [vmem:[#allocation2 + $0x99] sm:$0xff] %vm14714_vm0, %v296_v18  ;;  %301 = vst.msk [vmem:[#allocation2 + $0xa3] sm:$0xff] %vm14714_vm0, %v299_v19  ;;  %v1056_v26 = vld [vmem:[#allocation2 + $0x21] sm:$0xff]  ;;  %1128 = vrot.lane.b32.xlu1 %v1054_v25, %s9226_s25  ;;  %v1055_v27 = vld [vmem:[#allocation2 + $0x19] sm:$0xff] }
  0x2b   : > { %302 = vst.msk [vmem:[#allocation2 + $0xab] sm:$0xff] %vm14714_vm0, %v300_v20  ;;  %305 = vst.msk [vmem:[#allocation2 + $0xb5] sm:$0xff] %vm14714_vm0, %v303_v21  ;;  %1132 = vrot.lane.b32.xlu0 %v1056_v26, %s9226_s25  ;;  %v1058_v29 = vld [vmem:[#allocation2 + $0x31] sm:$0xff]  ;;  %v1057_v30 = vld [vmem:[#allocation2 + $0x29] sm:$0xff] }
  0x2c   : > { %306 = vst.msk [vmem:[#allocation2 + $0xbd] sm:$0xff] %vm14714_vm0, %v304_v22  ;;  %309 = vst.msk [vmem:[#allocation2 + $0xc7] sm:$0xff] %vm14714_vm0, %v307_v23  ;;  %v1060_v31 = vld [vmem:[#allocation2 + $0x41] sm:$0xff]  ;;  %v1059_v36 = vld [vmem:[#allocation2 + $0x39] sm:$0xff] }
  0x2d   : > { %310 = vst.msk [vmem:[#allocation2 + $0xcf] sm:$0xff] %vm14714_vm0, %v308_v24  ;;  %313 = vst.msk [vmem:[#allocation2 + $0xd9] sm:$0xff] %vm14714_vm0, %v311_v28  ;;  %v1062_v40 = vld [vmem:[#allocation2 + $0x51] sm:$0xff]  ;;  %v1061_v41 = vld [vmem:[#allocation2 + $0x49] sm:$0xff] }
  0x2e   : > { %1130 = vrot.lane.b32.xlu1 %v1055_v27, %s9226_s25  ;;  %314 = vst.msk [vmem:[#allocation2 + $0xe1] sm:$0xff] %vm14714_vm0, %v312_v32  ;;  %317 = vst.msk [vmem:[#allocation2 + $0xeb] sm:$0xff] %vm14714_vm0, %v315_v33  ;;  %v1064_v42 = vld [vmem:[#allocation2 + $0x61] sm:$0xff]  ;;  %v1063_v43 = vld [vmem:[#allocation2 + $0x59] sm:$0xff] }
  0x2f   : > { %1136 = vrot.lane.b32.xlu0 %v1058_v29, %s9226_s25  ;;  %318 = vst.msk [vmem:[#allocation2 + $0xf3] sm:$0xff] %vm14714_vm0, %v316_v34  ;;  %321 = vst.msk [vmem:[#allocation2 + $0xfd] sm:$0xff] %vm14714_vm0, %v319_v35  ;;  %v1066_v44 = vld [vmem:[#allocation2 + $0x71] sm:$0xff]  ;;  %v1065_v47 = vld [vmem:[#allocation2 + $0x69] sm:$0xff] }
  0x30   : > { %322 = vst.msk [vmem:[#allocation2 + $0x105] sm:$0xff] %vm14714_vm0, %v320_v37  ;;  %325 = vst.msk [vmem:[#allocation2 + $0x10f] sm:$0xff] %vm14714_vm0, %v323_v38  ;;  %v982_v46 = vld [vmem:[#allocation2 + $0x10] sm:$0xff]  ;;  %v983_v49 = vld [vmem:[#allocation2 + $0x18] sm:$0xff] }
  0x31   : > { %326 = vst.msk [vmem:[#allocation2 + $0x117] sm:$0xff] %vm14714_vm0, %v324_v39  ;;  %1016 = vst.msk [vmem:[#allocation3] sm:$0xff] %vm14714_vm0, %v980_v45  ;;  %v1068_v50 = vld [vmem:[#allocation2 + $0x81] sm:$0xff]  ;;  %v986_v53 = vld [vmem:[#allocation2 + $0x30] sm:$0xff] }
  0x32   : > { %1134 = vrot.lane.b32.xlu1 %v1057_v30, %s9226_s25  ;;  %1018 = vst.msk [vmem:[#allocation3 + $0x10] sm:$0xff] %vm14714_vm0, %v982_v46  ;;  %1017 = vst.msk [vmem:[#allocation3 + $0x8] sm:$0xff] %vm14714_vm0, %v981_v48  ;;  %v984_v51 = vld [vmem:[#allocation2 + $0x20] sm:$0xff]  ;;  %v985_v52 = vld [vmem:[#allocation2 + $0x28] sm:$0xff] }
  0x33   : > { %1140 = vrot.lane.b32.xlu0 %v1060_v31, %s9226_s25  ;;  %1019 = vst.msk [vmem:[#allocation3 + $0x18] sm:$0xff] %vm14714_vm0, %v983_v49  ;;  %1020 = vst.msk [vmem:[#allocation3 + $0x20] sm:$0xff] %vm14714_vm0, %v984_v51  ;;  %v987_v54 = vld [vmem:[#allocation2 + $0x38] sm:$0xff]  ;;  %v988_v56 = vld [vmem:[#allocation2 + $0x40] sm:$0xff] }
  0x34   : > { %1021 = vst.msk [vmem:[#allocation3 + $0x28] sm:$0xff] %vm14714_vm0, %v985_v52  ;;  %v1067_v55 = vld [vmem:[#allocation2 + $0x79] sm:$0xff]  ;;  %1022 = vst.msk [vmem:[#allocation3 + $0x30] sm:$0xff] %vm14714_vm0, %v986_v53  ;;  %v989_v57 = vld [vmem:[#allocation2 + $0x48] sm:$0xff] }
  0x35   : > { %1023 = vst.msk [vmem:[#allocation3 + $0x38] sm:$0xff] %vm14714_vm0, %v987_v54  ;;  %1024 = vst.msk [vmem:[#allocation3 + $0x40] sm:$0xff] %vm14714_vm0, %v988_v56  ;;  %v1070_v58 = vld [vmem:[#allocation2 + $0x91] sm:$0xff]  ;;  %v1069_v61 = vld [vmem:[#allocation2 + $0x89] sm:$0xff] }
  0x36   : > { %1138 = vrot.lane.b32.xlu1 %v1059_v36, %s9226_s25  ;;  %1025 = vst.msk [vmem:[#allocation3 + $0x48] sm:$0xff] %vm14714_vm0, %v989_v57  ;;  %v990_v59 = vld [vmem:[#allocation2 + $0x50] sm:$0xff]  ;;  %v991_v60 = vld [vmem:[#allocation2 + $0x58] sm:$0xff]  ;;  %v992_v62 = vld [vmem:[#allocation2 + $0x60] sm:$0xff] }
  0x37   : > { %1144 = vrot.lane.b32.xlu0 %v1062_v40, %s9226_s25  ;;  %1026 = vst.msk [vmem:[#allocation3 + $0x50] sm:$0xff] %vm14714_vm0, %v990_v59  ;;  %1027 = vst.msk [vmem:[#allocation3 + $0x58] sm:$0xff] %vm14714_vm0, %v991_v60  ;;  %v993_v63 = vld [vmem:[#allocation2 + $0x68] sm:$0xff]  ;;  %v994_v2 = vld [vmem:[#allocation2 + $0x70] sm:$0xff] }
  0x38   : > { %v1072_v0 = vld [vmem:[#allocation2 + $0xa1] sm:$0xff]  ;;  %1028 = vst.msk [vmem:[#allocation3 + $0x60] sm:$0xff] %vm14714_vm0, %v992_v62  ;;  %1029 = vst.msk [vmem:[#allocation3 + $0x68] sm:$0xff] %vm14714_vm0, %v993_v63  ;;  %v995_v3 = vld [vmem:[#allocation2 + $0x78] sm:$0xff] }
  0x39   : > { %329 = vst.msk [vmem:[#allocation2 + $0x121] sm:$0xff] %vm14714_vm0, %v327_v1  ;;  %1030 = vst.msk [vmem:[#allocation3 + $0x70] sm:$0xff] %vm14714_vm0, %v994_v2  ;;  %v996_v4 = vld [vmem:[#allocation2 + $0x80] sm:$0xff]  ;;  %v997_v5 = vld [vmem:[#allocation2 + $0x88] sm:$0xff] }
  0x3a   : > { %1142 = vrot.lane.b32.xlu1 %v1061_v41, %s9226_s25  ;;  %1031 = vst.msk [vmem:[#allocation3 + $0x78] sm:$0xff] %vm14714_vm0, %v995_v3  ;;  %1032 = vst.msk [vmem:[#allocation3 + $0x80] sm:$0xff] %vm14714_vm0, %v996_v4  ;;  %v998_v6 = vld [vmem:[#allocation2 + $0x90] sm:$0xff]  ;;  %v999_v7 = vld [vmem:[#allocation2 + $0x98] sm:$0xff] }
  0x3b   : > { %1148 = vrot.lane.b32.xlu0 %v1064_v42, %s9226_s25  ;;  %1033 = vst.msk [vmem:[#allocation3 + $0x88] sm:$0xff] %vm14714_vm0, %v997_v5  ;;  %v1000_v8 = vld [vmem:[#allocation2 + $0xa0] sm:$0xff]  ;;  %1034 = vst.msk [vmem:[#allocation3 + $0x90] sm:$0xff] %vm14714_vm0, %v998_v6  ;;  %v1001_v9 = vld [vmem:[#allocation2 + $0xa8] sm:$0xff] }
  0x3c   : > { %1035 = vst.msk [vmem:[#allocation3 + $0x98] sm:$0xff] %vm14714_vm0, %v999_v7  ;;  %1036 = vst.msk [vmem:[#allocation3 + $0xa0] sm:$0xff] %vm14714_vm0, %v1000_v8  ;;  %v1002_v10 = vld [vmem:[#allocation2 + $0xb0] sm:$0xff]  ;;  %v1003_v11 = vld [vmem:[#allocation2 + $0xb8] sm:$0xff] }
  0x3d   : > { %v1071_v12 = vld [vmem:[#allocation2 + $0x99] sm:$0xff]  ;;  %1037 = vst.msk [vmem:[#allocation3 + $0xa8] sm:$0xff] %vm14714_vm0, %v1001_v9  ;;  %1038 = vst.msk [vmem:[#allocation3 + $0xb0] sm:$0xff] %vm14714_vm0, %v1002_v10  ;;  %v1005_v14 = vld [vmem:[#allocation2 + $0xc8] sm:$0xff] }
  0x3e   : > { %1146 = vrot.lane.b32.xlu1 %v1063_v43, %s9226_s25  ;;  %1039 = vst.msk [vmem:[#allocation3 + $0xb8] sm:$0xff] %vm14714_vm0, %v1003_v11  ;;  %v1004_v13 = vld [vmem:[#allocation2 + $0xc0] sm:$0xff]  ;;  %1041 = vst.msk [vmem:[#allocation3 + $0xc8] sm:$0xff] %vm14714_vm0, %v1005_v14  ;;  %v1074_v15 = vld [vmem:[#allocation2 + $0xb1] sm:$0xff] }
  0x3f   : > { %1152 = vrot.lane.b32.xlu0 %v1066_v44, %s9226_s25  ;;  %1040 = vst.msk [vmem:[#allocation3 + $0xc0] sm:$0xff] %vm14714_vm0, %v1004_v13  ;;  %v1006_v16 = vld [vmem:[#allocation2 + $0xd0] sm:$0xff]  ;;  %v1007_v17 = vld [vmem:[#allocation2 + $0xd8] sm:$0xff]  ;;  %v1076_v19 = vld [vmem:[#allocation2 + $0xc1] sm:$0xff] }
  0x40   : > { %v1073_v18 = vld [vmem:[#allocation2 + $0xa9] sm:$0xff]  ;;  %1042 = vst.msk [vmem:[#allocation3 + $0xd0] sm:$0xff] %vm14714_vm0, %v1006_v16  ;;  %1043 = vst.msk [vmem:[#allocation3 + $0xd8] sm:$0xff] %vm14714_vm0, %v1007_v17  ;;  %v1008_v20 = vld [vmem:[#allocation2 + $0xe0] sm:$0xff] }
  0x41   : > { %v1009_v21 = vld [vmem:[#allocation2 + $0xe8] sm:$0xff]  ;;  %v1075_v22 = vld [vmem:[#allocation2 + $0xb9] sm:$0xff]  ;;  %1044 = vst.msk [vmem:[#allocation3 + $0xe0] sm:$0xff] %vm14714_vm0, %v1008_v20  ;;  %v1078_v23 = vld [vmem:[#allocation2 + $0xd1] sm:$0xff] }
  0x42   : > { %1150 = vrot.lane.b32.xlu1 %v1065_v47, %s9226_s25  ;;  %1045 = vst.msk [vmem:[#allocation3 + $0xe8] sm:$0xff] %vm14714_vm0, %v1009_v21  ;;  %v1010_v24 = vld [vmem:[#allocation2 + $0xf0] sm:$0xff]  ;;  %v1011_v25 = vld [vmem:[#allocation2 + $0xf8] sm:$0xff]  ;;  %v1080_v27 = vld [vmem:[#allocation2 + $0xe1] sm:$0xff] }
  0x43   : > { %1156 = vrot.lane.b32.xlu0 %v1068_v50, %s9226_s25  ;;  %v1077_v26 = vld [vmem:[#allocation2 + $0xc9] sm:$0xff]  ;;  %1046 = vst.msk [vmem:[#allocation3 + $0xf0] sm:$0xff] %vm14714_vm0, %v1010_v24  ;;  %1047 = vst.msk [vmem:[#allocation3 + $0xf8] sm:$0xff] %vm14714_vm0, %v1011_v25  ;;  %v1012_v28 = vld [vmem:[#allocation2 + $0x100] sm:$0xff] }
  0x44   : > { %v1013_v29 = vld [vmem:[#allocation2 + $0x108] sm:$0xff]  ;;  %v1079_v30 = vld [vmem:[#allocation2 + $0xd9] sm:$0xff]  ;;  %1048 = vst.msk [vmem:[#allocation3 + $0x100] sm:$0xff] %vm14714_vm0, %v1012_v28  ;;  %v1082_v31 = vld [vmem:[#allocation2 + $0xf1] sm:$0xff] }
  0x45   : > { %1049 = vst.msk [vmem:[#allocation3 + $0x108] sm:$0xff] %vm14714_vm0, %v1013_v29  ;;  %v1014_v32 = vld [vmem:[#allocation2 + $0x110] sm:$0xff]  ;;  %v1015_v33 = vld [vmem:[#allocation2 + $0x118] sm:$0xff]  ;;  %v1084_v35 = vld [vmem:[#allocation2 + $0x101] sm:$0xff] }
  0x46   : > { %1154 = vrot.lane.b32.xlu1 %v1067_v55, %s9226_s25  ;;  %v1081_v34 = vld [vmem:[#allocation2 + $0xe9] sm:$0xff]  ;;  %1050 = vst.msk [vmem:[#allocation3 + $0x110] sm:$0xff] %vm14714_vm0, %v1014_v32  ;;  %1051 = vst.msk [vmem:[#allocation3 + $0x118] sm:$0xff] %vm14714_vm0, %v1015_v33  ;;  %v1083_v36 = vld [vmem:[#allocation2 + $0xf9] sm:$0xff] }
  0x47   : > { %1160 = vrot.lane.b32.xlu0 %v1070_v58, %s9226_s25  ;;  %v1086_v37 = vld [vmem:[#allocation2 + $0x111] sm:$0xff]  ;;  %v1085_v38 = vld [vmem:[#allocation2 + $0x109] sm:$0xff]  ;;  %v1087_v40 = vld [vmem:[#allocation2 + $0x119] sm:$0xff] }
  0x48   : > { %v1269_v39 = vld [vmem:[#allocation2 + $0x2] sm:$0xff]  ;;  %v9466_v41 = vld [vmem:[#allocation2 + $0x12] sm:$0xff]  ;;  %v1270_v42 = vld [vmem:[#allocation2 + $0xa] sm:$0xff] }
  0x49   : > { %v9471_v43 = vld [vmem:[#allocation2 + $0x22] sm:$0xff]  ;;  %v9474_v44 = vld [vmem:[#allocation2 + $0x1a] sm:$0xff]  ;;  %v9479_v46 = vld [vmem:[#allocation2 + $0x32] sm:$0xff] }
  0x4a   : > { %1158 = vrot.lane.b32.xlu1 %v1069_v61, %s9226_s25  ;;  %v328_v45 = vld [vmem:[%s9330_s24 + $0xf8] sm:$0xff]  ;;  %v9484_v47 = vld [vmem:[#allocation2 + $0x2a] sm:$0xff]  ;;  %v9488_v48 = vld [vmem:[#allocation2 + $0x42] sm:$0xff] }
  0x4b   : > { %1164 = vrot.lane.b32.xlu0 %v1072_v0, %s9226_s25  ;;  %330 = vst.msk [vmem:[#allocation2 + $0x129] sm:$0xff] %vm14714_vm0, %v328_v45  ;;  %v9492_v49 = vld [vmem:[#allocation2 + $0x3a] sm:$0xff]  ;;  %v9496_v50 = vld [vmem:[#allocation2 + $0x52] sm:$0xff]  ;;  %v9500_v51 = vld [vmem:[#allocation2 + $0x4a] sm:$0xff] }
  0x4c   : > { %v9504_v52 = vld [vmem:[#allocation2 + $0x62] sm:$0xff]  ;;  %v9508_v53 = vld [vmem:[#allocation2 + $0x5a] sm:$0xff]  ;;  %v9512_v54 = vld [vmem:[#allocation2 + $0x72] sm:$0xff] }
  0x4d   : > { %v9516_v55 = vld [vmem:[#allocation2 + $0x6a] sm:$0xff]  ;;  %v9520_v56 = vld [vmem:[#allocation2 + $0x82] sm:$0xff]  ;;  %v9524_v57 = vld [vmem:[#allocation2 + $0x7a] sm:$0xff] }
  0x4e   : > { %1162 = vrot.lane.b32.xlu1 %v1071_v12, %s9226_s25  ;;  %v9528_v58 = vld [vmem:[#allocation2 + $0x92] sm:$0xff]  ;;  %v9532_v59 = vld [vmem:[#allocation2 + $0x8a] sm:$0xff]  ;;  %v9536_v60 = vld [vmem:[#allocation2 + $0xa2] sm:$0xff] }
  0x4f   : > { %1168 = vrot.lane.b32.xlu0 %v1074_v15, %s9226_s25  ;;  %v9540_v61 = vld [vmem:[#allocation2 + $0x9a] sm:$0xff]  ;;  %v9544_v62 = vld [vmem:[#allocation2 + $0xb2] sm:$0xff]  ;;  %v9548_v0 = vld [vmem:[#allocation2 + $0xaa] sm:$0xff] }
  0x50   : > { %v9553_v1 = vld [vmem:[#allocation2 + $0xc2] sm:$0xff]  ;;  %v9557_v3 = vld [vmem:[#allocation2 + $0xba] sm:$0xff]  ;;  %v9563_v5 = vld [vmem:[#allocation2 + $0xd2] sm:$0xff] }
  0x51   : > { %v9567_v7 = vld [vmem:[#allocation2 + $0xca] sm:$0xff]  ;;  %v9573_v9 = vld [vmem:[#allocation2 + $0xe2] sm:$0xff]  ;;  %v9577_v11 = vld [vmem:[#allocation2 + $0xda] sm:$0xff] }
  0x52   : > { %1166 = vrot.lane.b32.xlu1 %v1073_v18, %s9226_s25  ;;  %v9583_v13 = vld [vmem:[#allocation2 + $0xf2] sm:$0xff]  ;;  %v9587_v15 = vld [vmem:[#allocation2 + $0xea] sm:$0xff]  ;;  %v9593_v17 = vld [vmem:[#allocation2 + $0x102] sm:$0xff] }
  0x53   : > { %1172 = vrot.lane.b32.xlu0 %v1076_v19, %s9226_s25  ;;  %v9597_v19 = vld [vmem:[#allocation2 + $0xfa] sm:$0xff]  ;;  %v9603_v21 = vld [vmem:[#allocation2 + $0x112] sm:$0xff] }
  0x56   : > { %1170 = vrot.lane.b32.xlu1 %v1075_v22, %s9226_s25 }
  0x57   : > { %1176 = vrot.lane.b32.xlu0 %v1078_v23, %s9226_s25  ;;  %v9607_v23 = vld [vmem:[#allocation2 + $0x10a] sm:$0xff] }
  0x5a   : > { %1174 = vrot.lane.b32.xlu1 %v1077_v26, %s9226_s25  ;;  %v9615_v26 = vld [vmem:[#allocation2 + $0x11a] sm:$0xff] }
  0x5b   : > { %1180 = vrot.lane.b32.xlu0 %v1080_v27, %s9226_s25 }
  0x5e   : > { %1178 = vrot.lane.b32.xlu1 %v1079_v30, %s9226_s25 }
  0x5f   : > { %1184 = vrot.lane.b32.xlu0 %v1082_v31, %s9226_s25 }
  0x62   : > { %1182 = vrot.lane.b32.xlu1 %v1081_v34, %s9226_s25 }
  0x63   : > { %1188 = vrot.lane.b32.xlu0 %v1084_v35, %s9226_s25 }
  0x66   : > { %1186 = vrot.lane.b32.xlu1 %v1083_v36, %s9226_s25 }
  0x67   : > { %1192 = vrot.lane.b32.xlu0 %v1086_v37, %s9226_s25 }
  0x6a   : > { %1190 = vrot.lane.b32.xlu1 %v1085_v38, %s9226_s25 }
  0x6b   : > { %1341 = vrot.lane.b32.xlu0 %v1269_v39, %s9227_s26 }
  0x6e   : > { %1194 = vrot.lane.b32.xlu1 %v1087_v40, %s9226_s25 }
  0x6f   : > { %1345 = vrot.lane.b32.xlu0 %v9466_v41, %s9227_s26 }
  0x72   : > { %1343 = vrot.lane.b32.xlu1 %v1270_v42, %s9227_s26 }
  0x73   : > { %1349 = vrot.lane.b32.xlu0 %v9471_v43, %s9227_s26 }
  0x76   : > { %1347 = vrot.lane.b32.xlu1 %v9474_v44, %s9227_s26 }
  0x77   : > { %1353 = vrot.lane.b32.xlu0 %v9479_v46, %s9227_s26 }
  0x7a   : > { %1351 = vrot.lane.b32.xlu1 %v9484_v47, %s9227_s26 }
  0x7b   : > { %1357 = vrot.lane.b32.xlu0 %v9488_v48, %s9227_s26 }
  0x7e   : > { %1355 = vrot.lane.b32.xlu1 %v9492_v49, %s9227_s26 }
  0x7f   : > { %1361 = vrot.lane.b32.xlu0 %v9496_v50, %s9227_s26 }
  0x82   : > { %1359 = vrot.lane.b32.xlu1 %v9500_v51, %s9227_s26 }
  0x83   : > { %1365 = vrot.lane.b32.xlu0 %v9504_v52, %s9227_s26 }
  0x86   : > { %1363 = vrot.lane.b32.xlu1 %v9508_v53, %s9227_s26 }
  0x87   : > { %1369 = vrot.lane.b32.xlu0 %v9512_v54, %s9227_s26 }
  0x88   : > { %v1125_v63 = vpop.permute.xlu0 %1124 }
  0x89   : > { %1233 = vst.msk [vmem:[#allocation3] sm:$0xff] %vm14713_vm1, %v1125_v63  ;;  %v1703_v63 = vld [vmem:[#allocation2 + $0x13] sm:$0xff] }
  0x8a   : > { %1367 = vrot.lane.b32.xlu1 %v9516_v55, %s9227_s26 }
  0x8b   : > { %1373 = vrot.lane.b32.xlu0 %v9520_v56, %s9227_s26 }
  0x8c   : > { %v1127_v2 = vpop.permute.xlu0 %1126 }
  0x8d   : > { %1234 = vst.msk [vmem:[#allocation3 + $0x8] sm:$0xff] %vm14713_vm1, %v1127_v2 }
  0x8e   : > { %1371 = vrot.lane.b32.xlu1 %v9524_v57, %s9227_s26 }
  0x8f   : > { %1377 = vrot.lane.b32.xlu0 %v9528_v58, %s9227_s26 }
  0x92   : > { %1375 = vrot.lane.b32.xlu1 %v9532_v59, %s9227_s26 }
  0x93   : > { %1381 = vrot.lane.b32.xlu0 %v9536_v60, %s9227_s26 }
  0x96   : > { %1379 = vrot.lane.b32.xlu1 %v9540_v61, %s9227_s26 }
  0x97   : > { %1385 = vrot.lane.b32.xlu0 %v9544_v62, %s9227_s26 }
  0x9a   : > { %1383 = vrot.lane.b32.xlu1 %v9548_v0, %s9227_s26 }
  0x9b   : > { %1389 = vrot.lane.b32.xlu0 %v9553_v1, %s9227_s26 }
  0x9c   : > { %v1129_v4 = vpop.permute.xlu1 %1128 }
  0x9d   : > { %1235 = vst.msk [vmem:[#allocation3 + $0x10] sm:$0xff] %vm14713_vm1, %v1129_v4  ;;  %v1133_v6 = vpop.permute.xlu0 %1132 }
  0x9e   : > { %1387 = vrot.lane.b32.xlu1 %v9557_v3, %s9227_s26  ;;  %1237 = vst.msk [vmem:[#allocation3 + $0x20] sm:$0xff] %vm14713_vm1, %v1133_v6 }
  0x9f   : > { %1393 = vrot.lane.b32.xlu0 %v9563_v5, %s9227_s26 }
  0xa0   : > { %v1131_v8 = vpop.permute.xlu1 %1130 }
  0xa1   : > { %1236 = vst.msk [vmem:[#allocation3 + $0x18] sm:$0xff] %vm14713_vm1, %v1131_v8  ;;  %v1137_v10 = vpop.permute.xlu0 %1136 }
  0xa2   : > { %1391 = vrot.lane.b32.xlu1 %v9567_v7, %s9227_s26  ;;  %1239 = vst.msk [vmem:[#allocation3 + $0x30] sm:$0xff] %vm14713_vm1, %v1137_v10 }
  0xa3   : > { %1397 = vrot.lane.b32.xlu0 %v9573_v9, %s9227_s26 }
  0xa4   : > { %v1135_v12 = vpop.permute.xlu1 %1134 }
  0xa5   : > { %1238 = vst.msk [vmem:[#allocation3 + $0x28] sm:$0xff] %vm14713_vm1, %v1135_v12  ;;  %v1141_v14 = vpop.permute.xlu0 %1140 }
  0xa6   : > { %1395 = vrot.lane.b32.xlu1 %v9577_v11, %s9227_s26  ;;  %1241 = vst.msk [vmem:[#allocation3 + $0x40] sm:$0xff] %vm14713_vm1, %v1141_v14 }
  0xa7   : > { %1401 = vrot.lane.b32.xlu0 %v9583_v13, %s9227_s26 }
  0xa8   : > { %v1139_v16 = vpop.permute.xlu1 %1138 }
  0xa9   : > { %1240 = vst.msk [vmem:[#allocation3 + $0x38] sm:$0xff] %vm14713_vm1, %v1139_v16  ;;  %v1145_v18 = vpop.permute.xlu0 %1144 }
  0xaa   : > { %1399 = vrot.lane.b32.xlu1 %v9587_v15, %s9227_s26  ;;  %1243 = vst.msk [vmem:[#allocation3 + $0x50] sm:$0xff] %vm14713_vm1, %v1145_v18 }
  0xab   : > { %1405 = vrot.lane.b32.xlu0 %v9593_v17, %s9227_s26 }
  0xac   : > { %v1143_v20 = vpop.permute.xlu1 %1142 }
  0xad   : > { %1242 = vst.msk [vmem:[#allocation3 + $0x48] sm:$0xff] %vm14713_vm1, %v1143_v20  ;;  %v1149_v22 = vpop.permute.xlu0 %1148 }
  0xae   : > { %1403 = vrot.lane.b32.xlu1 %v9597_v19, %s9227_s26  ;;  %1245 = vst.msk [vmem:[#allocation3 + $0x60] sm:$0xff] %vm14713_vm1, %v1149_v22 }
  0xaf   : > { %1409 = vrot.lane.b32.xlu0 %v9603_v21, %s9227_s26 }
  0xb0   : > { %v1147_v24 = vpop.permute.xlu1 %1146 }
  0xb1   : > { %1244 = vst.msk [vmem:[#allocation3 + $0x58] sm:$0xff] %vm14713_vm1, %v1147_v24  ;;  %v1153_v25 = vpop.permute.xlu0 %1152 }
  0xb2   : > { %1407 = vrot.lane.b32.xlu1 %v9607_v23, %s9227_s26  ;;  %1247 = vst.msk [vmem:[#allocation3 + $0x70] sm:$0xff] %vm14713_vm1, %v1153_v25  ;;  %v1714_v25 = vld [vmem:[#allocation2 + $0x6b] sm:$0xff] }
  0xb3   : > { %1558 = vrot.lane.b32.xlu0 %v9466_v41, %s9228_s27 }
  0xb4   : > { %v1151_v27 = vpop.permute.xlu1 %1150 }
  0xb5   : > { %1246 = vst.msk [vmem:[#allocation3 + $0x68] sm:$0xff] %vm14713_vm1, %v1151_v27  ;;  %v1157_v28 = vpop.permute.xlu0 %1156  ;;  %v1717_v27 = vld [vmem:[#allocation2 + $0x83] sm:$0xff] }
  0xb6   : > { %1411 = vrot.lane.b32.xlu1 %v9615_v26, %s9227_s26  ;;  %1249 = vst.msk [vmem:[#allocation3 + $0x80] sm:$0xff] %vm14713_vm1, %v1157_v28 }
  0xb7   : > { %1562 = vrot.lane.b32.xlu0 %v9471_v43, %s9228_s27 }
  0xb8   : > { %v1155_v29 = vpop.permute.xlu1 %1154 }
  0xb9   : > { %1248 = vst.msk [vmem:[#allocation3 + $0x78] sm:$0xff] %vm14713_vm1, %v1155_v29  ;;  %v1161_v30 = vpop.permute.xlu0 %1160  ;;  %v1716_v29 = vld [vmem:[#allocation2 + $0x7b] sm:$0xff] }
  0xba   : > { %1560 = vrot.lane.b32.xlu1 %v9474_v44, %s9228_s27  ;;  %1251 = vst.msk [vmem:[#allocation3 + $0x90] sm:$0xff] %vm14713_vm1, %v1161_v30 }
  0xbb   : > { %1566 = vrot.lane.b32.xlu0 %v9479_v46, %s9228_s27 }
  0xbc   : > { %v1159_v31 = vpop.permute.xlu1 %1158 }
  0xbd   : > { %1250 = vst.msk [vmem:[#allocation3 + $0x88] sm:$0xff] %vm14713_vm1, %v1159_v31  ;;  %v1165_v32 = vpop.permute.xlu0 %1164  ;;  %v1719_v31 = vld [vmem:[#allocation2 + $0x93] sm:$0xff] }
  0xbe   : > { %1564 = vrot.lane.b32.xlu1 %v9484_v47, %s9228_s27  ;;  %1253 = vst.msk [vmem:[#allocation3 + $0xa0] sm:$0xff] %vm14713_vm1, %v1165_v32 }
  0xbf   : > { %1570 = vrot.lane.b32.xlu0 %v9488_v48, %s9228_s27 }
  0xc0   : > { %v1163_v33 = vpop.permute.xlu1 %1162 }
  0xc1   : > { %1252 = vst.msk [vmem:[#allocation3 + $0x98] sm:$0xff] %vm14713_vm1, %v1163_v33  ;;  %v1169_v34 = vpop.permute.xlu0 %1168  ;;  %v1718_v33 = vld [vmem:[#allocation2 + $0x8b] sm:$0xff] }
  0xc2   : > { %1568 = vrot.lane.b32.xlu1 %v9492_v49, %s9228_s27  ;;  %1255 = vst.msk [vmem:[#allocation3 + $0xb0] sm:$0xff] %vm14713_vm1, %v1169_v34 }
  0xc3   : > { %1574 = vrot.lane.b32.xlu0 %v9496_v50, %s9228_s27 }
  0xc4   : > { %v1167_v35 = vpop.permute.xlu1 %1166 }
  0xc5   : > { %1254 = vst.msk [vmem:[#allocation3 + $0xa8] sm:$0xff] %vm14713_vm1, %v1167_v35  ;;  %v1173_v36 = vpop.permute.xlu0 %1172  ;;  %v1721_v35 = vld [vmem:[#allocation2 + $0xa3] sm:$0xff] }
  0xc6   : > { %1572 = vrot.lane.b32.xlu1 %v9500_v51, %s9228_s27  ;;  %1257 = vst.msk [vmem:[#allocation3 + $0xc0] sm:$0xff] %vm14713_vm1, %v1173_v36 }
  0xc7   : > { %1578 = vrot.lane.b32.xlu0 %v9504_v52, %s9228_s27 }
  0xc8   : > { %v1171_v37 = vpop.permute.xlu1 %1170 }
  0xc9   : > { %1256 = vst.msk [vmem:[#allocation3 + $0xb8] sm:$0xff] %vm14713_vm1, %v1171_v37  ;;  %v1177_v38 = vpop.permute.xlu0 %1176  ;;  %v1720_v37 = vld [vmem:[#allocation2 + $0x9b] sm:$0xff] }
  0xca   : > { %1576 = vrot.lane.b32.xlu1 %v9508_v53, %s9228_s27  ;;  %1259 = vst.msk [vmem:[#allocation3 + $0xd0] sm:$0xff] %vm14713_vm1, %v1177_v38 }
  0xcb   : > { %1582 = vrot.lane.b32.xlu0 %v9512_v54, %s9228_s27 }
  0xcc   : > { %v1175_v39 = vpop.permute.xlu1 %1174 }
  0xcd   : > { %1258 = vst.msk [vmem:[#allocation3 + $0xc8] sm:$0xff] %vm14713_vm1, %v1175_v39  ;;  %v1181_v40 = vpop.permute.xlu0 %1180  ;;  %v1723_v39 = vld [vmem:[#allocation2 + $0xb3] sm:$0xff] }
  0xce   : > { %1580 = vrot.lane.b32.xlu1 %v9516_v55, %s9228_s27  ;;  %1261 = vst.msk [vmem:[#allocation3 + $0xe0] sm:$0xff] %vm14713_vm1, %v1181_v40 }
  0xcf   : > { %1586 = vrot.lane.b32.xlu0 %v9520_v56, %s9228_s27 }
  0xd0   : > { %v1179_v41 = vpop.permute.xlu1 %1178 }
  0xd1   : > { %1260 = vst.msk [vmem:[#allocation3 + $0xd8] sm:$0xff] %vm14713_vm1, %v1179_v41  ;;  %v1185_v42 = vpop.permute.xlu0 %1184  ;;  %v1722_v41 = vld [vmem:[#allocation2 + $0xab] sm:$0xff] }
  0xd2   : > { %1584 = vrot.lane.b32.xlu1 %v9524_v57, %s9228_s27  ;;  %1263 = vst.msk [vmem:[#allocation3 + $0xf0] sm:$0xff] %vm14713_vm1, %v1185_v42 }
  0xd3   : > { %1590 = vrot.lane.b32.xlu0 %v9528_v58, %s9228_s27 }
  0xd4   : > { %v1183_v43 = vpop.permute.xlu1 %1182 }
  0xd5   : > { %1262 = vst.msk [vmem:[#allocation3 + $0xe8] sm:$0xff] %vm14713_vm1, %v1183_v43  ;;  %v1189_v44 = vpop.permute.xlu0 %1188  ;;  %v1725_v43 = vld [vmem:[#allocation2 + $0xc3] sm:$0xff] }
  0xd6   : > { %1588 = vrot.lane.b32.xlu1 %v9532_v59, %s9228_s27  ;;  %1265 = vst.msk [vmem:[#allocation3 + $0x100] sm:$0xff] %vm14713_vm1, %v1189_v44 }
  0xd7   : > { %1594 = vrot.lane.b32.xlu0 %v9536_v60, %s9228_s27  ;;  %v1520_v60 = vld [vmem:[#allocation2 + $0x122] sm:$0xff] }
  0xd8   : > { %v1187_v45 = vpop.permute.xlu1 %1186 }
  0xd9   : > { %1264 = vst.msk [vmem:[#allocation3 + $0xf8] sm:$0xff] %vm14713_vm1, %v1187_v45  ;;  %v1193_v46 = vpop.permute.xlu0 %1192  ;;  %v1724_v45 = vld [vmem:[#allocation2 + $0xbb] sm:$0xff] }
  0xda   : > { %1592 = vrot.lane.b32.xlu1 %v9540_v61, %s9228_s27  ;;  %1267 = vst.msk [vmem:[#allocation3 + $0x110] sm:$0xff] %vm14713_vm1, %v1193_v46 }
  0xdb   : > { %1598 = vrot.lane.b32.xlu0 %v9544_v62, %s9228_s27 }
  0xdc   : > { %v1191_v47 = vpop.permute.xlu1 %1190 }
  0xdd   : > { %1266 = vst.msk [vmem:[#allocation3 + $0x108] sm:$0xff] %vm14713_vm1, %v1191_v47  ;;  %v1342_v48 = vpop.permute.xlu0 %1341  ;;  %v1727_v47 = vld [vmem:[#allocation2 + $0xd3] sm:$0xff] }
  0xde   : > { %1596 = vrot.lane.b32.xlu1 %v9548_v0, %s9228_s27  ;;  %1450 = vst.msk [vmem:[#allocation3] sm:$0xff] %vm14712_vm2, %v1342_v48 }
  0xdf   : > { %1602 = vrot.lane.b32.xlu0 %v9553_v1, %s9228_s27  ;;  %v1521_v1 = vld [vmem:[#allocation2 + $0x12a] sm:$0xff] }
  0xe0   : > { %v1195_v49 = vpop.permute.xlu1 %1194 }
  0xe1   : > { %1268 = vst.msk [vmem:[#allocation3 + $0x118] sm:$0xff] %vm14713_vm1, %v1195_v49  ;;  %v1346_v50 = vpop.permute.xlu0 %1345  ;;  %v1726_v49 = vld [vmem:[#allocation2 + $0xcb] sm:$0xff] }
  0xe2   : > { %1600 = vrot.lane.b32.xlu1 %v9557_v3, %s9228_s27  ;;  %1452 = vst.msk [vmem:[#allocation3 + $0x10] sm:$0xff] %vm14712_vm2, %v1346_v50  ;;  %v1705_v3 = vld [vmem:[#allocation2 + $0x23] sm:$0xff] }
  0xe3   : > { %1606 = vrot.lane.b32.xlu0 %v9563_v5, %s9228_s27  ;;  %v1704_v5 = vld [vmem:[#allocation2 + $0x1b] sm:$0xff] }
  0xe4   : > { %v1344_v51 = vpop.permute.xlu1 %1343 }
  0xe5   : > { %1451 = vst.msk [vmem:[#allocation3 + $0x8] sm:$0xff] %vm14712_vm2, %v1344_v51  ;;  %v1350_v52 = vpop.permute.xlu0 %1349  ;;  %v1729_v51 = vld [vmem:[#allocation2 + $0xe3] sm:$0xff] }
  0xe6   : > { %1604 = vrot.lane.b32.xlu1 %v9567_v7, %s9228_s27  ;;  %1454 = vst.msk [vmem:[#allocation3 + $0x20] sm:$0xff] %vm14712_vm2, %v1350_v52  ;;  %v1707_v7 = vld [vmem:[#allocation2 + $0x33] sm:$0xff] }
  0xe7   : > { %1610 = vrot.lane.b32.xlu0 %v9573_v9, %s9228_s27  ;;  %v1706_v9 = vld [vmem:[#allocation2 + $0x2b] sm:$0xff] }
  0xe8   : > { %v1348_v53 = vpop.permute.xlu1 %1347 }
  0xe9   : > { %1453 = vst.msk [vmem:[#allocation3 + $0x18] sm:$0xff] %vm14712_vm2, %v1348_v53  ;;  %v1354_v54 = vpop.permute.xlu0 %1353  ;;  %v1728_v53 = vld [vmem:[#allocation2 + $0xdb] sm:$0xff] }
  0xea   : > { %1608 = vrot.lane.b32.xlu1 %v9577_v11, %s9228_s27  ;;  %1456 = vst.msk [vmem:[#allocation3 + $0x30] sm:$0xff] %vm14712_vm2, %v1354_v54  ;;  %v1709_v11 = vld [vmem:[#allocation2 + $0x43] sm:$0xff] }
  0xeb   : > { %1614 = vrot.lane.b32.xlu0 %v9583_v13, %s9228_s27  ;;  %v1708_v13 = vld [vmem:[#allocation2 + $0x3b] sm:$0xff] }
  0xec   : > { %v1352_v55 = vpop.permute.xlu1 %1351 }
  0xed   : > { %1455 = vst.msk [vmem:[#allocation3 + $0x28] sm:$0xff] %vm14712_vm2, %v1352_v55  ;;  %v1358_v56 = vpop.permute.xlu0 %1357  ;;  %v1731_v55 = vld [vmem:[#allocation2 + $0xf3] sm:$0xff] }
  0xee   : > { %1612 = vrot.lane.b32.xlu1 %v9587_v15, %s9228_s27  ;;  %1458 = vst.msk [vmem:[#allocation3 + $0x40] sm:$0xff] %vm14712_vm2, %v1358_v56  ;;  %v1711_v15 = vld [vmem:[#allocation2 + $0x53] sm:$0xff] }
  0xef   : > { %1618 = vrot.lane.b32.xlu0 %v9593_v17, %s9228_s27  ;;  %v1710_v17 = vld [vmem:[#allocation2 + $0x4b] sm:$0xff] }
  0xf0   : > { %v1356_v57 = vpop.permute.xlu1 %1355 }
  0xf1   : > { %1457 = vst.msk [vmem:[#allocation3 + $0x38] sm:$0xff] %vm14712_vm2, %v1356_v57  ;;  %v1362_v58 = vpop.permute.xlu0 %1361  ;;  %v1730_v57 = vld [vmem:[#allocation2 + $0xeb] sm:$0xff] }
  0xf2   : > { %1616 = vrot.lane.b32.xlu1 %v9597_v19, %s9228_s27  ;;  %1460 = vst.msk [vmem:[#allocation3 + $0x50] sm:$0xff] %vm14712_vm2, %v1362_v58  ;;  %v1713_v19 = vld [vmem:[#allocation2 + $0x63] sm:$0xff] }
  0xf3   : > { %1622 = vrot.lane.b32.xlu0 %v9603_v21, %s9228_s27  ;;  %v1712_v21 = vld [vmem:[#allocation2 + $0x5b] sm:$0xff] }
  0xf4   : > { %v1360_v59 = vpop.permute.xlu1 %1359 }
  0xf5   : > { %1459 = vst.msk [vmem:[#allocation3 + $0x48] sm:$0xff] %vm14712_vm2, %v1360_v59  ;;  %v1366_v61 = vpop.permute.xlu0 %1365  ;;  %v1733_v59 = vld [vmem:[#allocation2 + $0x103] sm:$0xff] }
  0xf6   : > { %1620 = vrot.lane.b32.xlu1 %v9607_v23, %s9228_s27  ;;  %1462 = vst.msk [vmem:[#allocation3 + $0x60] sm:$0xff] %vm14712_vm2, %v1366_v61  ;;  %v1715_v23 = vld [vmem:[#allocation2 + $0x73] sm:$0xff]  ;;  %v1732_v61 = vld [vmem:[#allocation2 + $0xfb] sm:$0xff] }
  0xf7   : > { %1626 = vrot.lane.b32.xlu0 %v1520_v60, %s9228_s27 }
  0xf8   : > { %v1364_v62 = vpop.permute.xlu1 %1363 }
  0xf9   : > { %1461 = vst.msk [vmem:[#allocation3 + $0x58] sm:$0xff] %vm14712_vm2, %v1364_v62  ;;  %v1370_v0 = vpop.permute.xlu0 %1369 }
  0xfa   : > { %1624 = vrot.lane.b32.xlu1 %v9615_v26, %s9228_s27  ;;  %1464 = vst.msk [vmem:[#allocation3 + $0x70] sm:$0xff] %vm14712_vm2, %v1370_v0 }
  0xfb   : > { %1775 = vrot.lane.b32.xlu0 %v1703_v63, %s9229_s28  ;;  %v1735_v63 = vld [vmem:[#allocation2 + $0x113] sm:$0xff] }
  0xfc   : > { %v1368_v2 = vpop.permute.xlu1 %1367 }
  0xfd   : > { %1463 = vst.msk [vmem:[#allocation3 + $0x68] sm:$0xff] %vm14712_vm2, %v1368_v2  ;;  %v1374_v4 = vpop.permute.xlu0 %1373 }
  0xfe   : > { %1628 = vrot.lane.b32.xlu1 %v1521_v1, %s9228_s27  ;;  %1466 = vst.msk [vmem:[#allocation3 + $0x80] sm:$0xff] %vm14712_vm2, %v1374_v4  ;;  %v1734_v1 = vld [vmem:[#allocation2 + $0x10b] sm:$0xff] }
  0xff   : > { %1779 = vrot.lane.b32.xlu0 %v1705_v3, %s9229_s28  ;;  %v1737_v3 = vld [vmem:[#allocation2 + $0x123] sm:$0xff] }
 0x100   : > { %v1372_v6 = vpop.permute.xlu1 %1371 }
 0x101   : > { %1465 = vst.msk [vmem:[#allocation3 + $0x78] sm:$0xff] %vm14712_vm2, %v1372_v6  ;;  %v1378_v8 = vpop.permute.xlu0 %1377 }
 0x102   : > { %1777 = vrot.lane.b32.xlu1 %v1704_v5, %s9229_s28  ;;  %1468 = vst.msk [vmem:[#allocation3 + $0x90] sm:$0xff] %vm14712_vm2, %v1378_v8  ;;  %v1736_v5 = vld [vmem:[#allocation2 + $0x11b] sm:$0xff] }
 0x103   : > { %1783 = vrot.lane.b32.xlu0 %v1707_v7, %s9229_s28  ;;  %v1920_v7 = vld [vmem:[#allocation2 + $0x14] sm:$0xff] }
 0x104   : > { %v1376_v10 = vpop.permute.xlu1 %1375 }
 0x105   : > { %1467 = vst.msk [vmem:[#allocation3 + $0x88] sm:$0xff] %vm14712_vm2, %v1376_v10  ;;  %v1382_v12 = vpop.permute.xlu0 %1381 }
 0x106   : > { %1781 = vrot.lane.b32.xlu1 %v1706_v9, %s9229_s28  ;;  %1470 = vst.msk [vmem:[#allocation3 + $0xa0] sm:$0xff] %vm14712_vm2, %v1382_v12  ;;  %v1738_v9 = vld [vmem:[#allocation2 + $0x12b] sm:$0xff] }
 0x107   : > { %1787 = vrot.lane.b32.xlu0 %v1709_v11, %s9229_s28  ;;  %v9799_v11 = vld [vmem:[#allocation2 + $0x24] sm:$0xff] }
 0x108   : > { %v1380_v14 = vpop.permute.xlu1 %1379 }
 0x109   : > { %1469 = vst.msk [vmem:[#allocation3 + $0x98] sm:$0xff] %vm14712_vm2, %v1380_v14  ;;  %v1386_v16 = vpop.permute.xlu0 %1385 }
 0x10a   : > { %1785 = vrot.lane.b32.xlu1 %v1708_v13, %s9229_s28  ;;  %1472 = vst.msk [vmem:[#allocation3 + $0xb0] sm:$0xff] %vm14712_vm2, %v1386_v16  ;;  %v1921_v13 = vld [vmem:[#allocation2 + $0x1c] sm:$0xff] }
 0x10b   : > { %1791 = vrot.lane.b32.xlu0 %v1711_v15, %s9229_s28  ;;  %v9806_v15 = vld [vmem:[#allocation2 + $0x34] sm:$0xff] }
 0x10c   : > { %v1384_v18 = vpop.permute.xlu1 %1383 }
 0x10d   : > { %1471 = vst.msk [vmem:[#allocation3 + $0xa8] sm:$0xff] %vm14712_vm2, %v1384_v18  ;;  %v1390_v20 = vpop.permute.xlu0 %1389 }
 0x10e   : > { %1789 = vrot.lane.b32.xlu1 %v1710_v17, %s9229_s28  ;;  %1474 = vst.msk [vmem:[#allocation3 + $0xc0] sm:$0xff] %vm14712_vm2, %v1390_v20  ;;  %v9809_v17 = vld [vmem:[#allocation2 + $0x2c] sm:$0xff] }
 0x10f   : > { %1795 = vrot.lane.b32.xlu0 %v1713_v19, %s9229_s28  ;;  %v9815_v19 = vld [vmem:[#allocation2 + $0x44] sm:$0xff] }
 0x110   : > { %v1388_v22 = vpop.permute.xlu1 %1387 }
 0x111   : > { %1473 = vst.msk [vmem:[#allocation3 + $0xb8] sm:$0xff] %vm14712_vm2, %v1388_v22  ;;  %v1394_v24 = vpop.permute.xlu0 %1393 }
 0x112   : > { %1793 = vrot.lane.b32.xlu1 %v1712_v21, %s9229_s28  ;;  %1476 = vst.msk [vmem:[#allocation3 + $0xd0] sm:$0xff] %vm14712_vm2, %v1394_v24  ;;  %v9819_v21 = vld [vmem:[#allocation2 + $0x3c] sm:$0xff] }
 0x113   : > { %1799 = vrot.lane.b32.xlu0 %v1715_v23, %s9229_s28  ;;  %v9825_v23 = vld [vmem:[#allocation2 + $0x54] sm:$0xff] }
 0x114   : > { %v1392_v26 = vpop.permute.xlu1 %1391 }
 0x115   : > { %1475 = vst.msk [vmem:[#allocation3 + $0xc8] sm:$0xff] %vm14712_vm2, %v1392_v26  ;;  %v1398_v28 = vpop.permute.xlu0 %1397 }
 0x116   : > { %1797 = vrot.lane.b32.xlu1 %v1714_v25, %s9229_s28  ;;  %1478 = vst.msk [vmem:[#allocation3 + $0xe0] sm:$0xff] %vm14712_vm2, %v1398_v28  ;;  %v9829_v25 = vld [vmem:[#allocation2 + $0x4c] sm:$0xff] }
 0x117   : > { %1803 = vrot.lane.b32.xlu0 %v1717_v27, %s9229_s28  ;;  %v9835_v27 = vld [vmem:[#allocation2 + $0x64] sm:$0xff] }
 0x118   : > { %v1396_v30 = vpop.permute.xlu1 %1395 }
 0x119   : > { %1477 = vst.msk [vmem:[#allocation3 + $0xd8] sm:$0xff] %vm14712_vm2, %v1396_v30  ;;  %v1402_v32 = vpop.permute.xlu0 %1401 }
 0x11a   : > { %1801 = vrot.lane.b32.xlu1 %v1716_v29, %s9229_s28  ;;  %1480 = vst.msk [vmem:[#allocation3 + $0xf0] sm:$0xff] %vm14712_vm2, %v1402_v32  ;;  %v9839_v29 = vld [vmem:[#allocation2 + $0x5c] sm:$0xff] }
 0x11b   : > { %1807 = vrot.lane.b32.xlu0 %v1719_v31, %s9229_s28  ;;  %v9845_v31 = vld [vmem:[#allocation2 + $0x74] sm:$0xff] }
 0x11c   : > { %v1400_v34 = vpop.permute.xlu1 %1399 }
 0x11d   : > { %1479 = vst.msk [vmem:[#allocation3 + $0xe8] sm:$0xff] %vm14712_vm2, %v1400_v34  ;;  %v1406_v36 = vpop.permute.xlu0 %1405 }
 0x11e   : > { %1805 = vrot.lane.b32.xlu1 %v1718_v33, %s9229_s28  ;;  %1482 = vst.msk [vmem:[#allocation3 + $0x100] sm:$0xff] %vm14712_vm2, %v1406_v36  ;;  %v9849_v33 = vld [vmem:[#allocation2 + $0x6c] sm:$0xff] }
 0x11f   : > { %1811 = vrot.lane.b32.xlu0 %v1721_v35, %s9229_s28  ;;  %v9855_v35 = vld [vmem:[#allocation2 + $0x84] sm:$0xff] }
 0x120   : > { %v1404_v38 = vpop.permute.xlu1 %1403 }
 0x121   : > { %1481 = vst.msk [vmem:[#allocation3 + $0xf8] sm:$0xff] %vm14712_vm2, %v1404_v38  ;;  %v1410_v40 = vpop.permute.xlu0 %1409 }
 0x122   : > { %1809 = vrot.lane.b32.xlu1 %v1720_v37, %s9229_s28  ;;  %1484 = vst.msk [vmem:[#allocation3 + $0x110] sm:$0xff] %vm14712_vm2, %v1410_v40  ;;  %v9859_v37 = vld [vmem:[#allocation2 + $0x7c] sm:$0xff] }
 0x123   : > { %1815 = vrot.lane.b32.xlu0 %v1723_v39, %s9229_s28  ;;  %v9865_v39 = vld [vmem:[#allocation2 + $0x94] sm:$0xff] }
 0x124   : > { %v1408_v42 = vpop.permute.xlu1 %1407 }
 0x125   : > { %1483 = vst.msk [vmem:[#allocation3 + $0x108] sm:$0xff] %vm14712_vm2, %v1408_v42  ;;  %v1559_v44 = vpop.permute.xlu0 %1558 }
 0x126   : > { %1813 = vrot.lane.b32.xlu1 %v1722_v41, %s9229_s28  ;;  %1667 = vst.msk [vmem:[#allocation3] sm:$0xff] %vm14700_vm3, %v1559_v44  ;;  %v9869_v41 = vld [vmem:[#allocation2 + $0x8c] sm:$0xff] }
 0x127   : > { %1819 = vrot.lane.b32.xlu0 %v1725_v43, %s9229_s28  ;;  %v9875_v43 = vld [vmem:[#allocation2 + $0xa4] sm:$0xff] }
 0x128   : > { %v1412_v46 = vpop.permute.xlu1 %1411 }
 0x129   : > { %1485 = vst.msk [vmem:[#allocation3 + $0x118] sm:$0xff] %vm14712_vm2, %v1412_v46  ;;  %v1563_v48 = vpop.permute.xlu0 %1562 }
 0x12a   : > { %1817 = vrot.lane.b32.xlu1 %v1724_v45, %s9229_s28  ;;  %1669 = vst.msk [vmem:[#allocation3 + $0x10] sm:$0xff] %vm14700_vm3, %v1563_v48  ;;  %v9879_v45 = vld [vmem:[#allocation2 + $0x9c] sm:$0xff] }
 0x12b   : > { %1823 = vrot.lane.b32.xlu0 %v1727_v47, %s9229_s28  ;;  %v9885_v47 = vld [vmem:[#allocation2 + $0xb4] sm:$0xff] }
 0x12c   : > { %v1561_v50 = vpop.permute.xlu1 %1560 }
 0x12d   : > { %1668 = vst.msk [vmem:[#allocation3 + $0x8] sm:$0xff] %vm14700_vm3, %v1561_v50  ;;  %v1567_v52 = vpop.permute.xlu0 %1566 }
 0x12e   : > { %1821 = vrot.lane.b32.xlu1 %v1726_v49, %s9229_s28  ;;  %1671 = vst.msk [vmem:[#allocation3 + $0x20] sm:$0xff] %vm14700_vm3, %v1567_v52  ;;  %v9889_v49 = vld [vmem:[#allocation2 + $0xac] sm:$0xff] }
 0x12f   : > { %1827 = vrot.lane.b32.xlu0 %v1729_v51, %s9229_s28  ;;  %v9895_v51 = vld [vmem:[#allocation2 + $0xc4] sm:$0xff] }
 0x130   : > { %v1565_v54 = vpop.permute.xlu1 %1564 }
 0x131   : > { %1670 = vst.msk [vmem:[#allocation3 + $0x18] sm:$0xff] %vm14700_vm3, %v1565_v54  ;;  %v1571_v56 = vpop.permute.xlu0 %1570 }
 0x132   : > { %1825 = vrot.lane.b32.xlu1 %v1728_v53, %s9229_s28  ;;  %1673 = vst.msk [vmem:[#allocation3 + $0x30] sm:$0xff] %vm14700_vm3, %v1571_v56  ;;  %v9899_v53 = vld [vmem:[#allocation2 + $0xbc] sm:$0xff] }
 0x133   : > { %1831 = vrot.lane.b32.xlu0 %v1731_v55, %s9229_s28  ;;  %v9905_v55 = vld [vmem:[#allocation2 + $0xd4] sm:$0xff] }
 0x134   : > { %v1569_v58 = vpop.permute.xlu1 %1568 }
 0x135   : > { %1672 = vst.msk [vmem:[#allocation3 + $0x28] sm:$0xff] %vm14700_vm3, %v1569_v58  ;;  %v1575_v60 = vpop.permute.xlu0 %1574 }
 0x136   : > { %1829 = vrot.lane.b32.xlu1 %v1730_v57, %s9229_s28  ;;  %1675 = vst.msk [vmem:[#allocation3 + $0x40] sm:$0xff] %vm14700_vm3, %v1575_v60  ;;  %v9909_v57 = vld [vmem:[#allocation2 + $0xcc] sm:$0xff] }
 0x137   : > { %1835 = vrot.lane.b32.xlu0 %v1733_v59, %s9229_s28  ;;  %v9915_v59 = vld [vmem:[#allocation2 + $0xe4] sm:$0xff] }
 0x138   : > { %v1573_v62 = vpop.permute.xlu1 %1572 }
 0x139   : > { %1674 = vst.msk [vmem:[#allocation3 + $0x38] sm:$0xff] %vm14700_vm3, %v1573_v62  ;;  %v1579_v0 = vpop.permute.xlu0 %1578 }
 0x13a   : > { %1833 = vrot.lane.b32.xlu1 %v1732_v61, %s9229_s28  ;;  %1677 = vst.msk [vmem:[#allocation3 + $0x50] sm:$0xff] %vm14700_vm3, %v1579_v0  ;;  %v9919_v61 = vld [vmem:[#allocation2 + $0xdc] sm:$0xff] }
 0x13b   : > { %1839 = vrot.lane.b32.xlu0 %v1735_v63, %s9229_s28  ;;  %v9925_v63 = vld [vmem:[#allocation2 + $0xf4] sm:$0xff] }
 0x13c   : > { %v1577_v2 = vpop.permute.xlu1 %1576 }
 0x13d   : > { %1676 = vst.msk [vmem:[#allocation3 + $0x48] sm:$0xff] %vm14700_vm3, %v1577_v2  ;;  %v1583_v4 = vpop.permute.xlu0 %1582 }
 0x13e   : > { %1837 = vrot.lane.b32.xlu1 %v1734_v1, %s9229_s28  ;;  %1679 = vst.msk [vmem:[#allocation3 + $0x60] sm:$0xff] %vm14700_vm3, %v1583_v4  ;;  %v9929_v1 = vld [vmem:[#allocation2 + $0xec] sm:$0xff] }
 0x13f   : > { %1843 = vrot.lane.b32.xlu0 %v1737_v3, %s9229_s28  ;;  %v9935_v3 = vld [vmem:[#allocation2 + $0x104] sm:$0xff] }
 0x140   : > { %v1581_v6 = vpop.permute.xlu1 %1580 }
 0x141   : > { %1678 = vst.msk [vmem:[#allocation3 + $0x58] sm:$0xff] %vm14700_vm3, %v1581_v6  ;;  %v1587_v8 = vpop.permute.xlu0 %1586 }
 0x142   : > { %1841 = vrot.lane.b32.xlu1 %v1736_v5, %s9229_s28  ;;  %1681 = vst.msk [vmem:[#allocation3 + $0x70] sm:$0xff] %vm14700_vm3, %v1587_v8  ;;  %v9939_v5 = vld [vmem:[#allocation2 + $0xfc] sm:$0xff] }
 0x143   : > { %1992 = vrot.lane.b32.xlu0 %v1920_v7, %s9230_s29  ;;  %v9945_v7 = vld [vmem:[#allocation2 + $0x114] sm:$0xff] }
 0x144   : > { %v1585_v10 = vpop.permute.xlu1 %1584 }
 0x145   : > { %1680 = vst.msk [vmem:[#allocation3 + $0x68] sm:$0xff] %vm14700_vm3, %v1585_v10  ;;  %v1591_v12 = vpop.permute.xlu0 %1590 }
 0x146   : > { %1845 = vrot.lane.b32.xlu1 %v1738_v9, %s9229_s28  ;;  %1683 = vst.msk [vmem:[#allocation3 + $0x80] sm:$0xff] %vm14700_vm3, %v1591_v12  ;;  %v9949_v9 = vld [vmem:[#allocation2 + $0x10c] sm:$0xff]  ;;  %v9955_v12 = vld [vmem:[#allocation2 + $0x124] sm:$0xff] }
 0x147   : > { %1996 = vrot.lane.b32.xlu0 %v9799_v11, %s9230_s29 }
 0x148   : > { %v1589_v14 = vpop.permute.xlu1 %1588 }
 0x149   : > { %1682 = vst.msk [vmem:[#allocation3 + $0x78] sm:$0xff] %vm14700_vm3, %v1589_v14  ;;  %v1595_v16 = vpop.permute.xlu0 %1594  ;;  %v9959_v14 = vld [vmem:[#allocation2 + $0x11c] sm:$0xff] }
 0x14a   : > { %1994 = vrot.lane.b32.xlu1 %v1921_v13, %s9230_s29  ;;  %1685 = vst.msk [vmem:[#allocation3 + $0x90] sm:$0xff] %vm14700_vm3, %v1595_v16 }
 0x14b   : > { %2000 = vrot.lane.b32.xlu0 %v9806_v15, %s9230_s29 }
 0x14c   : > { %v1593_v18 = vpop.permute.xlu1 %1592 }
 0x14d   : > { %1684 = vst.msk [vmem:[#allocation3 + $0x88] sm:$0xff] %vm14700_vm3, %v1593_v18  ;;  %v1599_v20 = vpop.permute.xlu0 %1598 }
 0x14e   : > { %1998 = vrot.lane.b32.xlu1 %v9809_v17, %s9230_s29  ;;  %1687 = vst.msk [vmem:[#allocation3 + $0xa0] sm:$0xff] %vm14700_vm3, %v1599_v20  ;;  %v9967_v20 = vld [vmem:[#allocation2 + $0x12c] sm:$0xff] }
 0x14f   : > { %2004 = vrot.lane.b32.xlu0 %v9815_v19, %s9230_s29 }
 0x150   : > { %v1597_v22 = vpop.permute.xlu1 %1596 }
 0x151   : > { %1686 = vst.msk [vmem:[#allocation3 + $0x98] sm:$0xff] %vm14700_vm3, %v1597_v22  ;;  %v1603_v24 = vpop.permute.xlu0 %1602 }
 0x152   : > { %2002 = vrot.lane.b32.xlu1 %v9819_v21, %s9230_s29  ;;  %1689 = vst.msk [vmem:[#allocation3 + $0xb0] sm:$0xff] %vm14700_vm3, %v1603_v24 }
 0x153   : > { %2008 = vrot.lane.b32.xlu0 %v9825_v23, %s9230_s29 }
 0x154   : > { %v1601_v26 = vpop.permute.xlu1 %1600 }
 0x155   : > { %1688 = vst.msk [vmem:[#allocation3 + $0xa8] sm:$0xff] %vm14700_vm3, %v1601_v26  ;;  %v1607_v28 = vpop.permute.xlu0 %1606 }
 0x156   : > { %2006 = vrot.lane.b32.xlu1 %v9829_v25, %s9230_s29  ;;  %1691 = vst.msk [vmem:[#allocation3 + $0xc0] sm:$0xff] %vm14700_vm3, %v1607_v28 }
 0x157   : > { %2012 = vrot.lane.b32.xlu0 %v9835_v27, %s9230_s29 }
 0x158   : > { %v1605_v30 = vpop.permute.xlu1 %1604 }
 0x159   : > { %1690 = vst.msk [vmem:[#allocation3 + $0xb8] sm:$0xff] %vm14700_vm3, %v1605_v30  ;;  %v1611_v32 = vpop.permute.xlu0 %1610 }
 0x15a   : > { %2010 = vrot.lane.b32.xlu1 %v9839_v29, %s9230_s29  ;;  %1693 = vst.msk [vmem:[#allocation3 + $0xd0] sm:$0xff] %vm14700_vm3, %v1611_v32 }
 0x15b   : > { %2016 = vrot.lane.b32.xlu0 %v9845_v31, %s9230_s29 }
 0x15c   : > { %v1609_v34 = vpop.permute.xlu1 %1608 }
 0x15d   : > { %1692 = vst.msk [vmem:[#allocation3 + $0xc8] sm:$0xff] %vm14700_vm3, %v1609_v34  ;;  %v1615_v36 = vpop.permute.xlu0 %1614 }
 0x15e   : > { %2014 = vrot.lane.b32.xlu1 %v9849_v33, %s9230_s29  ;;  %1695 = vst.msk [vmem:[#allocation3 + $0xe0] sm:$0xff] %vm14700_vm3, %v1615_v36 }
 0x15f   : > { %2020 = vrot.lane.b32.xlu0 %v9855_v35, %s9230_s29 }
 0x160   : > { %v1613_v38 = vpop.permute.xlu1 %1612 }
 0x161   : > { %1694 = vst.msk [vmem:[#allocation3 + $0xd8] sm:$0xff] %vm14700_vm3, %v1613_v38  ;;  %v1619_v40 = vpop.permute.xlu0 %1618 }
 0x162   : > { %2018 = vrot.lane.b32.xlu1 %v9859_v37, %s9230_s29  ;;  %1697 = vst.msk [vmem:[#allocation3 + $0xf0] sm:$0xff] %vm14700_vm3, %v1619_v40 }
 0x163   : > { %2024 = vrot.lane.b32.xlu0 %v9865_v39, %s9230_s29 }
 0x164   : > { %v1617_v42 = vpop.permute.xlu1 %1616 }
 0x165   : > { %1696 = vst.msk [vmem:[#allocation3 + $0xe8] sm:$0xff] %vm14700_vm3, %v1617_v42  ;;  %v1623_v44 = vpop.permute.xlu0 %1622 }
 0x166   : > { %2022 = vrot.lane.b32.xlu1 %v9869_v41, %s9230_s29  ;;  %1699 = vst.msk [vmem:[#allocation3 + $0x100] sm:$0xff] %vm14700_vm3, %v1623_v44 }
 0x167   : > { %2028 = vrot.lane.b32.xlu0 %v9875_v43, %s9230_s29 }
 0x168   : > { %v1621_v46 = vpop.permute.xlu1 %1620 }
 0x169   : > { %1698 = vst.msk [vmem:[#allocation3 + $0xf8] sm:$0xff] %vm14700_vm3, %v1621_v46  ;;  %v1627_v48 = vpop.permute.xlu0 %1626 }
 0x16a   : > { %2026 = vrot.lane.b32.xlu1 %v9879_v45, %s9230_s29  ;;  %1701 = vst.msk [vmem:[#allocation3 + $0x110] sm:$0xff] %vm14700_vm3, %v1627_v48 }
 0x16b   : > { %2032 = vrot.lane.b32.xlu0 %v9885_v47, %s9230_s29 }
 0x16c   : > { %v1625_v50 = vpop.permute.xlu1 %1624 }
 0x16d   : > { %1700 = vst.msk [vmem:[#allocation3 + $0x108] sm:$0xff] %vm14700_vm3, %v1625_v50  ;;  %v1776_v52 = vpop.permute.xlu0 %1775  ;;  %v2171_v50 = vld [vmem:[#allocation2 + $0x134] sm:$0xff] }
 0x16e   : > { %2030 = vrot.lane.b32.xlu1 %v9889_v49, %s9230_s29  ;;  %1884 = vst.msk [vmem:[#allocation3] sm:$0xff] %vm14698_vm4, %v1776_v52 }
 0x16f   : > { %2036 = vrot.lane.b32.xlu0 %v9895_v51, %s9230_s29 }
 0x170   : > { %v1629_v54 = vpop.permute.xlu1 %1628 }
 0x171   : > { %1702 = vst.msk [vmem:[#allocation3 + $0x118] sm:$0xff] %vm14700_vm3, %v1629_v54  ;;  %v1780_v56 = vpop.permute.xlu0 %1779 }
 0x172   : > { %2034 = vrot.lane.b32.xlu1 %v9899_v53, %s9230_s29  ;;  %1886 = vst.msk [vmem:[#allocation3 + $0x10] sm:$0xff] %vm14698_vm4, %v1780_v56 }
 0x173   : > { %2040 = vrot.lane.b32.xlu0 %v9905_v55, %s9230_s29 }
 0x174   : > { %v1778_v58 = vpop.permute.xlu1 %1777 }
 0x175   : > { %1885 = vst.msk [vmem:[#allocation3 + $0x8] sm:$0xff] %vm14698_vm4, %v1778_v58  ;;  %v1784_v60 = vpop.permute.xlu0 %1783 }
 0x176   : > { %2038 = vrot.lane.b32.xlu1 %v9909_v57, %s9230_s29  ;;  %1888 = vst.msk [vmem:[#allocation3 + $0x20] sm:$0xff] %vm14698_vm4, %v1784_v60 }
 0x177   : > { %2044 = vrot.lane.b32.xlu0 %v9915_v59, %s9230_s29 }
 0x178   : > { %v1782_v62 = vpop.permute.xlu1 %1781 }
 0x179   : > { %1887 = vst.msk [vmem:[#allocation3 + $0x18] sm:$0xff] %vm14698_vm4, %v1782_v62  ;;  %v1788_v0 = vpop.permute.xlu0 %1787 }
 0x17a   : > { %2042 = vrot.lane.b32.xlu1 %v9919_v61, %s9230_s29  ;;  %1890 = vst.msk [vmem:[#allocation3 + $0x30] sm:$0xff] %vm14698_vm4, %v1788_v0 }
 0x17b   : > { %2048 = vrot.lane.b32.xlu0 %v9925_v63, %s9230_s29 }
 0x17c   : > { %v1786_v2 = vpop.permute.xlu1 %1785 }
 0x17d   : > { %1889 = vst.msk [vmem:[#allocation3 + $0x28] sm:$0xff] %vm14698_vm4, %v1786_v2  ;;  %v1792_v4 = vpop.permute.xlu0 %1791 }
 0x17e   : > { %2046 = vrot.lane.b32.xlu1 %v9929_v1, %s9230_s29  ;;  %1892 = vst.msk [vmem:[#allocation3 + $0x40] sm:$0xff] %vm14698_vm4, %v1792_v4 }
 0x17f   : > { %2052 = vrot.lane.b32.xlu0 %v9935_v3, %s9230_s29 }
 0x180   : > { %v1790_v6 = vpop.permute.xlu1 %1789 }
 0x181   : > { %1891 = vst.msk [vmem:[#allocation3 + $0x38] sm:$0xff] %vm14698_vm4, %v1790_v6  ;;  %v1796_v8 = vpop.permute.xlu0 %1795 }
 0x182   : > { %2050 = vrot.lane.b32.xlu1 %v9939_v5, %s9230_s29  ;;  %1894 = vst.msk [vmem:[#allocation3 + $0x50] sm:$0xff] %vm14698_vm4, %v1796_v8 }
 0x183   : > { %2056 = vrot.lane.b32.xlu0 %v9945_v7, %s9230_s29 }
 0x184   : > { %v1794_v10 = vpop.permute.xlu1 %1793 }
 0x185   : > { %1893 = vst.msk [vmem:[#allocation3 + $0x48] sm:$0xff] %vm14698_vm4, %v1794_v10  ;;  %v1800_v13 = vpop.permute.xlu0 %1799 }
 0x186   : > { %2054 = vrot.lane.b32.xlu1 %v9949_v9, %s9230_s29  ;;  %1896 = vst.msk [vmem:[#allocation3 + $0x60] sm:$0xff] %vm14698_vm4, %v1800_v13 }
 0x187   : > { %2060 = vrot.lane.b32.xlu0 %v9955_v12, %s9230_s29 }
 0x188   : > { %v1798_v16 = vpop.permute.xlu1 %1797 }
 0x189   : > { %1895 = vst.msk [vmem:[#allocation3 + $0x58] sm:$0xff] %vm14698_vm4, %v1798_v16  ;;  %v1804_v18 = vpop.permute.xlu0 %1803 }
 0x18a   : > { %2058 = vrot.lane.b32.xlu1 %v9959_v14, %s9230_s29  ;;  %1898 = vst.msk [vmem:[#allocation3 + $0x70] sm:$0xff] %vm14698_vm4, %v1804_v18  ;;  %v2365_v18 = vld [vmem:[#allocation2 + $0x7d] sm:$0xff] }
 0x18b   : > { %2209 = vrot.lane.b32.xlu0 %v9799_v11, %s9231_s30 }
 0x18c   : > { %v1802_v22 = vpop.permute.xlu1 %1801 }
 0x18d   : > { %1897 = vst.msk [vmem:[#allocation3 + $0x68] sm:$0xff] %vm14698_vm4, %v1802_v22  ;;  %v1808_v24 = vpop.permute.xlu0 %1807  ;;  %v2368_v22 = vld [vmem:[#allocation2 + $0x95] sm:$0xff] }
 0x18e   : > { %2062 = vrot.lane.b32.xlu1 %v9967_v20, %s9230_s29  ;;  %1900 = vst.msk [vmem:[#allocation3 + $0x80] sm:$0xff] %vm14698_vm4, %v1808_v24 }
 0x18f   : > { %2213 = vrot.lane.b32.xlu0 %v9806_v15, %s9231_s30 }
 0x190   : > { %v1806_v26 = vpop.permute.xlu1 %1805 }
 0x191   : > { %1899 = vst.msk [vmem:[#allocation3 + $0x78] sm:$0xff] %vm14698_vm4, %v1806_v26  ;;  %v1812_v28 = vpop.permute.xlu0 %1811  ;;  %v2367_v26 = vld [vmem:[#allocation2 + $0x8d] sm:$0xff] }
 0x192   : > { %2211 = vrot.lane.b32.xlu1 %v9809_v17, %s9231_s30  ;;  %1902 = vst.msk [vmem:[#allocation3 + $0x90] sm:$0xff] %vm14698_vm4, %v1812_v28 }
 0x193   : > { %2217 = vrot.lane.b32.xlu0 %v9815_v19, %s9231_s30 }
 0x194   : > { %v1810_v11 = vpop.permute.xlu1 %1809 }
 0x195   : > { %1901 = vst.msk [vmem:[#allocation3 + $0x88] sm:$0xff] %vm14698_vm4, %v1810_v11  ;;  %v1816_v30 = vpop.permute.xlu0 %1815  ;;  %v2370_v11 = vld [vmem:[#allocation2 + $0xa5] sm:$0xff] }
 0x196   : > { %2215 = vrot.lane.b32.xlu1 %v9819_v21, %s9231_s30  ;;  %1904 = vst.msk [vmem:[#allocation3 + $0xa0] sm:$0xff] %vm14698_vm4, %v1816_v30 }
 0x197   : > { %2221 = vrot.lane.b32.xlu0 %v9825_v23, %s9231_s30 }
 0x198   : > { %v1814_v15 = vpop.permute.xlu1 %1813 }
 0x199   : > { %1903 = vst.msk [vmem:[#allocation3 + $0x98] sm:$0xff] %vm14698_vm4, %v1814_v15  ;;  %v1820_v17 = vpop.permute.xlu0 %1819  ;;  %v2369_v15 = vld [vmem:[#allocation2 + $0x9d] sm:$0xff] }
 0x19a   : > { %2219 = vrot.lane.b32.xlu1 %v9829_v25, %s9231_s30  ;;  %1906 = vst.msk [vmem:[#allocation3 + $0xb0] sm:$0xff] %vm14698_vm4, %v1820_v17 }
 0x19b   : > { %2225 = vrot.lane.b32.xlu0 %v9835_v27, %s9231_s30 }
 0x19c   : > { %v1818_v19 = vpop.permute.xlu1 %1817 }
 0x19d   : > { %1905 = vst.msk [vmem:[#allocation3 + $0xa8] sm:$0xff] %vm14698_vm4, %v1818_v19  ;;  %v1824_v21 = vpop.permute.xlu0 %1823  ;;  %v2372_v19 = vld [vmem:[#allocation2 + $0xb5] sm:$0xff] }
 0x19e   : > { %2223 = vrot.lane.b32.xlu1 %v9839_v29, %s9231_s30  ;;  %1908 = vst.msk [vmem:[#allocation3 + $0xc0] sm:$0xff] %vm14698_vm4, %v1824_v21 }
 0x19f   : > { %2229 = vrot.lane.b32.xlu0 %v9845_v31, %s9231_s30 }
 0x1a0   : > { %v1822_v23 = vpop.permute.xlu1 %1821 }
 0x1a1   : > { %1907 = vst.msk [vmem:[#allocation3 + $0xb8] sm:$0xff] %vm14698_vm4, %v1822_v23  ;;  %v1828_v25 = vpop.permute.xlu0 %1827  ;;  %v2371_v23 = vld [vmem:[#allocation2 + $0xad] sm:$0xff] }
 0x1a2   : > { %2227 = vrot.lane.b32.xlu1 %v9849_v33, %s9231_s30  ;;  %1910 = vst.msk [vmem:[#allocation3 + $0xd0] sm:$0xff] %vm14698_vm4, %v1828_v25 }
 0x1a3   : > { %2233 = vrot.lane.b32.xlu0 %v9855_v35, %s9231_s30 }
 0x1a4   : > { %v1826_v27 = vpop.permute.xlu1 %1825 }
 0x1a5   : > { %1909 = vst.msk [vmem:[#allocation3 + $0xc8] sm:$0xff] %vm14698_vm4, %v1826_v27  ;;  %v1832_v29 = vpop.permute.xlu0 %1831  ;;  %v2374_v27 = vld [vmem:[#allocation2 + $0xc5] sm:$0xff] }
 0x1a6   : > { %2231 = vrot.lane.b32.xlu1 %v9859_v37, %s9231_s30  ;;  %1912 = vst.msk [vmem:[#allocation3 + $0xe0] sm:$0xff] %vm14698_vm4, %v1832_v29 }
 0x1a7   : > { %2237 = vrot.lane.b32.xlu0 %v9865_v39, %s9231_s30 }
 0x1a8   : > { %v1830_v31 = vpop.permute.xlu1 %1829 }
 0x1a9   : > { %1911 = vst.msk [vmem:[#allocation3 + $0xd8] sm:$0xff] %vm14698_vm4, %v1830_v31  ;;  %v1836_v32 = vpop.permute.xlu0 %1835  ;;  %v2373_v31 = vld [vmem:[#allocation2 + $0xbd] sm:$0xff] }
 0x1aa   : > { %2235 = vrot.lane.b32.xlu1 %v9869_v41, %s9231_s30  ;;  %1914 = vst.msk [vmem:[#allocation3 + $0xf0] sm:$0xff] %vm14698_vm4, %v1836_v32 }
 0x1ab   : > { %2241 = vrot.lane.b32.xlu0 %v9875_v43, %s9231_s30 }
 0x1ac   : > { %v1834_v33 = vpop.permute.xlu1 %1833 }
 0x1ad   : > { %1913 = vst.msk [vmem:[#allocation3 + $0xe8] sm:$0xff] %vm14698_vm4, %v1834_v33  ;;  %v1840_v34 = vpop.permute.xlu0 %1839  ;;  %v2376_v33 = vld [vmem:[#allocation2 + $0xd5] sm:$0xff] }
 0x1ae   : > { %2239 = vrot.lane.b32.xlu1 %v9879_v45, %s9231_s30  ;;  %1916 = vst.msk [vmem:[#allocation3 + $0x100] sm:$0xff] %vm14698_vm4, %v1840_v34 }
 0x1af   : > { %2245 = vrot.lane.b32.xlu0 %v9885_v47, %s9231_s30 }
 0x1b0   : > { %v1838_v35 = vpop.permute.xlu1 %1837 }
 0x1b1   : > { %1915 = vst.msk [vmem:[#allocation3 + $0xf8] sm:$0xff] %vm14698_vm4, %v1838_v35  ;;  %v1844_v36 = vpop.permute.xlu0 %1843  ;;  %v2375_v35 = vld [vmem:[#allocation2 + $0xcd] sm:$0xff] }
 0x1b2   : > { %2243 = vrot.lane.b32.xlu1 %v9889_v49, %s9231_s30  ;;  %1918 = vst.msk [vmem:[#allocation3 + $0x110] sm:$0xff] %vm14698_vm4, %v1844_v36 }
 0x1b3   : > { %2249 = vrot.lane.b32.xlu0 %v9895_v51, %s9231_s30 }
 0x1b4   : > { %v1842_v37 = vpop.permute.xlu1 %1841 }
 0x1b5   : > { %1917 = vst.msk [vmem:[#allocation3 + $0x108] sm:$0xff] %vm14698_vm4, %v1842_v37  ;;  %v1993_v38 = vpop.permute.xlu0 %1992  ;;  %v2378_v37 = vld [vmem:[#allocation2 + $0xe5] sm:$0xff] }
 0x1b6   : > { %2247 = vrot.lane.b32.xlu1 %v9899_v53, %s9231_s30  ;;  %2101 = vst.msk [vmem:[#allocation3] sm:$0xff] %vm14696_vm5, %v1993_v38  ;;  %v2354_v53 = vld [vmem:[#allocation2 + $0x25] sm:$0xff] }
 0x1b7   : > { %2253 = vrot.lane.b32.xlu0 %v9905_v55, %s9231_s30  ;;  %v2172_v55 = vld [vmem:[#allocation2 + $0x13c] sm:$0xff] }
 0x1b8   : > { %v1846_v39 = vpop.permute.xlu1 %1845 }
 0x1b9   : > { %1919 = vst.msk [vmem:[#allocation3 + $0x118] sm:$0xff] %vm14698_vm4, %v1846_v39  ;;  %v1997_v40 = vpop.permute.xlu0 %1996  ;;  %v2377_v39 = vld [vmem:[#allocation2 + $0xdd] sm:$0xff] }
 0x1ba   : > { %2251 = vrot.lane.b32.xlu1 %v9909_v57, %s9231_s30  ;;  %2103 = vst.msk [vmem:[#allocation3 + $0x10] sm:$0xff] %vm14696_vm5, %v1997_v40  ;;  %v2356_v57 = vld [vmem:[#allocation2 + $0x35] sm:$0xff] }
 0x1bb   : > { %2257 = vrot.lane.b32.xlu0 %v9915_v59, %s9231_s30  ;;  %v2355_v59 = vld [vmem:[#allocation2 + $0x2d] sm:$0xff] }
 0x1bc   : > { %v1995_v41 = vpop.permute.xlu1 %1994 }
 0x1bd   : > { %2102 = vst.msk [vmem:[#allocation3 + $0x8] sm:$0xff] %vm14696_vm5, %v1995_v41  ;;  %v2001_v42 = vpop.permute.xlu0 %2000  ;;  %v2380_v41 = vld [vmem:[#allocation2 + $0xf5] sm:$0xff] }
 0x1be   : > { %2255 = vrot.lane.b32.xlu1 %v9919_v61, %s9231_s30  ;;  %2105 = vst.msk [vmem:[#allocation3 + $0x20] sm:$0xff] %vm14696_vm5, %v2001_v42  ;;  %v2358_v61 = vld [vmem:[#allocation2 + $0x45] sm:$0xff] }
 0x1bf   : > { %2261 = vrot.lane.b32.xlu0 %v9925_v63, %s9231_s30  ;;  %v2357_v63 = vld [vmem:[#allocation2 + $0x3d] sm:$0xff] }
 0x1c0   : > { %v1999_v43 = vpop.permute.xlu1 %1998 }
 0x1c1   : > { %2104 = vst.msk [vmem:[#allocation3 + $0x18] sm:$0xff] %vm14696_vm5, %v1999_v43  ;;  %v2005_v44 = vpop.permute.xlu0 %2004  ;;  %v2379_v43 = vld [vmem:[#allocation2 + $0xed] sm:$0xff] }
 0x1c2   : > { %2259 = vrot.lane.b32.xlu1 %v9929_v1, %s9231_s30  ;;  %2107 = vst.msk [vmem:[#allocation3 + $0x30] sm:$0xff] %vm14696_vm5, %v2005_v44  ;;  %v2360_v1 = vld [vmem:[#allocation2 + $0x55] sm:$0xff] }
 0x1c3   : > { %2265 = vrot.lane.b32.xlu0 %v9935_v3, %s9231_s30  ;;  %v2359_v3 = vld [vmem:[#allocation2 + $0x4d] sm:$0xff] }
 0x1c4   : > { %v2003_v45 = vpop.permute.xlu1 %2002 }
 0x1c5   : > { %2106 = vst.msk [vmem:[#allocation3 + $0x28] sm:$0xff] %vm14696_vm5, %v2003_v45  ;;  %v2009_v46 = vpop.permute.xlu0 %2008  ;;  %v2824_v45 = vld [vmem:[%s14643_s1] sm:$0xff] }
 0x1c6   : > { %2263 = vrot.lane.b32.xlu1 %v9939_v5, %s9231_s30  ;;  %2109 = vst.msk [vmem:[#allocation3 + $0x40] sm:$0xff] %vm14696_vm5, %v2009_v46  ;;  %v2362_v5 = vld [vmem:[#allocation2 + $0x65] sm:$0xff] }
 0x1c7   : > { %2269 = vrot.lane.b32.xlu0 %v9945_v7, %s9231_s30  ;;  %v2361_v7 = vld [vmem:[#allocation2 + $0x5d] sm:$0xff]  ;;  %v2825_v46 = vld [vmem:[%s14643_s1 + $0x8] sm:$0xff] }
 0x1c8   : > { %v2007_v47 = vpop.permute.xlu1 %2006 }
 0x1c9   : > { %2108 = vst.msk [vmem:[#allocation3 + $0x38] sm:$0xff] %vm14696_vm5, %v2007_v47  ;;  %v2013_v48 = vpop.permute.xlu0 %2012  ;;  %v2382_v47 = vld [vmem:[#allocation2 + $0x105] sm:$0xff] }
 0x1ca   : > { %2267 = vrot.lane.b32.xlu1 %v9949_v9, %s9231_s30  ;;  %2111 = vst.msk [vmem:[#allocation3 + $0x50] sm:$0xff] %vm14696_vm5, %v2013_v48  ;;  %v2364_v9 = vld [vmem:[#allocation2 + $0x75] sm:$0xff]  ;;  %v9068_v48 = vpack.c.bf16 %v2825_v46, %v2824_v45 }
 0x1cb   : > { %2273 = vrot.lane.b32.xlu0 %v9955_v12, %s9231_s30  ;;  %v2363_v12 = vld [vmem:[#allocation2 + $0x6d] sm:$0xff]  ;;  %v2589_v46 = vld [vmem:[#allocation2 + $0xb6] sm:$0xff] }
 0x1cc   : > { %v2011_v49 = vpop.permute.xlu1 %2010  ;;  %9069 = vmatprep.subr.bf16.mxu0 %v9068_v48  ;;  %9116 = vmatprep.subr.bf16.mxu1 %v9068_v48 }
 0x1cd   : > { %2110 = vst.msk [vmem:[#allocation3 + $0x48] sm:$0xff] %vm14696_vm5, %v2011_v49  ;;  %v2017_v51 = vpop.permute.xlu0 %2016  ;;  %9071 = vmatpush3.bf16.msra.mxu0 %v9068_v48  ;;  %9121 = vmatpush3.bf16.msra.mxu1 %v9068_v48  ;;  %v2588_v48 = vld [vmem:[#allocation2 + $0xae] sm:$0xff] }
 0x1ce   : > { %2271 = vrot.lane.b32.xlu1 %v9959_v14, %s9231_s30  ;;  %2113 = vst.msk [vmem:[#allocation3 + $0x60] sm:$0xff] %vm14696_vm5, %v2017_v51  ;;  %v2366_v14 = vld [vmem:[#allocation2 + $0x85] sm:$0xff] }
 0x1cf   : > { %2277 = vrot.lane.b32.xlu0 %v2171_v50, %s9231_s30  ;;  %v2381_v50 = vld [vmem:[#allocation2 + $0xfd] sm:$0xff] }
 0x1d0   : > { %v2015_v52 = vpop.permute.xlu1 %2014 }
 0x1d1   : > { %2112 = vst.msk [vmem:[#allocation3 + $0x58] sm:$0xff] %vm14696_vm5, %v2015_v52  ;;  %v2021_v54 = vpop.permute.xlu0 %2020  ;;  %v2826_v52 = vld [vmem:[%s14643_s1 + $0x10] sm:$0xff] }
 0x1d2   : > { %2275 = vrot.lane.b32.xlu1 %v9967_v20, %s9231_s30  ;;  %2115 = vst.msk [vmem:[#allocation3 + $0x70] sm:$0xff] %vm14696_vm5, %v2021_v54  ;;  %v2384_v54 = vld [vmem:[#allocation2 + $0x115] sm:$0xff] }
 0x1d3   : > { %2426 = vrot.lane.b32.xlu0 %v2354_v53, %s9232_s6  ;;  %v2827_v53 = vld [vmem:[%s14643_s1 + $0x18] sm:$0xff] }
 0x1d4   : > { %v2019_v56 = vpop.permute.xlu1 %2018 }
 0x1d5   : > { %2114 = vst.msk [vmem:[#allocation3 + $0x68] sm:$0xff] %vm14696_vm5, %v2019_v56  ;;  %v2025_v58 = vpop.permute.xlu0 %2024 }
 0x1d6   : > { %2279 = vrot.lane.b32.xlu1 %v2172_v55, %s9231_s30  ;;  %2117 = vst.msk [vmem:[#allocation3 + $0x80] sm:$0xff] %vm14696_vm5, %v2025_v58  ;;  %v9072_v55 = vpack.c.bf16 %v2827_v53, %v2826_v52  ;;  %v2590_v52 = vld [vmem:[#allocation2 + $0xbe] sm:$0xff] }
 0x1d7   : > { %2430 = vrot.lane.b32.xlu0 %v2356_v57, %s9232_s6  ;;  %v2383_v57 = vld [vmem:[#allocation2 + $0x10d] sm:$0xff] }
 0x1d8   : > { %v2023_v60 = vpop.permute.xlu1 %2022  ;;  %9073 = vmatprep.subr.bf16.mxu0 %v9072_v55  ;;  %9117 = vmatprep.subr.bf16.mxu1 %v9072_v55 }
 0x1d9   : > { %2116 = vst.msk [vmem:[#allocation3 + $0x78] sm:$0xff] %vm14696_vm5, %v2023_v60  ;;  %v2029_v62 = vpop.permute.xlu0 %2028  ;;  %9075 = vmatpush3.bf16.msra.mxu0 %v9072_v55  ;;  %v2829_v60 = vld [vmem:[%s14643_s1 + $0x28] sm:$0xff]  ;;  %9122 = vmatpush3.bf16.msra.mxu1 %v9072_v55 }
 0x1da   : > { %2428 = vrot.lane.b32.xlu1 %v2355_v59, %s9232_s6  ;;  %2119 = vst.msk [vmem:[#allocation3 + $0x90] sm:$0xff] %vm14696_vm5, %v2029_v62  ;;  %v2828_v59 = vld [vmem:[%s14643_s1 + $0x20] sm:$0xff] }
 0x1db   : > { %2434 = vrot.lane.b32.xlu0 %v2358_v61, %s9232_s6  ;;  %v2386_v61 = vld [vmem:[#allocation2 + $0x125] sm:$0xff]  ;;  %v9076_v62 = vpack.c.bf16 %v2829_v60, %v2828_v59 }
 0x1dc   : > { %v2027_v0 = vpop.permute.xlu1 %2026  ;;  %v2594_v60 = vld [vmem:[#allocation2 + $0xde] sm:$0xff] }
 0x1dd   : > { %2118 = vst.msk [vmem:[#allocation3 + $0x88] sm:$0xff] %vm14696_vm5, %v2027_v0  ;;  %v2033_v2 = vpop.permute.xlu0 %2032  ;;  %v2385_v0 = vld [vmem:[#allocation2 + $0x11d] sm:$0xff]  ;;  %9077 = vmatprep.subr.bf16.mxu0 %v9076_v62  ;;  %9118 = vmatprep.subr.bf16.mxu1 %v9076_v62 }
 0x1de   : > { %2432 = vrot.lane.b32.xlu1 %v2357_v63, %s9232_s6  ;;  %2121 = vst.msk [vmem:[#allocation3 + $0xa0] sm:$0xff] %vm14696_vm5, %v2033_v2  ;;  %9079 = vmatpush3.bf16.msra.mxu0 %v9076_v62  ;;  %v2830_v2 = vld [vmem:[%s14643_s1 + $0x30] sm:$0xff] }
 0x1df   : > { %2438 = vrot.lane.b32.xlu0 %v2360_v1, %s9232_s6  ;;  %9123 = vmatpush3.bf16.msra.mxu1 %v9076_v62  ;;  %v2597_v62 = vld [vmem:[#allocation2 + $0xf6] sm:$0xff] }
 0x1e0   : > { %v2031_v4 = vpop.permute.xlu1 %2030 }
 0x1e1   : > { %2120 = vst.msk [vmem:[#allocation3 + $0x98] sm:$0xff] %vm14696_vm5, %v2031_v4  ;;  %v2037_v6 = vpop.permute.xlu0 %2036  ;;  %v2388_v4 = vld [vmem:[#allocation2 + $0x135] sm:$0xff] }
 0x1e2   : > { %2436 = vrot.lane.b32.xlu1 %v2359_v3, %s9232_s6  ;;  %2123 = vst.msk [vmem:[#allocation3 + $0xb0] sm:$0xff] %vm14696_vm5, %v2037_v6  ;;  %v2831_v3 = vld [vmem:[%s14643_s1 + $0x38] sm:$0xff] }
 0x1e3   : > { %2442 = vrot.lane.b32.xlu0 %v2362_v5, %s9232_s6  ;;  %v9080_v5 = vpack.c.bf16 %v2831_v3, %v2830_v2  ;;  %v2599_v2 = vld [vmem:[#allocation2 + $0x106] sm:$0xff] }
 0x1e4   : > { %v2035_v8 = vpop.permute.xlu1 %2034 }
 0x1e5   : > { %2122 = vst.msk [vmem:[#allocation3 + $0xa8] sm:$0xff] %vm14696_vm5, %v2035_v8  ;;  %v2041_v10 = vpop.permute.xlu0 %2040  ;;  %9081 = vmatprep.subr.bf16.mxu0 %v9080_v5  ;;  %9119 = vmatprep.subr.bf16.mxu1 %v9080_v5 }
 0x1e6   : > { %2440 = vrot.lane.b32.xlu1 %v2361_v7, %s9232_s6  ;;  %2125 = vst.msk [vmem:[#allocation3 + $0xc0] sm:$0xff] %vm14696_vm5, %v2041_v10  ;;  %v2387_v7 = vld [vmem:[#allocation2 + $0x12d] sm:$0xff]  ;;  %9083 = vmatpush3.bf16.msra.mxu0 %v9080_v5  ;;  %v2832_v10 = vld [vmem:[%s14643_s1 + $0x40] sm:$0xff] }
 0x1e7   : > { %2446 = vrot.lane.b32.xlu0 %v2364_v9, %s9232_s6  ;;  %v2571_v9 = vld [vmem:[#allocation2 + $0x26] sm:$0xff]  ;;  %9124 = vmatpush3.bf16.msra.mxu1 %v9080_v5 }
 0x1e8   : > { %v2039_v13 = vpop.permute.xlu1 %2038  ;;  %8868 = vmatprep.subr.mxu0 %v2832_v10  ;;  %9120 = vmatprep.subr.mxu1 %v2832_v10 }
 0x1e9   : > { %2124 = vst.msk [vmem:[#allocation3 + $0xb8] sm:$0xff] %vm14696_vm5, %v2039_v13  ;;  %v2045_v16 = vpop.permute.xlu0 %2044  ;;  %v2389_v13 = vld [vmem:[#allocation2 + $0x13d] sm:$0xff] }
 0x1ea   : > { %2444 = vrot.lane.b32.xlu1 %v2363_v12, %s9232_s6  ;;  %2127 = vst.msk [vmem:[#allocation3 + $0xd0] sm:$0xff] %vm14696_vm5, %v2045_v16  ;;  %8869 = vmatpush3.msra.mxu0 %v2832_v10  ;;  %v2573_v16 = vld [vmem:[#allocation2 + $0x36] sm:$0xff] }
 0x1eb   : > { %2450 = vrot.lane.b32.xlu0 %v2366_v14, %s9232_s6  ;;  %9125 = vmatpush3.msra.mxu1 %v2832_v10  ;;  %v2603_v10 = vld [vmem:[#allocation2 + $0x126] sm:$0xff] }
 0x1ec   : > { %v2043_v20 = vpop.permute.xlu1 %2042 }
 0x1ed   : > { %2126 = vst.msk [vmem:[#allocation3 + $0xc8] sm:$0xff] %vm14696_vm5, %v2043_v20  ;;  %v2049_v24 = vpop.permute.xlu0 %2048  ;;  %v2572_v20 = vld [vmem:[#allocation2 + $0x2e] sm:$0xff] }
 0x1ee   : > { %2448 = vrot.lane.b32.xlu1 %v2365_v18, %s9232_s6  ;;  %2129 = vst.msk [vmem:[#allocation3 + $0xe0] sm:$0xff] %vm14696_vm5, %v2049_v24  ;;  %v2575_v24 = vld [vmem:[#allocation2 + $0x46] sm:$0xff] }
 0x1ef   : > { %2454 = vrot.lane.b32.xlu0 %v2368_v22, %s9232_s6 }
 0x1f0   : > { %v2047_v28 = vpop.permute.xlu1 %2046 }
 0x1f1   : > { %2128 = vst.msk [vmem:[#allocation3 + $0xd8] sm:$0xff] %vm14696_vm5, %v2047_v28  ;;  %v2053_v30 = vpop.permute.xlu0 %2052  ;;  %v2574_v28 = vld [vmem:[#allocation2 + $0x3e] sm:$0xff] }
 0x1f2   : > { %2452 = vrot.lane.b32.xlu1 %v2367_v26, %s9232_s6  ;;  %2131 = vst.msk [vmem:[#allocation3 + $0xf0] sm:$0xff] %vm14696_vm5, %v2053_v30  ;;  %v2577_v30 = vld [vmem:[#allocation2 + $0x56] sm:$0xff] }
 0x1f3   : > { %2458 = vrot.lane.b32.xlu0 %v2370_v11, %s9232_s6 }
 0x1f4   : > { %v2051_v17 = vpop.permute.xlu1 %2050 }
 0x1f5   : > { %2130 = vst.msk [vmem:[#allocation3 + $0xe8] sm:$0xff] %vm14696_vm5, %v2051_v17  ;;  %v2057_v21 = vpop.permute.xlu0 %2056  ;;  %v2576_v17 = vld [vmem:[#allocation2 + $0x4e] sm:$0xff] }
 0x1f6   : > { %2456 = vrot.lane.b32.xlu1 %v2369_v15, %s9232_s6  ;;  %2133 = vst.msk [vmem:[#allocation3 + $0x100] sm:$0xff] %vm14696_vm5, %v2057_v21  ;;  %v2579_v21 = vld [vmem:[#allocation2 + $0x66] sm:$0xff] }
 0x1f7   : > { %2462 = vrot.lane.b32.xlu0 %v2372_v19, %s9232_s6 }
 0x1f8   : > { %v2055_v25 = vpop.permute.xlu1 %2054 }
 0x1f9   : > { %2132 = vst.msk [vmem:[#allocation3 + $0xf8] sm:$0xff] %vm14696_vm5, %v2055_v25  ;;  %v2061_v29 = vpop.permute.xlu0 %2060  ;;  %v2578_v25 = vld [vmem:[#allocation2 + $0x5e] sm:$0xff] }
 0x1fa   : > { %2460 = vrot.lane.b32.xlu1 %v2371_v23, %s9232_s6  ;;  %2135 = vst.msk [vmem:[#allocation3 + $0x110] sm:$0xff] %vm14696_vm5, %v2061_v29  ;;  %v2581_v29 = vld [vmem:[#allocation2 + $0x76] sm:$0xff] }
 0x1fb   : > { %2466 = vrot.lane.b32.xlu0 %v2374_v27, %s9232_s6 }
 0x1fc   : > { %v2059_v32 = vpop.permute.xlu1 %2058 }
 0x1fd   : > { %2134 = vst.msk [vmem:[#allocation3 + $0x108] sm:$0xff] %vm14696_vm5, %v2059_v32  ;;  %v2210_v34 = vpop.permute.xlu0 %2209  ;;  %v2580_v32 = vld [vmem:[#allocation2 + $0x6e] sm:$0xff] }
 0x1fe   : > { %2464 = vrot.lane.b32.xlu1 %v2373_v31, %s9232_s6  ;;  %2318 = vst.msk [vmem:[#allocation3] sm:$0xff] %vm14695_vm6, %v2210_v34  ;;  %v2583_v34 = vld [vmem:[#allocation2 + $0x86] sm:$0xff] }
 0x1ff   : > { %2470 = vrot.lane.b32.xlu0 %v2376_v33, %s9232_s6 }
 0x200   : > { %v2063_v36 = vpop.permute.xlu1 %2062 }
 0x201   : > { %2136 = vst.msk [vmem:[#allocation3 + $0x118] sm:$0xff] %vm14696_vm5, %v2063_v36  ;;  %v2214_v38 = vpop.permute.xlu0 %2213  ;;  %v2582_v36 = vld [vmem:[#allocation2 + $0x7e] sm:$0xff] }
 0x202   : > { %2468 = vrot.lane.b32.xlu1 %v2375_v35, %s9232_s6  ;;  %2320 = vst.msk [vmem:[#allocation3 + $0x10] sm:$0xff] %vm14695_vm6, %v2214_v38  ;;  %v2585_v38 = vld [vmem:[#allocation2 + $0x96] sm:$0xff] }
 0x203   : > { %2474 = vrot.lane.b32.xlu0 %v2378_v37, %s9232_s6 }
 0x204   : > { %v2212_v40 = vpop.permute.xlu1 %2211 }
 0x205   : > { %2319 = vst.msk [vmem:[#allocation3 + $0x8] sm:$0xff] %vm14695_vm6, %v2212_v40  ;;  %v2218_v42 = vpop.permute.xlu0 %2217  ;;  %v2584_v40 = vld [vmem:[#allocation2 + $0x8e] sm:$0xff] }
 0x206   : > { %2472 = vrot.lane.b32.xlu1 %v2377_v39, %s9232_s6  ;;  %2322 = vst.msk [vmem:[#allocation3 + $0x20] sm:$0xff] %vm14695_vm6, %v2218_v42  ;;  %v2587_v42 = vld [vmem:[#allocation2 + $0xa6] sm:$0xff] }
 0x207   : > { %2478 = vrot.lane.b32.xlu0 %v2380_v41, %s9232_s6 }
 0x208   : > { %v2216_v44 = vpop.permute.xlu1 %2215 }
 0x209   : > { %2321 = vst.msk [vmem:[#allocation3 + $0x18] sm:$0xff] %vm14695_vm6, %v2216_v44  ;;  %v2222_v49 = vpop.permute.xlu0 %2221  ;;  %v2586_v44 = vld [vmem:[#allocation2 + $0x9e] sm:$0xff] }
 0x20a   : > { %2476 = vrot.lane.b32.xlu1 %v2379_v43, %s9232_s6  ;;  %2324 = vst.msk [vmem:[#allocation3 + $0x30] sm:$0xff] %vm14695_vm6, %v2222_v49 }
 0x20b   : > { %2482 = vrot.lane.b32.xlu0 %v2382_v47, %s9232_s6 }
 0x20c   : > { %v2220_v51 = vpop.permute.xlu1 %2219 }
 0x20d   : > { %2323 = vst.msk [vmem:[#allocation3 + $0x28] sm:$0xff] %vm14695_vm6, %v2220_v51  ;;  %v2226_v56 = vpop.permute.xlu0 %2225 }
 0x20e   : > { %2480 = vrot.lane.b32.xlu1 %v2381_v50, %s9232_s6  ;;  %2326 = vst.msk [vmem:[#allocation3 + $0x40] sm:$0xff] %vm14695_vm6, %v2226_v56  ;;  %v2591_v50 = vld [vmem:[#allocation2 + $0xc6] sm:$0xff]  ;;  %v2592_v56 = vld [vmem:[#allocation2 + $0xce] sm:$0xff] }
 0x20f   : > { %2486 = vrot.lane.b32.xlu0 %v2384_v54, %s9232_s6  ;;  %v2593_v54 = vld [vmem:[#allocation2 + $0xd6] sm:$0xff] }
 0x210   : > { %v2224_v58 = vpop.permute.xlu1 %2223 }
 0x211   : > { %2325 = vst.msk [vmem:[#allocation3 + $0x38] sm:$0xff] %vm14695_vm6, %v2224_v58  ;;  %v2230_v63 = vpop.permute.xlu0 %2229  ;;  %v2595_v58 = vld [vmem:[#allocation2 + $0xe6] sm:$0xff] }
 0x212   : > { %2484 = vrot.lane.b32.xlu1 %v2383_v57, %s9232_s6  ;;  %2328 = vst.msk [vmem:[#allocation3 + $0x50] sm:$0xff] %vm14695_vm6, %v2230_v63 }
 0x213   : > { %2490 = vrot.lane.b32.xlu0 %v2386_v61, %s9232_s6 }
 0x214   : > { %v2228_v1 = vpop.permute.xlu1 %2227 }
 0x215   : > { %2327 = vst.msk [vmem:[#allocation3 + $0x48] sm:$0xff] %vm14695_vm6, %v2228_v1  ;;  %v2234_v6 = vpop.permute.xlu0 %2233 }
 0x216   : > { %2488 = vrot.lane.b32.xlu1 %v2385_v0, %s9232_s6  ;;  %2330 = vst.msk [vmem:[#allocation3 + $0x60] sm:$0xff] %vm14695_vm6, %v2234_v6  ;;  %v2596_v0 = vld [vmem:[#allocation2 + $0xee] sm:$0xff]  ;;  %v2601_v6 = vld [vmem:[#allocation2 + $0x116] sm:$0xff] }
 0x217   : > { %2494 = vrot.lane.b32.xlu0 %v2388_v4, %s9232_s6  ;;  %v2598_v4 = vld [vmem:[#allocation2 + $0xfe] sm:$0xff] }
 0x218   : > { %v2232_v8 = vpop.permute.xlu1 %2231 }
 0x219   : > { %2329 = vst.msk [vmem:[#allocation3 + $0x58] sm:$0xff] %vm14695_vm6, %v2232_v8  ;;  %v2238_v12 = vpop.permute.xlu0 %2237  ;;  %v2600_v8 = vld [vmem:[#allocation2 + $0x10e] sm:$0xff] }
 0x21a   : > { %2492 = vrot.lane.b32.xlu1 %v2387_v7, %s9232_s6  ;;  %2332 = vst.msk [vmem:[#allocation3 + $0x70] sm:$0xff] %vm14695_vm6, %v2238_v12 }
 0x21b   : > { %2643 = vrot.lane.b32.xlu0 %v2571_v9, %s9233_s9 }
 0x21c   : > { %v2236_v14 = vpop.permute.xlu1 %2235 }
 0x21d   : > { %2331 = vst.msk [vmem:[#allocation3 + $0x68] sm:$0xff] %vm14695_vm6, %v2236_v14  ;;  %v2242_v18 = vpop.permute.xlu0 %2241 }
 0x21e   : > { %2496 = vrot.lane.b32.xlu1 %v2389_v13, %s9232_s6  ;;  %2334 = vst.msk [vmem:[#allocation3 + $0x80] sm:$0xff] %vm14695_vm6, %v2242_v18  ;;  %v2602_v13 = vld [vmem:[#allocation2 + $0x11e] sm:$0xff] }
 0x21f   : > { %2647 = vrot.lane.b32.xlu0 %v2573_v16, %s9233_s9  ;;  %v2605_v16 = vld [vmem:[#allocation2 + $0x136] sm:$0xff] }
 0x220   : > { %v2240_v22 = vpop.permute.xlu1 %2239 }
 0x221   : > { %2333 = vst.msk [vmem:[#allocation3 + $0x78] sm:$0xff] %vm14695_vm6, %v2240_v22  ;;  %v2246_v26 = vpop.permute.xlu0 %2245 }
 0x222   : > { %2645 = vrot.lane.b32.xlu1 %v2572_v20, %s9233_s9  ;;  %2336 = vst.msk [vmem:[#allocation3 + $0x90] sm:$0xff] %vm14695_vm6, %v2246_v26  ;;  %v2604_v20 = vld [vmem:[#allocation2 + $0x12e] sm:$0xff]  ;;  %v2606_v26 = vld [vmem:[#allocation2 + $0x13e] sm:$0xff] }
 0x223   : > { %2651 = vrot.lane.b32.xlu0 %v2575_v24, %s9233_s9 }
 0x224   : > { %v2244_v11 = vpop.permute.xlu1 %2243 }
 0x225   : > { %2335 = vst.msk [vmem:[#allocation3 + $0x88] sm:$0xff] %vm14695_vm6, %v2244_v11  ;;  %v2250_v15 = vpop.permute.xlu0 %2249 }
 0x226   : > { %2649 = vrot.lane.b32.xlu1 %v2574_v28, %s9233_s9  ;;  %2338 = vst.msk [vmem:[#allocation3 + $0xa0] sm:$0xff] %vm14695_vm6, %v2250_v15 }
 0x227   : > { %2655 = vrot.lane.b32.xlu0 %v2577_v30, %s9233_s9 }
 0x228   : > { %v2248_v19 = vpop.permute.xlu1 %2247 }
 0x229   : > { %2337 = vst.msk [vmem:[#allocation3 + $0x98] sm:$0xff] %vm14695_vm6, %v2248_v19  ;;  %v2254_v23 = vpop.permute.xlu0 %2253 }
 0x22a   : > { %2653 = vrot.lane.b32.xlu1 %v2576_v17, %s9233_s9  ;;  %2340 = vst.msk [vmem:[#allocation3 + $0xb0] sm:$0xff] %vm14695_vm6, %v2254_v23 }
 0x22b   : > { %2659 = vrot.lane.b32.xlu0 %v2579_v21, %s9233_s9 }
 0x22c   : > { %v2252_v27 = vpop.permute.xlu1 %2251 }
 0x22d   : > { %2339 = vst.msk [vmem:[#allocation3 + $0xa8] sm:$0xff] %vm14695_vm6, %v2252_v27  ;;  %v2258_v31 = vpop.permute.xlu0 %2257 }
 0x22e   : > { %2657 = vrot.lane.b32.xlu1 %v2578_v25, %s9233_s9  ;;  %2342 = vst.msk [vmem:[#allocation3 + $0xc0] sm:$0xff] %vm14695_vm6, %v2258_v31 }
 0x22f   : > { %2663 = vrot.lane.b32.xlu0 %v2581_v29, %s9233_s9 }
 0x230   : > { %v2256_v33 = vpop.permute.xlu1 %2255 }
 0x231   : > { %2341 = vst.msk [vmem:[#allocation3 + $0xb8] sm:$0xff] %vm14695_vm6, %v2256_v33  ;;  %v2262_v35 = vpop.permute.xlu0 %2261 }
 0x232   : > { %2661 = vrot.lane.b32.xlu1 %v2580_v32, %s9233_s9  ;;  %2344 = vst.msk [vmem:[#allocation3 + $0xd0] sm:$0xff] %vm14695_vm6, %v2262_v35 }
 0x233   : > { %2667 = vrot.lane.b32.xlu0 %v2583_v34, %s9233_s9 }
 0x234   : > { %v2260_v37 = vpop.permute.xlu1 %2259 }
 0x235   : > { %2343 = vst.msk [vmem:[#allocation3 + $0xc8] sm:$0xff] %vm14695_vm6, %v2260_v37  ;;  %v2266_v39 = vpop.permute.xlu0 %2265 }
 0x236   : > { %2665 = vrot.lane.b32.xlu1 %v2582_v36, %s9233_s9  ;;  %2346 = vst.msk [vmem:[#allocation3 + $0xe0] sm:$0xff] %vm14695_vm6, %v2266_v39 }
 0x237   : > { %2671 = vrot.lane.b32.xlu0 %v2585_v38, %s9233_s9 }
 0x238   : > { %v2264_v41 = vpop.permute.xlu1 %2263 }
 0x239   : > { %2345 = vst.msk [vmem:[#allocation3 + $0xd8] sm:$0xff] %vm14695_vm6, %v2264_v41  ;;  %v2270_v43 = vpop.permute.xlu0 %2269 }
 0x23a   : > { %2669 = vrot.lane.b32.xlu1 %v2584_v40, %s9233_s9  ;;  %2348 = vst.msk [vmem:[#allocation3 + $0xf0] sm:$0xff] %vm14695_vm6, %v2270_v43 }
 0x23b   : > { %2675 = vrot.lane.b32.xlu0 %v2587_v42, %s9233_s9 }
 0x23c   : > { %v2268_v45 = vpop.permute.xlu1 %2267 }
 0x23d   : > { %2347 = vst.msk [vmem:[#allocation3 + $0xe8] sm:$0xff] %vm14695_vm6, %v2268_v45  ;;  %v2274_v47 = vpop.permute.xlu0 %2273 }
 0x23e   : > { %2673 = vrot.lane.b32.xlu1 %v2586_v44, %s9233_s9  ;;  %2350 = vst.msk [vmem:[#allocation3 + $0x100] sm:$0xff] %vm14695_vm6, %v2274_v47 }
 0x23f   : > { %2679 = vrot.lane.b32.xlu0 %v2589_v46, %s9233_s9 }
 0x240   : > { %v2272_v49 = vpop.permute.xlu1 %2271 }
 0x241   : > { %2349 = vst.msk [vmem:[#allocation3 + $0xf8] sm:$0xff] %vm14695_vm6, %v2272_v49  ;;  %v2278_v51 = vpop.permute.xlu0 %2277 }
 0x242   : > { %2677 = vrot.lane.b32.xlu1 %v2588_v48, %s9233_s9  ;;  %2352 = vst.msk [vmem:[#allocation3 + $0x110] sm:$0xff] %vm14695_vm6, %v2278_v51 }
 0x243   : > { %2683 = vrot.lane.b32.xlu0 %v2591_v50, %s9233_s9 }
 0x244   : > { %v2276_v53 = vpop.permute.xlu1 %2275 }
 0x245   : > { %2351 = vst.msk [vmem:[#allocation3 + $0x108] sm:$0xff] %vm14695_vm6, %v2276_v53  ;;  %v2427_v55 = vpop.permute.xlu0 %2426 }
 0x246   : > { %2681 = vrot.lane.b32.xlu1 %v2590_v52, %s9233_s9  ;;  %2535 = vst.msk [vmem:[#allocation3] sm:$0xff] %vm14693_vm7, %v2427_v55 }
 0x247   : > { %2687 = vrot.lane.b32.xlu0 %v2593_v54, %s9233_s9 }
 0x248   : > { %v2280_v57 = vpop.permute.xlu1 %2279 }
 0x249   : > { %2353 = vst.msk [vmem:[#allocation3 + $0x118] sm:$0xff] %vm14695_vm6, %v2280_v57  ;;  %v2431_v59 = vpop.permute.xlu0 %2430 }
 0x24a   : > { %2685 = vrot.lane.b32.xlu1 %v2592_v56, %s9233_s9  ;;  %2537 = vst.msk [vmem:[#allocation3 + $0x10] sm:$0xff] %vm14693_vm7, %v2431_v59 }
 0x24b   : > { %2691 = vrot.lane.b32.xlu0 %v2595_v58, %s9233_s9 }
 0x24c   : > { %v2429_v61 = vpop.permute.xlu1 %2428 }
 0x24d   : > { %2536 = vst.msk [vmem:[#allocation3 + $0x8] sm:$0xff] %vm14693_vm7, %v2429_v61  ;;  %v2435_v63 = vpop.permute.xlu0 %2434 }
 0x24e   : > { %2689 = vrot.lane.b32.xlu1 %v2594_v60, %s9233_s9  ;;  %2539 = vst.msk [vmem:[#allocation3 + $0x20] sm:$0xff] %vm14693_vm7, %v2435_v63 }
 0x24f   : > { %2695 = vrot.lane.b32.xlu0 %v2597_v62, %s9233_s9 }
 0x250   : > { %v2433_v1 = vpop.permute.xlu1 %2432 }
 0x251   : > { %2538 = vst.msk [vmem:[#allocation3 + $0x18] sm:$0xff] %vm14693_vm7, %v2433_v1  ;;  %v2439_v3 = vpop.permute.xlu0 %2438 }
 0x252   : > { %2693 = vrot.lane.b32.xlu1 %v2596_v0, %s9233_s9  ;;  %2541 = vst.msk [vmem:[#allocation3 + $0x30] sm:$0xff] %vm14693_vm7, %v2439_v3 }
 0x253   : > { %2699 = vrot.lane.b32.xlu0 %v2599_v2, %s9233_s9 }
 0x254   : > { %v2437_v5 = vpop.permute.xlu1 %2436 }
 0x255   : > { %2540 = vst.msk [vmem:[#allocation3 + $0x28] sm:$0xff] %vm14693_vm7, %v2437_v5  ;;  %v2443_v7 = vpop.permute.xlu0 %2442 }
 0x256   : > { %2697 = vrot.lane.b32.xlu1 %v2598_v4, %s9233_s9  ;;  %2543 = vst.msk [vmem:[#allocation3 + $0x40] sm:$0xff] %vm14693_vm7, %v2443_v7 }
 0x257   : > { %2703 = vrot.lane.b32.xlu0 %v2601_v6, %s9233_s9 }
 0x258   : > { %v2441_v9 = vpop.permute.xlu1 %2440 }
 0x259   : > { %2542 = vst.msk [vmem:[#allocation3 + $0x38] sm:$0xff] %vm14693_vm7, %v2441_v9  ;;  %v2447_v12 = vpop.permute.xlu0 %2446 }
 0x25a   : > { %2701 = vrot.lane.b32.xlu1 %v2600_v8, %s9233_s9  ;;  %2545 = vst.msk [vmem:[#allocation3 + $0x50] sm:$0xff] %vm14693_vm7, %v2447_v12 }
 0x25b   : > { %2707 = vrot.lane.b32.xlu0 %v2603_v10, %s9233_s9 }
 0x25c   : > { %v2445_v14 = vpop.permute.xlu1 %2444 }
 0x25d   : > { %2544 = vst.msk [vmem:[#allocation3 + $0x48] sm:$0xff] %vm14693_vm7, %v2445_v14  ;;  %v2451_v18 = vpop.permute.xlu0 %2450 }
 0x25e   : > { %2705 = vrot.lane.b32.xlu1 %v2602_v13, %s9233_s9  ;;  %2547 = vst.msk [vmem:[#allocation3 + $0x60] sm:$0xff] %vm14693_vm7, %v2451_v18 }
 0x25f   : > { %2711 = vrot.lane.b32.xlu0 %v2605_v16, %s9233_s9 }
 0x260   : > { %v2449_v22 = vpop.permute.xlu1 %2448 }
 0x261   : > { %2546 = vst.msk [vmem:[#allocation3 + $0x58] sm:$0xff] %vm14693_vm7, %v2449_v22  ;;  %v2455_v24 = vpop.permute.xlu0 %2454 }
 0x262   : > { %2709 = vrot.lane.b32.xlu1 %v2604_v20, %s9233_s9  ;;  %2549 = vst.msk [vmem:[#allocation3 + $0x70] sm:$0xff] %vm14693_vm7, %v2455_v24 }
 0x264   : > { %v2453_v28 = vpop.permute.xlu1 %2452 }
 0x265   : > { %2548 = vst.msk [vmem:[#allocation3 + $0x68] sm:$0xff] %vm14693_vm7, %v2453_v28  ;;  %v2459_v11 = vpop.permute.xlu0 %2458 }
 0x266   : > { %2713 = vrot.lane.b32.xlu1 %v2606_v26, %s9233_s9  ;;  %2551 = vst.msk [vmem:[#allocation3 + $0x80] sm:$0xff] %vm14693_vm7, %v2459_v11 }
 0x268   : > { %v2457_v30 = vpop.permute.xlu1 %2456 }
 0x269   : > { %2550 = vst.msk [vmem:[#allocation3 + $0x78] sm:$0xff] %vm14693_vm7, %v2457_v30  ;;  %v2463_v15 = vpop.permute.xlu0 %2462 }
 0x26a   : > { %2553 = vst.msk [vmem:[#allocation3 + $0x90] sm:$0xff] %vm14693_vm7, %v2463_v15 }
 0x26c   : > { %v2461_v17 = vpop.permute.xlu1 %2460 }
 0x26d   : > { %2552 = vst.msk [vmem:[#allocation3 + $0x88] sm:$0xff] %vm14693_vm7, %v2461_v17  ;;  %v2467_v19 = vpop.permute.xlu0 %2466 }
 0x26e   : > { %2555 = vst.msk [vmem:[#allocation3 + $0xa0] sm:$0xff] %vm14693_vm7, %v2467_v19 }
 0x270   : > { %v2465_v21 = vpop.permute.xlu1 %2464 }
 0x271   : > { %2554 = vst.msk [vmem:[#allocation3 + $0x98] sm:$0xff] %vm14693_vm7, %v2465_v21  ;;  %v2471_v23 = vpop.permute.xlu0 %2470 }
 0x272   : > { %2557 = vst.msk [vmem:[#allocation3 + $0xb0] sm:$0xff] %vm14693_vm7, %v2471_v23 }
 0x274   : > { %v2469_v25 = vpop.permute.xlu1 %2468 }
 0x275   : > { %2556 = vst.msk [vmem:[#allocation3 + $0xa8] sm:$0xff] %vm14693_vm7, %v2469_v25  ;;  %v2475_v27 = vpop.permute.xlu0 %2474 }
 0x276   : > { %2559 = vst.msk [vmem:[#allocation3 + $0xc0] sm:$0xff] %vm14693_vm7, %v2475_v27 }
 0x278   : > { %v2473_v29 = vpop.permute.xlu1 %2472 }
 0x279   : > { %2558 = vst.msk [vmem:[#allocation3 + $0xb8] sm:$0xff] %vm14693_vm7, %v2473_v29  ;;  %v2479_v31 = vpop.permute.xlu0 %2478 }
 0x27a   : > { %2561 = vst.msk [vmem:[#allocation3 + $0xd0] sm:$0xff] %vm14693_vm7, %v2479_v31 }
 0x27c   : > { %v2477_v32 = vpop.permute.xlu1 %2476 }
 0x27d   : > { %2560 = vst.msk [vmem:[#allocation3 + $0xc8] sm:$0xff] %vm14693_vm7, %v2477_v32  ;;  %v2483_v33 = vpop.permute.xlu0 %2482 }
 0x27e   : > { %2563 = vst.msk [vmem:[#allocation3 + $0xe0] sm:$0xff] %vm14693_vm7, %v2483_v33 }
 0x280   : > { %v2481_v34 = vpop.permute.xlu1 %2480 }
 0x281   : > { %2562 = vst.msk [vmem:[#allocation3 + $0xd8] sm:$0xff] %vm14693_vm7, %v2481_v34  ;;  %v2487_v35 = vpop.permute.xlu0 %2486 }
 0x282   : > { %2565 = vst.msk [vmem:[#allocation3 + $0xf0] sm:$0xff] %vm14693_vm7, %v2487_v35 }
 0x284   : > { %v2485_v36 = vpop.permute.xlu1 %2484 }
 0x285   : > { %2564 = vst.msk [vmem:[#allocation3 + $0xe8] sm:$0xff] %vm14693_vm7, %v2485_v36  ;;  %v2491_v37 = vpop.permute.xlu0 %2490 }
 0x286   : > { %2567 = vst.msk [vmem:[#allocation3 + $0x100] sm:$0xff] %vm14693_vm7, %v2491_v37 }
 0x288   : > { %v2489_v38 = vpop.permute.xlu1 %2488 }
 0x289   : > { %2566 = vst.msk [vmem:[#allocation3 + $0xf8] sm:$0xff] %vm14693_vm7, %v2489_v38  ;;  %v2495_v39 = vpop.permute.xlu0 %2494 }
 0x28a   : > { %2569 = vst.msk [vmem:[#allocation3 + $0x110] sm:$0xff] %vm14693_vm7, %v2495_v39 }
 0x28c   : > { %v2493_v40 = vpop.permute.xlu1 %2492 }
 0x28d   : > { %2568 = vst.msk [vmem:[#allocation3 + $0x108] sm:$0xff] %vm14693_vm7, %v2493_v40  ;;  %v2644_v41 = vpop.permute.xlu0 %2643 }
 0x28e   : > { %2752 = vst.msk [vmem:[#allocation3] sm:$0xff] %vm14692_vm8, %v2644_v41 }
 0x290   : > { %v2497_v42 = vpop.permute.xlu1 %2496 }
 0x291   : > { %2570 = vst.msk [vmem:[#allocation3 + $0x118] sm:$0xff] %vm14693_vm7, %v2497_v42  ;;  %v2648_v43 = vpop.permute.xlu0 %2647 }
 0x292   : > { %2754 = vst.msk [vmem:[#allocation3 + $0x10] sm:$0xff] %vm14692_vm8, %v2648_v43 }
 0x294   : > { %v2646_v44 = vpop.permute.xlu1 %2645 }
 0x295   : > { %2753 = vst.msk [vmem:[#allocation3 + $0x8] sm:$0xff] %vm14692_vm8, %v2646_v44  ;;  %v2652_v45 = vpop.permute.xlu0 %2651  ;;  %v2788_v46 = vld [vmem:[#allocation3] sm:$0xff] }
 0x296   : > { %2756 = vst.msk [vmem:[#allocation3 + $0x20] sm:$0xff] %vm14692_vm8, %v2652_v45  ;;  %8870 = vmatprep.mubr.msk.f32.mxu0 %vm14691_vm9, %v2788_v46 }
 0x298   : > { %v2650_v47 = vpop.permute.xlu1 %2649 }
 0x299   : > { %2755 = vst.msk [vmem:[#allocation3 + $0x18] sm:$0xff] %vm14692_vm8, %v2650_v47  ;;  %v2656_v48 = vpop.permute.xlu0 %2655  ;;  %v2790_v49 = vld [vmem:[#allocation3 + $0x10] sm:$0xff] }
 0x29a   : > { %2758 = vst.msk [vmem:[#allocation3 + $0x30] sm:$0xff] %vm14692_vm8, %v2656_v48 }
 0x29c   : > { %v2654_v50 = vpop.permute.xlu1 %2653  ;;  %v2789_v51 = vld [vmem:[#allocation3 + $0x8] sm:$0xff] }
 0x29d   : > { %2757 = vst.msk [vmem:[#allocation3 + $0x28] sm:$0xff] %vm14692_vm8, %v2654_v50  ;;  %8871 = vmatmul.mubr.msk.f32.vlgmr.msra.gmra.mrb[0].mxu0 %vm14691_vm9, %v2789_v51  ;;  %v2660_v52 = vpop.permute.xlu0 %2659  ;;  %v2792_v53 = vld [vmem:[#allocation3 + $0x20] sm:$0xff]  ;;  %v10346_v50 = vld [vmem:[%s14644_s2] ss:$0 sm:$0xff] }
 0x29e   : > { %8873 = vmatprep.mubr.msk.f32.mxu0 %vm14691_vm9, %v2790_v49  ;;  %2760 = vst.msk [vmem:[#allocation3 + $0x40] sm:$0xff] %vm14692_vm8, %v2660_v52 }
 0x2a0   : > { %v2658_v54 = vpop.permute.xlu1 %2657  ;;  %v2791_v55 = vld [vmem:[#allocation3 + $0x18] sm:$0xff] }
 0x2a1   : > { %2759 = vst.msk [vmem:[#allocation3 + $0x38] sm:$0xff] %vm14692_vm8, %v2658_v54  ;;  %8874 = vmatmul.mubr.msk.f32.gmra.mrb[2].mxu0 %vm14691_vm9, %v2791_v55  ;;  %v2664_v56 = vpop.permute.xlu0 %2663  ;;  %v2794_v57 = vld [vmem:[#allocation3 + $0x30] sm:$0xff] }
 0x2a2   : > { %8876 = vmatprep.mubr.msk.f32.mxu0 %vm14691_vm9, %v2792_v53  ;;  %2762 = vst.msk [vmem:[#allocation3 + $0x50] sm:$0xff] %vm14692_vm8, %v2664_v56 }
 0x2a4   : > { %v2662_v58 = vpop.permute.xlu1 %2661  ;;  %v2793_v59 = vld [vmem:[#allocation3 + $0x28] sm:$0xff] }
 0x2a5   : > { %2761 = vst.msk [vmem:[#allocation3 + $0x48] sm:$0xff] %vm14692_vm8, %v2662_v58  ;;  %8877 = vmatmul.mubr.msk.f32.gmra.mrb[4].mxu0 %vm14691_vm9, %v2793_v59  ;;  %v2668_v60 = vpop.permute.xlu0 %2667  ;;  %v2796_v61 = vld [vmem:[#allocation3 + $0x40] sm:$0xff] }
 0x2a6   : > { %8879 = vmatprep.mubr.msk.f32.mxu0 %vm14691_vm9, %v2794_v57  ;;  %2764 = vst.msk [vmem:[#allocation3 + $0x60] sm:$0xff] %vm14692_vm8, %v2668_v60 }
 0x2a8   : > { %v2666_v62 = vpop.permute.xlu1 %2665  ;;  %v2795_v63 = vld [vmem:[#allocation3 + $0x38] sm:$0xff] }
 0x2a9   : > { %2763 = vst.msk [vmem:[#allocation3 + $0x58] sm:$0xff] %vm14692_vm8, %v2666_v62  ;;  %8880 = vmatmul.mubr.msk.f32.gmra.mrb[6].mxu0 %vm14691_vm9, %v2795_v63  ;;  %v2672_v0 = vpop.permute.xlu0 %2671  ;;  %v2798_v1 = vld [vmem:[#allocation3 + $0x50] sm:$0xff] }
 0x2aa   : > { %8882 = vmatprep.mubr.msk.f32.mxu0 %vm14691_vm9, %v2796_v61  ;;  %2766 = vst.msk [vmem:[#allocation3 + $0x70] sm:$0xff] %vm14692_vm8, %v2672_v0 }
 0x2ac   : > { %v2670_v2 = vpop.permute.xlu1 %2669  ;;  %v2797_v3 = vld [vmem:[#allocation3 + $0x48] sm:$0xff] }
 0x2ad   : > { %2765 = vst.msk [vmem:[#allocation3 + $0x68] sm:$0xff] %vm14692_vm8, %v2670_v2  ;;  %8883 = vmatmul.mubr.msk.f32.gmra.mrb[8].mxu0 %vm14691_vm9, %v2797_v3  ;;  %v2676_v4 = vpop.permute.xlu0 %2675  ;;  %v2800_v5 = vld [vmem:[#allocation3 + $0x60] sm:$0xff] }
 0x2ae   : > { %8885 = vmatprep.mubr.msk.f32.mxu0 %vm14691_vm9, %v2798_v1  ;;  %2768 = vst.msk [vmem:[#allocation3 + $0x80] sm:$0xff] %vm14692_vm8, %v2676_v4 }
 0x2b0   : > { %v2674_v6 = vpop.permute.xlu1 %2673  ;;  %v2799_v7 = vld [vmem:[#allocation3 + $0x58] sm:$0xff] }
 0x2b1   : > { %2767 = vst.msk [vmem:[#allocation3 + $0x78] sm:$0xff] %vm14692_vm8, %v2674_v6  ;;  %8886 = vmatmul.mubr.msk.f32.gmra.mrb[10].mxu0 %vm14691_vm9, %v2799_v7  ;;  %v2680_v8 = vpop.permute.xlu0 %2679  ;;  %v2802_v9 = vld [vmem:[#allocation3 + $0x70] sm:$0xff] }
 0x2b2   : > { %8888 = vmatprep.mubr.msk.f32.mxu0 %vm14691_vm9, %v2800_v5  ;;  %2770 = vst.msk [vmem:[#allocation3 + $0x90] sm:$0xff] %vm14692_vm8, %v2680_v8 }
 0x2b4   : > { %v2678_v10 = vpop.permute.xlu1 %2677  ;;  %v2801_v12 = vld [vmem:[#allocation3 + $0x68] sm:$0xff] }
 0x2b5   : > { %2769 = vst.msk [vmem:[#allocation3 + $0x88] sm:$0xff] %vm14692_vm8, %v2678_v10  ;;  %8889 = vmatmul.mubr.msk.f32.gmra.mrb[12].mxu0 %vm14691_vm9, %v2801_v12  ;;  %v2684_v13 = vpop.permute.xlu0 %2683  ;;  %v2804_v14 = vld [vmem:[#allocation3 + $0x80] sm:$0xff] }
 0x2b6   : > { %8891 = vmatprep.mubr.msk.f32.mxu0 %vm14691_vm9, %v2802_v9  ;;  %2772 = vst.msk [vmem:[#allocation3 + $0xa0] sm:$0xff] %vm14692_vm8, %v2684_v13 }
 0x2b8   : > { %v2682_v16 = vpop.permute.xlu1 %2681  ;;  %v2803_v18 = vld [vmem:[#allocation3 + $0x78] sm:$0xff] }
 0x2b9   : > { %2771 = vst.msk [vmem:[#allocation3 + $0x98] sm:$0xff] %vm14692_vm8, %v2682_v16  ;;  %8892 = vmatmul.mubr.msk.f32.gmra.mrb[14].mxu0 %vm14691_vm9, %v2803_v18  ;;  %v2688_v20 = vpop.permute.xlu0 %2687  ;;  %v2806_v22 = vld [vmem:[#allocation3 + $0x90] sm:$0xff] }
 0x2ba   : > { %8894 = vmatprep.mubr.msk.f32.mxu0 %vm14691_vm9, %v2804_v14  ;;  %2774 = vst.msk [vmem:[#allocation3 + $0xb0] sm:$0xff] %vm14692_vm8, %v2688_v20  ;;  %8897 = vmatprep.mubr.msk.f32.mxu1 %vm14691_vm9, %v2806_v22 }
 0x2bc   : > { %v2686_v24 = vpop.permute.xlu1 %2685  ;;  %v2805_v26 = vld [vmem:[#allocation3 + $0x88] sm:$0xff] }
 0x2bd   : > { %2773 = vst.msk [vmem:[#allocation3 + $0xa8] sm:$0xff] %vm14692_vm8, %v2686_v24  ;;  %8895 = vmatmul.mubr.msk.f32.gmra.mrb[16].mxu0 %vm14691_vm9, %v2805_v26  ;;  %v2692_v28 = vpop.permute.xlu0 %2691  ;;  %v2808_v11 = vld [vmem:[#allocation3 + $0xa0] sm:$0xff] }
 0x2be   : > { %2776 = vst.msk [vmem:[#allocation3 + $0xc0] sm:$0xff] %vm14692_vm8, %v2692_v28 }
 0x2c0   : > { %v2690_v30 = vpop.permute.xlu1 %2689  ;;  %v2807_v15 = vld [vmem:[#allocation3 + $0x98] sm:$0xff] }
 0x2c1   : > { %2775 = vst.msk [vmem:[#allocation3 + $0xb8] sm:$0xff] %vm14692_vm8, %v2690_v30  ;;  %8898 = vmatmul.mubr.msk.f32.vlgmr.msra.gmra.mrb[0].mxu1 %vm14691_vm9, %v2807_v15  ;;  %v2696_v17 = vpop.permute.xlu0 %2695  ;;  %v2810_v19 = vld [vmem:[#allocation3 + $0xb0] sm:$0xff] }
 0x2c2   : > { %8900 = vmatprep.mubr.msk.f32.mxu1 %vm14691_vm9, %v2808_v11  ;;  %2778 = vst.msk [vmem:[#allocation3 + $0xd0] sm:$0xff] %vm14692_vm8, %v2696_v17 }
 0x2c4   : > { %v2694_v21 = vpop.permute.xlu1 %2693  ;;  %v2809_v23 = vld [vmem:[#allocation3 + $0xa8] sm:$0xff] }
 0x2c5   : > { %2777 = vst.msk [vmem:[#allocation3 + $0xc8] sm:$0xff] %vm14692_vm8, %v2694_v21  ;;  %8901 = vmatmul.mubr.msk.f32.gmra.mrb[2].mxu1 %vm14691_vm9, %v2809_v23  ;;  %v2700_v25 = vpop.permute.xlu0 %2699  ;;  %v2812_v27 = vld [vmem:[#allocation3 + $0xc0] sm:$0xff] }
 0x2c6   : > { %8903 = vmatprep.mubr.msk.f32.mxu1 %vm14691_vm9, %v2810_v19  ;;  %2780 = vst.msk [vmem:[#allocation3 + $0xe0] sm:$0xff] %vm14692_vm8, %v2700_v25 }
 0x2c8   : > { %v2698_v29 = vpop.permute.xlu1 %2697  ;;  %v2811_v31 = vld [vmem:[#allocation3 + $0xb8] sm:$0xff] }
 0x2c9   : > { %2779 = vst.msk [vmem:[#allocation3 + $0xd8] sm:$0xff] %vm14692_vm8, %v2698_v29  ;;  %8904 = vmatmul.mubr.msk.f32.gmra.mrb[4].mxu1 %vm14691_vm9, %v2811_v31  ;;  %v2704_v32 = vpop.permute.xlu0 %2703  ;;  %v2814_v33 = vld [vmem:[#allocation3 + $0xd0] sm:$0xff] }
 0x2ca   : > { %8906 = vmatprep.mubr.msk.f32.mxu1 %vm14691_vm9, %v2812_v27  ;;  %2782 = vst.msk [vmem:[#allocation3 + $0xf0] sm:$0xff] %vm14692_vm8, %v2704_v32 }
 0x2cc   : > { %v2702_v34 = vpop.permute.xlu1 %2701  ;;  %v2813_v35 = vld [vmem:[#allocation3 + $0xc8] sm:$0xff] }
 0x2cd   : > { %2781 = vst.msk [vmem:[#allocation3 + $0xe8] sm:$0xff] %vm14692_vm8, %v2702_v34  ;;  %8907 = vmatmul.mubr.msk.f32.gmra.mrb[6].mxu1 %vm14691_vm9, %v2813_v35  ;;  %v2708_v36 = vpop.permute.xlu0 %2707  ;;  %v2816_v37 = vld [vmem:[#allocation3 + $0xe0] sm:$0xff] }
 0x2ce   : > { %8909 = vmatprep.mubr.msk.f32.mxu1 %vm14691_vm9, %v2814_v33  ;;  %2784 = vst.msk [vmem:[#allocation3 + $0x100] sm:$0xff] %vm14692_vm8, %v2708_v36 }
 0x2d0   : > { %v2706_v38 = vpop.permute.xlu1 %2705  ;;  %v2815_v39 = vld [vmem:[#allocation3 + $0xd8] sm:$0xff] }
 0x2d1   : > { %2783 = vst.msk [vmem:[#allocation3 + $0xf8] sm:$0xff] %vm14692_vm8, %v2706_v38  ;;  %8910 = vmatmul.mubr.msk.f32.gmra.mrb[8].mxu1 %vm14691_vm9, %v2815_v39  ;;  %v2712_v40 = vpop.permute.xlu0 %2711  ;;  %v2818_v41 = vld [vmem:[#allocation3 + $0xf0] sm:$0xff] }
 0x2d2   : > { %8912 = vmatprep.mubr.msk.f32.mxu1 %vm14691_vm9, %v2816_v37  ;;  %2786 = vst.msk [vmem:[#allocation3 + $0x110] sm:$0xff] %vm14692_vm8, %v2712_v40 }
 0x2d4   : > { %v2710_v42 = vpop.permute.xlu1 %2709  ;;  %v2817_v43 = vld [vmem:[#allocation3 + $0xe8] sm:$0xff] }
 0x2d5   : > { %2785 = vst.msk [vmem:[#allocation3 + $0x108] sm:$0xff] %vm14692_vm8, %v2710_v42  ;;  %8913 = vmatmul.mubr.msk.f32.gmra.mrb[10].mxu1 %vm14691_vm9, %v2817_v43  ;;  %v2820_v44 = vld [vmem:[#allocation3 + $0x100] sm:$0xff] }
 0x2d6   : > { %8915 = vmatprep.mubr.msk.f32.mxu1 %vm14691_vm9, %v2818_v41 }
 0x2d8   : > { %v2714_v45 = vpop.permute.xlu1 %2713  ;;  %v2819_v46 = vld [vmem:[#allocation3 + $0xf8] sm:$0xff] }
 0x2d9   : > { %2787 = vst.msk [vmem:[#allocation3 + $0x118] sm:$0xff] %vm14692_vm8, %v2714_v45  ;;  %8916 = vmatmul.mubr.msk.f32.gmra.mrb[12].mxu1 %vm14691_vm9, %v2819_v46  ;;  %v2822_v47 = vld [vmem:[#allocation3 + $0x110] sm:$0xff] }
 0x2da   : > { %8918 = vmatprep.mubr.msk.f32.mxu1 %vm14691_vm9, %v2820_v44 }
 0x2dc   : > { %v2821_v48 = vld [vmem:[#allocation3 + $0x108] sm:$0xff] }
 0x2dd   : > { %8919 = vmatmul.mubr.msk.f32.gmra.mrb[14].mxu1 %vm14691_vm9, %v2821_v48 }
 0x2de   : > { %8921 = vmatprep.mubr.msk.f32.mxu1 %vm14691_vm9, %v2822_v47 }
 0x2e0   : > { %v2823_v49 = vld [vmem:[#allocation3 + $0x118] sm:$0xff] }
 0x2e1   : > { %8922 = vmatmul.mubr.msk.f32.gmra.mrb[16].mxu1 %vm14691_vm9, %v2823_v49 }
 0x370   : > { %v8872_v51 = vpop.f32.mrb[0].mxu0 }
 0x371   : > { %v10349_v52 = vadd.f32 %v8872_v51, %v10346_v50  ;;  %v3015_v53 = vpop.f32.mrb[1].mxu0 }
 0x372   : > { %v10352_v54 = vadd.f32 %v10346_v50, %v3015_v53 }
 0x373   : > { %v14683_v55 = vmax.f32 %v10349_v52, 0.0 }
 0x374   : > { %v14682_v56 = vmax.f32 %v10352_v54, 0.0  ;;  %v8875_v57 = vpop.f32.mrb[2].mxu0 }
 0x375   : > { %v10357_v58 = vadd.f32 %v8875_v57, %v10346_v50  ;;  %3268 = vrot.lane.b32.xlu1 %v14683_v55, %s9234_s12  ;;  %v3025_v59 = vpop.f32.mrb[3].mxu0 }
 0x376   : > { %v10363_v60 = vadd.f32 %v10346_v50, %v3025_v59  ;;  %3266 = vrot.lane.b32.xlu0 %v14682_v56, %s9234_s12 }
 0x377   : > { %v14681_v61 = vmax.f32 %v10357_v58, 0.0 }
 0x378   : > { %v14680_v62 = vmax.f32 %v10363_v60, 0.0  ;;  %v8878_v63 = vpop.f32.mrb[4].mxu0 }
 0x379   : > { %v10371_v0 = vadd.f32 %v8878_v63, %v10346_v50  ;;  %3272 = vrot.lane.b32.xlu1 %v14681_v61, %s9234_s12  ;;  %v3035_v1 = vpop.f32.mrb[5].mxu0 }
 0x37a   : > { %v10377_v2 = vadd.f32 %v10346_v50, %v3035_v1  ;;  %3270 = vrot.lane.b32.xlu0 %v14680_v62, %s9234_s12 }
 0x37b   : > { %v14679_v3 = vmax.f32 %v10371_v0, 0.0 }
 0x37c   : > { %v14677_v4 = vmax.f32 %v10377_v2, 0.0  ;;  %v8881_v5 = vpop.f32.mrb[6].mxu0 }
 0x37d   : > { %v10385_v6 = vadd.f32 %v8881_v5, %v10346_v50  ;;  %3276 = vrot.lane.b32.xlu1 %v14679_v3, %s9234_s12  ;;  %v3045_v7 = vpop.f32.mrb[7].mxu0 }
 0x37e   : > { %v10391_v8 = vadd.f32 %v10346_v50, %v3045_v7  ;;  %3274 = vrot.lane.b32.xlu0 %v14677_v4, %s9234_s12 }
 0x37f   : > { %v14676_v9 = vmax.f32 %v10385_v6, 0.0 }
 0x380   : > { %14853 = vst [vmem:[#allocation4_spill] sm:$0xff] %v10391_v8  ;;  %v14674_v10 = vmax.f32 %v10391_v8, 0.0  ;;  %v8884_v12 = vpop.f32.mrb[8].mxu0 }
 0x381   : > { %v10399_v13 = vadd.f32 %v8884_v12, %v10346_v50  ;;  %3280 = vrot.lane.b32.xlu1 %v14676_v9, %s9234_s12  ;;  %v3055_v14 = vpop.f32.mrb[9].mxu0 }
 0x382   : > { %v10405_v16 = vadd.f32 %v10346_v50, %v3055_v14  ;;  %3278 = vrot.lane.b32.xlu0 %v14674_v10, %s9234_s12 }
 0x383   : > { %14854 = vst [vmem:[#allocation5_spill] sm:$0xff] %v10399_v13  ;;  %v14673_v18 = vmax.f32 %v10399_v13, 0.0 }
 0x384   : > { %14855 = vst [vmem:[#allocation6_spill] sm:$0xff] %v10405_v16  ;;  %v14672_v20 = vmax.f32 %v10405_v16, 0.0  ;;  %v8887_v22 = vpop.f32.mrb[10].mxu0 }
 0x385   : > { %v10413_v24 = vadd.f32 %v8887_v22, %v10346_v50  ;;  %3284 = vrot.lane.b32.xlu1 %v14673_v18, %s9234_s12  ;;  %v3065_v26 = vpop.f32.mrb[11].mxu0  ;;  %v331_v22 = vlaneseq }
 0x386   : > { %v10419_v28 = vadd.f32 %v10346_v50, %v3065_v26  ;;  %3282 = vrot.lane.b32.xlu0 %v14672_v20, %s9234_s12  ;;  %v3627_v20 = vld [vmem:[#allocation2 + $0x9] sm:$0xff] }
 0x387   : > { %14856 = vst [vmem:[#allocation7_spill] sm:$0xff] %v10413_v24  ;;  %v14670_v11 = vmax.f32 %v10413_v24, 0.0 }
 0x388   : > { %14857 = vst [vmem:[#allocation8_spill] sm:$0xff] %v10419_v28  ;;  %v14669_v30 = vmax.f32 %v10419_v28, 0.0  ;;  %v8890_v15 = vpop.f32.mrb[12].mxu0 }
 0x389   : > { %v10427_v17 = vadd.f32 %v8890_v15, %v10346_v50  ;;  %3288 = vrot.lane.b32.xlu1 %v14670_v11, %s9234_s12  ;;  %v3075_v19 = vpop.f32.mrb[13].mxu0 }
 0x38a   : > { %v10433_v21 = vadd.f32 %v10346_v50, %v3075_v19  ;;  %3286 = vrot.lane.b32.xlu0 %v14669_v30, %s9234_s12 }
 0x38b   : > { %14858 = vst [vmem:[#allocation9_spill] sm:$0xff] %v10427_v17  ;;  %v14667_v23 = vmax.f32 %v10427_v17, 0.0 }
 0x38c   : > { %14859 = vst [vmem:[#allocation10_spill] sm:$0xff] %v10433_v21  ;;  %v14666_v25 = vmax.f32 %v10433_v21, 0.0  ;;  %v8893_v27 = vpop.f32.mrb[14].mxu0 }
 0x38d   : > { %v10441_v29 = vadd.f32 %v8893_v27, %v10346_v50  ;;  %3292 = vrot.lane.b32.xlu1 %v14667_v23, %s9234_s12  ;;  %v3085_v31 = vpop.f32.mrb[15].mxu0 }
 0x38e   : > { %v10447_v32 = vadd.f32 %v10346_v50, %v3085_v31  ;;  %3290 = vrot.lane.b32.xlu0 %v14666_v25, %s9234_s12 }
 0x38f   : > { %14860 = vst [vmem:[#allocation11_spill] sm:$0xff] %v10441_v29  ;;  %v14665_v33 = vmax.f32 %v10441_v29, 0.0 }
 0x390   : > { %14861 = vst [vmem:[#allocation12_spill] sm:$0xff] %v10447_v32  ;;  %v14663_v34 = vmax.f32 %v10447_v32, 0.0  ;;  %v8896_v35 = vpop.f32.mrb[16].mxu0 }
 0x391   : > { %v10455_v36 = vadd.f32 %v8896_v35, %v10346_v50  ;;  %3296 = vrot.lane.b32.xlu1 %v14665_v33, %s9234_s12  ;;  %v3095_v37 = vpop.f32.mrb[17].mxu0 }
 0x392   : > { %v10461_v38 = vadd.f32 %v10346_v50, %v3095_v37  ;;  %3294 = vrot.lane.b32.xlu0 %v14663_v34, %s9234_s12  ;;  %v10524_v37 = vshrl.u32 %v331_v22, 7 }
 0x393   : > { %14862 = vst [vmem:[#allocation13_spill] sm:$0xff] %v10455_v36  ;;  %v14662_v39 = vmax.f32 %v10455_v36, 0.0 }
 0x394   : > { %14863 = vst [vmem:[#allocation14_spill] sm:$0xff] %v10461_v38  ;;  %v14660_v40 = vmax.f32 %v10461_v38, 0.0  ;;  %v8899_v41 = vpop.f32.mrb[0].mxu1  ;;  %v10679_v3 = vadd.s32 80, %v10524_v37  ;;  %v10686_v56 = vadd.s32 104, %v10524_v37 }
 0x395   : > { %v10469_v42 = vadd.f32 %v8899_v41, %v10346_v50  ;;  %v3105_v43 = vpop.f32.mrb[1].mxu1  ;;  %3300 = vrot.lane.b32.xlu1 %v14662_v39, %s9234_s12  ;;  %v337_v39 = vadd.s32 40, %v10524_v37 }
 0x396   : > { %v10475_v44 = vadd.f32 %v10346_v50, %v3105_v43  ;;  %3298 = vrot.lane.b32.xlu0 %v14660_v40, %s9234_s12 }
 0x397   : > { %14864 = vst [vmem:[#allocation15_spill] sm:$0xff] %v10469_v42  ;;  %v14659_v45 = vmax.f32 %v10469_v42, 0.0 }
 0x398   : > { %14865 = vst [vmem:[#allocation16_spill] sm:$0xff] %v10475_v44  ;;  %v14656_v46 = vmax.f32 %v10475_v44, 0.0  ;;  %v8902_v47 = vpop.f32.mrb[2].mxu1 }
 0x399   : > { %v10483_v48 = vadd.f32 %v8902_v47, %v10346_v50  ;;  %v3115_v49 = vpop.f32.mrb[3].mxu1  ;;  %3304 = vrot.lane.b32.xlu1 %v14659_v45, %s9234_s12 }
 0x39a   : > { %v10489_v51 = vadd.f32 %v10346_v50, %v3115_v49  ;;  %3302 = vrot.lane.b32.xlu0 %v14656_v46, %s9234_s12 }
 0x39b   : > { %14866 = vst [vmem:[#allocation17_spill] sm:$0xff] %v10483_v48  ;;  %v14655_v53 = vmax.f32 %v10483_v48, 0.0 }
 0x39c   : > { %14867 = vst [vmem:[#allocation18_spill] sm:$0xff] %v10489_v51  ;;  %v14652_v57 = vmax.f32 %v10489_v51, 0.0  ;;  %v8905_v59 = vpop.f32.mrb[4].mxu1 }
 0x39d   : > { %v10497_v63 = vadd.f32 %v8905_v59, %v10346_v50  ;;  %v3125_v1 = vpop.f32.mrb[5].mxu1  ;;  %3308 = vrot.lane.b32.xlu1 %v14655_v53, %s9234_s12 }
 0x39e   : > { %v10503_v5 = vadd.f32 %v10346_v50, %v3125_v1  ;;  %3306 = vrot.lane.b32.xlu0 %v14652_v57, %s9234_s12 }
 0x39f   : > { %14868 = vst [vmem:[#allocation19_spill] sm:$0xff] %v10497_v63  ;;  %v14651_v7 = vmax.f32 %v10497_v63, 0.0 }
 0x3a0   : > { %14869 = vst [vmem:[#allocation20_spill] sm:$0xff] %v10503_v5  ;;  %v14650_v12 = vmax.f32 %v10503_v5, 0.0  ;;  %v8908_v14 = vpop.f32.mrb[6].mxu1 }
 0x3a1   : > { %v10511_v26 = vadd.f32 %v8908_v14, %v10346_v50  ;;  %v3135_v15 = vpop.f32.mrb[7].mxu1  ;;  %3312 = vrot.lane.b32.xlu1 %v14651_v7, %s9234_s12  ;;  %v333_v14 = vadd.s32 8, %v10524_v37 }
 0x3a2   : > { %v10517_v19 = vadd.f32 %v10346_v50, %v3135_v15  ;;  %3310 = vrot.lane.b32.xlu0 %v14650_v12, %s9234_s12 }
 0x3a3   : > { %14870 = vst [vmem:[#allocation21_spill] sm:$0xff] %v10511_v26  ;;  %v14649_v27 = vmax.f32 %v10511_v26, 0.0 }
 0x3a4   : > { %14871 = vst [vmem:[#allocation22_spill] sm:$0xff] %v10517_v19  ;;  %v14648_v31 = vmax.f32 %v10517_v19, 0.0  ;;  %v8911_v35 = vpop.f32.mrb[8].mxu1 }
 0x3a5   : > { %v10527_v41 = vadd.f32 %v8911_v35, %v10346_v50  ;;  %v3145_v43 = vpop.f32.mrb[9].mxu1  ;;  %3316 = vrot.lane.b32.xlu1 %v14649_v27, %s9234_s12 }
 0x3a6   : > { %v10533_v47 = vadd.f32 %v10346_v50, %v3145_v43  ;;  %3314 = vrot.lane.b32.xlu0 %v14648_v31, %s9234_s12 }
 0x3a7   : > { %14872 = vst [vmem:[#allocation23_spill] sm:$0xff] %v10527_v41  ;;  %v14654_v49 = vmax.f32 %v10527_v41, 0.0 }
 0x3a8   : > { %14873 = vst [vmem:[#allocation24_spill] sm:$0xff] %v10533_v47  ;;  %v14653_v59 = vmax.f32 %v10533_v47, 0.0  ;;  %v8914_v1 = vpop.f32.mrb[10].mxu1 }
 0x3a9   : > { %v10542_v22 = vadd.f32 %v8914_v1, %v10346_v50  ;;  %v3155_v15 = vpop.f32.mrb[11].mxu1  ;;  %3320 = vrot.lane.b32.xlu1 %v14654_v49, %s9234_s12  ;;  %v10555_v12 = vmul.u32.u64.low 3817748708, %v333_v14  ;;  %v10556_v1 = vmul.u32.u64.high 3817748708, %v333_v14, %v10555_v12 }
 0x3aa   : > { %v10548_v35 = vadd.f32 %v10346_v50, %v3155_v15  ;;  %3318 = vrot.lane.b32.xlu0 %v14653_v59, %s9234_s12  ;;  %v10571_v59 = vmul.u32.u64.low 3817748708, %v10524_v37  ;;  %v10572_v49 = vmul.u32.u64.high 3817748708, %v10524_v37, %v10571_v59 }
 0x3ab   : > { %14874 = vst [vmem:[#allocation25_spill] sm:$0xff] %v10542_v22  ;;  %v14657_v43 = vmax.f32 %v10542_v22, 0.0  ;;  %v10774_v22 = vadd.s32 120, %v10524_v37 }
 0x3ac   : > { %14875 = vst [vmem:[#allocation26_spill] sm:$0xff] %v10548_v35  ;;  %v14658_v31 = vmax.f32 %v10548_v35, 0.0  ;;  %v8917_v27 = vpop.f32.mrb[12].mxu1  ;;  %v10737_v35 = vadd.s32 96, %v10524_v37 }
 0x3ad   : > { %v10559_v7 = vadd.f32 %v8917_v27, %v10346_v50  ;;  %v3165_v57 = vpop.f32.mrb[13].mxu1  ;;  %3324 = vrot.lane.b32.xlu1 %v14657_v43, %s9234_s12  ;;  %v10821_v5 = vmul.u32.u64.low 3817748708, %v10774_v22  ;;  %v10822_v63 = vmul.u32.u64.high 3817748708, %v10774_v22, %v10821_v5 }
 0x3ae   : > { %v10565_v15 = vadd.f32 %v10346_v50, %v3165_v57  ;;  %3322 = vrot.lane.b32.xlu0 %v14658_v31, %s9234_s12  ;;  %v10583_v57 = vadd.s32 24, %v10524_v37 }
 0x3af   : > { %14876 = vst [vmem:[#allocation27_spill] sm:$0xff] %v10559_v7  ;;  %v14661_v12 = vmax.f32 %v10559_v7, 0.0 }
 0x3b0   : > { %14877 = vst [vmem:[#allocation28_spill] sm:$0xff] %v10565_v15  ;;  %v14664_v27 = vmax.f32 %v10565_v15, 0.0  ;;  %v8920_v53 = vpop.f32.mrb[14].mxu1 }
 0x3b1   : > { %v10577_v46 = vadd.f32 %v8920_v53, %v10346_v50  ;;  %v3175_v43 = vpop.f32.mrb[15].mxu1  ;;  %3328 = vrot.lane.b32.xlu1 %v14661_v12, %s9234_s12  ;;  %v10593_v53 = vadd.s32 16, %v10524_v37  ;;  %v385_v12 = vshrl.u32 %v10556_v1, 4  ;;  %v374_v1 = vshrl.u32 %v10572_v49, 4 }
 0x3b2   : > { %v10586_v31 = vadd.f32 %v10346_v50, %v3175_v43  ;;  %3326 = vrot.lane.b32.xlu0 %v14664_v27, %s9234_s12  ;;  %v10605_v27 = vmul.u32.u64.low 3817748708, %v10583_v57  ;;  %v10606_v33 = vmul.u32.u64.high 3817748708, %v10583_v57, %v10605_v27  ;;  %v10631_v49 = vadd.s32 56, %v10524_v37 }
 0x3b3   : > { %14878 = vst [vmem:[#allocation29_spill] sm:$0xff] %v10577_v46  ;;  %v14668_v59 = vmax.f32 %v10577_v46, 0.0  ;;  %v386_v11 = vmul.u32 18, %v385_v12  ;;  %v3626_v12 = vld [vmem:[#allocation2 + $0x1] sm:$0xff] }
 0x3b4   : > { %14879 = vst [vmem:[#allocation30_spill] sm:$0xff] %v10586_v31  ;;  %v14671_v45 = vmax.f32 %v10586_v31, 0.0  ;;  %v8923_v40 = vpop.f32.mrb[16].mxu1 }
 0x3b5   : > { %v10599_v34 = vadd.f32 %v8923_v40, %v10346_v50  ;;  %v3185_v43 = vpop.f32.mrb[17].mxu1  ;;  %3332 = vrot.lane.b32.xlu1 %v14668_v59, %s9234_s12  ;;  %v10616_v40 = vadd.s32 32, %v10524_v37  ;;  %v10620_v59 = vmul.u32.u64.low 3817748708, %v10593_v53  ;;  %v10621_v30 = vmul.u32.u64.high 3817748708, %v10593_v53, %v10620_v59 }
 0x3b6   : > { %v10609_v25 = vadd.f32 %v10346_v50, %v3185_v43  ;;  %3330 = vrot.lane.b32.xlu0 %v14671_v45, %s9234_s12  ;;  %v10624_v50 = vmul.u32.u64.low 3817748708, %v337_v39  ;;  %v10625_v43 = vmul.u32.u64.high 3817748708, %v337_v39, %v10624_v50  ;;  %v375_v45 = vmul.u32 18, %v374_v1 }
 0x3b7   : > { %14880 = vst [vmem:[#allocation31_spill] sm:$0xff] %v10599_v34  ;;  %v14675_v23 = vmax.f32 %v10599_v34, 0.0  ;;  %v10637_v59 = vmul.u32.u64.low 3817748708, %v10616_v40  ;;  %v10638_v18 = vmul.u32.u64.high 3817748708, %v10616_v40, %v10637_v59  ;;  %v10640_v10 = vsub.s32 %v333_v14, %v386_v11 }
 0x3b8   : > { %14881 = vst [vmem:[#allocation32_spill] sm:$0xff] %v10609_v25  ;;  %v14678_v27 = vmax.f32 %v10609_v25, 0.0  ;;  %v407_v50 = vshrl.u32 %v10606_v33, 4  ;;  %v10649_v4 = vsub.s32 %v10524_v37, %v375_v45  ;;  %v396_v1 = vshrl.u32 %v10621_v30, 4 }
 0x3b9   : > { %3336 = vrot.lane.b32.xlu1 %v14675_v23, %s9234_s12  ;;  %v10645_v23 = vmul.u32.u64.low 3817748708, %v10631_v49  ;;  %v10646_v9 = vmul.u32.u64.high 3817748708, %v10631_v49, %v10645_v23  ;;  %v10654_v59 = vadd.s32 48, %v10524_v37  ;;  %vm765_vm10 = vcmp.ne.s32.totalorder %v10640_v10, 0 }
 0x3ba   : > { %3334 = vrot.lane.b32.xlu0 %v14678_v27, %s9234_s12  ;;  %v429_v11 = vshrl.u32 %v10625_v43, 4  ;;  %vm801_vm11 = vcmp.lt.s32.totalorder %v10640_v10, 0  ;;  %v10663_v23 = vadd.s32 18, %v10640_v10  ;;  %v408_v33 = vmul.u32 18, %v407_v50 }
 0x3bb   : > { %v10666_v45 = vadd.s32 64, %v10524_v37  ;;  %vm764_vm12 = vcmp.ne.s32.totalorder %v10649_v4, 0  ;;  %vm800_vm13 = vcmp.lt.s32.totalorder %v10649_v4, 0  ;;  %v418_v30 = vshrl.u32 %v10638_v18, 4  ;;  %vm10700_vm14 = vmand %vm801_vm11, %vm765_vm10 }
 0x3bc   : > { %v10672_v14 = vadd.s32 88, %v10524_v37  ;;  %v397_v43 = vmul.u32 18, %v396_v1  ;;  %v430_v50 = vmul.u32 18, %v429_v11  ;;  %v10689_v18 = vadd.s32 18, %v10649_v4  ;;  %vm10715_vm15 = vmand %vm800_vm13, %vm764_vm12 }
 0x3bd   : > { %3700 = vrot.lane.b32.xlu1 %v3627_v20, %s9226_s25  ;;  %v10659_v20 = vadd.s32 72, %v10524_v37  ;;  %v451_v1 = vshrl.u32 %v10646_v9, 4  ;;  %v10693_v55 = vmul.u32.u64.low 3817748708, %v10666_v45  ;;  %v10694_v25 = vmul.u32.u64.high 3817748708, %v10666_v45, %v10693_v55 }
 0x3be   : > { %3698 = vrot.lane.b32.xlu0 %v3626_v12, %s9226_s25  ;;  %v10675_v12 = vmul.u32.u64.low 3817748708, %v10654_v59  ;;  %v10676_v27 = vmul.u32.u64.high 3817748708, %v10654_v59, %v10675_v12  ;;  %v10708_v34 = vmul.u32.u64.low 3817748708, %v10672_v14  ;;  %v10709_v31 = vmul.u32.u64.high 3817748708, %v10672_v14, %v10708_v34 }
 0x3bf   : > { %v10682_v62 = vmul.u32.u64.low 3817748708, %v10659_v20  ;;  %v10683_v61 = vmul.u32.u64.high 3817748708, %v10659_v20, %v10682_v62  ;;  %v419_v12 = vmul.u32 18, %v418_v30  ;;  %v10720_v9 = vsub.s32 %v10593_v53, %v397_v43 }
 0x3c0   : > { %v10705_v62 = vsub.s32 %v10583_v57, %v408_v33  ;;  %v10723_v46 = vmul.u32.u64.low 3817748708, %v10679_v3  ;;  %v10724_v57 = vmul.u32.u64.high 3817748708, %v10679_v3, %v10723_v46  ;;  %v10726_v33 = vsub.s32 %v337_v39, %v430_v50 }
 0x3c1   : > { %v10729_v30 = vmul.u32.u64.low 3817748708, %v10686_v56  ;;  %v10730_v34 = vmul.u32.u64.high 3817748708, %v10686_v56, %v10729_v30  ;;  %v452_v7 = vmul.u32 18, %v451_v1  ;;  %v10746_v39 = vsub.s32 %v10616_v40, %v419_v12 }
 0x3c2   : > { %vm767_vm10 = vcmp.ne.s32.totalorder %v10705_v62, 0  ;;  %vm803_vm11 = vcmp.lt.s32.totalorder %v10705_v62, 0  ;;  %v10749_v53 = vadd.s32 18, %v10705_v62  ;;  %vm766_vm12 = vcmp.ne.s32.totalorder %v10720_v9, 0 }
 0x3c3   : > { %vm802_vm13 = vcmp.lt.s32.totalorder %v10720_v9, 0  ;;  %v440_v43 = vshrl.u32 %v10676_v27, 4  ;;  %v10755_v50 = vadd.s32 18, %v10720_v9  ;;  %vm769_vm9 = vcmp.ne.s32.totalorder %v10726_v33, 0  ;;  %vm10785_vm5 = vmand %vm803_vm11, %vm767_vm10 }
 0x3c4   : > { %vm805_vm8 = vcmp.lt.s32.totalorder %v10726_v33, 0  ;;  %v473_v1 = vshrl.u32 %v10683_v61, 4  ;;  %v10761_v40 = vsub.s32 %v10631_v49, %v452_v7  ;;  %v462_v12 = vshrl.u32 %v10694_v25, 4  ;;  %vm10800_vm4 = vmand %vm802_vm13, %vm766_vm12 }
 0x3c5   : > { %v10765_v30 = vmul.u32.u64.low 3817748708, %v10737_v35  ;;  %v10766_v46 = vmul.u32.u64.high 3817748708, %v10737_v35, %v10765_v30  ;;  %v10769_v27 = vadd.s32 18, %v10726_v33  ;;  %vm768_vm7 = vcmp.ne.s32.totalorder %v10746_v39, 0  ;;  %vm10813_vm3 = vmand %vm805_vm8, %vm769_vm9 }
 0x3c6   : > { %v495_v15 = vshrl.u32 %v10709_v31, 4  ;;  %vm804_vm6 = vcmp.lt.s32.totalorder %v10746_v39, 0  ;;  %v441_v61 = vmul.u32 18, %v440_v43  ;;  %v484_v7 = vshrl.u32 %v10724_v57, 4 }
 0x3c7   : > { %v10779_v25 = vadd.s32 112, %v10524_v37  ;;  %v10790_v31 = vadd.s32 18, %v10746_v39  ;;  %v474_v30 = vmul.u32 18, %v473_v1  ;;  %v517_v47 = vshrl.u32 %v10730_v34, 4  ;;  %vm10828_vm12 = vmand %vm804_vm6, %vm768_vm7 }
 0x3c8   : > { %v10794_v43 = vadd.s32 136, %v10524_v37  ;;  %vm771_vm10 = vcmp.ne.s32.totalorder %v10761_v40, 0  ;;  %vm807_vm11 = vcmp.lt.s32.totalorder %v10761_v40, 0  ;;  %v463_v41 = vmul.u32 18, %v462_v12 }
 0x3c9   : > { %v10807_v1 = vadd.s32 128, %v10524_v37  ;;  %v10818_v19 = vadd.s32 18, %v10761_v40  ;;  %v496_v26 = vmul.u32 18, %v495_v15  ;;  %v10833_v51 = vsub.s32 %v10654_v59, %v441_v61  ;;  %vm10839_vm8 = vmand %vm807_vm11, %vm771_vm10 }
 0x3ca   : > { %v485_v48 = vmul.u32 18, %v484_v7  ;;  %v10836_v44 = vmul.u32.u64.low 3817748708, %v10779_v25  ;;  %v10837_v42 = vmul.u32.u64.high 3817748708, %v10779_v25, %v10836_v44  ;;  %v14894_v15 = vmov 0 }
 0x3cb   : > { %v14895_v15 = vsel %vm10839_vm8, 4294967295, %v14894_v15  ;;  %v10844_v5 = vsub.s32 %v10659_v20, %v474_v30  ;;  %v518_v38 = vmul.u32 18, %v517_v47  ;;  %v506_v59 = vshrl.u32 %v10766_v46, 4 }
 0x3cc   : > { %v10847_v36 = vmul.u32.u64.low 3817748708, %v10794_v43  ;;  %v10848_v32 = vmul.u32.u64.high 3817748708, %v10794_v43, %v10847_v36  ;;  %v10852_v61 = vmul.u32.u64.low 3817748708, %v10807_v1  ;;  %v10853_v7 = vmul.u32.u64.high 3817748708, %v10807_v1, %v10852_v61 }
 0x3cd   : > { %v10856_v44 = vadd.s32 152, %v10524_v37  ;;  %v10871_v46 = vsub.s32 %v10666_v45, %v463_v41  ;;  %vm770_vm6 = vcmp.ne.s32.totalorder %v10833_v51, 0  ;;  %v10883_v47 = vsub.s32 %v10672_v14, %v496_v26 }
 0x3ce   : > { %vm806_vm7 = vcmp.lt.s32.totalorder %v10833_v51, 0  ;;  %vm773_vm9 = vcmp.ne.s32.totalorder %v10844_v5, 0  ;;  %vm809_vm13 = vcmp.lt.s32.totalorder %v10844_v5, 0  ;;  %v10889_v41 = vsub.s32 %v10679_v3, %v485_v48 }
 0x3cf   : > { %v10892_v45 = vsub.s32 %v10686_v56, %v518_v38  ;;  %v507_v30 = vmul.u32 18, %v506_v59  ;;  %v10895_v61 = vmul.u32.u64.low 3817748708, %v10856_v44  ;;  %v10896_v36 = vmul.u32.u64.high 3817748708, %v10856_v44, %v10895_v61  ;;  %vm10906_vm2 = vmand %vm806_vm7, %vm770_vm6 }
 0x3d0   : > { %v10899_v26 = vadd.s32 18, %v10833_v51  ;;  %vm772_vm10 = vcmp.ne.s32.totalorder %v10871_v46, 0  ;;  %vm808_vm11 = vcmp.lt.s32.totalorder %v10871_v46, 0  ;;  %v539_v14 = vshrl.u32 %v10822_v63, 4  ;;  %vm10920_vm8 = vmand %vm809_vm13, %vm773_vm9 }
 0x3d1   : > { %v528_v56 = vshrl.u32 %v10837_v42, 4  ;;  %v10914_v38 = vadd.s32 144, %v10524_v37  ;;  %v10925_v63 = vadd.s32 18, %v10844_v5  ;;  %vm810_vm7 = vcmp.lt.s32.totalorder %v10889_v41, 0  ;;  %vm10930_vm0 = vmand %vm808_vm11, %vm772_vm10 }
 0x3d2   : > { %v561_v42 = vshrl.u32 %v10848_v32, 4  ;;  %vm777_vm1 = vcmp.ne.s32.totalorder %v10892_v45, 0  ;;  %vm813_vm9 = vcmp.lt.s32.totalorder %v10892_v45, 0  ;;  %v10937_v61 = vsub.s32 %v10737_v35, %v507_v30 }
 0x3d3   : > { %v550_v20 = vshrl.u32 %v10853_v7, 4  ;;  %v10941_v29 = vadd.s32 18, %v10871_v46  ;;  %vm14902_vm13 = vcmp.ne.s32.totalorder %v10883_v47, 0  ;;  %vm14903_vm6 = vcmp.lt.s32.totalorder %v10883_v47, 0 }
 0x3d4   : > { %vm10947_vm10 = vmand %vm14903_vm6, %vm14902_vm13  ;;  %v10952_v21 = vadd.s32 18, %v10883_v47  ;;  %v10955_v17 = vadd.s32 18, %v10889_v41  ;;  %v540_v35 = vmul.u32 18, %v539_v14  ;;  %v14906_v7 = vsel %vm10700_vm14, %v10663_v23, %v10640_v10 }
 0x3d5   : > { %vm10962_vm11 = vcmp.lt.s32.totalorder %v14906_v7, 16  ;;  %v14907_v30 = vmov 0  ;;  %vm14909_vm6 = vcmp.ne.s32.totalorder %v10889_v41, 0  ;;  %v10973_v24 = vadd.s32 18, %v10892_v45 }
 0x3d6   : > { %v14908_v30 = vsel %vm10962_vm11, 4294967295, %v14907_v30  ;;  %vm10968_vm13 = vmand %vm810_vm7, %vm14909_vm6  ;;  %v529_v16 = vmul.u32 18, %v528_v56  ;;  %v10976_v14 = vmul.u32.u64.low 3817748708, %v10914_v38  ;;  %v10977_v11 = vmul.u32.u64.high 3817748708, %v10914_v38, %v10976_v14 }
 0x3d7   : > { %v14912_v10 = vsel %vm10715_vm15, %v10689_v18, %v10649_v4  ;;  %v14913_v23 = vmov 0  ;;  %vm10996_vm7 = vmand %vm813_vm9, %vm777_vm1  ;;  %v14915_v56 = vmov 0  ;;  %v562_v55 = vmul.u32 18, %v561_v42  ;;  %v3555_v14 = vld [vmem:[#allocation2 + $0x8] sm:$0xff] }
 0x3d8   : > { %vm10984_vm14 = vcmp.lt.s32.totalorder %v14912_v10, 16  ;;  %v14916_v56 = vsel %vm10996_vm7, 4294967295, %v14915_v56  ;;  %v11001_v4 = vadd.s32 168, %v10524_v37  ;;  %v11004_v18 = vadd.s32 160, %v10524_v37  ;;  %v3554_v10 = vld [vmem:[#allocation2] sm:$0xff] }
 0x3d9   : > { %v14914_v23 = vsel %vm10984_vm14, 4294967295, %v14913_v23  ;;  %vm776_vm15 = vcmp.ne.s32.totalorder %v10937_v61, 0  ;;  %vm812_vm6 = vcmp.lt.s32.totalorder %v10937_v61, 0  ;;  %v551_v7 = vmul.u32 18, %v550_v20 }
 0x3da   : > { %v583_v13 = vshrl.u32 %v10896_v36, 4  ;;  %vm14917_vm1 = vcmask 64512   ;;  %v11024_v36 = vsub.s32 %v10774_v22, %v540_v35  ;;  %v11044_v35 = vadd.s32 18, %v10937_v61 }
 0x3db   : > { %3591 = vst.msk [vmem:[#allocation3 + $0x8] sm:$0xff] %vm14917_vm1, %v3555_v14  ;;  %vm14918_vm9 = vmmov %vm14917_vm1  ;;  %v14919_v14 = vsel %vm10785_vm5, %v10749_v53, %v10705_v62  ;;  %v11047_v49 = vsub.s32 %v10779_v25, %v529_v16  ;;  %v14922_v62 = vsel %vm10800_vm4, %v10755_v50, %v10720_v9  ;;  %v14923_v53 = vmov 0 }
 0x3dc   : > { %3590 = vst.msk [vmem:[#allocation3] sm:$0xff] %vm14918_vm9, %v3554_v10  ;;  %vm11031_vm1 = vcmp.lt.s32.totalorder %v14919_v14, 16  ;;  %v14920_v10 = vmov 0  ;;  %vm11054_vm5 = vcmp.lt.s32.totalorder %v14922_v62, 16  ;;  %vm11062_vm9 = vmand %vm812_vm6, %vm776_vm15  ;;  %v14926_v14 = vmov 0 }
 0x3dd   : > { %v14921_v10 = vsel %vm11031_vm1, 4294967295, %v14920_v10  ;;  %v14924_v53 = vsel %vm11054_vm5, 4294967295, %v14923_v53  ;;  %v14927_v14 = vsel %vm11062_vm9, 4294967295, %v14926_v14  ;;  %v11067_v16 = vsub.s32 %v10794_v43, %v562_v55 }
 0x3de   : > { %14925 = vst [vmem:[#allocation33_spill] sm:$0xff] %v14924_v53  ;;  %v11070_v25 = vmul.u32.u64.low 3817748708, %v11001_v4  ;;  %v11071_v57 = vmul.u32.u64.high 3817748708, %v11001_v4, %v11070_v25  ;;  %v11074_v9 = vadd.s32 184, %v10524_v37  ;;  %v11077_v50 = vsub.s32 %v10807_v1, %v551_v7 }
 0x3df   : > { %v584_v62 = vmul.u32 18, %v583_v13  ;;  %v11080_v22 = vmul.u32.u64.low 3817748708, %v11004_v18  ;;  %v11081_v8 = vmul.u32.u64.high 3817748708, %v11004_v18, %v11080_v22  ;;  %v11086_v43 = vadd.s32 18, %v11024_v36 }
 0x3e0   : > { %v11089_v55 = vadd.s32 176, %v10524_v37  ;;  %v14928_v13 = vsel %vm10813_vm3, %v10769_v27, %v10726_v33  ;;  %v14929_v1 = vmov 0  ;;  %v572_v22 = vshrl.u32 %v10977_v11, 4 }
 0x3e1   : > { %vm11096_vm6 = vcmp.lt.s32.totalorder %v14928_v13, 16  ;;  %v14931_v34 = vmax.f32 %v10349_v52, 0.0  ;;  %v14932_v33 = vsel %vm10828_vm12, %v10790_v31, %v10746_v39  ;;  %v14933_v27 = vmov 0 }
 0x3e2   : > { %v14930_v1 = vsel %vm11096_vm6, 4294967295, %v14929_v1  ;;  %vm11114_vm3 = vcmp.lt.s32.totalorder %v14932_v33, 16  ;;  %v11119_v13 = vadd.s32 18, %v11047_v49  ;;  %v14935_v52 = vmax.f32 %v10352_v54, 0.0 }
 0x3e3   : > { %v14934_v27 = vsel %vm11114_vm3, 4294967295, %v14933_v27  ;;  %v11130_v39 = vsub.s32 %v10856_v44, %v584_v62  ;;  %v11139_v33 = vadd.s32 200, %v10524_v37  ;;  %vm14936_vm12 = vcmask 64512  }
 0x3e4   : > { %vm14937_vm9 = vnez %v14895_v15  ;;  %v573_v62 = vmul.u32 18, %v572_v22  ;;  %vm14941_vm4 = vmmov %vm14936_vm12  ;;  %v11180_v3 = vadd.s32 192, %v10524_v37  ;;  %vm14952_vm7 = vcmp.lt.s32.totalorder %v11047_v49, 0 }
 0x3e5   : > { %v14938_v44 = vsel %vm14937_vm9, %v10818_v19, %v10761_v40  ;;  %v14943_v19 = vsel %vm10906_vm2, %v10899_v26, %v10833_v51  ;;  %v14944_v40 = vmov 0  ;;  %v14950_v51 = vmax.f32 %v10363_v60, 0.0 }
 0x3e6   : > { %vm11149_vm15 = vcmp.lt.s32.totalorder %v14938_v44, 16  ;;  %vm11165_vm9 = vcmp.lt.s32.totalorder %v14943_v19, 16  ;;  %vm14951_vm2 = vcmp.ne.s32.totalorder %v11047_v49, 0  ;;  %v11237_v48 = vadd.s32 18, %v11130_v39 }
 0x3e7   : > { %v3269_v25 = vpop.permute.xlu1 %3268  ;;  %v14945_v40 = vsel %vm11165_vm9, 4294967295, %v14944_v40  ;;  %vm11188_vm9 = vmand %vm14952_vm7, %vm14951_vm2  ;;  %vm14959_vm2 = vcmask 64512   ;;  %v14981_v32 = vmov 0 }
 0x3e8   : > { %v3375_v20 = vadd.f32 %v3269_v25, %v14931_v34  ;;  %v3267_v42 = vpop.permute.xlu0 %3266  ;;  %v11126_v25 = vadd.s32 18, %v11067_v16  ;;  %v11135_v12 = vmul.u32.u64.low 3817748708, %v11074_v9  ;;  %v11136_v34 = vmul.u32.u64.high 3817748708, %v11074_v9, %v11135_v12 }
 0x3e9   : > { %v3374_v11 = vadd.f32 %v3267_v42, %v14935_v52  ;;  %v11154_v52 = vmul.u32.u64.low 3817748708, %v11089_v55  ;;  %v11155_v12 = vmul.u32.u64.high 3817748708, %v11089_v55, %v11154_v52 }
 0x3ea   : > { %v3483_v31 = vsel %vm10962_vm11, %v3375_v20, 0.0  ;;  %v14939_v20 = vmov 0 }
 0x3eb   : > { %3519 = vst.msk [vmem:[#allocation2 + $0x1b] sm:$0xff] %vm14936_vm12, %v3483_v31  ;;  %v3482_v54 = vsel %vm10984_vm14, %v3374_v11, 0.0  ;;  %v3273_v42 = vpop.permute.xlu1 %3272  ;;  %v14940_v20 = vsel %vm11149_vm15, 4294967295, %v14939_v20  ;;  %v14942_v31 = vmax.f32 %v10357_v58, 0.0  ;;  %vm14946_vm12 = vcmp.ne.s32.totalorder %v11024_v36, 0 }
 0x3ec   : > { %3518 = vst.msk [vmem:[#allocation2 + $0x13] sm:$0xff] %vm14941_vm4, %v3482_v54  ;;  %v3271_v7 = vpop.permute.xlu0 %3270  ;;  %vm14947_vm14 = vcmp.lt.s32.totalorder %v11024_v36, 0  ;;  %v605_v58 = vshrl.u32 %v11071_v57, 4  ;;  %v11193_v54 = vadd.s32 18, %v11077_v50  ;;  %v594_v57 = vshrl.u32 %v11081_v8, 4 }
 0x3ed   : > { %v3377_v11 = vadd.f32 %v3273_v42, %v14942_v31  ;;  %vm11173_vm11 = vmand %vm14947_vm14, %vm14946_vm12  ;;  %v3376_v26 = vadd.f32 %v3271_v7, %v14950_v51  ;;  %vm783_vm14 = vcmp.ne.s32.totalorder %v11130_v39, 0  ;;  %vm14955_vm12 = vcmp.ne.s32.totalorder %v11067_v16, 0 }
 0x3ee   : > { %vm14956_vm4 = vcmp.lt.s32.totalorder %v11067_v16, 0  ;;  %v11209_v7 = vmul.u32.u64.low 3817748708, %v11139_v33  ;;  %v11210_v44 = vmul.u32.u64.high 3817748708, %v11139_v33, %v11209_v7  ;;  %v14960_v31 = vsel %vm10920_vm8, %v10925_v63, %v10844_v5 }
 0x3ef   : > { %v3485_v42 = vsel %vm11031_vm1, %v3377_v11, 0.0  ;;  %vm11203_vm15 = vmand %vm14956_vm4, %vm14955_vm12  ;;  %v3484_v8 = vsel %vm11054_vm5, %v3376_v26, 0.0  ;;  %v3277_v52 = vpop.permute.xlu1 %3276  ;;  %vm11220_vm4 = vcmp.lt.s32.totalorder %v14960_v31, 16  ;;  %v14961_v11 = vmov 0 }
 0x3f0   : > { %3521 = vst.msk [vmem:[#allocation2 + $0x2b] sm:$0xff] %vm14959_vm2, %v3485_v42  ;;  %v14962_v11 = vsel %vm11220_vm4, 4294967295, %v14961_v11  ;;  %vm14963_vm12 = vcmp.ne.s32.totalorder %v11077_v50, 0  ;;  %vm14964_vm2 = vcmp.lt.s32.totalorder %v11077_v50, 0  ;;  %v11240_v5 = vsub.s32 %v10914_v38, %v573_v62  ;;  %v3275_v42 = vpop.permute.xlu0 %3274 }
 0x3f1   : > { %vm11232_vm7 = vmand %vm14964_vm2, %vm14963_vm12  ;;  %vm14967_vm8 = vcmask 64512   ;;  %v14968_v63 = vmax.f32 %v10371_v0, 0.0  ;;  %v14969_v7 = vsel %vm10930_vm0, %v10941_v29, %v10871_v46  ;;  %v14970_v31 = vmov 0 }
 0x3f2   : > { %3520 = vst.msk [vmem:[#allocation2 + $0x23] sm:$0xff] %vm14967_vm8, %v3484_v8  ;;  %vm11250_vm12 = vcmp.lt.s32.totalorder %v14969_v7, 16  ;;  %v606_v19 = vmul.u32 18, %v605_v58  ;;  %v11255_v53 = vmul.u32.u64.low 3817748708, %v11180_v3  ;;  %v11256_v38 = vmul.u32.u64.high 3817748708, %v11180_v3, %v11255_v53 }
 0x3f3   : > { %v3379_v26 = vadd.f32 %v3277_v52, %v14968_v63  ;;  %v14971_v31 = vsel %vm11250_vm12, 4294967295, %v14970_v31  ;;  %v14972_v62 = vmax.f32 %v10377_v2, 0.0  ;;  %v922_v0 = vsel %vm11188_vm9, %v11119_v13, %v11047_v49  ;;  %v3628_v7 = vld [vmem:[#allocation2 + $0x11] sm:$0xff]  ;;  %v15022_v49 = vld [vmem:[#allocation8_spill] sm:$0xff] }
 0x3f4   : > { %v925_v29 = vsel %vm11203_vm15, %v11126_v25, %v11067_v16  ;;  %vm14973_vm0 = vcmp.lt.s32.totalorder %v11130_v39, 0  ;;  %v14974_v46 = vmov 0  ;;  %v595_v2 = vmul.u32 18, %v594_v57  ;;  %v3629_v57 = vld [vmem:[#allocation2 + $0x19] sm:$0xff]  ;;  %3702 = vrot.lane.b32.xlu0 %v3628_v7, %s9226_s25 }
 0x3f5   : > { %v3378_v8 = vadd.f32 %v3275_v42, %v14972_v62  ;;  %vm11272_vm2 = vmand %vm14973_vm0, %vm783_vm14  ;;  %v3487_v59 = vsel %vm11096_vm6, %v3379_v26, 0.0  ;;  %v924_v53 = vsel %vm11232_vm7, %v11193_v54, %v11077_v50  ;;  %v627_v58 = vshrl.u32 %v11136_v34, 4  ;;  %v3281_v42 = vpop.permute.xlu1 %3280  ;;  %3704 = vrot.lane.b32.xlu1 %v3629_v57, %s9226_s25  ;;  %v14983_v57 = vld [vmem:[#allocation4_spill] sm:$0xff] }
 0x3f6   : > { %v14975_v46 = vsel %vm11272_vm2, 4294967295, %v14974_v46  ;;  %v11284_v52 = vadd.s32 216, %v10524_v37  ;;  %3523 = vst.msk [vmem:[#allocation2 + $0x3b] sm:$0xff] %vm14967_vm8, %v3487_v59  ;;  %v14976_v26 = vsel %vm10947_vm10, %v10952_v21, %v10883_v47  ;;  %v14977_v62 = vmov 0  ;;  %v3279_v21 = vpop.permute.xlu0 %3278 }
 0x3f7   : > { %v3486_v63 = vsel %vm11114_vm3, %v3378_v8, 0.0  ;;  %vm11294_vm14 = vcmp.lt.s32.totalorder %v14976_v26, 16  ;;  %vm782_vm0 = vcmp.ne.s32.totalorder %v11240_v5, 0  ;;  %v616_v34 = vshrl.u32 %v11155_v12, 4 }
 0x3f8   : > { %v14978_v62 = vsel %vm11294_vm14, 4294967295, %v14977_v62  ;;  %3522 = vst.msk [vmem:[#allocation2 + $0x33] sm:$0xff] %vm14967_vm8, %v3486_v63  ;;  %v14979_v8 = vmax.f32 %v10385_v6, 0.0  ;;  %v14980_v47 = vsel %vm10968_vm13, %v10955_v17, %v10889_v41  ;;  %v11320_v12 = vsub.s32 %v11001_v4, %v606_v19  ;;  %v3557_v63 = vld [vmem:[#allocation2 + $0x18] sm:$0xff]  ;;  %vm14985_vm13 = vmmov %vm14967_vm8 }
 0x3f9   : > { %vm11311_vm10 = vcmp.lt.s32.totalorder %v14980_v47, 16  ;;  %v14984_v7 = vmax.f32 %v14983_v57, 0.0  ;;  %v11325_v26 = vadd.s32 18, %v11240_v5  ;;  %v11328_v17 = vsub.s32 %v11004_v18, %v595_v2  ;;  %3593 = vst.msk [vmem:[#allocation3 + $0x18] sm:$0xff] %vm14985_vm13, %v3557_v63  ;;  %vm14990_vm13 = vmmov %vm14967_vm8  ;;  %v3631_v47 = vld [vmem:[#allocation2 + $0x29] sm:$0xff]  ;;  %v3630_v63 = vld [vmem:[#allocation2 + $0x21] sm:$0xff] }
 0x3fa   : > { %v3381_v59 = vadd.f32 %v3281_v42, %v14979_v8  ;;  %v14982_v32 = vsel %vm11311_vm10, 4294967295, %v14981_v32  ;;  %v3556_v42 = vld [vmem:[#allocation2 + $0x10] sm:$0xff]  ;;  %v11331_v41 = vadd.s32 208, %v10524_v37  ;;  %vm14986_vm6 = vnez %v14940_v20  ;;  %3708 = vrot.lane.b32.xlu1 %v3631_v47, %s9226_s25  ;;  %3706 = vrot.lane.b32.xlu0 %v3630_v63, %s9226_s25  ;;  %v15003_v47 = vld [vmem:[#allocation6_spill] sm:$0xff] }
 0x3fb   : > { %v3380_v28 = vadd.f32 %v3279_v21, %v14984_v7  ;;  %3592 = vst.msk [vmem:[#allocation3 + $0x10] sm:$0xff] %vm14967_vm8, %v3556_v42  ;;  %vm14987_vm3 = vcmp.lt.s32.totalorder %v11240_v5, 0  ;;  %v628_v18 = vmul.u32 18, %v627_v58  ;;  %v649_v2 = vshrl.u32 %v11210_v44, 4 }
 0x3fc   : > { %v3489_v4 = vsel %vm14986_vm6, %v3381_v59, 0.0  ;;  %vm11341_vm5 = vmand %vm14987_vm3, %vm782_vm0  ;;  %v11347_v8 = vadd.s32 232, %v10524_v37  ;;  %vm14991_vm8 = vnez %v14945_v40  ;;  %v3285_v59 = vpop.permute.xlu1 %3284  ;;  %vm14992_vm6 = vnez %v14916_v56  ;;  %v3283_v56 = vpop.permute.xlu0 %3282 }
 0x3fd   : > { %3525 = vst.msk [vmem:[#allocation2 + $0x4b] sm:$0xff] %vm14990_vm13, %v3489_v4  ;;  %v3488_v21 = vsel %vm14991_vm8, %v3380_v28, 0.0  ;;  %v14993_v42 = vsel %vm14992_vm6, %v10973_v24, %v10892_v45  ;;  %v14994_v58 = vmov 0  ;;  %v617_v44 = vmul.u32 18, %v616_v34  ;;  %vm14996_vm0 = vmmov %vm14990_vm13  ;;  %v14997_v28 = vld [vmem:[#allocation5_spill] sm:$0xff] }
 0x3fe   : > { %vm11357_vm3 = vcmp.lt.s32.totalorder %v14993_v42, 16  ;;  %v11362_v57 = vmul.u32.u64.low 3817748708, %v11284_v52  ;;  %v11363_v7 = vmul.u32.u64.high 3817748708, %v11284_v52, %v11362_v57  ;;  %3524 = vst.msk [vmem:[#allocation2 + $0x43] sm:$0xff] %vm14996_vm0, %v3488_v21  ;;  %v14998_v4 = vmax.f32 %v14997_v28, 0.0  ;;  %v3559_v21 = vld [vmem:[#allocation2 + $0x28] sm:$0xff]  ;;  %vm15005_vm2 = vmmov %vm14996_vm0 }
 0x3ff   : > { %v14995_v58 = vsel %vm11357_vm3, 4294967295, %v14994_v58  ;;  %vm14999_vm6 = vnez %v14927_v14  ;;  %v15001_v45 = vmov 0  ;;  %v638_v34 = vshrl.u32 %v11256_v38, 4  ;;  %3595 = vst.msk [vmem:[#allocation3 + $0x28] sm:$0xff] %vm15005_vm2, %v3559_v21  ;;  %vm15006_vm8 = vmmov %vm14996_vm0  ;;  %v3561_v22 = vld [vmem:[#allocation2 + $0x38] sm:$0xff] }
 0x400   : > { %v3383_v6 = vadd.f32 %v3285_v59, %v14998_v4  ;;  %v15000_v24 = vsel %vm14999_vm6, %v11044_v35, %v10937_v61  ;;  %v3558_v59 = vld [vmem:[#allocation2 + $0x20] sm:$0xff]  ;;  %v15004_v63 = vmax.f32 %v15003_v47, 0.0  ;;  %v926_v61 = vsel %vm11341_vm5, %v11325_v26, %v11240_v5  ;;  %v3289_v4 = vpop.permute.xlu1 %3288 }
 0x401   : > { %vm11375_vm13 = vcmp.lt.s32.totalorder %v15000_v24, 16  ;;  %vm784_vm6 = vcmp.ne.s32.totalorder %v11328_v17, 0  ;;  %3594 = vst.msk [vmem:[#allocation3 + $0x20] sm:$0xff] %vm15006_vm8, %v3558_v59  ;;  %v11395_v14 = vadd.s32 18, %v11320_v12  ;;  %v650_v38 = vmul.u32 18, %v649_v2  ;;  %v3632_v24 = vld [vmem:[#allocation2 + $0x31] sm:$0xff] }
 0x402   : > { %v15002_v45 = vsel %vm11375_vm13, 4294967295, %v15001_v45  ;;  %v3382_v42 = vadd.f32 %v3283_v56, %v15004_v63  ;;  %v3491_v35 = vsel %vm11220_vm4, %v3383_v6, 0.0  ;;  %v11398_v57 = vadd.s32 224, %v10524_v37  ;;  %v3633_v56 = vld [vmem:[#allocation2 + $0x39] sm:$0xff]  ;;  %3710 = vrot.lane.b32.xlu0 %v3632_v24, %s9226_s25 }
 0x403   : > { %3527 = vst.msk [vmem:[#allocation2 + $0x5b] sm:$0xff] %vm14996_vm0, %v3491_v35  ;;  %v15007_v6 = vsel %vm11173_vm11, %v11086_v43, %v11024_v36  ;;  %vm15010_vm8 = vcmp.ne.s32.totalorder %v11320_v12, 0  ;;  %vm15011_vm1 = vcmp.lt.s32.totalorder %v11320_v12, 0  ;;  %v11421_v59 = vadd.s32 18, %v11328_v17  ;;  %v15015_v43 = vld [vmem:[#allocation7_spill] sm:$0xff]  ;;  %3712 = vrot.lane.b32.xlu1 %v3633_v56, %s9226_s25 }
 0x404   : > { %v3490_v28 = vsel %vm11250_vm12, %v3382_v42, 0.0  ;;  %vm11408_vm2 = vcmp.lt.s32.totalorder %v15007_v6, 16  ;;  %vm11416_vm0 = vmand %vm15011_vm1, %vm15010_vm8  ;;  %v11424_v15 = vsub.s32 %v11074_v9, %v628_v18  ;;  %v11427_v36 = vsub.s32 %v11089_v55, %v617_v44  ;;  %v3287_v42 = vpop.permute.xlu0 %3286 }
 0x405   : > { %vm15014_vm11 = vcmask 64512   ;;  %v15016_v47 = vmax.f32 %v15015_v43, 0.0  ;;  %vm11439_vm1 = vcmp.lt.s32.totalorder %v922_v0, 16  ;;  %vm15019_vm8 = vcmp.lt.s32.totalorder %v11328_v17, 0 }
 0x406   : > { %3526 = vst.msk [vmem:[#allocation2 + $0x53] sm:$0xff] %vm15014_vm11, %v3490_v28  ;;  %vm11447_vm11 = vmand %vm15019_vm8, %vm784_vm6  ;;  %v639_v18 = vmul.u32 18, %v638_v34  ;;  %v11452_v44 = vmul.u32.u64.low 3817748708, %v11331_v41  ;;  %v11453_v35 = vmul.u32.u64.high 3817748708, %v11331_v41, %v11452_v44  ;;  %v3560_v28 = vld [vmem:[#allocation2 + $0x30] sm:$0xff]  ;;  %v15023_v13 = vmax.f32 %v15022_v49, 0.0 }
 0x407   : > { %v3385_v63 = vadd.f32 %v3289_v4, %v15016_v47  ;;  %v11458_v4 = vmul.u32.u64.low 3817748708, %v11347_v8  ;;  %v11459_v56 = vmul.u32.u64.high 3817748708, %v11347_v8, %v11458_v4  ;;  %v11462_v24 = vadd.s32 248, %v10524_v37  ;;  %v3293_v44 = vpop.permute.xlu1 %3292  ;;  %v15030_v49 = vld [vmem:[#allocation9_spill] sm:$0xff] }
 0x408   : > { %v3384_v0 = vadd.f32 %v3287_v42, %v15023_v13  ;;  %vm15024_vm9 = vcmask 64512   ;;  %v929_v6 = vsel %vm11416_vm0, %v11395_v14, %v11320_v12  ;;  %v11473_v43 = vsub.s32 %v11139_v33, %v650_v38  ;;  %v3291_v16 = vpop.permute.xlu0 %3290  ;;  %v15034_v4 = vld [vmem:[#allocation10_spill] sm:$0xff]  ;;  %v15067_v12 = vld [vmem:[#allocation13_spill] sm:$0xff] }
 0x409   : > { %3597 = vst.msk [vmem:[#allocation3 + $0x38] sm:$0xff] %vm15024_vm9, %v3561_v22  ;;  %vm15025_vm6 = vmmov %vm15024_vm9  ;;  %v3493_v34 = vsel %vm11294_vm14, %v3385_v63, 0.0  ;;  %v11476_v47 = vadd.s32 240, %v10524_v37  ;;  %v3635_v22 = vld [vmem:[#allocation2 + $0x49] sm:$0xff]  ;;  %vm11486_vm9 = vcmp.lt.s32.totalorder %v925_v29, 16  ;;  %v15027_v63 = vmov 0 }
 0x40a   : > { %3596 = vst.msk [vmem:[#allocation3 + $0x30] sm:$0xff] %vm15025_vm6, %v3560_v28  ;;  %vm15026_vm8 = vmmov %vm15025_vm6  ;;  %v3492_v42 = vsel %vm11311_vm10, %v3384_v0, 0.0  ;;  %v3634_v28 = vld [vmem:[#allocation2 + $0x41] sm:$0xff]  ;;  %v15028_v63 = vsel %vm11486_vm9, 4294967295, %v15027_v63  ;;  %v928_v33 = vsel %vm11447_vm11, %v11421_v59, %v11328_v17  ;;  %v671_v38 = vshrl.u32 %v11363_v7, 4  ;;  %3716 = vrot.lane.b32.xlu1 %v3635_v22, %s9226_s25 }
 0x40b   : > { %3529 = vst.msk [vmem:[#allocation2 + $0x6b] sm:$0xff] %vm15026_vm8, %v3493_v34  ;;  %vm15029_vm8 = vmmov %vm15025_vm6  ;;  %v15031_v60 = vmax.f32 %v15030_v49, 0.0  ;;  %3714 = vrot.lane.b32.xlu0 %v3634_v28, %s9226_s25  ;;  %vm11506_vm15 = vcmp.lt.s32.totalorder %v924_v53, 16  ;;  %v15032_v25 = vmov 0  ;;  %v11513_v29 = vsub.s32 %v11180_v3, %v639_v18  ;;  %v3563_v7 = vld [vmem:[#allocation2 + $0x48] sm:$0xff]  ;;  %v3562_v0 = vld [vmem:[#allocation2 + $0x40] sm:$0xff] }
 0x40c   : > { %3528 = vst.msk [vmem:[#allocation2 + $0x63] sm:$0xff] %vm15029_vm8, %v3492_v42  ;;  %v15033_v25 = vsel %vm11506_vm15, 4294967295, %v15032_v25  ;;  %v15035_v34 = vmax.f32 %v15034_v4, 0.0  ;;  %v11519_v50 = vmul.u32.u64.low 3817748708, %v11398_v57  ;;  %v11520_v54 = vmul.u32.u64.high 3817748708, %v11398_v57, %v11519_v50  ;;  %vm15036_vm7 = vmmov %vm15025_vm6 }
 0x40d   : > { %v3387_v13 = vadd.f32 %v3293_v44, %v15031_v60  ;;  %3599 = vst.msk [vmem:[#allocation3 + $0x48] sm:$0xff] %vm15036_vm7, %v3563_v7  ;;  %vm15037_vm14 = vmmov %vm15025_vm6  ;;  %v11527_v3 = vadd.s32 18, %v11424_v15  ;;  %v11530_v53 = vadd.s32 18, %v11427_v36  ;;  %v3297_v44 = vpop.permute.xlu1 %3296  ;;  %v3637_v22 = vld [vmem:[#allocation2 + $0x59] sm:$0xff]  ;;  %v3636_v28 = vld [vmem:[#allocation2 + $0x51] sm:$0xff]  ;;  %v15041_v60 = vmov 0 }
 0x40e   : > { %v3386_v42 = vadd.f32 %v3291_v16, %v15035_v34  ;;  %3598 = vst.msk [vmem:[#allocation3 + $0x40] sm:$0xff] %vm15037_vm14, %v3562_v0  ;;  %vm15038_vm10 = vmmov %vm15025_vm6  ;;  %vm15039_vm14 = vnez %v14975_v46  ;;  %vm15043_vm6 = vcmp.ne.s32.totalorder %v11424_v15, 0  ;;  %vm15044_vm8 = vcmp.lt.s32.totalorder %v11424_v15, 0  ;;  %3720 = vrot.lane.b32.xlu1 %v3637_v22, %s9226_s25  ;;  %v3295_v0 = vpop.permute.xlu0 %3294  ;;  %v3565_v5 = vld [vmem:[#allocation2 + $0x58] sm:$0xff]  ;;  %v3564_v26 = vld [vmem:[#allocation2 + $0x50] sm:$0xff] }
 0x40f   : > { %v3495_v51 = vsel %vm11357_vm3, %v3387_v13, 0.0  ;;  %v15040_v49 = vsel %vm15039_vm14, %v11237_v48, %v11130_v39  ;;  %v11555_v16 = vadd.s32 18, %v11473_v43  ;;  %v672_v46 = vmul.u32 18, %v671_v38  ;;  %v15048_v39 = vld [vmem:[#allocation11_spill] sm:$0xff]  ;;  %3718 = vrot.lane.b32.xlu0 %v3636_v28, %s9226_s25 }
 0x410   : > { %3531 = vst.msk [vmem:[#allocation2 + $0x7b] sm:$0xff] %vm15038_vm10, %v3495_v51  ;;  %v3494_v18 = vsel %vm11375_vm13, %v3386_v42, 0.0  ;;  %vm11541_vm7 = vcmp.lt.s32.totalorder %v15040_v49, 16  ;;  %vm11549_vm10 = vmand %vm15044_vm8, %vm15043_vm6  ;;  %vm15047_vm3 = vcmask 64512   ;;  %v15049_v48 = vmax.f32 %v15048_v39, 0.0  ;;  %v15104_v38 = vld [vmem:[#allocation19_spill] sm:$0xff] }
 0x411   : > { %v15042_v60 = vsel %vm11541_vm7, 4294967295, %v15041_v60  ;;  %3530 = vst.msk [vmem:[#allocation2 + $0x73] sm:$0xff] %vm15047_vm3, %v3494_v18  ;;  %vm11567_vm6 = vcmp.lt.s32.totalorder %v926_v61, 16  ;;  %v15050_v4 = vmov 0  ;;  %vm15052_vm8 = vcmp.ne.s32.totalorder %v11427_v36, 0  ;;  %v15056_v61 = vld [vmem:[#allocation12_spill] sm:$0xff]  ;;  %v3301_v39 = vpop.permute.xlu1 %3300 }
 0x412   : > { %v3389_v7 = vadd.f32 %v3297_v44, %v15049_v48  ;;  %v15051_v4 = vsel %vm11567_vm6, 4294967295, %v15050_v4  ;;  %vm15053_vm3 = vcmp.lt.s32.totalorder %v11427_v36, 0  ;;  %v660_v34 = vshrl.u32 %v11453_v35, 4 }
 0x413   : > { %vm11575_vm14 = vmand %vm15053_vm3, %vm15052_vm8  ;;  %v11582_v19 = vadd.s32 264, %v10524_v37  ;;  %v15057_v42 = vmax.f32 %v15056_v61, 0.0  ;;  %v693_v51 = vshrl.u32 %v11459_v56, 4  ;;  %vm15058_vm5 = vcmask 64512   ;;  %v3639_v48 = vld [vmem:[#allocation2 + $0x69] sm:$0xff] }
 0x414   : > { %v11588_v18 = vmul.u32.u64.low 3817748708, %v11462_v24  ;;  %v11589_v44 = vmul.u32.u64.high 3817748708, %v11462_v24, %v11588_v18  ;;  %3601 = vst.msk [vmem:[#allocation3 + $0x58] sm:$0xff] %vm15058_vm5, %v3565_v5  ;;  %vm15059_vm8 = vmmov %vm15058_vm5  ;;  %v3497_v35 = vsel %vm11408_vm2, %v3389_v7, 0.0  ;;  %vm15060_vm3 = vcmp.ne.s32.totalorder %v11473_v43, 0  ;;  %v3638_v7 = vld [vmem:[#allocation2 + $0x61] sm:$0xff]  ;;  %3724 = vrot.lane.b32.xlu1 %v3639_v48, %s9226_s25 }
 0x415   : > { %v3388_v50 = vadd.f32 %v3295_v0, %v15057_v42  ;;  %3600 = vst.msk [vmem:[#allocation3 + $0x50] sm:$0xff] %vm15059_vm8, %v3564_v26  ;;  %vm15061_vm13 = vcmp.lt.s32.totalorder %v11473_v43, 0  ;;  %vm824_vm4 = vcmp.lt.s32.totalorder %v11513_v29, 0  ;;  %v15064_v0 = vmov 0  ;;  %vm15066_vm8 = vmmov %vm15058_vm5  ;;  %3722 = vrot.lane.b32.xlu0 %v3638_v7, %s9226_s25  ;;  %v3566_v18 = vld [vmem:[#allocation2 + $0x60] sm:$0xff] }
 0x416   : > { %vm11599_vm12 = vmand %vm15061_vm13, %vm15060_vm3  ;;  %v11605_v56 = vmul.u32.u64.low 3817748708, %v11476_v47  ;;  %v11606_v28 = vmul.u32.u64.high 3817748708, %v11476_v47, %v11605_v56  ;;  %3533 = vst.msk [vmem:[#allocation2 + $0x8b] sm:$0xff] %vm15058_vm5, %v3497_v35  ;;  %vm11616_vm13 = vcmp.lt.s32.totalorder %v929_v6, 16  ;;  %v931_v5 = vsel %vm11549_vm10, %v11527_v3, %v11424_v15  ;;  %v3299_v6 = vpop.permute.xlu0 %3298  ;;  %v15071_v35 = vld [vmem:[#allocation14_spill] sm:$0xff] }
 0x417   : > { %v3496_v49 = vsel %vm11439_vm1, %v3388_v50, 0.0  ;;  %v15065_v0 = vsel %vm11616_vm13, 4294967295, %v15064_v0  ;;  %v930_v26 = vsel %vm11575_vm14, %v11530_v53, %v11427_v36  ;;  %v11629_v61 = vadd.s32 256, %v10524_v37  ;;  %v3567_v50 = vld [vmem:[#allocation2 + $0x68] sm:$0xff]  ;;  %vm15076_vm3 = vmmov %vm15058_vm5 }
 0x418   : > { %3532 = vst.msk [vmem:[#allocation2 + $0x83] sm:$0xff] %vm15066_vm8, %v3496_v49  ;;  %v15068_v14 = vmax.f32 %v15067_v12, 0.0  ;;  %vm11641_vm0 = vcmp.lt.s32.totalorder %v928_v33, 16  ;;  %v15069_v15 = vmov 0  ;;  %v11646_v3 = vadd.s32 18, %v11513_v29  ;;  %vm15077_vm5 = vmmov %vm15076_vm3  ;;  %v3641_v48 = vld [vmem:[#allocation2 + $0x79] sm:$0xff] }
 0x419   : > { %v15070_v15 = vsel %vm11641_vm0, 4294967295, %v15069_v15  ;;  %v11649_v13 = vsub.s32 %v11284_v52, %v672_v46  ;;  %v661_v42 = vmul.u32 18, %v660_v34  ;;  %v15072_v56 = vmax.f32 %v15071_v35, 0.0  ;;  %3603 = vst.msk [vmem:[#allocation3 + $0x68] sm:$0xff] %vm15076_vm3, %v3567_v50  ;;  %v3640_v7 = vld [vmem:[#allocation2 + $0x71] sm:$0xff]  ;;  %v15082_v50 = vld [vmem:[#allocation15_spill] sm:$0xff]  ;;  %3728 = vrot.lane.b32.xlu1 %v3641_v48, %s9226_s25 }
 0x41a   : > { %v3391_v2 = vadd.f32 %v3301_v39, %v15068_v14  ;;  %v933_v17 = vsel %vm11599_vm12, %v11555_v16, %v11473_v43  ;;  %vm15073_vm11 = vcmp.ne.s32.totalorder %v11513_v29, 0  ;;  %v694_v52 = vmul.u32 18, %v693_v51  ;;  %3602 = vst.msk [vmem:[#allocation3 + $0x60] sm:$0xff] %vm15077_vm5, %v3566_v18  ;;  %3726 = vrot.lane.b32.xlu0 %v3640_v7, %s9226_s25  ;;  %vm15086_vm5 = vmmov %vm15076_vm3 }
 0x41b   : > { %v3390_v49 = vadd.f32 %v3299_v6, %v15072_v56  ;;  %vm11661_vm10 = vmand %vm824_vm4, %vm15073_vm11  ;;  %v682_v55 = vshrl.u32 %v11520_v54, 4  ;;  %v11671_v46 = vmul.u32.u64.low 3817748708, %v11582_v19  ;;  %v11672_v34 = vmul.u32.u64.high 3817748708, %v11582_v19, %v11671_v46  ;;  %v3305_v54 = vpop.permute.xlu1 %3304 }
 0x41c   : > { %v3499_v33 = vsel %vm11486_vm9, %v3391_v2, 0.0  ;;  %v11675_v39 = vadd.s32 280, %v10524_v37  ;;  %vm15078_vm4 = vmmov %vm15076_vm3  ;;  %vm11680_vm8 = vcmp.lt.s32.totalorder %v931_v5, 16  ;;  %v15079_v12 = vmov 0  ;;  %v3303_v5 = vpop.permute.xlu0 %3302  ;;  %v15084_v46 = vld [vmem:[#allocation16_spill] sm:$0xff] }
 0x41d   : > { %3535 = vst.msk [vmem:[#allocation2 + $0x9b] sm:$0xff] %vm15078_vm4, %v3499_v33  ;;  %v3498_v51 = vsel %vm11506_vm15, %v3390_v49, 0.0  ;;  %v15080_v12 = vsel %vm11680_vm8, 4294967295, %v15079_v12  ;;  %v11685_v14 = vmul.u32.u64.low 3817748708, %v11629_v61  ;;  %v11686_v2 = vmul.u32.u64.high 3817748708, %v11629_v61, %v11685_v14  ;;  %vm15081_vm11 = vmmov %vm15076_vm3  ;;  %v3569_v49 = vld [vmem:[#allocation2 + $0x78] sm:$0xff] }
 0x41e   : > { %v11689_v6 = vadd.s32 272, %v10524_v37  ;;  %3534 = vst.msk [vmem:[#allocation2 + $0x93] sm:$0xff] %vm15081_vm11, %v3498_v51  ;;  %v15083_v18 = vmax.f32 %v15082_v50, 0.0  ;;  %v932_v56 = vsel %vm11661_vm10, %v11646_v3, %v11513_v29  ;;  %v11702_v37 = vsub.s32 %v11331_v41, %v661_v42  ;;  %v3568_v33 = vld [vmem:[#allocation2 + $0x70] sm:$0xff]  ;;  %vm15087_vm4 = vmmov %vm15076_vm3 }
 0x41f   : > { %v15085_v51 = vmax.f32 %v15084_v46, 0.0  ;;  %v11707_v48 = vsub.s32 %v11347_v8, %v694_v52  ;;  %v683_v7 = vmul.u32 18, %v682_v55  ;;  %v715_v14 = vshrl.u32 %v11589_v44, 4  ;;  %3605 = vst.msk [vmem:[#allocation3 + $0x78] sm:$0xff] %vm15086_vm5, %v3569_v49  ;;  %vm15088_vm10 = vmmov %vm15076_vm3  ;;  %v3309_v59 = vpop.permute.xlu1 %3308  ;;  %v3643_v44 = vld [vmem:[#allocation2 + $0x89] sm:$0xff]  ;;  %v3642_v52 = vld [vmem:[#allocation2 + $0x81] sm:$0xff] }
 0x420   : > { %v3393_v35 = vadd.f32 %v3305_v54, %v15083_v18  ;;  %3604 = vst.msk [vmem:[#allocation3 + $0x70] sm:$0xff] %vm15087_vm4, %v3568_v33  ;;  %v704_v41 = vshrl.u32 %v11606_v28, 4  ;;  %v11716_v3 = vmul.u32.u64.low 3817748708, %v11675_v39  ;;  %v11717_v42 = vmul.u32.u64.high 3817748708, %v11675_v39, %v11716_v3  ;;  %vm15089_vm5 = vmmov %vm15076_vm3  ;;  %v15090_v28 = vld [vmem:[#allocation17_spill] sm:$0xff]  ;;  %3732 = vrot.lane.b32.xlu1 %v3643_v44, %s9226_s25  ;;  %3730 = vrot.lane.b32.xlu0 %v3642_v52, %s9226_s25  ;;  %v3571_v33 = vld [vmem:[#allocation2 + $0x88] sm:$0xff] }
 0x421   : > { %v3392_v54 = vadd.f32 %v3303_v5, %v15085_v51  ;;  %v11724_v55 = vmul.u32.u64.low 3817748708, %v11689_v6  ;;  %v11725_v50 = vmul.u32.u64.high 3817748708, %v11689_v6, %v11724_v55  ;;  %v15091_v18 = vmax.f32 %v15090_v28, 0.0  ;;  %v3307_v5 = vpop.permute.xlu0 %3306  ;;  %v3570_v46 = vld [vmem:[#allocation2 + $0x80] sm:$0xff]  ;;  %v15092_v51 = vld [vmem:[#allocation18_spill] sm:$0xff]  ;;  %vm15094_vm11 = vmmov %vm15076_vm3 }
 0x422   : > { %v3501_v29 = vsel %vm11541_vm7, %v3393_v35, 0.0  ;;  %v899_v49 = vadd.s32 18, %v11649_v13  ;;  %v11739_v3 = vsub.s32 %v11398_v57, %v683_v7  ;;  %3607 = vst.msk [vmem:[#allocation3 + $0x88] sm:$0xff] %vm15094_vm11, %v3571_v33  ;;  %vm15096_vm4 = vcmp.lt.s32.totalorder %v11649_v13, 0  ;;  %vm15099_vm7 = vmmov %vm15076_vm3 }
 0x423   : > { %3537 = vst.msk [vmem:[#allocation2 + $0xab] sm:$0xff] %vm15088_vm10, %v3501_v29  ;;  %v3500_v8 = vsel %vm11567_vm6, %v3392_v54, 0.0  ;;  %v3395_v35 = vadd.f32 %v3309_v59, %v15091_v18  ;;  %v15093_v54 = vmax.f32 %v15092_v51, 0.0  ;;  %vm15095_vm10 = vcmp.ne.s32.totalorder %v11649_v13, 0  ;;  %v3313_v52 = vpop.permute.xlu1 %3312 }
 0x424   : > { %3536 = vst.msk [vmem:[#allocation2 + $0xa3] sm:$0xff] %vm15089_vm5, %v3500_v8  ;;  %v716_v8 = vmul.u32 18, %v715_v14  ;;  %vm11749_vm6 = vmand %vm15096_vm4, %vm15095_vm10  ;;  %vm829_vm5 = vcmp.lt.s32.totalorder %v11707_v48, 0  ;;  %v705_v57 = vmul.u32 18, %v704_v41  ;;  %v737_v7 = vshrl.u32 %v11672_v34, 4 }
 0x425   : > { %v3394_v29 = vadd.f32 %v3307_v5, %v15093_v54  ;;  %3606 = vst.msk [vmem:[#allocation3 + $0x80] sm:$0xff] %vm15076_vm3, %v3570_v46  ;;  %v3503_v59 = vsel %vm11616_vm13, %v3395_v35, 0.0  ;;  %v3645_v55 = vld [vmem:[#allocation2 + $0x99] sm:$0xff]  ;;  %v3644_v28 = vld [vmem:[#allocation2 + $0x91] sm:$0xff]  ;;  %vm11763_vm3 = vcmp.lt.s32.totalorder %v930_v26, 16  ;;  %v15100_v18 = vmov 0  ;;  %v3311_v53 = vpop.permute.xlu0 %3310 }
 0x426   : > { %3539 = vst.msk [vmem:[#allocation2 + $0xbb] sm:$0xff] %vm15099_vm7, %v3503_v59  ;;  %v15101_v18 = vsel %vm11763_vm3, 4294967295, %v15100_v18  ;;  %vm11772_vm7 = vcmp.lt.s32.totalorder %v933_v17, 16  ;;  %v15102_v34 = vmov 0  ;;  %v726_v41 = vshrl.u32 %v11686_v2, 4  ;;  %3736 = vrot.lane.b32.xlu1 %v3645_v55, %s9226_s25  ;;  %3734 = vrot.lane.b32.xlu0 %v3644_v28, %s9226_s25  ;;  %v3573_v17 = vld [vmem:[#allocation2 + $0x98] sm:$0xff] }
 0x427   : > { %v3502_v14 = vsel %vm11641_vm0, %v3394_v29, 0.0  ;;  %v15103_v34 = vsel %vm11772_vm7, 4294967295, %v15102_v34  ;;  %v15105_v35 = vmax.f32 %v15104_v38, 0.0  ;;  %vm11782_vm14 = vcmp.lt.s32.totalorder %v932_v56, 16  ;;  %v3572_v2 = vld [vmem:[#allocation2 + $0x90] sm:$0xff]  ;;  %v15112_v5 = vld [vmem:[#allocation20_spill] sm:$0xff] }
 0x428   : > { %3538 = vst.msk [vmem:[#allocation2 + $0xb3] sm:$0xff] %vm15094_vm11, %v3502_v14  ;;  %v15106_v22 = vmov 0  ;;  %vm15108_vm12 = vcmp.ne.s32.totalorder %v11702_v37, 0  ;;  %vm15109_vm4 = vcmp.lt.s32.totalorder %v11702_v37, 0  ;;  %v898_v16 = vadd.s32 18, %v11702_v37 }
 0x429   : > { %v3397_v36 = vadd.f32 %v3313_v52, %v15105_v35  ;;  %v15107_v22 = vsel %vm11782_vm14, 4294967295, %v15106_v22  ;;  %vm11790_vm10 = vmand %vm15109_vm4, %vm15108_vm12  ;;  %v901_v26 = vadd.s32 18, %v11707_v48  ;;  %v15113_v33 = vmax.f32 %v15112_v5, 0.0 }
 0x42a   : > { %v935_v46 = vsel %vm11749_vm6, %v899_v49, %v11649_v13  ;;  %vm15114_vm11 = vcmp.ne.s32.totalorder %v11707_v48, 0  ;;  %vm792_vm4 = vcmp.ne.s32.totalorder %v11739_v3, 0  ;;  %v11811_v54 = vsub.s32 %v11462_v24, %v716_v8  ;;  %v3317_v24 = vpop.permute.xlu1 %3316 }
 0x42b   : > { %v3396_v56 = vadd.f32 %v3311_v53, %v15113_v33  ;;  %vm11805_vm12 = vmand %vm829_vm5, %vm15114_vm11  ;;  %vm15117_vm0 = vcmask 64512   ;;  %v3505_v13 = vsel %vm11680_vm8, %v3397_v36, 0.0  ;;  %v11818_v49 = vsub.s32 %v11476_v47, %v705_v57  ;;  %v3647_v8 = vld [vmem:[#allocation2 + $0xa9] sm:$0xff]  ;;  %v3646_v14 = vld [vmem:[#allocation2 + $0xa1] sm:$0xff] }
 0x42c   : > { %3609 = vst.msk [vmem:[#allocation3 + $0x98] sm:$0xff] %vm15117_vm0, %v3573_v17  ;;  %vm15118_vm13 = vmmov %vm15117_vm0  ;;  %v738_v29 = vmul.u32 18, %v737_v7  ;;  %v759_v59 = vshrl.u32 %v11717_v42, 4  ;;  %v727_v52 = vmul.u32 18, %v726_v41  ;;  %v748_v55 = vshrl.u32 %v11725_v50, 4  ;;  %v15121_v47 = vld [vmem:[#allocation21_spill] sm:$0xff]  ;;  %3740 = vrot.lane.b32.xlu1 %v3647_v8, %s9226_s25  ;;  %3738 = vrot.lane.b32.xlu0 %v3646_v14, %s9226_s25  ;;  %v3315_v42 = vpop.permute.xlu0 %3314 }
 0x42d   : > { %3608 = vst.msk [vmem:[#allocation3 + $0x90] sm:$0xff] %vm15118_vm13, %v3572_v2  ;;  %vm15119_vm6 = vmmov %vm15117_vm0  ;;  %v3504_v44 = vsel %vm11763_vm3, %v3396_v56, 0.0  ;;  %v15122_v57 = vmax.f32 %v15121_v47, 0.0  ;;  %vm11831_vm5 = vcmp.lt.s32.totalorder %v935_v46, 16  ;;  %v15123_v28 = vmov 0  ;;  %v3575_v38 = vld [vmem:[#allocation2 + $0xa8] sm:$0xff] }
 0x42e   : > { %3541 = vst.msk [vmem:[#allocation2 + $0xcb] sm:$0xff] %vm15119_vm6, %v3505_v13  ;;  %vm15120_vm13 = vmmov %vm15117_vm0  ;;  %v15124_v28 = vsel %vm11831_vm5, 4294967295, %v15123_v28  ;;  %v934_v41 = vsel %vm11790_vm10, %v898_v16, %v11702_v37  ;;  %v937_v50 = vsel %vm11805_vm12, %v901_v26, %v11707_v48  ;;  %v3574_v35 = vld [vmem:[#allocation2 + $0xa0] sm:$0xff]  ;;  %v15126_v36 = vld [vmem:[#allocation22_spill] sm:$0xff]  ;;  %v900_v2 = vadd.s32 18, %v11739_v3  ;;  %v3321_v5 = vpop.permute.xlu1 %3320 }
 0x42f   : > { %3540 = vst.msk [vmem:[#allocation2 + $0xc3] sm:$0xff] %vm15120_vm13, %v3504_v44  ;;  %v3399_v7 = vadd.f32 %v3317_v24, %v15122_v57  ;;  %15125 = vst [vmem:[#allocation4_spill] sm:$0xff] %v15124_v28  ;;  %v15127_v53 = vmax.f32 %v15126_v36, 0.0  ;;  %vm795_vm11 = vcmp.ne.s32.totalorder %v11811_v54, 0  ;;  %vm831_vm6 = vcmp.lt.s32.totalorder %v11811_v54, 0  ;;  %v3649_v33 = vld [vmem:[#allocation2 + $0xb9] sm:$0xff] }
 0x430   : > { %vm15128_vm13 = vmmov %vm15117_vm0  ;;  %3610 = vst.msk [vmem:[#allocation3 + $0xa0] sm:$0xff] %vm15117_vm0, %v3574_v35  ;;  %vm15129_vm10 = vcmp.lt.s32.totalorder %v11739_v3, 0  ;;  %v11860_v43 = vsub.s32 %v11582_v19, %v738_v29  ;;  %v760_v16 = vmul.u32 18, %v759_v59  ;;  %v3648_v56 = vld [vmem:[#allocation2 + $0xb1] sm:$0xff]  ;;  %v11867_v46 = vsub.s32 %v11629_v61, %v727_v52  ;;  %v15134_v13 = vld [vmem:[#allocation23_spill] sm:$0xff]  ;;  %3744 = vrot.lane.b32.xlu1 %v3649_v33, %s9226_s25  ;;  %v3319_v44 = vpop.permute.xlu0 %3318 }
 0x431   : > { %v3398_v17 = vadd.f32 %v3315_v42, %v15127_v53  ;;  %3611 = vst.msk [vmem:[#allocation3 + $0xa8] sm:$0xff] %vm15128_vm13, %v3575_v38  ;;  %v3507_v37 = vsel %vm11772_vm7, %v3399_v7, 0.0  ;;  %vm11854_vm12 = vmand %vm15129_vm10, %vm792_vm4  ;;  %v749_v51 = vmul.u32 18, %v748_v55  ;;  %v15135_v19 = vmax.f32 %v15134_v13, 0.0  ;;  %3742 = vrot.lane.b32.xlu0 %v3648_v56, %s9226_s25  ;;  %v3577_v8 = vld [vmem:[#allocation2 + $0xb8] sm:$0xff]  ;;  %v3576_v61 = vld [vmem:[#allocation2 + $0xb0] sm:$0xff] }
 0x432   : > { %vm15132_vm13 = vmmov %vm15117_vm0  ;;  %vm11874_vm10 = vcmp.lt.s32.totalorder %v934_v41, 16  ;;  %v15136_v59 = vmov 0  ;;  %v903_v24 = vadd.s32 18, %v11811_v54  ;;  %v15139_v14 = vld [vmem:[#allocation24_spill] sm:$0xff]  ;;  %v15141_v47 = vmov 0  ;;  %3613 = vst.msk [vmem:[#allocation3 + $0xb8] sm:$0xff] %vm15117_vm0, %v3577_v8  ;;  %v3325_v35 = vpop.permute.xlu1 %3324 }
 0x433   : > { %3543 = vst.msk [vmem:[#allocation2 + $0xdb] sm:$0xff] %vm15132_vm13, %v3507_v37  ;;  %v3506_v26 = vsel %vm11782_vm14, %v3398_v17, 0.0  ;;  %vm15133_vm4 = vmmov %vm15117_vm0  ;;  %v3401_v29 = vadd.f32 %v3321_v5, %v15135_v19  ;;  %v15137_v59 = vsel %vm11874_vm10, 4294967295, %v15136_v59  ;;  %v15140_v52 = vmax.f32 %v15139_v14, 0.0  ;;  %v15157_v56 = vld [vmem:[#allocation26_spill] sm:$0xff] }
 0x434   : > { %3542 = vst.msk [vmem:[#allocation2 + $0xd3] sm:$0xff] %vm15133_vm4, %v3506_v26  ;;  %15138 = vst [vmem:[#allocation5_spill] sm:$0xff] %v15137_v59  ;;  %vm11881_vm13 = vcmp.lt.s32.totalorder %v937_v50, 16  ;;  %v936_v57 = vsel %vm11854_vm12, %v900_v2, %v11739_v3  ;;  %v902_v42 = vadd.s32 18, %v11818_v49  ;;  %vm15147_vm14 = vcmp.ne.s32.totalorder %v11818_v49, 0  ;;  %v15152_v2 = vld [vmem:[#allocation25_spill] sm:$0xff] }
 0x435   : > { %v3400_v55 = vadd.f32 %v3319_v44, %v15140_v52  ;;  %v15142_v47 = vsel %vm11881_vm13, 4294967295, %v15141_v47  ;;  %vm11892_vm4 = vmand %vm831_vm6, %vm795_vm11  ;;  %v3509_v41 = vsel %vm11831_vm5, %v3401_v29, 0.0  ;;  %vm15148_vm12 = vcmp.lt.s32.totalorder %v11818_v49, 0 }
 0x436   : > { %15143 = vst [vmem:[#allocation6_spill] sm:$0xff] %v15142_v47  ;;  %vm15146_vm3 = vmmov %vm15117_vm0  ;;  %vm797_vm11 = vcmp.ne.s32.totalorder %v11860_v43, 0  ;;  %vm833_vm6 = vcmp.lt.s32.totalorder %v11860_v43, 0  ;;  %v11912_v50 = vsub.s32 %v11675_v39, %v760_v16  ;;  %v3651_v36 = vld [vmem:[#allocation2 + $0xc9] sm:$0xff]  ;;  %v3650_v53 = vld [vmem:[#allocation2 + $0xc1] sm:$0xff]  ;;  %v11920_v17 = vsub.s32 %v11689_v6, %v749_v51  ;;  %v3323_v16 = vpop.permute.xlu0 %3322 }
 0x437   : > { %3612 = vst.msk [vmem:[#allocation3 + $0xb0] sm:$0xff] %vm15146_vm3, %v3576_v61  ;;  %vm11905_vm7 = vmand %vm15148_vm12, %vm15147_vm14  ;;  %v3508_v38 = vsel %vm11874_vm10, %v3400_v55, 0.0  ;;  %vm796_vm3 = vcmp.ne.s32.totalorder %v11867_v46, 0  ;;  %v15153_v39 = vmax.f32 %v15152_v2, 0.0  ;;  %3748 = vrot.lane.b32.xlu1 %v3651_v36, %s9226_s25  ;;  %3746 = vrot.lane.b32.xlu0 %v3650_v53, %s9226_s25  ;;  %v15154_v48 = vmov 0  ;;  %v3579_v5 = vld [vmem:[#allocation2 + $0xc8] sm:$0xff]  ;;  %v3329_v61 = vpop.permute.xlu1 %3328 }
 0x438   : > { %3545 = vst.msk [vmem:[#allocation2 + $0xeb] sm:$0xff] %vm15117_vm0, %v3509_v41  ;;  %vm15151_vm12 = vmmov %vm15117_vm0  ;;  %vm11927_vm0 = vcmp.lt.s32.totalorder %v936_v57, 16  ;;  %v939_v26 = vsel %vm11892_vm4, %v903_v24, %v11811_v54  ;;  %v905_v6 = vadd.s32 18, %v11860_v43  ;;  %v3578_v33 = vld [vmem:[#allocation2 + $0xc0] sm:$0xff]  ;;  %v15158_v51 = vmax.f32 %v15157_v56, 0.0  ;;  %v15176_v53 = vld [vmem:[#allocation28_spill] sm:$0xff] }
 0x439   : > { %3544 = vst.msk [vmem:[#allocation2 + $0xe3] sm:$0xff] %vm15151_vm12, %v3508_v38  ;;  %v3403_v37 = vadd.f32 %v3325_v35, %v15153_v39  ;;  %v15155_v48 = vsel %vm11927_vm0, 4294967295, %v15154_v48  ;;  %v938_v19 = vsel %vm11905_vm7, %v902_v42, %v11818_v49  ;;  %vm11944_vm12 = vmand %vm833_vm6, %vm797_vm11  ;;  %v904_v54 = vadd.s32 18, %v11867_v46  ;;  %v15171_v55 = vld [vmem:[#allocation27_spill] sm:$0xff] }
 0x43a   : > { %15156 = vst [vmem:[#allocation7_spill] sm:$0xff] %v15155_v48  ;;  %v3402_v13 = vadd.f32 %v3323_v16, %v15158_v51  ;;  %vm15161_vm4 = vcmask 64512   ;;  %vm15163_vm7 = vcmp.lt.s32.totalorder %v11867_v46, 0  ;;  %vm799_vm11 = vcmp.ne.s32.totalorder %v11912_v50, 0  ;;  %v3327_v41 = vpop.permute.xlu0 %3326 }
 0x43b   : > { %3615 = vst.msk [vmem:[#allocation3 + $0xc8] sm:$0xff] %vm15161_vm4, %v3579_v5  ;;  %vm15162_vm14 = vmmov %vm15161_vm4  ;;  %v3511_v44 = vsel %vm11881_vm13, %v3403_v37, 0.0  ;;  %vm835_vm6 = vcmp.lt.s32.totalorder %v11912_v50, 0  ;;  %v15167_v8 = vmov 0  ;;  %v3653_v14 = vld [vmem:[#allocation2 + $0xd9] sm:$0xff]  ;;  %v3652_v52 = vld [vmem:[#allocation2 + $0xd1] sm:$0xff]  ;;  %v941_v3 = vsel %vm11944_vm12, %v905_v6, %v11860_v43 }
 0x43c   : > { %3614 = vst.msk [vmem:[#allocation3 + $0xc0] sm:$0xff] %vm15162_vm14, %v3578_v33  ;;  %vm11957_vm10 = vmand %vm15163_vm7, %vm796_vm3  ;;  %v3510_v24 = vsel %vm11927_vm0, %v3402_v13, 0.0  ;;  %vm11966_vm14 = vcmp.lt.s32.totalorder %v939_v26, 16  ;;  %vm798_vm3 = vcmp.ne.s32.totalorder %v11920_v17, 0  ;;  %v15172_v57 = vmax.f32 %v15171_v55, 0.0  ;;  %3752 = vrot.lane.b32.xlu1 %v3653_v14, %s9226_s25  ;;  %3750 = vrot.lane.b32.xlu0 %v3652_v52, %s9226_s25  ;;  %v3581_v35 = vld [vmem:[#allocation2 + $0xd8] sm:$0xff]  ;;  %v3333_v33 = vpop.permute.xlu1 %3332 }
 0x43d   : > { %vm15166_vm5 = vmmov %vm15161_vm4  ;;  %v15168_v8 = vsel %vm11966_vm14, 4294967295, %v15167_v8  ;;  %v15173_v42 = vmov 0  ;;  %v907_v38 = vadd.s32 18, %v11912_v50  ;;  %v3580_v36 = vld [vmem:[#allocation2 + $0xd0] sm:$0xff]  ;;  %v15177_v2 = vmax.f32 %v15176_v53, 0.0  ;;  %v15193_v14 = vld [vmem:[#allocation30_spill] sm:$0xff] }
 0x43e   : > { %3547 = vst.msk [vmem:[#allocation2 + $0xfb] sm:$0xff] %vm15166_vm5, %v3511_v44  ;;  %15169 = vst [vmem:[#allocation8_spill] sm:$0xff] %v15168_v8  ;;  %v3405_v7 = vadd.f32 %v3329_v61, %v15172_v57  ;;  %vm11977_vm5 = vcmp.lt.s32.totalorder %v938_v19, 16  ;;  %v940_v37 = vsel %vm11957_vm10, %v904_v54, %v11867_v46  ;;  %v906_v43 = vadd.s32 18, %v11920_v17  ;;  %v15188_v13 = vld [vmem:[#allocation29_spill] sm:$0xff]  ;;  %v3331_v44 = vpop.permute.xlu0 %3330 }
 0x43f   : > { %vm15170_vm7 = vmmov %vm15161_vm4  ;;  %v15174_v42 = vsel %vm11977_vm5, 4294967295, %v15173_v42  ;;  %v3404_v39 = vadd.f32 %v3327_v41, %v15177_v2  ;;  %3616 = vst.msk [vmem:[#allocation3 + $0xd0] sm:$0xff] %vm15161_vm4, %v3580_v36  ;;  %vm15181_vm10 = vcmp.lt.s32.totalorder %v11920_v17, 0  ;;  %v15185_v5 = vmov 0 }
 0x440   : > { %3546 = vst.msk [vmem:[#allocation2 + $0xf3] sm:$0xff] %vm15170_vm7, %v3510_v24  ;;  %15175 = vst [vmem:[#allocation9_spill] sm:$0xff] %v15174_v42  ;;  %v3513_v26 = vsel %vm11966_vm14, %v3405_v7, 0.0  ;;  %v3655_v56 = vld [vmem:[#allocation2 + $0xe9] sm:$0xff]  ;;  %v3654_v51 = vld [vmem:[#allocation2 + $0xe1] sm:$0xff]  ;;  %v15189_v19 = vmax.f32 %v15188_v13, 0.0 }
 0x441   : > { %vm11994_vm7 = vmand %vm835_vm6, %vm799_vm11  ;;  %v3512_v6 = vsel %vm11977_vm5, %v3404_v39, 0.0  ;;  %vm12014_vm6 = vcmp.lt.s32.totalorder %v941_v3, 16  ;;  %3756 = vrot.lane.b32.xlu1 %v3655_v56, %s9226_s25  ;;  %3754 = vrot.lane.b32.xlu0 %v3654_v51, %s9226_s25  ;;  %v15190_v54 = vmov 0  ;;  %v3583_v24 = vld [vmem:[#allocation2 + $0xe8] sm:$0xff]  ;;  %v3582_v61 = vld [vmem:[#allocation2 + $0xe0] sm:$0xff]  ;;  %v15194_v52 = vmax.f32 %v15193_v14, 0.0  ;;  %v3337_v3 = vpop.permute.xlu1 %3336 }
 0x442   : > { %vm15180_vm12 = vmmov %vm15161_vm4  ;;  %v15186_v5 = vsel %vm12014_vm6, 4294967295, %v15185_v5  ;;  %3548 = vst.msk [vmem:[#allocation2 + $0x103] sm:$0xff] %vm15161_vm4, %v3512_v6  ;;  %v3407_v29 = vadd.f32 %v3333_v33, %v15189_v19  ;;  %v943_v49 = vsel %vm11994_vm7, %v907_v38, %v11912_v50  ;;  %v15198_v41 = vmov 0  ;;  %v3335_v39 = vpop.permute.xlu0 %3334 }
 0x443   : > { %3617 = vst.msk [vmem:[#allocation3 + $0xd8] sm:$0xff] %vm15180_vm12, %v3581_v35  ;;  %vm12007_vm0 = vmand %vm15181_vm10, %vm798_vm3  ;;  %vm12023_vm3 = vcmp.lt.s32.totalorder %v940_v37, 16  ;;  %v3406_v55 = vadd.f32 %v3331_v44, %v15194_v52  ;;  %vm12042_vm7 = vcmp.lt.s32.totalorder %v943_v49, 16  ;;  %v15204_v2 = vmov 0  ;;  %v3843_v52 = vld [vmem:[#allocation2 + $0xa] sm:$0xff] }
 0x444   : > { %vm15184_vm11 = vmmov %vm15161_vm4  ;;  %15187 = vst [vmem:[#allocation10_spill] sm:$0xff] %v15186_v5  ;;  %v15191_v54 = vsel %vm12023_vm3, 4294967295, %v15190_v54  ;;  %v942_v57 = vsel %vm12007_vm0, %v906_v43, %v11920_v17  ;;  %v3515_v7 = vsel %vm12014_vm6, %v3407_v29, 0.0  ;;  %v15199_v41 = vsel %vm12042_vm7, 4294967295, %v15198_v41  ;;  %v15202_v17 = vld [vmem:[#allocation31_spill] sm:$0xff]  ;;  %v15207_v43 = vld [vmem:[#allocation32_spill] sm:$0xff] }
 0x445   : > { %3549 = vst.msk [vmem:[#allocation2 + $0x10b] sm:$0xff] %vm15184_vm11, %v3513_v26  ;;  %15192 = vst [vmem:[#allocation11_spill] sm:$0xff] %v15191_v54  ;;  %v3514_v50 = vsel %vm12023_vm3, %v3406_v55, 0.0  ;;  %v15203_v36 = vmax.f32 %v15202_v17, 0.0  ;;  %v15208_v26 = vmax.f32 %v15207_v43, 0.0  ;;  %v3701_v13 = vpop.permute.xlu1 %3700  ;;  %v3842_v55 = vld [vmem:[#allocation2 + $0x2] sm:$0xff] }
 0x446   : > { %vm15195_vm12 = vmmov %vm15161_vm4  ;;  %15200 = vst [vmem:[#allocation12_spill] sm:$0xff] %v15199_v41  ;;  %v3699_v19 = vpop.permute.xlu0 %3698  ;;  %v12101_v17 = vld [vmem:[#allocation2 + $0x4a] sm:$0xff]  ;;  %v12125_v43 = vld [vmem:[#allocation2 + $0x7a] sm:$0xff] }
 0x447   : > { %3619 = vst.msk [vmem:[#allocation3 + $0xe8] sm:$0xff] %vm15195_vm12, %v3583_v24  ;;  %vm15196_vm10 = vmmov %vm15161_vm4  ;;  %v3657_v38 = vld [vmem:[#allocation2 + $0xf9] sm:$0xff]  ;;  %v3656_v35 = vld [vmem:[#allocation2 + $0xf1] sm:$0xff]  ;;  %v3409_v53 = vadd.f32 %v3337_v3, %v15203_v36  ;;  %v3408_v46 = vadd.f32 %v3335_v39, %v15208_v26 }
 0x448   : > { %3618 = vst.msk [vmem:[#allocation3 + $0xe0] sm:$0xff] %vm15196_vm10, %v3582_v61  ;;  %vm15197_vm11 = vmmov %vm15161_vm4  ;;  %3760 = vrot.lane.b32.xlu1 %v3657_v38, %s9226_s25  ;;  %3758 = vrot.lane.b32.xlu0 %v3656_v35, %s9226_s25  ;;  %v3585_v37 = vld [vmem:[#allocation2 + $0xf8] sm:$0xff]  ;;  %v3584_v16 = vld [vmem:[#allocation2 + $0xf0] sm:$0xff] }
 0x449   : > { %3551 = vst.msk [vmem:[#allocation2 + $0x11b] sm:$0xff] %vm15197_vm11, %v3515_v7  ;;  %vm15201_vm0 = vmmov %vm15161_vm4  ;;  %vm12051_vm4 = vcmp.lt.s32.totalorder %v942_v57, 16  ;;  %v3517_v6 = vsel %vm12042_vm7, %v3409_v53, 0.0  ;;  %v3658_v51 = vld [vmem:[#allocation2 + $0x101] sm:$0xff]  ;;  %v12079_v7 = vld [vmem:[#allocation2 + $0x12] sm:$0xff] }
 0x44a   : > { %3550 = vst.msk [vmem:[#allocation2 + $0x113] sm:$0xff] %vm15201_vm0, %v3514_v50  ;;  %v15205_v2 = vsel %vm12051_vm4, 4294967295, %v15204_v2  ;;  %vm15209_vm12 = vmmov %vm15201_vm0  ;;  %v3516_v33 = vsel %vm12051_vm4, %v3408_v46, 0.0  ;;  %v3586_v44 = vld [vmem:[#allocation2 + $0x100] sm:$0xff]  ;;  %v12085_v50 = vld [vmem:[#allocation2 + $0x2a] sm:$0xff] }
 0x44b   : > { %15206 = vst [vmem:[#allocation13_spill] sm:$0xff] %v15205_v2  ;;  %3621 = vst.msk [vmem:[#allocation3 + $0xf8] sm:$0xff] %vm15209_vm12, %v3585_v37  ;;  %vm15212_vm12 = vcmask 130112   ;;  %v12077_v57 = vld [vmem:[#allocation2 + $0x1a] sm:$0xff]  ;;  %v12087_v3 = vld [vmem:[#allocation2 + $0x22] sm:$0xff] }
 0x44c   : > { %vm15210_vm10 = vmmov %vm15201_vm0  ;;  %v3659_v56 = vld [vmem:[#allocation2 + $0x109] sm:$0xff]  ;;  %3552 = vst.msk [vmem:[#allocation2 + $0x123] sm:$0xff] %vm15201_vm0, %v3516_v33  ;;  %3762 = vrot.lane.b32.xlu0 %v3658_v51, %s9226_s25  ;;  %v12093_v38 = vld [vmem:[#allocation2 + $0x3a] sm:$0xff] }
 0x44d   : > { %3620 = vst.msk [vmem:[#allocation3 + $0xf0] sm:$0xff] %vm15210_vm10, %v3584_v16  ;;  %vm15211_vm11 = vmmov %vm15201_vm0  ;;  %3764 = vrot.lane.b32.xlu1 %v3659_v56, %s9226_s25  ;;  %v3587_v29 = vld [vmem:[#allocation2 + $0x108] sm:$0xff]  ;;  %v12095_v35 = vld [vmem:[#allocation2 + $0x32] sm:$0xff] }
 0x44e   : > { %3553 = vst.msk [vmem:[#allocation2 + $0x12b] sm:$0xff] %vm15211_vm11, %v3517_v6  ;;  %vm15213_vm10 = vmmov %vm15212_vm12  ;;  %v12103_v36 = vld [vmem:[#allocation2 + $0x42] sm:$0xff]  ;;  %v12109_v53 = vld [vmem:[#allocation2 + $0x5a] sm:$0xff] }
 0x44f   : > { %3807 = vst.msk [vmem:[#allocation3 + $0x8] sm:$0xff] %vm15212_vm12, %v3701_v13  ;;  %vm15214_vm11 = vmmov %vm15201_vm0  ;;  %v12111_v39 = vld [vmem:[#allocation2 + $0x52] sm:$0xff]  ;;  %v12117_v37 = vld [vmem:[#allocation2 + $0x6a] sm:$0xff] }
 0x450   : > { %3806 = vst.msk [vmem:[#allocation3] sm:$0xff] %vm15213_vm10, %v3699_v19  ;;  %vm15215_vm7 = vmmov %vm15201_vm0  ;;  %v12119_v16 = vld [vmem:[#allocation2 + $0x62] sm:$0xff]  ;;  %v12127_v26 = vld [vmem:[#allocation2 + $0x72] sm:$0xff] }
 0x451   : > { %3623 = vst.msk [vmem:[#allocation3 + $0x108] sm:$0xff] %vm15214_vm11, %v3587_v29  ;;  %v3661_v49 = vld [vmem:[#allocation2 + $0x119] sm:$0xff]  ;;  %v3660_v24 = vld [vmem:[#allocation2 + $0x111] sm:$0xff]  ;;  %vm15216_vm12 = vmmov %vm15201_vm0 }
 0x452   : > { %3622 = vst.msk [vmem:[#allocation3 + $0x100] sm:$0xff] %vm15215_vm7, %v3586_v44  ;;  %3768 = vrot.lane.b32.xlu1 %v3661_v49, %s9226_s25  ;;  %3766 = vrot.lane.b32.xlu0 %v3660_v24, %s9226_s25  ;;  %v3589_v61 = vld [vmem:[#allocation2 + $0x118] sm:$0xff]  ;;  %v3588_v14 = vld [vmem:[#allocation2 + $0x110] sm:$0xff]  ;;  %v12135_v6 = vld [vmem:[#allocation2 + $0x82] sm:$0xff] }
 0x453   : > { %3625 = vst.msk [vmem:[#allocation3 + $0x118] sm:$0xff] %vm15201_vm0, %v3589_v61  ;;  %v12133_v46 = vld [vmem:[#allocation2 + $0x8a] sm:$0xff]  ;;  %v12141_v33 = vld [vmem:[#allocation2 + $0x9a] sm:$0xff]  ;;  %v12143_v56 = vld [vmem:[#allocation2 + $0x92] sm:$0xff] }
 0x454   : > { %3624 = vst.msk [vmem:[#allocation3 + $0x110] sm:$0xff] %vm15216_vm12, %v3588_v14  ;;  %v12149_v51 = vld [vmem:[#allocation2 + $0xaa] sm:$0xff]  ;;  %v12151_v13 = vld [vmem:[#allocation2 + $0xa2] sm:$0xff]  ;;  %v12157_v19 = vld [vmem:[#allocation2 + $0xba] sm:$0xff] }
 0x455   : > { %v12159_v29 = vld [vmem:[#allocation2 + $0xb2] sm:$0xff]  ;;  %vm15217_vm7 = vmmov %vm15213_vm10  ;;  %v12167_v24 = vld [vmem:[#allocation2 + $0xca] sm:$0xff] }
 0x456   : > { %3916 = vrot.lane.b32.xlu1 %v3843_v52, %s9227_s26  ;;  %3914 = vrot.lane.b32.xlu0 %v3842_v55, %s9227_s26  ;;  %vm15218_vm10 = vmmov %vm15217_vm7  ;;  %v12169_v61 = vld [vmem:[#allocation2 + $0xc2] sm:$0xff]  ;;  %v12177_v55 = vld [vmem:[#allocation2 + $0xda] sm:$0xff] }
 0x457   : > { %vm15219_vm11 = vmmov %vm15217_vm7  ;;  %v12187_v41 = vld [vmem:[#allocation2 + $0xea] sm:$0xff]  ;;  %v12197_v5 = vld [vmem:[#allocation2 + $0xfa] sm:$0xff] }
 0x458   : > { %vm15220_vm0 = vmmov %vm15217_vm7  ;;  %v12207_v8 = vld [vmem:[#allocation2 + $0x10a] sm:$0xff]  ;;  %v12217_v47 = vld [vmem:[#allocation2 + $0x11a] sm:$0xff] }
 0x459   : > { %vm15221_vm12 = vmmov %vm15220_vm0 }
 0x45a   : > { %3920 = vrot.lane.b32.xlu1 %v12077_v57, %s9227_s26  ;;  %3918 = vrot.lane.b32.xlu0 %v12079_v7, %s9227_s26 }
 0x45e   : > { %3924 = vrot.lane.b32.xlu1 %v12085_v50, %s9227_s26  ;;  %3922 = vrot.lane.b32.xlu0 %v12087_v3, %s9227_s26 }
 0x462   : > { %3928 = vrot.lane.b32.xlu1 %v12093_v38, %s9227_s26  ;;  %3926 = vrot.lane.b32.xlu0 %v12095_v35, %s9227_s26 }
 0x466   : > { %3932 = vrot.lane.b32.xlu1 %v12101_v17, %s9227_s26  ;;  %3930 = vrot.lane.b32.xlu0 %v12103_v36, %s9227_s26  ;;  %v3703_v49 = vpop.permute.xlu0 %3702 }
 0x467   : > { %v3705_v44 = vpop.permute.xlu1 %3704  ;;  %3808 = vst.msk [vmem:[#allocation3 + $0x10] sm:$0xff] %vm15218_vm10, %v3703_v49  ;;  %vm15223_vm10 = vmmov %vm15220_vm0 }
 0x468   : > { %3809 = vst.msk [vmem:[#allocation3 + $0x18] sm:$0xff] %vm15217_vm7, %v3705_v44  ;;  %v12179_v44 = vld [vmem:[#allocation2 + $0xd2] sm:$0xff]  ;;  %vm15222_vm7 = vmmov %vm15220_vm0 }
 0x46a   : > { %3936 = vrot.lane.b32.xlu1 %v12109_v53, %s9227_s26  ;;  %3934 = vrot.lane.b32.xlu0 %v12111_v39, %s9227_s26 }
 0x46c   : > { %v3709_v14 = vpop.permute.xlu1 %3708  ;;  %v3707_v52 = vpop.permute.xlu0 %3706 }
 0x46d   : > { %3811 = vst.msk [vmem:[#allocation3 + $0x28] sm:$0xff] %vm15219_vm11, %v3709_v14  ;;  %v12189_v14 = vld [vmem:[#allocation2 + $0xe2] sm:$0xff]  ;;  %vm15224_vm11 = vmmov %vm15220_vm0 }
 0x46e   : > { %3940 = vrot.lane.b32.xlu1 %v12117_v37, %s9227_s26  ;;  %3938 = vrot.lane.b32.xlu0 %v12119_v16, %s9227_s26  ;;  %3810 = vst.msk [vmem:[#allocation3 + $0x20] sm:$0xff] %vm15220_vm0, %v3707_v52 }
 0x472   : > { %3944 = vrot.lane.b32.xlu1 %v12125_v43, %s9227_s26  ;;  %3942 = vrot.lane.b32.xlu0 %v12127_v26, %s9227_s26 }
 0x474   : > { %v3711_v2 = vpop.permute.xlu0 %3710 }
 0x475   : > { %v3713_v49 = vpop.permute.xlu1 %3712  ;;  %3812 = vst.msk [vmem:[#allocation3 + $0x30] sm:$0xff] %vm15222_vm7, %v3711_v2  ;;  %vm15226_vm7 = vmmov %vm15220_vm0 }
 0x476   : > { %3948 = vrot.lane.b32.xlu1 %v12133_v46, %s9227_s26  ;;  %3946 = vrot.lane.b32.xlu0 %v12135_v6, %s9227_s26  ;;  %3813 = vst.msk [vmem:[#allocation3 + $0x38] sm:$0xff] %vm15221_vm12, %v3713_v49  ;;  %v12199_v49 = vld [vmem:[#allocation2 + $0xf2] sm:$0xff]  ;;  %vm15225_vm12 = vmmov %vm15220_vm0 }
 0x47a   : > { %3952 = vrot.lane.b32.xlu1 %v12141_v33, %s9227_s26  ;;  %3950 = vrot.lane.b32.xlu0 %v12143_v56, %s9227_s26 }
 0x47c   : > { %v3717_v52 = vpop.permute.xlu1 %3716 }
 0x47d   : > { %v3715_v54 = vpop.permute.xlu0 %3714  ;;  %3815 = vst.msk [vmem:[#allocation3 + $0x48] sm:$0xff] %vm15223_vm10, %v3717_v52  ;;  %v12209_v52 = vld [vmem:[#allocation2 + $0x102] sm:$0xff]  ;;  %vm15227_vm10 = vmmov %vm15220_vm0 }
 0x47e   : > { %3956 = vrot.lane.b32.xlu1 %v12149_v51, %s9227_s26  ;;  %3954 = vrot.lane.b32.xlu0 %v12151_v13, %s9227_s26  ;;  %3814 = vst.msk [vmem:[#allocation3 + $0x40] sm:$0xff] %vm15224_vm11, %v3715_v54  ;;  %vm15228_vm11 = vmmov %vm15220_vm0 }
 0x480   : > { %v3721_v2 = vpop.permute.xlu1 %3720 }
 0x481   : > { %v3719_v42 = vpop.permute.xlu0 %3718  ;;  %3817 = vst.msk [vmem:[#allocation3 + $0x58] sm:$0xff] %vm15220_vm0, %v3721_v2  ;;  %v12219_v2 = vld [vmem:[#allocation2 + $0x112] sm:$0xff] }
 0x482   : > { %3960 = vrot.lane.b32.xlu1 %v12157_v19, %s9227_s26  ;;  %3958 = vrot.lane.b32.xlu0 %v12159_v29, %s9227_s26  ;;  %3816 = vst.msk [vmem:[#allocation3 + $0x50] sm:$0xff] %vm15225_vm12, %v3719_v42  ;;  %vm15229_vm12 = vmmov %vm15220_vm0 }
 0x486   : > { %3964 = vrot.lane.b32.xlu1 %v12167_v24, %s9227_s26  ;;  %3962 = vrot.lane.b32.xlu0 %v12169_v61, %s9227_s26  ;;  %v3725_v54 = vpop.permute.xlu1 %3724 }
 0x487   : > { %v3723_v48 = vpop.permute.xlu0 %3722  ;;  %3819 = vst.msk [vmem:[#allocation3 + $0x68] sm:$0xff] %vm15226_vm7, %v3725_v54  ;;  %vm15230_vm7 = vmmov %vm15220_vm0 }
 0x488   : > { %3818 = vst.msk [vmem:[#allocation3 + $0x60] sm:$0xff] %vm15227_vm10, %v3723_v48  ;;  %vm15231_vm10 = vmmov %vm15220_vm0 }
 0x48a   : > { %3968 = vrot.lane.b32.xlu1 %v12177_v55, %s9227_s26  ;;  %3966 = vrot.lane.b32.xlu0 %v12179_v44, %s9227_s26 }
 0x48b   : > { %v3729_v42 = vpop.permute.xlu1 %3728 }
 0x48c   : > { %v3727_v59 = vpop.permute.xlu0 %3726  ;;  %3821 = vst.msk [vmem:[#allocation3 + $0x78] sm:$0xff] %vm15228_vm11, %v3729_v42  ;;  %vm15232_vm11 = vmmov %vm15220_vm0 }
 0x48d   : > { %3820 = vst.msk [vmem:[#allocation3 + $0x70] sm:$0xff] %vm15220_vm0, %v3727_v59 }
 0x48e   : > { %3972 = vrot.lane.b32.xlu1 %v12187_v41, %s9227_s26  ;;  %3970 = vrot.lane.b32.xlu0 %v12189_v14, %s9227_s26 }
 0x492   : > { %3976 = vrot.lane.b32.xlu1 %v12197_v5, %s9227_s26  ;;  %3974 = vrot.lane.b32.xlu0 %v12199_v49, %s9227_s26  ;;  %v3733_v48 = vpop.permute.xlu1 %3732  ;;  %v3731_v54 = vpop.permute.xlu0 %3730 }
 0x493   : > { %3823 = vst.msk [vmem:[#allocation3 + $0x88] sm:$0xff] %vm15229_vm12, %v3733_v48  ;;  %vm15233_vm12 = vmmov %vm15220_vm0 }
 0x494   : > { %3822 = vst.msk [vmem:[#allocation3 + $0x80] sm:$0xff] %vm15230_vm7, %v3731_v54  ;;  %vm15234_vm7 = vmmov %vm15220_vm0 }
 0x496   : > { %3980 = vrot.lane.b32.xlu1 %v12207_v8, %s9227_s26  ;;  %3978 = vrot.lane.b32.xlu0 %v12209_v52, %s9227_s26 }
 0x498   : > { %v3737_v42 = vpop.permute.xlu1 %3736  ;;  %v3735_v59 = vpop.permute.xlu0 %3734 }
 0x499   : > { %3825 = vst.msk [vmem:[#allocation3 + $0x98] sm:$0xff] %vm15231_vm10, %v3737_v42  ;;  %vm15235_vm10 = vmmov %vm15220_vm0 }
 0x49a   : > { %3984 = vrot.lane.b32.xlu1 %v12217_v47, %s9227_s26  ;;  %3982 = vrot.lane.b32.xlu0 %v12219_v2, %s9227_s26  ;;  %3824 = vst.msk [vmem:[#allocation3 + $0x90] sm:$0xff] %vm15232_vm11, %v3735_v59  ;;  %vm15236_vm11 = vmmov %vm15220_vm0 }
 0x49e   : > { %4132 = vrot.lane.b32.xlu1 %v12077_v57, %s9228_s27  ;;  %4130 = vrot.lane.b32.xlu0 %v12079_v7, %s9228_s27  ;;  %v3741_v57 = vpop.permute.xlu1 %3740  ;;  %v3739_v7 = vpop.permute.xlu0 %3738 }
 0x49f   : > { %3827 = vst.msk [vmem:[#allocation3 + $0xa8] sm:$0xff] %vm15220_vm0, %v3741_v57  ;;  %v4277_v57 = vld [vmem:[#allocation2 + $0x2b] sm:$0xff] }
 0x4a0   : > { %3826 = vst.msk [vmem:[#allocation3 + $0xa0] sm:$0xff] %vm15233_vm12, %v3739_v7  ;;  %vm15237_vm12 = vmmov %vm15220_vm0  ;;  %v4276_v7 = vld [vmem:[#allocation2 + $0x23] sm:$0xff] }
 0x4a2   : > { %4136 = vrot.lane.b32.xlu1 %v12085_v50, %s9228_s27  ;;  %4134 = vrot.lane.b32.xlu0 %v12087_v3, %s9228_s27  ;;  %v3745_v50 = vpop.permute.xlu1 %3744 }
 0x4a3   : > { %v3743_v3 = vpop.permute.xlu0 %3742  ;;  %3829 = vst.msk [vmem:[#allocation3 + $0xb8] sm:$0xff] %vm15234_vm7, %v3745_v50  ;;  %vm15238_vm7 = vmmov %vm15220_vm0 }
 0x4a4   : > { %3828 = vst.msk [vmem:[#allocation3 + $0xb0] sm:$0xff] %vm15235_vm10, %v3743_v3  ;;  %vm15239_vm10 = vmmov %vm15220_vm0 }
 0x4a6   : > { %4140 = vrot.lane.b32.xlu1 %v12093_v38, %s9228_s27  ;;  %4138 = vrot.lane.b32.xlu0 %v12095_v35, %s9228_s27 }
 0x4a9   : > { %v3749_v38 = vpop.permute.xlu1 %3748  ;;  %v3747_v35 = vpop.permute.xlu0 %3746 }
 0x4aa   : > { %4144 = vrot.lane.b32.xlu1 %v12101_v17, %s9228_s27  ;;  %4142 = vrot.lane.b32.xlu0 %v12103_v36, %s9228_s27  ;;  %3831 = vst.msk [vmem:[#allocation3 + $0xc8] sm:$0xff] %vm15236_vm11, %v3749_v38  ;;  %vm15240_vm11 = vmmov %vm15220_vm0  ;;  %v4279_v38 = vld [vmem:[#allocation2 + $0x3b] sm:$0xff] }
 0x4ab   : > { %3830 = vst.msk [vmem:[#allocation3 + $0xc0] sm:$0xff] %vm15220_vm0, %v3747_v35  ;;  %v4278_v35 = vld [vmem:[#allocation2 + $0x33] sm:$0xff] }
 0x4ae   : > { %4148 = vrot.lane.b32.xlu1 %v12109_v53, %s9228_s27  ;;  %4146 = vrot.lane.b32.xlu0 %v12111_v39, %s9228_s27  ;;  %v3753_v17 = vpop.permute.xlu1 %3752  ;;  %v3751_v36 = vpop.permute.xlu0 %3750 }
 0x4af   : > { %3833 = vst.msk [vmem:[#allocation3 + $0xd8] sm:$0xff] %vm15237_vm12, %v3753_v17  ;;  %vm15241_vm12 = vmmov %vm15220_vm0 }
 0x4b0   : > { %3832 = vst.msk [vmem:[#allocation3 + $0xd0] sm:$0xff] %vm15238_vm7, %v3751_v36  ;;  %vm15242_vm7 = vmmov %vm15220_vm0 }
 0x4b2   : > { %4152 = vrot.lane.b32.xlu1 %v12117_v37, %s9228_s27  ;;  %4150 = vrot.lane.b32.xlu0 %v12119_v16, %s9228_s27 }
 0x4b3   : > { %v3757_v53 = vpop.permute.xlu1 %3756  ;;  %v3755_v39 = vpop.permute.xlu0 %3754 }
 0x4b4   : > { %3835 = vst.msk [vmem:[#allocation3 + $0xe8] sm:$0xff] %vm15239_vm10, %v3757_v53  ;;  %vm15243_vm10 = vmmov %vm15220_vm0  ;;  %v4281_v53 = vld [vmem:[#allocation2 + $0x4b] sm:$0xff] }
 0x4b5   : > { %3834 = vst.msk [vmem:[#allocation3 + $0xe0] sm:$0xff] %vm15240_vm11, %v3755_v39  ;;  %vm15244_vm11 = vmmov %vm15220_vm0  ;;  %v4280_v39 = vld [vmem:[#allocation2 + $0x43] sm:$0xff] }
 0x4b6   : > { %4156 = vrot.lane.b32.xlu1 %v12125_v43, %s9228_s27  ;;  %4154 = vrot.lane.b32.xlu0 %v12127_v26, %s9228_s27 }
 0x4ba   : > { %4160 = vrot.lane.b32.xlu1 %v12133_v46, %s9228_s27  ;;  %4158 = vrot.lane.b32.xlu0 %v12135_v6, %s9228_s27  ;;  %v3761_v37 = vpop.permute.xlu1 %3760  ;;  %v3759_v16 = vpop.permute.xlu0 %3758 }
 0x4bb   : > { %3837 = vst.msk [vmem:[#allocation3 + $0xf8] sm:$0xff] %vm15220_vm0, %v3761_v37 }
 0x4bc   : > { %3836 = vst.msk [vmem:[#allocation3 + $0xf0] sm:$0xff] %vm15241_vm12, %v3759_v16  ;;  %vm15245_vm12 = vcmask 195712  }
 0x4be   : > { %4164 = vrot.lane.b32.xlu1 %v12141_v33, %s9228_s27  ;;  %4162 = vrot.lane.b32.xlu0 %v12143_v56, %s9228_s27  ;;  %v3763_v26 = vpop.permute.xlu0 %3762 }
 0x4bf   : > { %v3765_v43 = vpop.permute.xlu1 %3764  ;;  %3838 = vst.msk [vmem:[#allocation3 + $0x100] sm:$0xff] %vm15243_vm10, %v3763_v26  ;;  %v4282_v26 = vld [vmem:[#allocation2 + $0x53] sm:$0xff] }
 0x4c0   : > { %3839 = vst.msk [vmem:[#allocation3 + $0x108] sm:$0xff] %vm15242_vm7, %v3765_v43  ;;  %vm15246_vm7 = vmmov %vm15245_vm12  ;;  %v4283_v43 = vld [vmem:[#allocation2 + $0x5b] sm:$0xff] }
 0x4c1   : > { %vm15247_vm10 = vmmov %vm15246_vm7 }
 0x4c2   : > { %4168 = vrot.lane.b32.xlu1 %v12149_v51, %s9228_s27  ;;  %4166 = vrot.lane.b32.xlu0 %v12151_v13, %s9228_s27 }
 0x4c4   : > { %v3769_v46 = vpop.permute.xlu1 %3768  ;;  %v3767_v6 = vpop.permute.xlu0 %3766 }
 0x4c5   : > { %3841 = vst.msk [vmem:[#allocation3 + $0x118] sm:$0xff] %vm15244_vm11, %v3769_v46  ;;  %vm15248_vm11 = vmmov %vm15246_vm7 }
 0x4c6   : > { %3840 = vst.msk [vmem:[#allocation3 + $0x110] sm:$0xff] %vm15220_vm0, %v3767_v6  ;;  %4172 = vrot.lane.b32.xlu1 %v12157_v19, %s9228_s27  ;;  %4170 = vrot.lane.b32.xlu0 %v12159_v29, %s9228_s27  ;;  %vm15249_vm0 = vmmov %vm15246_vm7 }
 0x4c8   : > { %v3917_v33 = vpop.permute.xlu1 %3916  ;;  %v3915_v56 = vpop.permute.xlu0 %3914 }
 0x4c9   : > { %4023 = vst.msk [vmem:[#allocation3 + $0x8] sm:$0xff] %vm15245_vm12, %v3917_v33  ;;  %vm15250_vm12 = vmmov %vm15249_vm0  ;;  %v4285_v33 = vld [vmem:[#allocation2 + $0x6b] sm:$0xff] }
 0x4ca   : > { %4022 = vst.msk [vmem:[#allocation3] sm:$0xff] %vm15246_vm7, %v3915_v56  ;;  %4176 = vrot.lane.b32.xlu1 %v12167_v24, %s9228_s27  ;;  %4174 = vrot.lane.b32.xlu0 %v12169_v61, %s9228_s27  ;;  %vm15251_vm7 = vmmov %vm15249_vm0  ;;  %v4284_v56 = vld [vmem:[#allocation2 + $0x63] sm:$0xff] }
 0x4cc   : > { %v3921_v51 = vpop.permute.xlu1 %3920  ;;  %v3919_v13 = vpop.permute.xlu0 %3918 }
 0x4cd   : > { %4025 = vst.msk [vmem:[#allocation3 + $0x18] sm:$0xff] %vm15247_vm10, %v3921_v51  ;;  %vm15252_vm10 = vmmov %vm15249_vm0 }
 0x4ce   : > { %4024 = vst.msk [vmem:[#allocation3 + $0x10] sm:$0xff] %vm15248_vm11, %v3919_v13  ;;  %4180 = vrot.lane.b32.xlu1 %v12177_v55, %s9228_s27  ;;  %4178 = vrot.lane.b32.xlu0 %v12179_v44, %s9228_s27  ;;  %vm15253_vm11 = vmmov %vm15249_vm0 }
 0x4d0   : > { %v3925_v19 = vpop.permute.xlu1 %3924  ;;  %v3923_v29 = vpop.permute.xlu0 %3922 }
 0x4d1   : > { %4027 = vst.msk [vmem:[#allocation3 + $0x28] sm:$0xff] %vm15249_vm0, %v3925_v19  ;;  %v4287_v19 = vld [vmem:[#allocation2 + $0x7b] sm:$0xff] }
 0x4d2   : > { %4026 = vst.msk [vmem:[#allocation3 + $0x20] sm:$0xff] %vm15250_vm12, %v3923_v29  ;;  %4184 = vrot.lane.b32.xlu1 %v12187_v41, %s9228_s27  ;;  %4182 = vrot.lane.b32.xlu0 %v12189_v14, %s9228_s27  ;;  %vm15254_vm12 = vmmov %vm15249_vm0  ;;  %v4286_v29 = vld [vmem:[#allocation2 + $0x73] sm:$0xff] }
 0x4d4   : > { %v3929_v24 = vpop.permute.xlu1 %3928  ;;  %v3927_v61 = vpop.permute.xlu0 %3926 }
 0x4d5   : > { %4029 = vst.msk [vmem:[#allocation3 + $0x38] sm:$0xff] %vm15251_vm7, %v3929_v24  ;;  %vm15255_vm7 = vmmov %vm15249_vm0 }
 0x4d6   : > { %4028 = vst.msk [vmem:[#allocation3 + $0x30] sm:$0xff] %vm15252_vm10, %v3927_v61  ;;  %4188 = vrot.lane.b32.xlu1 %v12197_v5, %s9228_s27  ;;  %4186 = vrot.lane.b32.xlu0 %v12199_v49, %s9228_s27  ;;  %vm15256_vm10 = vmmov %vm15249_vm0 }
 0x4d8   : > { %v3933_v55 = vpop.permute.xlu1 %3932  ;;  %v3931_v44 = vpop.permute.xlu0 %3930 }
 0x4d9   : > { %4031 = vst.msk [vmem:[#allocation3 + $0x48] sm:$0xff] %vm15253_vm11, %v3933_v55  ;;  %vm15257_vm11 = vmmov %vm15249_vm0  ;;  %v4289_v55 = vld [vmem:[#allocation2 + $0x8b] sm:$0xff] }
 0x4da   : > { %4030 = vst.msk [vmem:[#allocation3 + $0x40] sm:$0xff] %vm15249_vm0, %v3931_v44  ;;  %4192 = vrot.lane.b32.xlu1 %v12207_v8, %s9228_s27  ;;  %4190 = vrot.lane.b32.xlu0 %v12209_v52, %s9228_s27  ;;  %v4093_v8 = vld [vmem:[#allocation2 + $0x12a] sm:$0xff]  ;;  %v4092_v52 = vld [vmem:[#allocation2 + $0x122] sm:$0xff] }
 0x4db   : > { %v4288_v44 = vld [vmem:[#allocation2 + $0x83] sm:$0xff] }
 0x4dc   : > { %v3937_v41 = vpop.permute.xlu1 %3936  ;;  %v3935_v14 = vpop.permute.xlu0 %3934 }
 0x4dd   : > { %4033 = vst.msk [vmem:[#allocation3 + $0x58] sm:$0xff] %vm15254_vm12, %v3937_v41  ;;  %vm15258_vm12 = vmmov %vm15249_vm0 }
 0x4de   : > { %4032 = vst.msk [vmem:[#allocation3 + $0x50] sm:$0xff] %vm15255_vm7, %v3935_v14  ;;  %4196 = vrot.lane.b32.xlu1 %v12217_v47, %s9228_s27  ;;  %4194 = vrot.lane.b32.xlu0 %v12219_v2, %s9228_s27  ;;  %v4275_v47 = vld [vmem:[#allocation2 + $0x1b] sm:$0xff]  ;;  %v4274_v2 = vld [vmem:[#allocation2 + $0x13] sm:$0xff]  ;;  %vm15259_vm7 = vmmov %vm15249_vm0 }
 0x4e0   : > { %v3941_v5 = vpop.permute.xlu1 %3940  ;;  %v3939_v49 = vpop.permute.xlu0 %3938 }
 0x4e1   : > { %4035 = vst.msk [vmem:[#allocation3 + $0x68] sm:$0xff] %vm15256_vm10, %v3941_v5  ;;  %vm15260_vm10 = vmmov %vm15249_vm0  ;;  %v4291_v5 = vld [vmem:[#allocation2 + $0x9b] sm:$0xff] }
 0x4e2   : > { %4034 = vst.msk [vmem:[#allocation3 + $0x60] sm:$0xff] %vm15257_vm11, %v3939_v49  ;;  %4200 = vrot.lane.b32.xlu1 %v4093_v8, %s9228_s27  ;;  %4198 = vrot.lane.b32.xlu0 %v4092_v52, %s9228_s27  ;;  %vm15261_vm11 = vmmov %vm15249_vm0  ;;  %v4290_v49 = vld [vmem:[#allocation2 + $0x93] sm:$0xff] }
 0x4e4   : > { %v3945_v48 = vpop.permute.xlu1 %3944  ;;  %v3943_v54 = vpop.permute.xlu0 %3942 }
 0x4e5   : > { %4037 = vst.msk [vmem:[#allocation3 + $0x78] sm:$0xff] %vm15249_vm0, %v3945_v48  ;;  %v4293_v48 = vld [vmem:[#allocation2 + $0xab] sm:$0xff] }
 0x4e6   : > { %4036 = vst.msk [vmem:[#allocation3 + $0x70] sm:$0xff] %vm15258_vm12, %v3943_v54  ;;  %4348 = vrot.lane.b32.xlu1 %v4275_v47, %s9229_s28  ;;  %4346 = vrot.lane.b32.xlu0 %v4274_v2, %s9229_s28  ;;  %vm15262_vm12 = vmmov %vm15249_vm0  ;;  %v4292_v54 = vld [vmem:[#allocation2 + $0xa3] sm:$0xff] }
 0x4e8   : > { %v3949_v42 = vpop.permute.xlu1 %3948  ;;  %v3947_v59 = vpop.permute.xlu0 %3946 }
 0x4e9   : > { %4039 = vst.msk [vmem:[#allocation3 + $0x88] sm:$0xff] %vm15259_vm7, %v3949_v42  ;;  %vm15263_vm7 = vmmov %vm15249_vm0  ;;  %v4295_v42 = vld [vmem:[#allocation2 + $0xbb] sm:$0xff] }
 0x4ea   : > { %4038 = vst.msk [vmem:[#allocation3 + $0x80] sm:$0xff] %vm15260_vm10, %v3947_v59  ;;  %4352 = vrot.lane.b32.xlu1 %v4277_v57, %s9229_s28  ;;  %4350 = vrot.lane.b32.xlu0 %v4276_v7, %s9229_s28  ;;  %vm15264_vm10 = vmmov %vm15249_vm0  ;;  %v4294_v59 = vld [vmem:[#allocation2 + $0xb3] sm:$0xff] }
 0x4ec   : > { %v3953_v50 = vpop.permute.xlu1 %3952  ;;  %v3951_v3 = vpop.permute.xlu0 %3950 }
 0x4ed   : > { %4041 = vst.msk [vmem:[#allocation3 + $0x98] sm:$0xff] %vm15261_vm11, %v3953_v50  ;;  %vm15265_vm11 = vmmov %vm15249_vm0  ;;  %v4297_v50 = vld [vmem:[#allocation2 + $0xcb] sm:$0xff] }
 0x4ee   : > { %4040 = vst.msk [vmem:[#allocation3 + $0x90] sm:$0xff] %vm15249_vm0, %v3951_v3  ;;  %4356 = vrot.lane.b32.xlu1 %v4279_v38, %s9229_s28  ;;  %4354 = vrot.lane.b32.xlu0 %v4278_v35, %s9229_s28  ;;  %v4296_v3 = vld [vmem:[#allocation2 + $0xc3] sm:$0xff] }
 0x4f0   : > { %v3957_v17 = vpop.permute.xlu1 %3956  ;;  %v3955_v36 = vpop.permute.xlu0 %3954 }
 0x4f1   : > { %4043 = vst.msk [vmem:[#allocation3 + $0xa8] sm:$0xff] %vm15262_vm12, %v3957_v17  ;;  %vm15266_vm12 = vmmov %vm15249_vm0  ;;  %v4299_v17 = vld [vmem:[#allocation2 + $0xdb] sm:$0xff] }
 0x4f2   : > { %4042 = vst.msk [vmem:[#allocation3 + $0xa0] sm:$0xff] %vm15263_vm7, %v3955_v36  ;;  %4360 = vrot.lane.b32.xlu1 %v4281_v53, %s9229_s28  ;;  %4358 = vrot.lane.b32.xlu0 %v4280_v39, %s9229_s28  ;;  %vm15267_vm7 = vmmov %vm15249_vm0  ;;  %v4298_v36 = vld [vmem:[#allocation2 + $0xd3] sm:$0xff] }
 0x4f4   : > { %v3961_v37 = vpop.permute.xlu1 %3960  ;;  %v3959_v16 = vpop.permute.xlu0 %3958 }
 0x4f5   : > { %4045 = vst.msk [vmem:[#allocation3 + $0xb8] sm:$0xff] %vm15264_vm10, %v3961_v37  ;;  %vm15268_vm10 = vmmov %vm15249_vm0  ;;  %v4301_v37 = vld [vmem:[#allocation2 + $0xeb] sm:$0xff] }
 0x4f6   : > { %4044 = vst.msk [vmem:[#allocation3 + $0xb0] sm:$0xff] %vm15265_vm11, %v3959_v16  ;;  %4364 = vrot.lane.b32.xlu1 %v4283_v43, %s9229_s28  ;;  %4362 = vrot.lane.b32.xlu0 %v4282_v26, %s9229_s28  ;;  %vm15269_vm11 = vmmov %vm15249_vm0  ;;  %v4300_v16 = vld [vmem:[#allocation2 + $0xe3] sm:$0xff] }
 0x4f8   : > { %v3965_v46 = vpop.permute.xlu1 %3964  ;;  %v3963_v6 = vpop.permute.xlu0 %3962 }
 0x4f9   : > { %4047 = vst.msk [vmem:[#allocation3 + $0xc8] sm:$0xff] %vm15249_vm0, %v3965_v46  ;;  %v4303_v46 = vld [vmem:[#allocation2 + $0xfb] sm:$0xff] }
 0x4fa   : > { %4046 = vst.msk [vmem:[#allocation3 + $0xc0] sm:$0xff] %vm15266_vm12, %v3963_v6  ;;  %4368 = vrot.lane.b32.xlu1 %v4285_v33, %s9229_s28  ;;  %4366 = vrot.lane.b32.xlu0 %v4284_v56, %s9229_s28  ;;  %vm15270_vm12 = vmmov %vm15249_vm0  ;;  %v4302_v6 = vld [vmem:[#allocation2 + $0xf3] sm:$0xff] }
 0x4fc   : > { %v3969_v51 = vpop.permute.xlu1 %3968  ;;  %v3967_v13 = vpop.permute.xlu0 %3966 }
 0x4fd   : > { %4049 = vst.msk [vmem:[#allocation3 + $0xd8] sm:$0xff] %vm15267_vm7, %v3969_v51  ;;  %vm15271_vm7 = vmmov %vm15249_vm0  ;;  %v4305_v51 = vld [vmem:[#allocation2 + $0x10b] sm:$0xff] }
 0x4fe   : > { %4048 = vst.msk [vmem:[#allocation3 + $0xd0] sm:$0xff] %vm15268_vm10, %v3967_v13  ;;  %4372 = vrot.lane.b32.xlu1 %v4287_v19, %s9229_s28  ;;  %4370 = vrot.lane.b32.xlu0 %v4286_v29, %s9229_s28  ;;  %vm15272_vm10 = vmmov %vm15249_vm0  ;;  %v4304_v13 = vld [vmem:[#allocation2 + $0x103] sm:$0xff] }
 0x500   : > { %v3973_v24 = vpop.permute.xlu1 %3972  ;;  %v3971_v61 = vpop.permute.xlu0 %3970 }
 0x501   : > { %4051 = vst.msk [vmem:[#allocation3 + $0xe8] sm:$0xff] %vm15269_vm11, %v3973_v24  ;;  %vm15273_vm11 = vmmov %vm15249_vm0  ;;  %v4307_v24 = vld [vmem:[#allocation2 + $0x11b] sm:$0xff] }
 0x502   : > { %4050 = vst.msk [vmem:[#allocation3 + $0xe0] sm:$0xff] %vm15249_vm0, %v3971_v61  ;;  %4376 = vrot.lane.b32.xlu1 %v4289_v55, %s9229_s28  ;;  %4374 = vrot.lane.b32.xlu0 %v4288_v44, %s9229_s28  ;;  %v4306_v61 = vld [vmem:[#allocation2 + $0x113] sm:$0xff] }
 0x504   : > { %v3977_v41 = vpop.permute.xlu1 %3976  ;;  %v3975_v14 = vpop.permute.xlu0 %3974 }
 0x505   : > { %4053 = vst.msk [vmem:[#allocation3 + $0xf8] sm:$0xff] %vm15270_vm12, %v3977_v41  ;;  %vm15274_vm12 = vmmov %vm15249_vm0  ;;  %v4309_v41 = vld [vmem:[#allocation2 + $0x12b] sm:$0xff] }
 0x506   : > { %4052 = vst.msk [vmem:[#allocation3 + $0xf0] sm:$0xff] %vm15271_vm7, %v3975_v14  ;;  %4380 = vrot.lane.b32.xlu1 %v4291_v5, %s9229_s28  ;;  %4378 = vrot.lane.b32.xlu0 %v4290_v49, %s9229_s28  ;;  %vm15275_vm7 = vcmask 261312   ;;  %v4308_v14 = vld [vmem:[#allocation2 + $0x123] sm:$0xff] }
 0x508   : > { %v3981_v8 = vpop.permute.xlu1 %3980  ;;  %v3979_v52 = vpop.permute.xlu0 %3978 }
 0x509   : > { %4055 = vst.msk [vmem:[#allocation3 + $0x108] sm:$0xff] %vm15272_vm10, %v3981_v8  ;;  %vm15276_vm10 = vmmov %vm15275_vm7  ;;  %v4491_v8 = vld [vmem:[#allocation2 + $0x1c] sm:$0xff] }
 0x50a   : > { %4054 = vst.msk [vmem:[#allocation3 + $0x100] sm:$0xff] %vm15273_vm11, %v3979_v52  ;;  %4384 = vrot.lane.b32.xlu1 %v4293_v48, %s9229_s28  ;;  %4382 = vrot.lane.b32.xlu0 %v4292_v54, %s9229_s28  ;;  %vm15277_vm11 = vmmov %vm15275_vm7  ;;  %v4490_v52 = vld [vmem:[#allocation2 + $0x14] sm:$0xff] }
 0x50c   : > { %v3985_v47 = vpop.permute.xlu1 %3984  ;;  %v3983_v2 = vpop.permute.xlu0 %3982 }
 0x50d   : > { %4057 = vst.msk [vmem:[#allocation3 + $0x118] sm:$0xff] %vm15249_vm0, %v3985_v47  ;;  %vm15278_vm0 = vmmov %vm15275_vm7  ;;  %v12409_v47 = vld [vmem:[#allocation2 + $0x2c] sm:$0xff] }
 0x50e   : > { %4056 = vst.msk [vmem:[#allocation3 + $0x110] sm:$0xff] %vm15274_vm12, %v3983_v2  ;;  %4388 = vrot.lane.b32.xlu1 %v4295_v42, %s9229_s28  ;;  %4386 = vrot.lane.b32.xlu0 %v4294_v59, %s9229_s28  ;;  %vm15279_vm12 = vmmov %vm15278_vm0  ;;  %v12411_v2 = vld [vmem:[#allocation2 + $0x24] sm:$0xff] }
 0x510   : > { %v4133_v57 = vpop.permute.xlu1 %4132  ;;  %v4131_v7 = vpop.permute.xlu0 %4130 }
 0x511   : > { %4239 = vst.msk [vmem:[#allocation3 + $0x8] sm:$0xff] %vm15275_vm7, %v4133_v57  ;;  %vm15280_vm7 = vmmov %vm15278_vm0  ;;  %v12419_v57 = vld [vmem:[#allocation2 + $0x3c] sm:$0xff] }
 0x512   : > { %4238 = vst.msk [vmem:[#allocation3] sm:$0xff] %vm15276_vm10, %v4131_v7  ;;  %4392 = vrot.lane.b32.xlu1 %v4297_v50, %s9229_s28  ;;  %4390 = vrot.lane.b32.xlu0 %v4296_v3, %s9229_s28  ;;  %vm15281_vm10 = vmmov %vm15278_vm0  ;;  %v12421_v7 = vld [vmem:[#allocation2 + $0x34] sm:$0xff] }
 0x514   : > { %v4137_v38 = vpop.permute.xlu1 %4136  ;;  %v4135_v35 = vpop.permute.xlu0 %4134 }
 0x515   : > { %4241 = vst.msk [vmem:[#allocation3 + $0x18] sm:$0xff] %vm15277_vm11, %v4137_v38  ;;  %vm15282_vm11 = vmmov %vm15278_vm0  ;;  %v12429_v38 = vld [vmem:[#allocation2 + $0x4c] sm:$0xff] }
 0x516   : > { %4240 = vst.msk [vmem:[#allocation3 + $0x10] sm:$0xff] %vm15278_vm0, %v4135_v35  ;;  %4396 = vrot.lane.b32.xlu1 %v4299_v17, %s9229_s28  ;;  %4394 = vrot.lane.b32.xlu0 %v4298_v36, %s9229_s28  ;;  %v12431_v35 = vld [vmem:[#allocation2 + $0x44] sm:$0xff] }
 0x518   : > { %v4141_v53 = vpop.permute.xlu1 %4140  ;;  %v4139_v39 = vpop.permute.xlu0 %4138 }
 0x519   : > { %4243 = vst.msk [vmem:[#allocation3 + $0x28] sm:$0xff] %vm15279_vm12, %v4141_v53  ;;  %vm15283_vm12 = vmmov %vm15278_vm0  ;;  %v12439_v53 = vld [vmem:[#allocation2 + $0x5c] sm:$0xff] }
 0x51a   : > { %4242 = vst.msk [vmem:[#allocation3 + $0x20] sm:$0xff] %vm15280_vm7, %v4139_v39  ;;  %4400 = vrot.lane.b32.xlu1 %v4301_v37, %s9229_s28  ;;  %4398 = vrot.lane.b32.xlu0 %v4300_v16, %s9229_s28  ;;  %vm15284_vm7 = vmmov %vm15278_vm0  ;;  %v12441_v39 = vld [vmem:[#allocation2 + $0x54] sm:$0xff] }
 0x51c   : > { %v4145_v43 = vpop.permute.xlu1 %4144  ;;  %v4143_v26 = vpop.permute.xlu0 %4142 }
 0x51d   : > { %4245 = vst.msk [vmem:[#allocation3 + $0x38] sm:$0xff] %vm15281_vm10, %v4145_v43  ;;  %vm15285_vm10 = vmmov %vm15278_vm0  ;;  %v12449_v43 = vld [vmem:[#allocation2 + $0x6c] sm:$0xff] }
 0x51e   : > { %4244 = vst.msk [vmem:[#allocation3 + $0x30] sm:$0xff] %vm15282_vm11, %v4143_v26  ;;  %4404 = vrot.lane.b32.xlu1 %v4303_v46, %s9229_s28  ;;  %4402 = vrot.lane.b32.xlu0 %v4302_v6, %s9229_s28  ;;  %vm15286_vm11 = vmmov %vm15278_vm0  ;;  %v12451_v26 = vld [vmem:[#allocation2 + $0x64] sm:$0xff] }
 0x520   : > { %v4149_v33 = vpop.permute.xlu1 %4148  ;;  %v4147_v56 = vpop.permute.xlu0 %4146 }
 0x521   : > { %4247 = vst.msk [vmem:[#allocation3 + $0x48] sm:$0xff] %vm15278_vm0, %v4149_v33  ;;  %v12459_v33 = vld [vmem:[#allocation2 + $0x7c] sm:$0xff] }
 0x522   : > { %4246 = vst.msk [vmem:[#allocation3 + $0x40] sm:$0xff] %vm15283_vm12, %v4147_v56  ;;  %4408 = vrot.lane.b32.xlu1 %v4305_v51, %s9229_s28  ;;  %4406 = vrot.lane.b32.xlu0 %v4304_v13, %s9229_s28  ;;  %vm15287_vm12 = vmmov %vm15278_vm0  ;;  %v12461_v56 = vld [vmem:[#allocation2 + $0x74] sm:$0xff] }
 0x524   : > { %v4153_v19 = vpop.permute.xlu1 %4152  ;;  %v4151_v29 = vpop.permute.xlu0 %4150 }
 0x525   : > { %4249 = vst.msk [vmem:[#allocation3 + $0x58] sm:$0xff] %vm15284_vm7, %v4153_v19  ;;  %vm15288_vm7 = vmmov %vm15278_vm0  ;;  %v12469_v19 = vld [vmem:[#allocation2 + $0x8c] sm:$0xff] }
 0x526   : > { %4248 = vst.msk [vmem:[#allocation3 + $0x50] sm:$0xff] %vm15285_vm10, %v4151_v29  ;;  %4412 = vrot.lane.b32.xlu1 %v4307_v24, %s9229_s28  ;;  %4410 = vrot.lane.b32.xlu0 %v4306_v61, %s9229_s28  ;;  %vm15289_vm10 = vmmov %vm15278_vm0  ;;  %v12471_v29 = vld [vmem:[#allocation2 + $0x84] sm:$0xff] }
 0x528   : > { %v4157_v55 = vpop.permute.xlu1 %4156  ;;  %v4155_v44 = vpop.permute.xlu0 %4154 }
 0x529   : > { %4251 = vst.msk [vmem:[#allocation3 + $0x68] sm:$0xff] %vm15286_vm11, %v4157_v55  ;;  %vm15290_vm11 = vmmov %vm15278_vm0  ;;  %v12479_v55 = vld [vmem:[#allocation2 + $0x9c] sm:$0xff] }
 0x52a   : > { %4250 = vst.msk [vmem:[#allocation3 + $0x60] sm:$0xff] %vm15278_vm0, %v4155_v44  ;;  %4416 = vrot.lane.b32.xlu1 %v4309_v41, %s9229_s28  ;;  %4414 = vrot.lane.b32.xlu0 %v4308_v14, %s9229_s28  ;;  %v12481_v44 = vld [vmem:[#allocation2 + $0x94] sm:$0xff] }
 0x52c   : > { %v4161_v5 = vpop.permute.xlu1 %4160  ;;  %v4159_v49 = vpop.permute.xlu0 %4158 }
 0x52d   : > { %4253 = vst.msk [vmem:[#allocation3 + $0x78] sm:$0xff] %vm15287_vm12, %v4161_v5  ;;  %vm15291_vm12 = vmmov %vm15278_vm0  ;;  %v12489_v5 = vld [vmem:[#allocation2 + $0xac] sm:$0xff] }
 0x52e   : > { %4252 = vst.msk [vmem:[#allocation3 + $0x70] sm:$0xff] %vm15288_vm7, %v4159_v49  ;;  %4564 = vrot.lane.b32.xlu1 %v4491_v8, %s9230_s29  ;;  %4562 = vrot.lane.b32.xlu0 %v4490_v52, %s9230_s29  ;;  %vm15292_vm7 = vmmov %vm15278_vm0  ;;  %v12491_v49 = vld [vmem:[#allocation2 + $0xa4] sm:$0xff] }
 0x530   : > { %v4165_v48 = vpop.permute.xlu1 %4164  ;;  %v4163_v54 = vpop.permute.xlu0 %4162 }
 0x531   : > { %4255 = vst.msk [vmem:[#allocation3 + $0x88] sm:$0xff] %vm15289_vm10, %v4165_v48  ;;  %vm15293_vm10 = vmmov %vm15278_vm0  ;;  %v12499_v48 = vld [vmem:[#allocation2 + $0xbc] sm:$0xff] }
 0x532   : > { %4254 = vst.msk [vmem:[#allocation3 + $0x80] sm:$0xff] %vm15290_vm11, %v4163_v54  ;;  %4568 = vrot.lane.b32.xlu1 %v12409_v47, %s9230_s29  ;;  %4566 = vrot.lane.b32.xlu0 %v12411_v2, %s9230_s29  ;;  %vm15294_vm11 = vmmov %vm15278_vm0  ;;  %v12501_v54 = vld [vmem:[#allocation2 + $0xb4] sm:$0xff] }
 0x534   : > { %v4169_v42 = vpop.permute.xlu1 %4168  ;;  %v4167_v59 = vpop.permute.xlu0 %4166 }
 0x535   : > { %4257 = vst.msk [vmem:[#allocation3 + $0x98] sm:$0xff] %vm15278_vm0, %v4169_v42 }
 0x536   : > { %4256 = vst.msk [vmem:[#allocation3 + $0x90] sm:$0xff] %vm15291_vm12, %v4167_v59  ;;  %4572 = vrot.lane.b32.xlu1 %v12419_v57, %s9230_s29  ;;  %4570 = vrot.lane.b32.xlu0 %v12421_v7, %s9230_s29  ;;  %vm15295_vm12 = vmmov %vm15278_vm0 }
 0x538   : > { %v4173_v50 = vpop.permute.xlu1 %4172  ;;  %v4171_v3 = vpop.permute.xlu0 %4170 }
 0x539   : > { %4259 = vst.msk [vmem:[#allocation3 + $0xa8] sm:$0xff] %vm15292_vm7, %v4173_v50  ;;  %vm15296_vm7 = vmmov %vm15278_vm0  ;;  %v12509_v50 = vld [vmem:[#allocation2 + $0xcc] sm:$0xff] }
 0x53a   : > { %4258 = vst.msk [vmem:[#allocation3 + $0xa0] sm:$0xff] %vm15293_vm10, %v4171_v3  ;;  %4576 = vrot.lane.b32.xlu1 %v12429_v38, %s9230_s29  ;;  %4574 = vrot.lane.b32.xlu0 %v12431_v35, %s9230_s29  ;;  %vm15297_vm10 = vmmov %vm15278_vm0  ;;  %v12511_v3 = vld [vmem:[#allocation2 + $0xc4] sm:$0xff] }
 0x53c   : > { %v4177_v17 = vpop.permute.xlu1 %4176  ;;  %v4175_v36 = vpop.permute.xlu0 %4174 }
 0x53d   : > { %4261 = vst.msk [vmem:[#allocation3 + $0xb8] sm:$0xff] %vm15294_vm11, %v4177_v17  ;;  %vm15298_vm11 = vmmov %vm15278_vm0 }
 0x53e   : > { %4260 = vst.msk [vmem:[#allocation3 + $0xb0] sm:$0xff] %vm15278_vm0, %v4175_v36  ;;  %4580 = vrot.lane.b32.xlu1 %v12439_v53, %s9230_s29  ;;  %4578 = vrot.lane.b32.xlu0 %v12441_v39, %s9230_s29 }
 0x540   : > { %v4181_v37 = vpop.permute.xlu1 %4180  ;;  %v4179_v16 = vpop.permute.xlu0 %4178 }
 0x541   : > { %4263 = vst.msk [vmem:[#allocation3 + $0xc8] sm:$0xff] %vm15295_vm12, %v4181_v37  ;;  %vm15299_vm12 = vmmov %vm15278_vm0  ;;  %v12519_v37 = vld [vmem:[#allocation2 + $0xdc] sm:$0xff] }
 0x542   : > { %4262 = vst.msk [vmem:[#allocation3 + $0xc0] sm:$0xff] %vm15296_vm7, %v4179_v16  ;;  %4584 = vrot.lane.b32.xlu1 %v12449_v43, %s9230_s29  ;;  %4582 = vrot.lane.b32.xlu0 %v12451_v26, %s9230_s29  ;;  %vm15300_vm7 = vmmov %vm15278_vm0  ;;  %v12521_v16 = vld [vmem:[#allocation2 + $0xd4] sm:$0xff] }
 0x544   : > { %v4185_v46 = vpop.permute.xlu1 %4184  ;;  %v4183_v6 = vpop.permute.xlu0 %4182 }
 0x545   : > { %4265 = vst.msk [vmem:[#allocation3 + $0xd8] sm:$0xff] %vm15297_vm10, %v4185_v46  ;;  %vm15301_vm10 = vmmov %vm15278_vm0 }
 0x546   : > { %4264 = vst.msk [vmem:[#allocation3 + $0xd0] sm:$0xff] %vm15298_vm11, %v4183_v6  ;;  %4588 = vrot.lane.b32.xlu1 %v12459_v33, %s9230_s29  ;;  %4586 = vrot.lane.b32.xlu0 %v12461_v56, %s9230_s29  ;;  %vm15302_vm11 = vmmov %vm15278_vm0 }
 0x548   : > { %v4189_v51 = vpop.permute.xlu1 %4188  ;;  %v4187_v13 = vpop.permute.xlu0 %4186 }
 0x549   : > { %4267 = vst.msk [vmem:[#allocation3 + $0xe8] sm:$0xff] %vm15278_vm0, %v4189_v51  ;;  %v12529_v51 = vld [vmem:[#allocation2 + $0xec] sm:$0xff] }
 0x54a   : > { %4266 = vst.msk [vmem:[#allocation3 + $0xe0] sm:$0xff] %vm15299_vm12, %v4187_v13  ;;  %4592 = vrot.lane.b32.xlu1 %v12469_v19, %s9230_s29  ;;  %4590 = vrot.lane.b32.xlu0 %v12471_v29, %s9230_s29  ;;  %vm15303_vm12 = vmmov %vm15278_vm0  ;;  %v12531_v13 = vld [vmem:[#allocation2 + $0xe4] sm:$0xff] }
 0x54c   : > { %v4193_v24 = vpop.permute.xlu1 %4192  ;;  %v4191_v61 = vpop.permute.xlu0 %4190 }
 0x54d   : > { %4269 = vst.msk [vmem:[#allocation3 + $0xf8] sm:$0xff] %vm15300_vm7, %v4193_v24  ;;  %vm15304_vm7 = vmmov %vm15278_vm0 }
 0x54e   : > { %4268 = vst.msk [vmem:[#allocation3 + $0xf0] sm:$0xff] %vm15301_vm10, %v4191_v61  ;;  %4596 = vrot.lane.b32.xlu1 %v12479_v55, %s9230_s29  ;;  %4594 = vrot.lane.b32.xlu0 %v12481_v44, %s9230_s29  ;;  %vm15305_vm10 = vcmask 326912  }
 0x550   : > { %v4197_v41 = vpop.permute.xlu1 %4196  ;;  %v4195_v14 = vpop.permute.xlu0 %4194 }
 0x551   : > { %4271 = vst.msk [vmem:[#allocation3 + $0x108] sm:$0xff] %vm15302_vm11, %v4197_v41  ;;  %vm15306_vm11 = vmmov %vm15305_vm10  ;;  %v12539_v41 = vld [vmem:[#allocation2 + $0xfc] sm:$0xff] }
 0x552   : > { %4270 = vst.msk [vmem:[#allocation3 + $0x100] sm:$0xff] %vm15278_vm0, %v4195_v14  ;;  %4600 = vrot.lane.b32.xlu1 %v12489_v5, %s9230_s29  ;;  %4598 = vrot.lane.b32.xlu0 %v12491_v49, %s9230_s29  ;;  %vm15307_vm0 = vmmov %vm15305_vm10  ;;  %v12541_v14 = vld [vmem:[#allocation2 + $0xf4] sm:$0xff] }
 0x554   : > { %v4201_v8 = vpop.permute.xlu1 %4200  ;;  %v4199_v52 = vpop.permute.xlu0 %4198 }
 0x555   : > { %4273 = vst.msk [vmem:[#allocation3 + $0x118] sm:$0xff] %vm15303_vm12, %v4201_v8  ;;  %vm15308_vm12 = vmmov %vm15307_vm0 }
 0x556   : > { %4272 = vst.msk [vmem:[#allocation3 + $0x110] sm:$0xff] %vm15304_vm7, %v4199_v52  ;;  %4604 = vrot.lane.b32.xlu1 %v12499_v48, %s9230_s29  ;;  %4602 = vrot.lane.b32.xlu0 %v12501_v54, %s9230_s29  ;;  %vm15309_vm7 = vmmov %vm15307_vm0 }
 0x558   : > { %v4349_v42 = vpop.permute.xlu1 %4348  ;;  %v4347_v59 = vpop.permute.xlu0 %4346 }
 0x559   : > { %4455 = vst.msk [vmem:[#allocation3 + $0x8] sm:$0xff] %vm15305_vm10, %v4349_v42  ;;  %vm15310_vm10 = vmmov %vm15307_vm0  ;;  %v12549_v42 = vld [vmem:[#allocation2 + $0x10c] sm:$0xff] }
 0x55a   : > { %4454 = vst.msk [vmem:[#allocation3] sm:$0xff] %vm15306_vm11, %v4347_v59  ;;  %4608 = vrot.lane.b32.xlu1 %v12509_v50, %s9230_s29  ;;  %4606 = vrot.lane.b32.xlu0 %v12511_v3, %s9230_s29  ;;  %vm15311_vm11 = vmmov %vm15307_vm0  ;;  %v12551_v59 = vld [vmem:[#allocation2 + $0x104] sm:$0xff] }
 0x55c   : > { %v4353_v17 = vpop.permute.xlu1 %4352  ;;  %v4351_v36 = vpop.permute.xlu0 %4350 }
 0x55d   : > { %4457 = vst.msk [vmem:[#allocation3 + $0x18] sm:$0xff] %vm15307_vm0, %v4353_v17 }
 0x55e   : > { %4456 = vst.msk [vmem:[#allocation3 + $0x10] sm:$0xff] %vm15308_vm12, %v4351_v36  ;;  %4612 = vrot.lane.b32.xlu1 %v12519_v37, %s9230_s29  ;;  %4610 = vrot.lane.b32.xlu0 %v12521_v16, %s9230_s29  ;;  %vm15312_vm12 = vmmov %vm15307_vm0 }
 0x560   : > { %v4357_v46 = vpop.permute.xlu1 %4356  ;;  %v4355_v6 = vpop.permute.xlu0 %4354 }
 0x561   : > { %4459 = vst.msk [vmem:[#allocation3 + $0x28] sm:$0xff] %vm15309_vm7, %v4357_v46  ;;  %vm15313_vm7 = vmmov %vm15307_vm0  ;;  %v12559_v46 = vld [vmem:[#allocation2 + $0x11c] sm:$0xff] }
 0x562   : > { %4458 = vst.msk [vmem:[#allocation3 + $0x20] sm:$0xff] %vm15310_vm10, %v4355_v6  ;;  %4616 = vrot.lane.b32.xlu1 %v12529_v51, %s9230_s29  ;;  %4614 = vrot.lane.b32.xlu0 %v12531_v13, %s9230_s29  ;;  %vm15314_vm10 = vmmov %vm15307_vm0  ;;  %v12561_v6 = vld [vmem:[#allocation2 + $0x114] sm:$0xff] }
 0x564   : > { %v4361_v24 = vpop.permute.xlu1 %4360  ;;  %v4359_v61 = vpop.permute.xlu0 %4358 }
 0x565   : > { %4461 = vst.msk [vmem:[#allocation3 + $0x38] sm:$0xff] %vm15311_vm11, %v4361_v24  ;;  %vm15315_vm11 = vmmov %vm15307_vm0 }
 0x566   : > { %4460 = vst.msk [vmem:[#allocation3 + $0x30] sm:$0xff] %vm15307_vm0, %v4359_v61  ;;  %4620 = vrot.lane.b32.xlu1 %v12539_v41, %s9230_s29  ;;  %4618 = vrot.lane.b32.xlu0 %v12541_v14, %s9230_s29 }
 0x568   : > { %v4365_v8 = vpop.permute.xlu1 %4364  ;;  %v4363_v52 = vpop.permute.xlu0 %4362 }
 0x569   : > { %4463 = vst.msk [vmem:[#allocation3 + $0x48] sm:$0xff] %vm15312_vm12, %v4365_v8  ;;  %vm15316_vm12 = vmmov %vm15307_vm0  ;;  %v12569_v8 = vld [vmem:[#allocation2 + $0x12c] sm:$0xff] }
 0x56a   : > { %4462 = vst.msk [vmem:[#allocation3 + $0x40] sm:$0xff] %vm15313_vm7, %v4363_v52  ;;  %4624 = vrot.lane.b32.xlu1 %v12549_v42, %s9230_s29  ;;  %4622 = vrot.lane.b32.xlu0 %v12551_v59, %s9230_s29  ;;  %v12571_v52 = vld [vmem:[#allocation2 + $0x124] sm:$0xff]  ;;  %vm15317_vm7 = vmmov %vm15307_vm0 }
 0x56c   : > { %v4369_v17 = vpop.permute.xlu1 %4368  ;;  %v4367_v36 = vpop.permute.xlu0 %4366 }
 0x56d   : > { %4465 = vst.msk [vmem:[#allocation3 + $0x58] sm:$0xff] %vm15314_vm10, %v4369_v17  ;;  %vm15318_vm10 = vmmov %vm15307_vm0 }
 0x56e   : > { %4464 = vst.msk [vmem:[#allocation3 + $0x50] sm:$0xff] %vm15315_vm11, %v4367_v36  ;;  %4628 = vrot.lane.b32.xlu1 %v12559_v46, %s9230_s29  ;;  %4626 = vrot.lane.b32.xlu0 %v12561_v6, %s9230_s29  ;;  %vm15319_vm11 = vmmov %vm15307_vm0 }
 0x570   : > { %v4373_v24 = vpop.permute.xlu1 %4372  ;;  %v4371_v61 = vpop.permute.xlu0 %4370 }
 0x571   : > { %4467 = vst.msk [vmem:[#allocation3 + $0x68] sm:$0xff] %vm15307_vm0, %v4373_v24 }
 0x572   : > { %4466 = vst.msk [vmem:[#allocation3 + $0x60] sm:$0xff] %vm15316_vm12, %v4371_v61  ;;  %4632 = vrot.lane.b32.xlu1 %v12569_v8, %s9230_s29  ;;  %4630 = vrot.lane.b32.xlu0 %v12571_v52, %s9230_s29  ;;  %vm15320_vm12 = vmmov %vm15307_vm0 }
 0x574   : > { %v4377_v17 = vpop.permute.xlu1 %4376  ;;  %v4375_v36 = vpop.permute.xlu0 %4374 }
 0x575   : > { %4469 = vst.msk [vmem:[#allocation3 + $0x78] sm:$0xff] %vm15317_vm7, %v4377_v17  ;;  %vm15321_vm7 = vmmov %vm15307_vm0 }
 0x576   : > { %4468 = vst.msk [vmem:[#allocation3 + $0x70] sm:$0xff] %vm15318_vm10, %v4375_v36  ;;  %4780 = vrot.lane.b32.xlu1 %v12409_v47, %s9231_s30  ;;  %4778 = vrot.lane.b32.xlu0 %v12411_v2, %s9231_s30  ;;  %vm15322_vm10 = vmmov %vm15307_vm0 }
 0x578   : > { %v4381_v24 = vpop.permute.xlu1 %4380  ;;  %v4379_v61 = vpop.permute.xlu0 %4378 }
 0x579   : > { %4471 = vst.msk [vmem:[#allocation3 + $0x88] sm:$0xff] %vm15319_vm11, %v4381_v24  ;;  %vm15323_vm11 = vmmov %vm15307_vm0 }
 0x57a   : > { %4470 = vst.msk [vmem:[#allocation3 + $0x80] sm:$0xff] %vm15307_vm0, %v4379_v61  ;;  %4784 = vrot.lane.b32.xlu1 %v12419_v57, %s9231_s30  ;;  %4782 = vrot.lane.b32.xlu0 %v12421_v7, %s9231_s30 }
 0x57c   : > { %v4385_v17 = vpop.permute.xlu1 %4384  ;;  %v4383_v36 = vpop.permute.xlu0 %4382 }
 0x57d   : > { %4473 = vst.msk [vmem:[#allocation3 + $0x98] sm:$0xff] %vm15320_vm12, %v4385_v17  ;;  %vm15324_vm12 = vmmov %vm15307_vm0 }
 0x57e   : > { %4472 = vst.msk [vmem:[#allocation3 + $0x90] sm:$0xff] %vm15321_vm7, %v4383_v36  ;;  %4788 = vrot.lane.b32.xlu1 %v12429_v38, %s9231_s30  ;;  %4786 = vrot.lane.b32.xlu0 %v12431_v35, %s9231_s30  ;;  %vm15325_vm7 = vmmov %vm15307_vm0 }
 0x580   : > { %v4389_v47 = vpop.permute.xlu1 %4388  ;;  %v4387_v2 = vpop.permute.xlu0 %4386 }
 0x581   : > { %4475 = vst.msk [vmem:[#allocation3 + $0xa8] sm:$0xff] %vm15322_vm10, %v4389_v47  ;;  %vm15326_vm10 = vmmov %vm15307_vm0  ;;  %v4925_v47 = vld [vmem:[#allocation2 + $0x3d] sm:$0xff] }
 0x582   : > { %4474 = vst.msk [vmem:[#allocation3 + $0xa0] sm:$0xff] %vm15323_vm11, %v4387_v2  ;;  %4792 = vrot.lane.b32.xlu1 %v12439_v53, %s9231_s30  ;;  %4790 = vrot.lane.b32.xlu0 %v12441_v39, %s9231_s30  ;;  %vm15327_vm11 = vmmov %vm15307_vm0  ;;  %v4924_v2 = vld [vmem:[#allocation2 + $0x35] sm:$0xff] }
 0x584   : > { %v4393_v57 = vpop.permute.xlu1 %4392  ;;  %v4391_v7 = vpop.permute.xlu0 %4390 }
 0x585   : > { %4477 = vst.msk [vmem:[#allocation3 + $0xb8] sm:$0xff] %vm15307_vm0, %v4393_v57 }
 0x586   : > { %4476 = vst.msk [vmem:[#allocation3 + $0xb0] sm:$0xff] %vm15324_vm12, %v4391_v7  ;;  %4796 = vrot.lane.b32.xlu1 %v12449_v43, %s9231_s30  ;;  %4794 = vrot.lane.b32.xlu0 %v12451_v26, %s9231_s30  ;;  %vm15328_vm12 = vmmov %vm15307_vm0 }
 0x588   : > { %v4397_v38 = vpop.permute.xlu1 %4396  ;;  %v4395_v35 = vpop.permute.xlu0 %4394 }
 0x589   : > { %4479 = vst.msk [vmem:[#allocation3 + $0xc8] sm:$0xff] %vm15325_vm7, %v4397_v38  ;;  %vm15329_vm7 = vmmov %vm15307_vm0  ;;  %v4927_v38 = vld [vmem:[#allocation2 + $0x4d] sm:$0xff] }
 0x58a   : > { %4478 = vst.msk [vmem:[#allocation3 + $0xc0] sm:$0xff] %vm15326_vm10, %v4395_v35  ;;  %4800 = vrot.lane.b32.xlu1 %v12459_v33, %s9231_s30  ;;  %4798 = vrot.lane.b32.xlu0 %v12461_v56, %s9231_s30  ;;  %vm15330_vm10 = vmmov %vm15307_vm0  ;;  %v4926_v35 = vld [vmem:[#allocation2 + $0x45] sm:$0xff] }
 0x58c   : > { %v4401_v53 = vpop.permute.xlu1 %4400  ;;  %v4399_v39 = vpop.permute.xlu0 %4398 }
 0x58d   : > { %4481 = vst.msk [vmem:[#allocation3 + $0xd8] sm:$0xff] %vm15327_vm11, %v4401_v53  ;;  %vm15331_vm11 = vmmov %vm15307_vm0 }
 0x58e   : > { %4480 = vst.msk [vmem:[#allocation3 + $0xd0] sm:$0xff] %vm15307_vm0, %v4399_v39  ;;  %4804 = vrot.lane.b32.xlu1 %v12469_v19, %s9231_s30  ;;  %4802 = vrot.lane.b32.xlu0 %v12471_v29, %s9231_s30 }
 0x590   : > { %v4405_v43 = vpop.permute.xlu1 %4404  ;;  %v4403_v26 = vpop.permute.xlu0 %4402 }
 0x591   : > { %4483 = vst.msk [vmem:[#allocation3 + $0xe8] sm:$0xff] %vm15328_vm12, %v4405_v43  ;;  %vm15332_vm12 = vmmov %vm15307_vm0  ;;  %v4929_v43 = vld [vmem:[#allocation2 + $0x5d] sm:$0xff] }
 0x592   : > { %4482 = vst.msk [vmem:[#allocation3 + $0xe0] sm:$0xff] %vm15329_vm7, %v4403_v26  ;;  %4808 = vrot.lane.b32.xlu1 %v12479_v55, %s9231_s30  ;;  %4806 = vrot.lane.b32.xlu0 %v12481_v44, %s9231_s30  ;;  %vm15333_vm7 = vmmov %vm15307_vm0  ;;  %v4928_v26 = vld [vmem:[#allocation2 + $0x55] sm:$0xff] }
 0x594   : > { %v4409_v33 = vpop.permute.xlu1 %4408  ;;  %v4407_v56 = vpop.permute.xlu0 %4406 }
 0x595   : > { %4485 = vst.msk [vmem:[#allocation3 + $0xf8] sm:$0xff] %vm15330_vm10, %v4409_v33  ;;  %vm15334_vm10 = vmmov %vm15307_vm0 }
 0x596   : > { %4484 = vst.msk [vmem:[#allocation3 + $0xf0] sm:$0xff] %vm15331_vm11, %v4407_v56  ;;  %4812 = vrot.lane.b32.xlu1 %v12489_v5, %s9231_s30  ;;  %4810 = vrot.lane.b32.xlu0 %v12491_v49, %s9231_s30  ;;  %vm15335_vm11 = vcmask 392512  }
 0x598   : > { %v4413_v19 = vpop.permute.xlu1 %4412  ;;  %v4411_v29 = vpop.permute.xlu0 %4410 }
 0x599   : > { %4487 = vst.msk [vmem:[#allocation3 + $0x108] sm:$0xff] %vm15307_vm0, %v4413_v19  ;;  %vm15336_vm0 = vmmov %vm15335_vm11  ;;  %v4931_v19 = vld [vmem:[#allocation2 + $0x6d] sm:$0xff] }
 0x59a   : > { %4486 = vst.msk [vmem:[#allocation3 + $0x100] sm:$0xff] %vm15332_vm12, %v4411_v29  ;;  %4816 = vrot.lane.b32.xlu1 %v12499_v48, %s9231_s30  ;;  %4814 = vrot.lane.b32.xlu0 %v12501_v54, %s9231_s30  ;;  %vm15337_vm12 = vmmov %vm15336_vm0  ;;  %v4930_v29 = vld [vmem:[#allocation2 + $0x65] sm:$0xff] }
 0x59c   : > { %v4417_v55 = vpop.permute.xlu1 %4416  ;;  %v4415_v44 = vpop.permute.xlu0 %4414 }
 0x59d   : > { %4489 = vst.msk [vmem:[#allocation3 + $0x118] sm:$0xff] %vm15333_vm7, %v4417_v55  ;;  %vm15338_vm7 = vmmov %vm15336_vm0 }
 0x59e   : > { %4488 = vst.msk [vmem:[#allocation3 + $0x110] sm:$0xff] %vm15334_vm10, %v4415_v44  ;;  %4820 = vrot.lane.b32.xlu1 %v12509_v50, %s9231_s30  ;;  %4818 = vrot.lane.b32.xlu0 %v12511_v3, %s9231_s30  ;;  %vm15339_vm10 = vmmov %vm15336_vm0 }
 0x5a0   : > { %v4565_v5 = vpop.permute.xlu1 %4564  ;;  %v4563_v49 = vpop.permute.xlu0 %4562 }
 0x5a1   : > { %4671 = vst.msk [vmem:[#allocation3 + $0x8] sm:$0xff] %vm15335_vm11, %v4565_v5  ;;  %vm15340_vm11 = vmmov %vm15336_vm0  ;;  %v4933_v5 = vld [vmem:[#allocation2 + $0x7d] sm:$0xff] }
 0x5a2   : > { %4670 = vst.msk [vmem:[#allocation3] sm:$0xff] %vm15336_vm0, %v4563_v49  ;;  %4824 = vrot.lane.b32.xlu1 %v12519_v37, %s9231_s30  ;;  %4822 = vrot.lane.b32.xlu0 %v12521_v16, %s9231_s30  ;;  %v4932_v49 = vld [vmem:[#allocation2 + $0x75] sm:$0xff] }
 0x5a4   : > { %v4569_v48 = vpop.permute.xlu1 %4568  ;;  %v4567_v54 = vpop.permute.xlu0 %4566 }
 0x5a5   : > { %4673 = vst.msk [vmem:[#allocation3 + $0x18] sm:$0xff] %vm15337_vm12, %v4569_v48  ;;  %vm15341_vm12 = vmmov %vm15336_vm0 }
 0x5a6   : > { %4672 = vst.msk [vmem:[#allocation3 + $0x10] sm:$0xff] %vm15338_vm7, %v4567_v54  ;;  %4828 = vrot.lane.b32.xlu1 %v12529_v51, %s9231_s30  ;;  %4826 = vrot.lane.b32.xlu0 %v12531_v13, %s9231_s30  ;;  %vm15342_vm7 = vmmov %vm15336_vm0 }
 0x5a8   : > { %v4573_v50 = vpop.permute.xlu1 %4572  ;;  %v4571_v3 = vpop.permute.xlu0 %4570 }
 0x5a9   : > { %4675 = vst.msk [vmem:[#allocation3 + $0x28] sm:$0xff] %vm15339_vm10, %v4573_v50  ;;  %vm15343_vm10 = vmmov %vm15336_vm0  ;;  %v4935_v50 = vld [vmem:[#allocation2 + $0x8d] sm:$0xff] }
 0x5aa   : > { %4674 = vst.msk [vmem:[#allocation3 + $0x20] sm:$0xff] %vm15340_vm11, %v4571_v3  ;;  %4832 = vrot.lane.b32.xlu1 %v12539_v41, %s9231_s30  ;;  %4830 = vrot.lane.b32.xlu0 %v12541_v14, %s9231_s30  ;;  %vm15344_vm11 = vmmov %vm15336_vm0  ;;  %v4934_v3 = vld [vmem:[#allocation2 + $0x85] sm:$0xff] }
 0x5ac   : > { %v4577_v37 = vpop.permute.xlu1 %4576  ;;  %v4575_v16 = vpop.permute.xlu0 %4574 }
 0x5ad   : > { %4677 = vst.msk [vmem:[#allocation3 + $0x38] sm:$0xff] %vm15336_vm0, %v4577_v37 }
 0x5ae   : > { %4676 = vst.msk [vmem:[#allocation3 + $0x30] sm:$0xff] %vm15341_vm12, %v4575_v16  ;;  %4836 = vrot.lane.b32.xlu1 %v12549_v42, %s9231_s30  ;;  %4834 = vrot.lane.b32.xlu0 %v12551_v59, %s9231_s30  ;;  %v4741_v42 = vld [vmem:[#allocation2 + $0x13c] sm:$0xff]  ;;  %v4740_v59 = vld [vmem:[#allocation2 + $0x134] sm:$0xff]  ;;  %vm15345_vm12 = vmmov %vm15336_vm0 }
 0x5b0   : > { %v4581_v51 = vpop.permute.xlu1 %4580  ;;  %v4579_v13 = vpop.permute.xlu0 %4578 }
 0x5b1   : > { %4679 = vst.msk [vmem:[#allocation3 + $0x48] sm:$0xff] %vm15342_vm7, %v4581_v51  ;;  %vm15346_vm7 = vmmov %vm15336_vm0  ;;  %v4937_v51 = vld [vmem:[#allocation2 + $0x9d] sm:$0xff] }
 0x5b2   : > { %4678 = vst.msk [vmem:[#allocation3 + $0x40] sm:$0xff] %vm15343_vm10, %v4579_v13  ;;  %4840 = vrot.lane.b32.xlu1 %v12559_v46, %s9231_s30  ;;  %4838 = vrot.lane.b32.xlu0 %v12561_v6, %s9231_s30  ;;  %vm15347_vm10 = vmmov %vm15336_vm0  ;;  %v4936_v13 = vld [vmem:[#allocation2 + $0x95] sm:$0xff] }
 0x5b4   : > { %v4585_v41 = vpop.permute.xlu1 %4584  ;;  %v4583_v14 = vpop.permute.xlu0 %4582 }
 0x5b5   : > { %4681 = vst.msk [vmem:[#allocation3 + $0x58] sm:$0xff] %vm15344_vm11, %v4585_v41  ;;  %vm15348_vm11 = vmmov %vm15336_vm0 }
 0x5b6   : > { %4680 = vst.msk [vmem:[#allocation3 + $0x50] sm:$0xff] %vm15336_vm0, %v4583_v14  ;;  %4844 = vrot.lane.b32.xlu1 %v12569_v8, %s9231_s30  ;;  %4842 = vrot.lane.b32.xlu0 %v12571_v52, %s9231_s30  ;;  %v4923_v8 = vld [vmem:[#allocation2 + $0x2d] sm:$0xff]  ;;  %v4922_v52 = vld [vmem:[#allocation2 + $0x25] sm:$0xff] }
 0x5b8   : > { %v4589_v24 = vpop.permute.xlu1 %4588  ;;  %v4587_v61 = vpop.permute.xlu0 %4586 }
 0x5b9   : > { %4683 = vst.msk [vmem:[#allocation3 + $0x68] sm:$0xff] %vm15345_vm12, %v4589_v24  ;;  %vm15349_vm12 = vmmov %vm15336_vm0  ;;  %v5390_v24 = vld [vmem:[%s14645_s3] sm:$0xff] }
 0x5ba   : > { %4682 = vst.msk [vmem:[#allocation3 + $0x60] sm:$0xff] %vm15346_vm7, %v4587_v61  ;;  %4848 = vrot.lane.b32.xlu1 %v4741_v42, %s9231_s30  ;;  %4846 = vrot.lane.b32.xlu0 %v4740_v59, %s9231_s30  ;;  %vm15350_vm7 = vmmov %vm15336_vm0  ;;  %v4938_v42 = vld [vmem:[#allocation2 + $0xa5] sm:$0xff]  ;;  %v4939_v59 = vld [vmem:[#allocation2 + $0xad] sm:$0xff] }
 0x5bb   : > { %v5391_v61 = vld [vmem:[%s14645_s3 + $0x8] sm:$0xff] }
 0x5bc   : > { %v4593_v46 = vpop.permute.xlu1 %4592  ;;  %v4591_v6 = vpop.permute.xlu0 %4590 }
 0x5bd   : > { %4685 = vst.msk [vmem:[#allocation3 + $0x78] sm:$0xff] %vm15347_vm10, %v4593_v46  ;;  %vm15351_vm10 = vmmov %vm15336_vm0  ;;  %v9084_v46 = vpack.c.bf16 %v5391_v61, %v5390_v24  ;;  %v4953_v24 = vld [vmem:[#allocation2 + $0x11d] sm:$0xff]  ;;  %v4952_v61 = vld [vmem:[#allocation2 + $0x115] sm:$0xff] }
 0x5be   : > { %4684 = vst.msk [vmem:[#allocation3 + $0x70] sm:$0xff] %vm15348_vm11, %v4591_v6  ;;  %4996 = vrot.lane.b32.xlu1 %v4923_v8, %s9232_s6  ;;  %4994 = vrot.lane.b32.xlu0 %v4922_v52, %s9232_s6  ;;  %vm15352_vm11 = vmmov %vm15336_vm0  ;;  %v4941_v52 = vld [vmem:[#allocation2 + $0xbd] sm:$0xff] }
 0x5bf   : > { %9085 = vmatprep.subr.bf16.mxu1 %v9084_v46 }
 0x5c0   : > { %v4597_v17 = vpop.permute.xlu1 %4596  ;;  %v4595_v36 = vpop.permute.xlu0 %4594  ;;  %9087 = vmatpush3.bf16.msra.mxu1 %v9084_v46  ;;  %v5398_v46 = vld [vmem:[%s14645_s3 + $0x40] sm:$0xff] }
 0x5c1   : > { %4687 = vst.msk [vmem:[#allocation3 + $0x88] sm:$0xff] %vm15336_vm0, %v4597_v17  ;;  %v4940_v17 = vld [vmem:[#allocation2 + $0xb5] sm:$0xff] }
 0x5c2   : > { %4686 = vst.msk [vmem:[#allocation3 + $0x80] sm:$0xff] %vm15349_vm12, %v4595_v36  ;;  %5000 = vrot.lane.b32.xlu1 %v4925_v47, %s9232_s6  ;;  %4998 = vrot.lane.b32.xlu0 %v4924_v2, %s9232_s6  ;;  %vm15353_vm12 = vmmov %vm15336_vm0  ;;  %v4942_v2 = vld [vmem:[#allocation2 + $0xc5] sm:$0xff] }
 0x5c4   : > { %v4601_v57 = vpop.permute.xlu1 %4600  ;;  %v4599_v7 = vpop.permute.xlu0 %4598 }
 0x5c5   : > { %4689 = vst.msk [vmem:[#allocation3 + $0x98] sm:$0xff] %vm15350_vm7, %v4601_v57  ;;  %vm15354_vm7 = vmmov %vm15336_vm0  ;;  %v4943_v57 = vld [vmem:[#allocation2 + $0xcd] sm:$0xff] }
 0x5c6   : > { %4688 = vst.msk [vmem:[#allocation3 + $0x90] sm:$0xff] %vm15351_vm10, %v4599_v7  ;;  %5004 = vrot.lane.b32.xlu1 %v4927_v38, %s9232_s6  ;;  %5002 = vrot.lane.b32.xlu0 %v4926_v35, %s9232_s6  ;;  %vm15355_vm10 = vmmov %vm15336_vm0  ;;  %v5392_v7 = vld [vmem:[%s14645_s3 + $0x10] sm:$0xff]  ;;  %v5393_v38 = vld [vmem:[%s14645_s3 + $0x18] sm:$0xff] }
 0x5c7   : > { %v9088_v35 = vpack.c.bf16 %v5393_v38, %v5392_v7 }
 0x5c8   : > { %v4605_v53 = vpop.permute.xlu1 %4604  ;;  %v4603_v39 = vpop.permute.xlu0 %4602 }
 0x5c9   : > { %4691 = vst.msk [vmem:[#allocation3 + $0xa8] sm:$0xff] %vm15352_vm11, %v4605_v53  ;;  %vm15356_vm11 = vmmov %vm15336_vm0  ;;  %9089 = vmatprep.subr.bf16.mxu1 %v9088_v35 }
 0x5ca   : > { %4690 = vst.msk [vmem:[#allocation3 + $0xa0] sm:$0xff] %vm15336_vm0, %v4603_v39  ;;  %5008 = vrot.lane.b32.xlu1 %v4929_v43, %s9232_s6  ;;  %5006 = vrot.lane.b32.xlu0 %v4928_v26, %s9232_s6  ;;  %v4944_v43 = vld [vmem:[#allocation2 + $0xd5] sm:$0xff]  ;;  %v4945_v26 = vld [vmem:[#allocation2 + $0xdd] sm:$0xff] }
 0x5cb   : > { %9091 = vmatpush3.bf16.msra.mxu1 %v9088_v35  ;;  %v5139_v35 = vld [vmem:[#allocation2 + $0x2e] sm:$0xff] }
 0x5cc   : > { %v4609_v33 = vpop.permute.xlu1 %4608  ;;  %v4607_v56 = vpop.permute.xlu0 %4606 }
 0x5cd   : > { %4693 = vst.msk [vmem:[#allocation3 + $0xb8] sm:$0xff] %vm15353_vm12, %v4609_v33  ;;  %vm15357_vm12 = vmmov %vm15336_vm0  ;;  %v5394_v33 = vld [vmem:[%s14645_s3 + $0x20] sm:$0xff] }
 0x5ce   : > { %4692 = vst.msk [vmem:[#allocation3 + $0xb0] sm:$0xff] %vm15354_vm7, %v4607_v56  ;;  %5012 = vrot.lane.b32.xlu1 %v4931_v19, %s9232_s6  ;;  %5010 = vrot.lane.b32.xlu0 %v4930_v29, %s9232_s6  ;;  %vm15358_vm7 = vmmov %vm15336_vm0  ;;  %v5395_v56 = vld [vmem:[%s14645_s3 + $0x28] sm:$0xff] }
 0x5cf   : > { %v9092_v19 = vpack.c.bf16 %v5395_v56, %v5394_v33  ;;  %v5140_v33 = vld [vmem:[#allocation2 + $0x36] sm:$0xff] }
 0x5d0   : > { %v4613_v55 = vpop.permute.xlu1 %4612  ;;  %v4611_v44 = vpop.permute.xlu0 %4610 }
 0x5d1   : > { %4695 = vst.msk [vmem:[#allocation3 + $0xc8] sm:$0xff] %vm15355_vm10, %v4613_v55  ;;  %vm15359_vm10 = vmmov %vm15336_vm0  ;;  %9093 = vmatprep.subr.bf16.mxu1 %v9092_v19 }
 0x5d2   : > { %4694 = vst.msk [vmem:[#allocation3 + $0xc0] sm:$0xff] %vm15356_vm11, %v4611_v44  ;;  %5016 = vrot.lane.b32.xlu1 %v4933_v5, %s9232_s6  ;;  %5014 = vrot.lane.b32.xlu0 %v4932_v49, %s9232_s6  ;;  %vm15360_vm11 = vmmov %vm15336_vm0  ;;  %v4947_v44 = vld [vmem:[#allocation2 + $0xed] sm:$0xff]  ;;  %v4946_v5 = vld [vmem:[#allocation2 + $0xe5] sm:$0xff] }
 0x5d3   : > { %9095 = vmatpush3.bf16.msra.mxu1 %v9092_v19 }
 0x5d4   : > { %v4617_v48 = vpop.permute.xlu1 %4616  ;;  %v4615_v54 = vpop.permute.xlu0 %4614 }
 0x5d5   : > { %4697 = vst.msk [vmem:[#allocation3 + $0xd8] sm:$0xff] %vm15336_vm0, %v4617_v48 }
 0x5d6   : > { %4696 = vst.msk [vmem:[#allocation3 + $0xd0] sm:$0xff] %vm15357_vm12, %v4615_v54  ;;  %5020 = vrot.lane.b32.xlu1 %v4935_v50, %s9232_s6  ;;  %5018 = vrot.lane.b32.xlu0 %v4934_v3, %s9232_s6  ;;  %vm15361_vm12 = vmmov %vm15336_vm0  ;;  %v4948_v54 = vld [vmem:[#allocation2 + $0xf5] sm:$0xff]  ;;  %v4949_v50 = vld [vmem:[#allocation2 + $0xfd] sm:$0xff] }
 0x5d7   : > { %v5396_v3 = vld [vmem:[%s14645_s3 + $0x30] sm:$0xff] }
 0x5d8   : > { %v4621_v37 = vpop.permute.xlu1 %4620  ;;  %v4619_v16 = vpop.permute.xlu0 %4618 }
 0x5d9   : > { %4699 = vst.msk [vmem:[#allocation3 + $0xe8] sm:$0xff] %vm15358_vm7, %v4621_v37  ;;  %vm15362_vm7 = vmmov %vm15336_vm0  ;;  %v5397_v37 = vld [vmem:[%s14645_s3 + $0x38] sm:$0xff] }
 0x5da   : > { %4698 = vst.msk [vmem:[#allocation3 + $0xe0] sm:$0xff] %vm15359_vm10, %v4619_v16  ;;  %5024 = vrot.lane.b32.xlu1 %v4937_v51, %s9232_s6  ;;  %5022 = vrot.lane.b32.xlu0 %v4936_v13, %s9232_s6  ;;  %vm15363_vm10 = vmmov %vm15336_vm0  ;;  %v9096_v16 = vpack.c.bf16 %v5397_v37, %v5396_v3  ;;  %v5147_v3 = vld [vmem:[#allocation2 + $0x6e] sm:$0xff]  ;;  %v5146_v37 = vld [vmem:[#allocation2 + $0x66] sm:$0xff] }
 0x5dc   : > { %v4625_v41 = vpop.permute.xlu1 %4624  ;;  %v4623_v14 = vpop.permute.xlu0 %4622  ;;  %9097 = vmatprep.subr.bf16.mxu1 %v9096_v16 }
 0x5dd   : > { %4701 = vst.msk [vmem:[#allocation3 + $0xf8] sm:$0xff] %vm15360_vm11, %v4625_v41  ;;  %vm15364_vm11 = vmmov %vm15336_vm0  ;;  %v4951_v41 = vld [vmem:[#allocation2 + $0x10d] sm:$0xff]  ;;  %9099 = vmatpush3.bf16.msra.mxu1 %v9096_v16 }
 0x5de   : > { %4700 = vst.msk [vmem:[#allocation3 + $0xf0] sm:$0xff] %vm15336_vm0, %v4623_v14  ;;  %5028 = vrot.lane.b32.xlu1 %v4939_v59, %s9232_s6  ;;  %5026 = vrot.lane.b32.xlu0 %v4938_v42, %s9232_s6  ;;  %vm15365_vm0 = vcmask 458112   ;;  %v4950_v14 = vld [vmem:[#allocation2 + $0x105] sm:$0xff] }
 0x5df   : > { %8940 = vmatprep.subr.mxu1 %v5398_v46 }
 0x5e0   : > { %v4629_v6 = vpop.permute.xlu1 %4628  ;;  %v4627_v8 = vpop.permute.xlu0 %4626 }
 0x5e1   : > { %4703 = vst.msk [vmem:[#allocation3 + $0x108] sm:$0xff] %vm15361_vm12, %v4629_v6  ;;  %vm15366_vm12 = vmmov %vm15365_vm0  ;;  %8941 = vmatpush3.msra.mxu1 %v5398_v46 }
 0x5e2   : > { %4702 = vst.msk [vmem:[#allocation3 + $0x100] sm:$0xff] %vm15362_vm7, %v4627_v8  ;;  %5032 = vrot.lane.b32.xlu1 %v4941_v52, %s9232_s6  ;;  %5030 = vrot.lane.b32.xlu0 %v4940_v17, %s9232_s6  ;;  %vm15367_vm7 = vmmov %vm15365_vm0  ;;  %v4955_v52 = vld [vmem:[#allocation2 + $0x12d] sm:$0xff]  ;;  %v4954_v17 = vld [vmem:[#allocation2 + $0x125] sm:$0xff] }
 0x5e4   : > { %v4633_v36 = vpop.permute.xlu1 %4632  ;;  %v4631_v47 = vpop.permute.xlu0 %4630 }
 0x5e5   : > { %4705 = vst.msk [vmem:[#allocation3 + $0x118] sm:$0xff] %vm15363_vm10, %v4633_v36  ;;  %vm15368_vm10 = vmmov %vm15365_vm0  ;;  %v4957_v36 = vld [vmem:[#allocation2 + $0x13d] sm:$0xff] }
 0x5e6   : > { %4704 = vst.msk [vmem:[#allocation3 + $0x110] sm:$0xff] %vm15364_vm11, %v4631_v47  ;;  %5036 = vrot.lane.b32.xlu1 %v4943_v57, %s9232_s6  ;;  %5034 = vrot.lane.b32.xlu0 %v4942_v2, %s9232_s6  ;;  %vm15369_vm11 = vmmov %vm15365_vm0  ;;  %v4956_v47 = vld [vmem:[#allocation2 + $0x135] sm:$0xff] }
 0x5e8   : > { %v4781_v53 = vpop.permute.xlu1 %4780  ;;  %v4779_v39 = vpop.permute.xlu0 %4778 }
 0x5e9   : > { %4887 = vst.msk [vmem:[#allocation3 + $0x8] sm:$0xff] %vm15365_vm0, %v4781_v53  ;;  %v5138_v53 = vld [vmem:[#allocation2 + $0x26] sm:$0xff] }
 0x5ea   : > { %4886 = vst.msk [vmem:[#allocation3] sm:$0xff] %vm15366_vm12, %v4779_v39  ;;  %5040 = vrot.lane.b32.xlu1 %v4945_v26, %s9232_s6  ;;  %5038 = vrot.lane.b32.xlu0 %v4944_v43, %s9232_s6  ;;  %vm15370_vm12 = vmmov %vm15365_vm0  ;;  %v5141_v26 = vld [vmem:[#allocation2 + $0x3e] sm:$0xff] }
 0x5ec   : > { %v4785_v29 = vpop.permute.xlu1 %4784  ;;  %v4783_v55 = vpop.permute.xlu0 %4782 }
 0x5ed   : > { %4889 = vst.msk [vmem:[#allocation3 + $0x18] sm:$0xff] %vm15367_vm7, %v4785_v29  ;;  %vm15371_vm7 = vmmov %vm15365_vm0  ;;  %v5143_v29 = vld [vmem:[#allocation2 + $0x4e] sm:$0xff] }
 0x5ee   : > { %4888 = vst.msk [vmem:[#allocation3 + $0x10] sm:$0xff] %vm15368_vm10, %v4783_v55  ;;  %5044 = vrot.lane.b32.xlu1 %v4947_v44, %s9232_s6  ;;  %5042 = vrot.lane.b32.xlu0 %v4946_v5, %s9232_s6  ;;  %vm15372_vm10 = vmmov %vm15365_vm0  ;;  %v5142_v55 = vld [vmem:[#allocation2 + $0x46] sm:$0xff] }
 0x5f0   : > { %v4789_v49 = vpop.permute.xlu1 %4788  ;;  %v4787_v48 = vpop.permute.xlu0 %4786 }
 0x5f1   : > { %4891 = vst.msk [vmem:[#allocation3 + $0x28] sm:$0xff] %vm15369_vm11, %v4789_v49  ;;  %vm15373_vm11 = vmmov %vm15365_vm0  ;;  %v5145_v49 = vld [vmem:[#allocation2 + $0x5e] sm:$0xff] }
 0x5f2   : > { %4890 = vst.msk [vmem:[#allocation3 + $0x20] sm:$0xff] %vm15365_vm0, %v4787_v48  ;;  %5048 = vrot.lane.b32.xlu1 %v4949_v50, %s9232_s6  ;;  %5046 = vrot.lane.b32.xlu0 %v4948_v54, %s9232_s6  ;;  %v5144_v48 = vld [vmem:[#allocation2 + $0x56] sm:$0xff] }
 0x5f4   : > { %v4793_v51 = vpop.permute.xlu1 %4792  ;;  %v4791_v13 = vpop.permute.xlu0 %4790 }
 0x5f5   : > { %4893 = vst.msk [vmem:[#allocation3 + $0x38] sm:$0xff] %vm15370_vm12, %v4793_v51  ;;  %vm15374_vm12 = vmmov %vm15365_vm0 }
 0x5f6   : > { %4892 = vst.msk [vmem:[#allocation3 + $0x30] sm:$0xff] %vm15371_vm7, %v4791_v13  ;;  %5052 = vrot.lane.b32.xlu1 %v4951_v41, %s9232_s6  ;;  %5050 = vrot.lane.b32.xlu0 %v4950_v14, %s9232_s6  ;;  %vm15375_vm7 = vmmov %vm15365_vm0  ;;  %v5149_v13 = vld [vmem:[#allocation2 + $0x7e] sm:$0xff]  ;;  %v5148_v41 = vld [vmem:[#allocation2 + $0x76] sm:$0xff] }
 0x5f8   : > { %v4797_v42 = vpop.permute.xlu1 %4796  ;;  %v4795_v59 = vpop.permute.xlu0 %4794 }
 0x5f9   : > { %4895 = vst.msk [vmem:[#allocation3 + $0x48] sm:$0xff] %vm15372_vm10, %v4797_v42  ;;  %vm15376_vm10 = vmmov %vm15365_vm0 }
 0x5fa   : > { %4894 = vst.msk [vmem:[#allocation3 + $0x40] sm:$0xff] %vm15373_vm11, %v4795_v59  ;;  %5056 = vrot.lane.b32.xlu1 %v4953_v24, %s9232_s6  ;;  %5054 = vrot.lane.b32.xlu0 %v4952_v61, %s9232_s6  ;;  %vm15377_vm11 = vmmov %vm15365_vm0  ;;  %v5151_v59 = vld [vmem:[#allocation2 + $0x8e] sm:$0xff]  ;;  %v5150_v24 = vld [vmem:[#allocation2 + $0x86] sm:$0xff] }
 0x5fc   : > { %v4801_v6 = vpop.permute.xlu1 %4800  ;;  %v4799_v8 = vpop.permute.xlu0 %4798 }
 0x5fd   : > { %4897 = vst.msk [vmem:[#allocation3 + $0x58] sm:$0xff] %vm15365_vm0, %v4801_v6  ;;  %v5153_v6 = vld [vmem:[#allocation2 + $0x9e] sm:$0xff] }
 0x5fe   : > { %4896 = vst.msk [vmem:[#allocation3 + $0x50] sm:$0xff] %vm15374_vm12, %v4799_v8  ;;  %5060 = vrot.lane.b32.xlu1 %v4955_v52, %s9232_s6  ;;  %5058 = vrot.lane.b32.xlu0 %v4954_v17, %s9232_s6  ;;  %vm15378_vm12 = vmmov %vm15365_vm0  ;;  %v5152_v8 = vld [vmem:[#allocation2 + $0x96] sm:$0xff] }
 0x600   : > { %v4805_v2 = vpop.permute.xlu1 %4804  ;;  %v4803_v57 = vpop.permute.xlu0 %4802 }
 0x601   : > { %4899 = vst.msk [vmem:[#allocation3 + $0x68] sm:$0xff] %vm15375_vm7, %v4805_v2  ;;  %vm15379_vm7 = vmmov %vm15365_vm0 }
 0x602   : > { %4898 = vst.msk [vmem:[#allocation3 + $0x60] sm:$0xff] %vm15376_vm10, %v4803_v57  ;;  %5064 = vrot.lane.b32.xlu1 %v4957_v36, %s9232_s6  ;;  %5062 = vrot.lane.b32.xlu0 %v4956_v47, %s9232_s6  ;;  %vm15380_vm10 = vmmov %vm15365_vm0  ;;  %v5155_v36 = vld [vmem:[#allocation2 + $0xae] sm:$0xff]  ;;  %v5154_v47 = vld [vmem:[#allocation2 + $0xa6] sm:$0xff] }
 0x604   : > { %v4809_v7 = vpop.permute.xlu1 %4808  ;;  %v4807_v38 = vpop.permute.xlu0 %4806 }
 0x605   : > { %4901 = vst.msk [vmem:[#allocation3 + $0x78] sm:$0xff] %vm15377_vm11, %v4809_v7  ;;  %vm15381_vm11 = vmmov %vm15365_vm0  ;;  %v5157_v7 = vld [vmem:[#allocation2 + $0xbe] sm:$0xff] }
 0x606   : > { %4900 = vst.msk [vmem:[#allocation3 + $0x70] sm:$0xff] %vm15365_vm0, %v4807_v38  ;;  %5212 = vrot.lane.b32.xlu1 %v5139_v35, %s9233_s9  ;;  %5210 = vrot.lane.b32.xlu0 %v5138_v53, %s9233_s9  ;;  %v5156_v38 = vld [vmem:[#allocation2 + $0xb6] sm:$0xff] }
 0x608   : > { %v4813_v39 = vpop.permute.xlu1 %4812  ;;  %v4811_v43 = vpop.permute.xlu0 %4810 }
 0x609   : > { %4903 = vst.msk [vmem:[#allocation3 + $0x88] sm:$0xff] %vm15378_vm12, %v4813_v39  ;;  %vm15382_vm12 = vmmov %vm15365_vm0  ;;  %v5159_v39 = vld [vmem:[#allocation2 + $0xce] sm:$0xff] }
 0x60a   : > { %4902 = vst.msk [vmem:[#allocation3 + $0x80] sm:$0xff] %vm15379_vm7, %v4811_v43  ;;  %5216 = vrot.lane.b32.xlu1 %v5141_v26, %s9233_s9  ;;  %5214 = vrot.lane.b32.xlu0 %v5140_v33, %s9233_s9  ;;  %vm15383_vm7 = vmmov %vm15365_vm0  ;;  %v5158_v43 = vld [vmem:[#allocation2 + $0xc6] sm:$0xff] }
 0x60c   : > { %v4817_v56 = vpop.permute.xlu1 %4816  ;;  %v4815_v19 = vpop.permute.xlu0 %4814 }
 0x60d   : > { %4905 = vst.msk [vmem:[#allocation3 + $0x98] sm:$0xff] %vm15380_vm10, %v4817_v56  ;;  %vm15384_vm10 = vmmov %vm15365_vm0  ;;  %v5161_v56 = vld [vmem:[#allocation2 + $0xde] sm:$0xff] }
 0x60e   : > { %4904 = vst.msk [vmem:[#allocation3 + $0x90] sm:$0xff] %vm15381_vm11, %v4815_v19  ;;  %5220 = vrot.lane.b32.xlu1 %v5143_v29, %s9233_s9  ;;  %5218 = vrot.lane.b32.xlu0 %v5142_v55, %s9233_s9  ;;  %vm15385_vm11 = vmmov %vm15365_vm0  ;;  %v5160_v19 = vld [vmem:[#allocation2 + $0xd6] sm:$0xff] }
 0x610   : > { %v4821_v44 = vpop.permute.xlu1 %4820  ;;  %v4819_v5 = vpop.permute.xlu0 %4818 }
 0x611   : > { %4907 = vst.msk [vmem:[#allocation3 + $0xa8] sm:$0xff] %vm15365_vm0, %v4821_v44  ;;  %v5163_v44 = vld [vmem:[#allocation2 + $0xee] sm:$0xff] }
 0x612   : > { %4906 = vst.msk [vmem:[#allocation3 + $0xa0] sm:$0xff] %vm15382_vm12, %v4819_v5  ;;  %5224 = vrot.lane.b32.xlu1 %v5145_v49, %s9233_s9  ;;  %5222 = vrot.lane.b32.xlu0 %v5144_v48, %s9233_s9  ;;  %vm15386_vm12 = vmmov %vm15365_vm0  ;;  %v5162_v5 = vld [vmem:[#allocation2 + $0xe6] sm:$0xff] }
 0x614   : > { %v4825_v54 = vpop.permute.xlu1 %4824  ;;  %v4823_v50 = vpop.permute.xlu0 %4822 }
 0x615   : > { %4909 = vst.msk [vmem:[#allocation3 + $0xb8] sm:$0xff] %vm15383_vm7, %v4825_v54  ;;  %vm15387_vm7 = vmmov %vm15365_vm0  ;;  %v5165_v54 = vld [vmem:[#allocation2 + $0xfe] sm:$0xff] }
 0x616   : > { %4908 = vst.msk [vmem:[#allocation3 + $0xb0] sm:$0xff] %vm15384_vm10, %v4823_v50  ;;  %5228 = vrot.lane.b32.xlu1 %v5147_v3, %s9233_s9  ;;  %5226 = vrot.lane.b32.xlu0 %v5146_v37, %s9233_s9  ;;  %vm15388_vm10 = vmmov %vm15365_vm0  ;;  %v5164_v50 = vld [vmem:[#allocation2 + $0xf6] sm:$0xff] }
 0x618   : > { %v4829_v16 = vpop.permute.xlu1 %4828  ;;  %v4827_v51 = vpop.permute.xlu0 %4826 }
 0x619   : > { %4911 = vst.msk [vmem:[#allocation3 + $0xc8] sm:$0xff] %vm15385_vm11, %v4829_v16  ;;  %vm15389_vm11 = vmmov %vm15365_vm0  ;;  %v5167_v16 = vld [vmem:[#allocation2 + $0x10e] sm:$0xff] }
 0x61a   : > { %4910 = vst.msk [vmem:[#allocation3 + $0xc0] sm:$0xff] %vm15365_vm0, %v4827_v51  ;;  %5232 = vrot.lane.b32.xlu1 %v5149_v13, %s9233_s9  ;;  %5230 = vrot.lane.b32.xlu0 %v5148_v41, %s9233_s9  ;;  %v5166_v51 = vld [vmem:[#allocation2 + $0x106] sm:$0xff] }
 0x61c   : > { %v4833_v14 = vpop.permute.xlu1 %4832  ;;  %v4831_v42 = vpop.permute.xlu0 %4830 }
 0x61d   : > { %4913 = vst.msk [vmem:[#allocation3 + $0xd8] sm:$0xff] %vm15386_vm12, %v4833_v14  ;;  %vm15390_vm12 = vmmov %vm15365_vm0  ;;  %v5169_v14 = vld [vmem:[#allocation2 + $0x11e] sm:$0xff] }
 0x61e   : > { %4912 = vst.msk [vmem:[#allocation3 + $0xd0] sm:$0xff] %vm15387_vm7, %v4831_v42  ;;  %5236 = vrot.lane.b32.xlu1 %v5151_v59, %s9233_s9  ;;  %5234 = vrot.lane.b32.xlu0 %v5150_v24, %s9233_s9  ;;  %vm15391_vm7 = vmmov %vm15365_vm0  ;;  %v5168_v42 = vld [vmem:[#allocation2 + $0x116] sm:$0xff] }
 0x620   : > { %v4837_v61 = vpop.permute.xlu1 %4836  ;;  %v4835_v46 = vpop.permute.xlu0 %4834 }
 0x621   : > { %4915 = vst.msk [vmem:[#allocation3 + $0xe8] sm:$0xff] %vm15388_vm10, %v4837_v61  ;;  %vm15392_vm10 = vmmov %vm15365_vm0  ;;  %v5171_v61 = vld [vmem:[#allocation2 + $0x12e] sm:$0xff] }
 0x622   : > { %4914 = vst.msk [vmem:[#allocation3 + $0xe0] sm:$0xff] %vm15389_vm11, %v4835_v46  ;;  %5240 = vrot.lane.b32.xlu1 %v5153_v6, %s9233_s9  ;;  %5238 = vrot.lane.b32.xlu0 %v5152_v8, %s9233_s9  ;;  %vm15393_vm11 = vmmov %vm15365_vm0  ;;  %v5170_v46 = vld [vmem:[#allocation2 + $0x126] sm:$0xff]  ;;  %v5172_v6 = vld [vmem:[#allocation2 + $0x136] sm:$0xff] }
 0x623   : > { %v5173_v8 = vld [vmem:[#allocation2 + $0x13e] sm:$0xff] }
 0x624   : > { %v4841_v52 = vpop.permute.xlu1 %4840  ;;  %v4839_v17 = vpop.permute.xlu0 %4838 }
 0x625   : > { %4917 = vst.msk [vmem:[#allocation3 + $0xf8] sm:$0xff] %vm15365_vm0, %v4841_v52 }
 0x626   : > { %4916 = vst.msk [vmem:[#allocation3 + $0xf0] sm:$0xff] %vm15390_vm12, %v4839_v17  ;;  %5244 = vrot.lane.b32.xlu1 %v5155_v36, %s9233_s9  ;;  %5242 = vrot.lane.b32.xlu0 %v5154_v47, %s9233_s9  ;;  %vm15394_vm12 = vcmask 523712  }
 0x628   : > { %v4845_v2 = vpop.permute.xlu1 %4844  ;;  %v4843_v57 = vpop.permute.xlu0 %4842 }
 0x629   : > { %4919 = vst.msk [vmem:[#allocation3 + $0x108] sm:$0xff] %vm15391_vm7, %v4845_v2  ;;  %vm15395_vm7 = vmmov %vm15394_vm12 }
 0x62a   : > { %4918 = vst.msk [vmem:[#allocation3 + $0x100] sm:$0xff] %vm15392_vm10, %v4843_v57  ;;  %5248 = vrot.lane.b32.xlu1 %v5157_v7, %s9233_s9  ;;  %5246 = vrot.lane.b32.xlu0 %v5156_v38, %s9233_s9  ;;  %vm15396_vm10 = vmmov %vm15395_vm7 }
 0x62c   : > { %v4849_v35 = vpop.permute.xlu1 %4848  ;;  %v4847_v53 = vpop.permute.xlu0 %4846 }
 0x62d   : > { %4921 = vst.msk [vmem:[#allocation3 + $0x118] sm:$0xff] %vm15393_vm11, %v4849_v35  ;;  %vm15397_vm11 = vmmov %vm15395_vm7 }
 0x62e   : > { %4920 = vst.msk [vmem:[#allocation3 + $0x110] sm:$0xff] %vm15365_vm0, %v4847_v53  ;;  %5252 = vrot.lane.b32.xlu1 %v5159_v39, %s9233_s9  ;;  %5250 = vrot.lane.b32.xlu0 %v5158_v43, %s9233_s9  ;;  %vm15398_vm0 = vmmov %vm15395_vm7 }
 0x62f   : > { %vm15409_vm4 = vmmov %vm15398_vm0 }
 0x630   : > { %v4997_v26 = vpop.permute.xlu1 %4996  ;;  %v4995_v33 = vpop.permute.xlu0 %4994  ;;  %vm15412_vm3 = vmmov %vm15398_vm0 }
 0x631   : > { %5103 = vst.msk [vmem:[#allocation3 + $0x8] sm:$0xff] %vm15394_vm12, %v4997_v26  ;;  %vm15399_vm12 = vmmov %vm15398_vm0 }
 0x632   : > { %5102 = vst.msk [vmem:[#allocation3] sm:$0xff] %vm15395_vm7, %v4995_v33  ;;  %5256 = vrot.lane.b32.xlu1 %v5161_v56, %s9233_s9  ;;  %5254 = vrot.lane.b32.xlu0 %v5160_v19, %s9233_s9  ;;  %vm15400_vm7 = vmmov %vm15398_vm0 }
 0x633   : > { %vm15413_vm6 = vmmov %vm15398_vm0 }
 0x634   : > { %v5001_v29 = vpop.permute.xlu1 %5000  ;;  %v4999_v55 = vpop.permute.xlu0 %4998 }
 0x635   : > { %5105 = vst.msk [vmem:[#allocation3 + $0x18] sm:$0xff] %vm15396_vm10, %v5001_v29  ;;  %vm15401_vm10 = vmmov %vm15398_vm0 }
 0x636   : > { %5104 = vst.msk [vmem:[#allocation3 + $0x10] sm:$0xff] %vm15397_vm11, %v4999_v55  ;;  %5260 = vrot.lane.b32.xlu1 %v5163_v44, %s9233_s9  ;;  %5258 = vrot.lane.b32.xlu0 %v5162_v5, %s9233_s9  ;;  %vm15402_vm11 = vmmov %vm15398_vm0 }
 0x638   : > { %v5005_v49 = vpop.permute.xlu1 %5004  ;;  %v5003_v48 = vpop.permute.xlu0 %5002 }
 0x639   : > { %5107 = vst.msk [vmem:[#allocation3 + $0x28] sm:$0xff] %vm15398_vm0, %v5005_v49 }
 0x63a   : > { %5106 = vst.msk [vmem:[#allocation3 + $0x20] sm:$0xff] %vm15399_vm12, %v5003_v48  ;;  %5264 = vrot.lane.b32.xlu1 %v5165_v54, %s9233_s9  ;;  %5262 = vrot.lane.b32.xlu0 %v5164_v50, %s9233_s9  ;;  %vm15403_vm12 = vmmov %vm15398_vm0 }
 0x63c   : > { %v5009_v3 = vpop.permute.xlu1 %5008  ;;  %v5007_v37 = vpop.permute.xlu0 %5006 }
 0x63d   : > { %5109 = vst.msk [vmem:[#allocation3 + $0x38] sm:$0xff] %vm15400_vm7, %v5009_v3  ;;  %vm15404_vm7 = vmmov %vm15398_vm0 }
 0x63e   : > { %5108 = vst.msk [vmem:[#allocation3 + $0x30] sm:$0xff] %vm15401_vm10, %v5007_v37  ;;  %5268 = vrot.lane.b32.xlu1 %v5167_v16, %s9233_s9  ;;  %5266 = vrot.lane.b32.xlu0 %v5166_v51, %s9233_s9  ;;  %vm15405_vm10 = vmmov %vm15398_vm0 }
 0x640   : > { %v5013_v13 = vpop.permute.xlu1 %5012  ;;  %v5011_v41 = vpop.permute.xlu0 %5010 }
 0x641   : > { %5111 = vst.msk [vmem:[#allocation3 + $0x48] sm:$0xff] %vm15402_vm11, %v5013_v13  ;;  %vm15406_vm11 = vmmov %vm15398_vm0 }
 0x642   : > { %5110 = vst.msk [vmem:[#allocation3 + $0x40] sm:$0xff] %vm15398_vm0, %v5011_v41  ;;  %5272 = vrot.lane.b32.xlu1 %v5169_v14, %s9233_s9  ;;  %5270 = vrot.lane.b32.xlu0 %v5168_v42, %s9233_s9 }
 0x644   : > { %v5017_v59 = vpop.permute.xlu1 %5016  ;;  %v5015_v24 = vpop.permute.xlu0 %5014 }
 0x645   : > { %5113 = vst.msk [vmem:[#allocation3 + $0x58] sm:$0xff] %vm15403_vm12, %v5017_v59  ;;  %vm15407_vm12 = vmmov %vm15398_vm0 }
 0x646   : > { %5112 = vst.msk [vmem:[#allocation3 + $0x50] sm:$0xff] %vm15404_vm7, %v5015_v24  ;;  %5276 = vrot.lane.b32.xlu1 %v5171_v61, %s9233_s9  ;;  %5274 = vrot.lane.b32.xlu0 %v5170_v46, %s9233_s9  ;;  %vm15408_vm7 = vmmov %vm15398_vm0 }
 0x648   : > { %v5021_v52 = vpop.permute.xlu1 %5020  ;;  %v5019_v17 = vpop.permute.xlu0 %5018 }
 0x649   : > { %5115 = vst.msk [vmem:[#allocation3 + $0x68] sm:$0xff] %vm15405_vm10, %v5021_v52  ;;  %vm15410_vm10 = vmmov %vm15398_vm0 }
 0x64a   : > { %5114 = vst.msk [vmem:[#allocation3 + $0x60] sm:$0xff] %vm15406_vm11, %v5019_v17  ;;  %5278 = vrot.lane.b32.xlu0 %v5172_v6, %s9233_s9  ;;  %5280 = vrot.lane.b32.xlu1 %v5173_v8, %s9233_s9  ;;  %vm15411_vm11 = vmmov %vm15398_vm0 }
 0x64c   : > { %v5025_v36 = vpop.permute.xlu1 %5024  ;;  %v5023_v47 = vpop.permute.xlu0 %5022 }
 0x64d   : > { %5117 = vst.msk [vmem:[#allocation3 + $0x78] sm:$0xff] %vm15398_vm0, %v5025_v36 }
 0x64e   : > { %5116 = vst.msk [vmem:[#allocation3 + $0x70] sm:$0xff] %vm15407_vm12, %v5023_v47  ;;  %vm15414_vm12 = vmmov %vm15398_vm0 }
 0x650   : > { %v5029_v2 = vpop.permute.xlu1 %5028  ;;  %v5027_v57 = vpop.permute.xlu0 %5026 }
 0x651   : > { %5119 = vst.msk [vmem:[#allocation3 + $0x88] sm:$0xff] %vm15408_vm7, %v5029_v2  ;;  %vm15416_vm7 = vmmov %vm15398_vm0 }
 0x652   : > { %5118 = vst.msk [vmem:[#allocation3 + $0x80] sm:$0xff] %vm15409_vm4, %v5027_v57  ;;  %vm15415_vm4 = vmmov %vm15398_vm0 }
 0x654   : > { %v5033_v7 = vpop.permute.xlu1 %5032  ;;  %v5031_v38 = vpop.permute.xlu0 %5030 }
 0x655   : > { %5121 = vst.msk [vmem:[#allocation3 + $0x98] sm:$0xff] %vm15410_vm10, %v5033_v7  ;;  %vm15417_vm10 = vmmov %vm15398_vm0 }
 0x656   : > { %5120 = vst.msk [vmem:[#allocation3 + $0x90] sm:$0xff] %vm15411_vm11, %v5031_v38  ;;  %vm15418_vm11 = vmmov %vm15398_vm0 }
 0x658   : > { %v5037_v35 = vpop.permute.xlu1 %5036  ;;  %v5035_v53 = vpop.permute.xlu0 %5034 }
 0x659   : > { %5123 = vst.msk [vmem:[#allocation3 + $0xa8] sm:$0xff] %vm15412_vm3, %v5037_v35  ;;  %vm15420_vm3 = vmmov %vm15398_vm0 }
 0x65a   : > { %5122 = vst.msk [vmem:[#allocation3 + $0xa0] sm:$0xff] %vm15413_vm6, %v5035_v53  ;;  %vm15419_vm6 = vmmov %vm15398_vm0 }
 0x65c   : > { %v5041_v39 = vpop.permute.xlu1 %5040  ;;  %v5039_v43 = vpop.permute.xlu0 %5038 }
 0x65d   : > { %5125 = vst.msk [vmem:[#allocation3 + $0xb8] sm:$0xff] %vm15398_vm0, %v5041_v39 }
 0x65e   : > { %5124 = vst.msk [vmem:[#allocation3 + $0xb0] sm:$0xff] %vm15414_vm12, %v5039_v43  ;;  %vm15421_vm12 = vmmov %vm15398_vm0 }
 0x660   : > { %v5045_v26 = vpop.permute.xlu1 %5044  ;;  %v5043_v33 = vpop.permute.xlu0 %5042 }
 0x661   : > { %5127 = vst.msk [vmem:[#allocation3 + $0xc8] sm:$0xff] %vm15415_vm4, %v5045_v26  ;;  %vm15422_vm4 = vmmov %vm15398_vm0 }
 0x662   : > { %5126 = vst.msk [vmem:[#allocation3 + $0xc0] sm:$0xff] %vm15416_vm7, %v5043_v33  ;;  %vm15423_vm7 = vmmov %vm15398_vm0 }
 0x664   : > { %v5049_v56 = vpop.permute.xlu1 %5048  ;;  %v5047_v19 = vpop.permute.xlu0 %5046 }
 0x665   : > { %5129 = vst.msk [vmem:[#allocation3 + $0xd8] sm:$0xff] %vm15417_vm10, %v5049_v56  ;;  %vm15424_vm10 = vmmov %vm15398_vm0 }
 0x666   : > { %5128 = vst.msk [vmem:[#allocation3 + $0xd0] sm:$0xff] %vm15418_vm11, %v5047_v19  ;;  %vm15425_vm11 = vmmov %vm15398_vm0 }
 0x668   : > { %v5053_v29 = vpop.permute.xlu1 %5052  ;;  %v5051_v55 = vpop.permute.xlu0 %5050 }
 0x669   : > { %5131 = vst.msk [vmem:[#allocation3 + $0xe8] sm:$0xff] %vm15419_vm6, %v5053_v29  ;;  %vm15426_vm6 = vcmask 589312  }
 0x66a   : > { %5130 = vst.msk [vmem:[#allocation3 + $0xe0] sm:$0xff] %vm15420_vm3, %v5051_v55  ;;  %vm15427_vm3 = vmmov %vm15426_vm6 }
 0x66c   : > { %v5057_v44 = vpop.permute.xlu1 %5056  ;;  %v5055_v5 = vpop.permute.xlu0 %5054 }
 0x66d   : > { %5133 = vst.msk [vmem:[#allocation3 + $0xf8] sm:$0xff] %vm15398_vm0, %v5057_v44  ;;  %vm15428_vm0 = vmmov %vm15427_vm3 }
 0x66e   : > { %5132 = vst.msk [vmem:[#allocation3 + $0xf0] sm:$0xff] %vm15421_vm12, %v5055_v5  ;;  %vm15429_vm12 = vmmov %vm15428_vm0 }
 0x670   : > { %v5061_v49 = vpop.permute.xlu1 %5060  ;;  %v5059_v48 = vpop.permute.xlu0 %5058 }
 0x671   : > { %5135 = vst.msk [vmem:[#allocation3 + $0x108] sm:$0xff] %vm15422_vm4, %v5061_v49  ;;  %vm15430_vm4 = vmmov %vm15428_vm0 }
 0x672   : > { %5134 = vst.msk [vmem:[#allocation3 + $0x100] sm:$0xff] %vm15423_vm7, %v5059_v48  ;;  %vm15431_vm7 = vmmov %vm15428_vm0 }
 0x674   : > { %v5065_v54 = vpop.permute.xlu1 %5064  ;;  %v5063_v50 = vpop.permute.xlu0 %5062 }
 0x675   : > { %5137 = vst.msk [vmem:[#allocation3 + $0x118] sm:$0xff] %vm15424_vm10, %v5065_v54  ;;  %vm15432_vm10 = vcmask 588800  }
 0x676   : > { %5136 = vst.msk [vmem:[#allocation3 + $0x110] sm:$0xff] %vm15425_vm11, %v5063_v50  ;;  %vm15433_vm11 = vmmov %vm15432_vm10 }
 0x678   : > { %v5213_v3 = vpop.permute.xlu1 %5212  ;;  %v5211_v37 = vpop.permute.xlu0 %5210 }
 0x679   : > { %5319 = vst.msk [vmem:[#allocation3 + $0x8] sm:$0xff] %vm15426_vm6, %v5213_v3  ;;  %vm15434_vm6 = vmmov %vm15428_vm0 }
 0x67a   : > { %5318 = vst.msk [vmem:[#allocation3] sm:$0xff] %vm15427_vm3, %v5211_v37  ;;  %vm15435_vm3 = vmmov %vm15428_vm0 }
 0x67c   : > { %v5217_v16 = vpop.permute.xlu1 %5216  ;;  %v5215_v51 = vpop.permute.xlu0 %5214 }
 0x67d   : > { %5321 = vst.msk [vmem:[#allocation3 + $0x18] sm:$0xff] %vm15428_vm0, %v5217_v16  ;;  %vm15436_vm0 = vmmov %vm15432_vm10 }
 0x67e   : > { %5320 = vst.msk [vmem:[#allocation3 + $0x10] sm:$0xff] %vm15429_vm12, %v5215_v51  ;;  %vm15437_vm12 = vmmov %vm15436_vm0 }
 0x680   : > { %v5221_v13 = vpop.permute.xlu1 %5220  ;;  %v5219_v41 = vpop.permute.xlu0 %5218  ;;  %v5355_v42 = vld [vmem:[#allocation3 + $0x8] sm:$0xff] }
 0x681   : > { %v5354_v14 = vld [vmem:[#allocation3] sm:$0xff]  ;;  %5323 = vst.msk [vmem:[#allocation3 + $0x28] sm:$0xff] %vm15430_vm4, %v5221_v13  ;;  %vm15438_vm4 = vmmov %vm15435_vm3 }
 0x682   : > { %5322 = vst.msk [vmem:[#allocation3 + $0x20] sm:$0xff] %vm15431_vm7, %v5219_v41  ;;  %8942 = vmatprep.mubr.msk.f32.mxu1 %vm15432_vm10, %v5354_v14  ;;  %vm15439_vm7 = vmmov %vm15435_vm3 }
 0x683   : > { %8943 = vmatmul.mubr.msk.f32.vlgmr.msra.gmra.mrb[18].mxu1 %vm15433_vm11, %v5355_v42  ;;  %vm15440_vm10 = vmmov %vm15436_vm0 }
 0x684   : > { %v5225_v59 = vpop.permute.xlu1 %5224  ;;  %v5223_v24 = vpop.permute.xlu0 %5222  ;;  %v5357_v46 = vld [vmem:[#allocation3 + $0x18] sm:$0xff]  ;;  %vm15441_vm11 = vmmov %vm15436_vm0 }
 0x685   : > { %v5356_v61 = vld [vmem:[#allocation3 + $0x10] sm:$0xff]  ;;  %5325 = vst.msk [vmem:[#allocation3 + $0x38] sm:$0xff] %vm15434_vm6, %v5225_v59  ;;  %vm15442_vm6 = vmmov %vm15435_vm3 }
 0x686   : > { %5324 = vst.msk [vmem:[#allocation3 + $0x30] sm:$0xff] %vm15435_vm3, %v5223_v24  ;;  %8945 = vmatprep.mubr.msk.f32.mxu1 %vm15436_vm0, %v5356_v61 }
 0x687   : > { %8946 = vmatmul.mubr.msk.f32.gmra.mrb[20].mxu1 %vm15437_vm12, %v5357_v46  ;;  %vm15443_vm12 = vmmov %vm15436_vm0 }
 0x688   : > { %v5229_v6 = vpop.permute.xlu1 %5228  ;;  %v5227_v8 = vpop.permute.xlu0 %5226  ;;  %v5359_v17 = vld [vmem:[#allocation3 + $0x28] sm:$0xff] }
 0x689   : > { %v5358_v52 = vld [vmem:[#allocation3 + $0x20] sm:$0xff]  ;;  %5327 = vst.msk [vmem:[#allocation3 + $0x48] sm:$0xff] %vm15438_vm4, %v5229_v6  ;;  %vm15444_vm4 = vmmov %vm15435_vm3 }
 0x68a   : > { %5326 = vst.msk [vmem:[#allocation3 + $0x40] sm:$0xff] %vm15439_vm7, %v5227_v8  ;;  %8948 = vmatprep.mubr.msk.f32.mxu1 %vm15440_vm10, %v5358_v52  ;;  %vm15445_vm7 = vmmov %vm15435_vm3 }
 0x68b   : > { %8949 = vmatmul.mubr.msk.f32.gmra.mrb[22].mxu1 %vm15441_vm11, %v5359_v17  ;;  %vm15446_vm10 = vmmov %vm15436_vm0 }
 0x68c   : > { %v5233_v36 = vpop.permute.xlu1 %5232  ;;  %v5231_v47 = vpop.permute.xlu0 %5230  ;;  %v5361_v57 = vld [vmem:[#allocation3 + $0x38] sm:$0xff]  ;;  %vm15447_vm11 = vmmov %vm15436_vm0 }
 0x68d   : > { %v5360_v2 = vld [vmem:[#allocation3 + $0x30] sm:$0xff]  ;;  %5329 = vst.msk [vmem:[#allocation3 + $0x58] sm:$0xff] %vm15442_vm6, %v5233_v36  ;;  %vm15448_vm6 = vmmov %vm15435_vm3 }
 0x68e   : > { %5328 = vst.msk [vmem:[#allocation3 + $0x50] sm:$0xff] %vm15435_vm3, %v5231_v47  ;;  %8951 = vmatprep.mubr.msk.f32.mxu1 %vm15436_vm0, %v5360_v2 }
 0x68f   : > { %8952 = vmatmul.mubr.msk.f32.gmra.mrb[24].mxu1 %vm15443_vm12, %v5361_v57  ;;  %vm15449_vm12 = vmmov %vm15436_vm0 }
 0x690   : > { %v5237_v7 = vpop.permute.xlu1 %5236  ;;  %v5235_v38 = vpop.permute.xlu0 %5234  ;;  %v5363_v53 = vld [vmem:[#allocation3 + $0x48] sm:$0xff] }
 0x691   : > { %v5362_v35 = vld [vmem:[#allocation3 + $0x40] sm:$0xff]  ;;  %5331 = vst.msk [vmem:[#allocation3 + $0x68] sm:$0xff] %vm15444_vm4, %v5237_v7  ;;  %vm15450_vm4 = vmmov %vm15435_vm3 }
 0x692   : > { %5330 = vst.msk [vmem:[#allocation3 + $0x60] sm:$0xff] %vm15445_vm7, %v5235_v38  ;;  %8954 = vmatprep.mubr.msk.f32.mxu1 %vm15446_vm10, %v5362_v35  ;;  %vm15451_vm7 = vmmov %vm15435_vm3 }
 0x693   : > { %8955 = vmatmul.mubr.msk.f32.gmra.mrb[26].mxu1 %vm15447_vm11, %v5363_v53  ;;  %vm15452_vm10 = vmmov %vm15436_vm0 }
 0x694   : > { %v5241_v39 = vpop.permute.xlu1 %5240  ;;  %v5239_v43 = vpop.permute.xlu0 %5238  ;;  %v5365_v33 = vld [vmem:[#allocation3 + $0x58] sm:$0xff]  ;;  %vm15453_vm11 = vmmov %vm15436_vm0 }
 0x695   : > { %v5364_v26 = vld [vmem:[#allocation3 + $0x50] sm:$0xff]  ;;  %5333 = vst.msk [vmem:[#allocation3 + $0x78] sm:$0xff] %vm15448_vm6, %v5241_v39  ;;  %vm15454_vm6 = vmmov %vm15435_vm3 }
 0x696   : > { %5332 = vst.msk [vmem:[#allocation3 + $0x70] sm:$0xff] %vm15435_vm3, %v5239_v43  ;;  %8957 = vmatprep.mubr.msk.f32.mxu1 %vm15436_vm0, %v5364_v26 }
 0x697   : > { %8958 = vmatmul.mubr.msk.f32.gmra.mrb[28].mxu1 %vm15449_vm12, %v5365_v33  ;;  %vm15455_vm12 = vmmov %vm15436_vm0 }
 0x698   : > { %v5245_v56 = vpop.permute.xlu1 %5244  ;;  %v5243_v19 = vpop.permute.xlu0 %5242  ;;  %v5367_v55 = vld [vmem:[#allocation3 + $0x68] sm:$0xff] }
 0x699   : > { %v5366_v29 = vld [vmem:[#allocation3 + $0x60] sm:$0xff]  ;;  %5335 = vst.msk [vmem:[#allocation3 + $0x88] sm:$0xff] %vm15450_vm4, %v5245_v56  ;;  %vm15456_vm4 = vmmov %vm15435_vm3 }
 0x69a   : > { %5334 = vst.msk [vmem:[#allocation3 + $0x80] sm:$0xff] %vm15451_vm7, %v5243_v19  ;;  %8960 = vmatprep.mubr.msk.f32.mxu1 %vm15452_vm10, %v5366_v29  ;;  %vm15457_vm7 = vmmov %vm15435_vm3 }
 0x69b   : > { %8961 = vmatmul.mubr.msk.f32.gmra.mrb[30].mxu1 %vm15453_vm11, %v5367_v55  ;;  %vm15458_vm10 = vmmov %vm15436_vm0 }
 0x69c   : > { %v5249_v44 = vpop.permute.xlu1 %5248  ;;  %v5247_v5 = vpop.permute.xlu0 %5246  ;;  %v5369_v48 = vld [vmem:[#allocation3 + $0x78] sm:$0xff]  ;;  %vm15459_vm11 = vmmov %vm15436_vm0 }
 0x69d   : > { %v5368_v49 = vld [vmem:[#allocation3 + $0x70] sm:$0xff]  ;;  %5337 = vst.msk [vmem:[#allocation3 + $0x98] sm:$0xff] %vm15454_vm6, %v5249_v44  ;;  %vm15460_vm6 = vmmov %vm15435_vm3 }
 0x69e   : > { %5336 = vst.msk [vmem:[#allocation3 + $0x90] sm:$0xff] %vm15435_vm3, %v5247_v5  ;;  %8963 = vmatprep.mubr.msk.f32.mxu1 %vm15436_vm0, %v5368_v49  ;;  %v12951_v49 = vld [vmem:[%s14646_s4] ss:$0 sm:$0xff] }
 0x69f   : > { %8964 = vmatmul.mubr.msk.f32.gmra.mrb[32].mxu1 %vm15455_vm12, %v5369_v48  ;;  %vm15461_vm12 = vmmov %vm15436_vm0 }
 0x6a0   : > { %v5253_v54 = vpop.permute.xlu1 %5252  ;;  %v5251_v50 = vpop.permute.xlu0 %5250  ;;  %v5371_v37 = vld [vmem:[#allocation3 + $0x88] sm:$0xff] }
 0x6a1   : > { %v5370_v3 = vld [vmem:[#allocation3 + $0x80] sm:$0xff]  ;;  %5339 = vst.msk [vmem:[#allocation3 + $0xa8] sm:$0xff] %vm15456_vm4, %v5253_v54  ;;  %vm15462_vm4 = vmmov %vm15435_vm3 }
 0x6a2   : > { %5338 = vst.msk [vmem:[#allocation3 + $0xa0] sm:$0xff] %vm15457_vm7, %v5251_v50  ;;  %8966 = vmatprep.mubr.msk.f32.mxu1 %vm15458_vm10, %v5370_v3  ;;  %vm15463_vm7 = vmmov %vm15435_vm3 }
 0x6a3   : > { %8967 = vmatmul.mubr.msk.f32.gmra.mrb[34].mxu1 %vm15459_vm11, %v5371_v37  ;;  %vm15464_vm10 = vmmov %vm15436_vm0 }
 0x6a4   : > { %v5257_v16 = vpop.permute.xlu1 %5256  ;;  %v5255_v51 = vpop.permute.xlu0 %5254  ;;  %v5373_v41 = vld [vmem:[#allocation3 + $0x98] sm:$0xff]  ;;  %vm15465_vm11 = vmmov %vm15436_vm0 }
 0x6a5   : > { %v5372_v13 = vld [vmem:[#allocation3 + $0x90] sm:$0xff]  ;;  %5341 = vst.msk [vmem:[#allocation3 + $0xb8] sm:$0xff] %vm15460_vm6, %v5257_v16  ;;  %vm15466_vm6 = vmmov %vm15435_vm3 }
 0x6a6   : > { %5340 = vst.msk [vmem:[#allocation3 + $0xb0] sm:$0xff] %vm15435_vm3, %v5255_v51  ;;  %8969 = vmatprep.mubr.msk.f32.mxu1 %vm15436_vm0, %v5372_v13 }
 0x6a7   : > { %8970 = vmatmul.mubr.msk.f32.gmra.mrb[36].mxu1 %vm15461_vm12, %v5373_v41  ;;  %vm15467_vm12 = vmmov %vm15436_vm0 }
 0x6a8   : > { %v5261_v14 = vpop.permute.xlu1 %5260  ;;  %v5259_v42 = vpop.permute.xlu0 %5258  ;;  %v5375_v24 = vld [vmem:[#allocation3 + $0xa8] sm:$0xff] }
 0x6a9   : > { %v5374_v59 = vld [vmem:[#allocation3 + $0xa0] sm:$0xff]  ;;  %5343 = vst.msk [vmem:[#allocation3 + $0xc8] sm:$0xff] %vm15462_vm4, %v5261_v14  ;;  %vm15468_vm4 = vmmov %vm15435_vm3 }
 0x6aa   : > { %5342 = vst.msk [vmem:[#allocation3 + $0xc0] sm:$0xff] %vm15463_vm7, %v5259_v42  ;;  %8972 = vmatprep.mubr.msk.f32.mxu1 %vm15464_vm10, %v5374_v59  ;;  %vm15469_vm7 = vmmov %vm15435_vm3 }
 0x6ab   : > { %8973 = vmatmul.mubr.msk.f32.gmra.mrb[38].mxu1 %vm15465_vm11, %v5375_v24  ;;  %vm15470_vm10 = vmmov %vm15436_vm0 }
 0x6ac   : > { %v5265_v61 = vpop.permute.xlu1 %5264  ;;  %v5263_v46 = vpop.permute.xlu0 %5262  ;;  %v5377_v8 = vld [vmem:[#allocation3 + $0xb8] sm:$0xff]  ;;  %vm15471_vm11 = vmmov %vm15436_vm0 }
 0x6ad   : > { %v5376_v6 = vld [vmem:[#allocation3 + $0xb0] sm:$0xff]  ;;  %5345 = vst.msk [vmem:[#allocation3 + $0xd8] sm:$0xff] %vm15466_vm6, %v5265_v61  ;;  %vm15472_vm6 = vmmov %vm15435_vm3 }
 0x6ae   : > { %5344 = vst.msk [vmem:[#allocation3 + $0xd0] sm:$0xff] %vm15435_vm3, %v5263_v46  ;;  %8975 = vmatprep.mubr.msk.f32.mxu1 %vm15436_vm0, %v5376_v6 }
 0x6af   : > { %8976 = vmatmul.mubr.msk.f32.gmra.mrb[40].mxu1 %vm15467_vm12, %v5377_v8  ;;  %vm15473_vm12 = vmmov %vm15436_vm0 }
 0x6b0   : > { %v5269_v52 = vpop.permute.xlu1 %5268  ;;  %v5267_v17 = vpop.permute.xlu0 %5266  ;;  %v5379_v47 = vld [vmem:[#allocation3 + $0xc8] sm:$0xff] }
 0x6b1   : > { %v5378_v36 = vld [vmem:[#allocation3 + $0xc0] sm:$0xff]  ;;  %5347 = vst.msk [vmem:[#allocation3 + $0xe8] sm:$0xff] %vm15468_vm4, %v5269_v52  ;;  %vm15474_vm4 = vmmov %vm15435_vm3 }
 0x6b2   : > { %5346 = vst.msk [vmem:[#allocation3 + $0xe0] sm:$0xff] %vm15469_vm7, %v5267_v17  ;;  %8978 = vmatprep.mubr.msk.f32.mxu1 %vm15470_vm10, %v5378_v36  ;;  %vm15475_vm7 = vmmov %vm15435_vm3 }
 0x6b3   : > { %8979 = vmatmul.mubr.msk.f32.gmra.mrb[42].mxu1 %vm15471_vm11, %v5379_v47  ;;  %vm15476_vm10 = vmmov %vm15436_vm0 }
 0x6b4   : > { %v5273_v2 = vpop.permute.xlu1 %5272  ;;  %v5271_v57 = vpop.permute.xlu0 %5270  ;;  %v5381_v38 = vld [vmem:[#allocation3 + $0xd8] sm:$0xff]  ;;  %vm15477_vm11 = vmmov %vm15436_vm0 }
 0x6b5   : > { %v5380_v7 = vld [vmem:[#allocation3 + $0xd0] sm:$0xff]  ;;  %5349 = vst.msk [vmem:[#allocation3 + $0xf8] sm:$0xff] %vm15472_vm6, %v5273_v2  ;;  %vm15478_vm6 = vmmov %vm15435_vm3 }
 0x6b6   : > { %5348 = vst.msk [vmem:[#allocation3 + $0xf0] sm:$0xff] %vm15435_vm3, %v5271_v57  ;;  %8981 = vmatprep.mubr.msk.f32.mxu1 %vm15436_vm0, %v5380_v7 }
 0x6b7   : > { %8982 = vmatmul.mubr.msk.f32.gmra.mrb[44].mxu1 %vm15473_vm12, %v5381_v38  ;;  %vm15479_vm12 = vmmov %vm15436_vm0 }
 0x6b8   : > { %v5277_v35 = vpop.permute.xlu1 %5276  ;;  %v5275_v53 = vpop.permute.xlu0 %5274  ;;  %v5383_v43 = vld [vmem:[#allocation3 + $0xe8] sm:$0xff] }
 0x6b9   : > { %v5382_v39 = vld [vmem:[#allocation3 + $0xe0] sm:$0xff]  ;;  %5351 = vst.msk [vmem:[#allocation3 + $0x108] sm:$0xff] %vm15474_vm4, %v5277_v35  ;;  %vm15480_vm4 = vmmov %vm15436_vm0 }
 0x6ba   : > { %5350 = vst.msk [vmem:[#allocation3 + $0x100] sm:$0xff] %vm15475_vm7, %v5275_v53  ;;  %8984 = vmatprep.mubr.msk.f32.mxu1 %vm15476_vm10, %v5382_v39  ;;  %vm15481_vm7 = vmmov %vm15436_vm0 }
 0x6bb   : > { %8985 = vmatmul.mubr.msk.f32.gmra.mrb[46].mxu1 %vm15477_vm11, %v5383_v43  ;;  %vm15482_vm10 = vmmov %vm15436_vm0 }
 0x6bc   : > { %v5279_v26 = vpop.permute.xlu0 %5278  ;;  %v5281_v33 = vpop.permute.xlu1 %5280  ;;  %v5385_v19 = vld [vmem:[#allocation3 + $0xf8] sm:$0xff]  ;;  %vm15483_vm11 = vmmov %vm15436_vm0 }
 0x6bd   : > { %v5384_v56 = vld [vmem:[#allocation3 + $0xf0] sm:$0xff]  ;;  %5352 = vst.msk [vmem:[#allocation3 + $0x110] sm:$0xff] %vm15478_vm6, %v5279_v26  ;;  %vm15492_vm6 = vcmask 64512  }
 0x6be   : > { %5353 = vst.msk [vmem:[#allocation3 + $0x118] sm:$0xff] %vm15435_vm3, %v5281_v33  ;;  %8987 = vmatprep.mubr.msk.f32.mxu1 %vm15436_vm0, %v5384_v56  ;;  %vm15493_vm3 = vmmov %vm15492_vm6  ;;  %vm15496_vm0 = vnez %v14908_v30 }
 0x6bf   : > { %8988 = vmatmul.mubr.msk.f32.gmra.mrb[48].mxu1 %vm15479_vm12, %v5385_v19  ;;  %vm15497_vm12 = vmmov %vm15493_vm3 }
 0x6c0   : > { %v5387_v55 = vld [vmem:[#allocation3 + $0x108] sm:$0xff] }
 0x6c1   : > { %v5386_v29 = vld [vmem:[#allocation3 + $0x100] sm:$0xff] }
 0x6c2   : > { %8990 = vmatprep.mubr.msk.f32.mxu1 %vm15480_vm4, %v5386_v29  ;;  %vm15498_vm4 = vnez %v14914_v23 }
 0x6c3   : > { %8991 = vmatmul.mubr.msk.f32.gmra.mrb[50].mxu1 %vm15481_vm7, %v5387_v55  ;;  %vm15499_vm7 = vmmov %vm15493_vm3 }
 0x6c4   : > { %v5388_v44 = vld [vmem:[#allocation3 + $0x110] sm:$0xff] }
 0x6c5   : > { %v5389_v5 = vld [vmem:[#allocation3 + $0x118] sm:$0xff]  ;;  %8993 = vmatprep.mubr.msk.f32.mxu1 %vm15482_vm10, %v5388_v44  ;;  %vm15502_vm10 = vnez %v14921_v10 }
 0x6c7   : > { %8994 = vmatmul.mubr.msk.f32.gmra.mrb[52].mxu1 %vm15483_vm11, %v5389_v5  ;;  %vm15503_vm11 = vmmov %vm15493_vm3 }
 0x756   : > { %v8944_v48 = vpop.f32.mrb[18].mxu1 }
 0x757   : > { %v12954_v54 = vadd.f32 %v8944_v48, %v12951_v49  ;;  %v5580_v50 = vpop.f32.mrb[19].mxu1 }
 0x758   : > { %v12957_v3 = vadd.f32 %v12951_v49, %v5580_v50 }
 0x759   : > { %v14826_v37 = vmax.f32 %v12954_v54, 0.0 }
 0x75a   : > { %v14825_v16 = vmax.f32 %v12957_v3, 0.0  ;;  %v8947_v51 = vpop.f32.mrb[20].mxu1 }
 0x75b   : > { %v12962_v13 = vadd.f32 %v8947_v51, %v12951_v49  ;;  %5833 = vrot.lane.b32.xlu1 %v14826_v37, %s9234_s12  ;;  %v5590_v41 = vpop.f32.mrb[21].mxu1 }
 0x75c   : > { %v12968_v14 = vadd.f32 %v12951_v49, %v5590_v41  ;;  %5831 = vrot.lane.b32.xlu0 %v14825_v16, %s9234_s12 }
 0x75d   : > { %v14822_v42 = vmax.f32 %v12962_v13, 0.0 }
 0x75e   : > { %v14821_v59 = vmax.f32 %v12968_v14, 0.0  ;;  %v8950_v24 = vpop.f32.mrb[22].mxu1 }
 0x75f   : > { %v12976_v61 = vadd.f32 %v8950_v24, %v12951_v49  ;;  %5837 = vrot.lane.b32.xlu1 %v14822_v42, %s9234_s12  ;;  %v5600_v46 = vpop.f32.mrb[23].mxu1 }
 0x760   : > { %v12982_v6 = vadd.f32 %v12951_v49, %v5600_v46  ;;  %5835 = vrot.lane.b32.xlu0 %v14821_v59, %s9234_s12 }
 0x761   : > { %v14818_v8 = vmax.f32 %v12976_v61, 0.0 }
 0x762   : > { %v14817_v52 = vmax.f32 %v12982_v6, 0.0  ;;  %v8953_v17 = vpop.f32.mrb[24].mxu1 }
 0x763   : > { %v12990_v36 = vadd.f32 %v8953_v17, %v12951_v49  ;;  %5841 = vrot.lane.b32.xlu1 %v14818_v8, %s9234_s12  ;;  %v5610_v47 = vpop.f32.mrb[25].mxu1 }
 0x764   : > { %v12996_v2 = vadd.f32 %v12951_v49, %v5610_v47  ;;  %5839 = vrot.lane.b32.xlu0 %v14817_v52, %s9234_s12 }
 0x765   : > { %v14814_v57 = vmax.f32 %v12990_v36, 0.0 }
 0x766   : > { %v14813_v7 = vmax.f32 %v12996_v2, 0.0  ;;  %v8956_v38 = vpop.f32.mrb[26].mxu1 }
 0x767   : > { %v13004_v35 = vadd.f32 %v8956_v38, %v12951_v49  ;;  %5845 = vrot.lane.b32.xlu1 %v14814_v57, %s9234_s12  ;;  %v5620_v53 = vpop.f32.mrb[27].mxu1 }
 0x768   : > { %v13010_v39 = vadd.f32 %v12951_v49, %v5620_v53  ;;  %5843 = vrot.lane.b32.xlu0 %v14813_v7, %s9234_s12 }
 0x769   : > { %v14810_v43 = vmax.f32 %v13004_v35, 0.0 }
 0x76a   : > { %v14809_v26 = vmax.f32 %v13010_v39, 0.0  ;;  %v8959_v33 = vpop.f32.mrb[28].mxu1 }
 0x76b   : > { %v13018_v56 = vadd.f32 %v8959_v33, %v12951_v49  ;;  %5849 = vrot.lane.b32.xlu1 %v14810_v43, %s9234_s12  ;;  %v5630_v19 = vpop.f32.mrb[29].mxu1 }
 0x76c   : > { %v13024_v29 = vadd.f32 %v12951_v49, %v5630_v19  ;;  %5847 = vrot.lane.b32.xlu0 %v14809_v26, %s9234_s12 }
 0x76d   : > { %v14806_v55 = vmax.f32 %v13018_v56, 0.0 }
 0x76e   : > { %v14805_v44 = vmax.f32 %v13024_v29, 0.0  ;;  %v8962_v5 = vpop.f32.mrb[30].mxu1 }
 0x76f   : > { %v13032_v48 = vadd.f32 %v8962_v5, %v12951_v49  ;;  %5853 = vrot.lane.b32.xlu1 %v14806_v55, %s9234_s12  ;;  %v5640_v50 = vpop.f32.mrb[31].mxu1 }
 0x770   : > { %v13038_v51 = vadd.f32 %v12951_v49, %v5640_v50  ;;  %5851 = vrot.lane.b32.xlu0 %v14805_v44, %s9234_s12 }
 0x771   : > { %v14802_v41 = vmax.f32 %v13032_v48, 0.0 }
 0x772   : > { %v14801_v24 = vmax.f32 %v13038_v51, 0.0  ;;  %v8965_v46 = vpop.f32.mrb[32].mxu1 }
 0x773   : > { %v13046_v17 = vadd.f32 %v8965_v46, %v12951_v49  ;;  %5857 = vrot.lane.b32.xlu1 %v14802_v41, %s9234_s12  ;;  %v5650_v47 = vpop.f32.mrb[33].mxu1 }
 0x774   : > { %v13052_v38 = vadd.f32 %v12951_v49, %v5650_v47  ;;  %5855 = vrot.lane.b32.xlu0 %v14801_v24, %s9234_s12 }
 0x775   : > { %v14803_v53 = vmax.f32 %v13046_v17, 0.0 }
 0x776   : > { %v14804_v33 = vmax.f32 %v13052_v38, 0.0  ;;  %v8968_v19 = vpop.f32.mrb[34].mxu1 }
 0x777   : > { %v13060_v5 = vadd.f32 %v8968_v19, %v12951_v49  ;;  %5861 = vrot.lane.b32.xlu1 %v14803_v53, %s9234_s12  ;;  %v5660_v50 = vpop.f32.mrb[35].mxu1 }
 0x778   : > { %v13066_v46 = vadd.f32 %v12951_v49, %v5660_v50  ;;  %5859 = vrot.lane.b32.xlu0 %v14804_v33, %s9234_s12 }
 0x779   : > { %v14807_v47 = vmax.f32 %v13060_v5, 0.0 }
 0x77a   : > { %v14808_v24 = vmax.f32 %v13066_v46, 0.0  ;;  %v8971_v41 = vpop.f32.mrb[36].mxu1 }
 0x77b   : > { %v13074_v19 = vadd.f32 %v8971_v41, %v12951_v49  ;;  %5865 = vrot.lane.b32.xlu1 %v14807_v47, %s9234_s12  ;;  %v5670_v53 = vpop.f32.mrb[37].mxu1 }
 0x77c   : > { %v13080_v50 = vadd.f32 %v12951_v49, %v5670_v53  ;;  %5863 = vrot.lane.b32.xlu0 %v14808_v24, %s9234_s12 }
 0x77d   : > { %v14811_v33 = vmax.f32 %v13074_v19, 0.0 }
 0x77e   : > { %v14812_v44 = vmax.f32 %v13080_v50, 0.0  ;;  %v8974_v55 = vpop.f32.mrb[38].mxu1 }
 0x77f   : > { %v13088_v41 = vadd.f32 %v8974_v55, %v12951_v49  ;;  %5869 = vrot.lane.b32.xlu1 %v14811_v33, %s9234_s12  ;;  %v5680_v47 = vpop.f32.mrb[39].mxu1 }
 0x780   : > { %v13094_v53 = vadd.f32 %v12951_v49, %v5680_v47  ;;  %5867 = vrot.lane.b32.xlu0 %v14812_v44, %s9234_s12 }
 0x781   : > { %v14815_v24 = vmax.f32 %v13088_v41, 0.0 }
 0x782   : > { %v14816_v26 = vmax.f32 %v13094_v53, 0.0  ;;  %v8977_v43 = vpop.f32.mrb[40].mxu1 }
 0x783   : > { %v13102_v55 = vadd.f32 %v8977_v43, %v12951_v49  ;;  %5873 = vrot.lane.b32.xlu1 %v14815_v24, %s9234_s12  ;;  %v5690_v33 = vpop.f32.mrb[41].mxu1 }
 0x784   : > { %v13108_v47 = vadd.f32 %v12951_v49, %v5690_v33  ;;  %5871 = vrot.lane.b32.xlu0 %v14816_v26, %s9234_s12 }
 0x785   : > { %v14819_v44 = vmax.f32 %v13102_v55, 0.0 }
 0x786   : > { %v14820_v7 = vmax.f32 %v13108_v47, 0.0  ;;  %v8980_v57 = vpop.f32.mrb[42].mxu1 }
 0x787   : > { %v13116_v43 = vadd.f32 %v8980_v57, %v12951_v49  ;;  %5877 = vrot.lane.b32.xlu1 %v14819_v44, %s9234_s12  ;;  %v5700_v24 = vpop.f32.mrb[43].mxu1 }
 0x788   : > { %v13122_v33 = vadd.f32 %v12951_v49, %v5700_v24  ;;  %5875 = vrot.lane.b32.xlu0 %v14820_v7, %s9234_s12 }
 0x789   : > { %v14823_v26 = vmax.f32 %v13116_v43, 0.0 }
 0x78a   : > { %v14824_v52 = vmax.f32 %v13122_v33, 0.0  ;;  %v8983_v8 = vpop.f32.mrb[44].mxu1 }
 0x78b   : > { %v13130_v57 = vadd.f32 %v8983_v8, %v12951_v49  ;;  %5881 = vrot.lane.b32.xlu1 %v14823_v26, %s9234_s12  ;;  %v5710_v44 = vpop.f32.mrb[45].mxu1 }
 0x78c   : > { %v13136_v24 = vadd.f32 %v12951_v49, %v5710_v44  ;;  %5879 = vrot.lane.b32.xlu0 %v14824_v52, %s9234_s12 }
 0x78d   : > { %v14827_v7 = vmax.f32 %v13130_v57, 0.0 }
 0x78e   : > { %15484 = vst [vmem:[#allocation14_spill] sm:$0xff] %v13136_v24  ;;  %v14828_v59 = vmax.f32 %v13136_v24, 0.0  ;;  %v8986_v42 = vpop.f32.mrb[46].mxu1 }
 0x78f   : > { %v13144_v8 = vadd.f32 %v8986_v42, %v12951_v49  ;;  %5885 = vrot.lane.b32.xlu1 %v14827_v7, %s9234_s12  ;;  %v5720_v26 = vpop.f32.mrb[47].mxu1 }
 0x790   : > { %v13150_v44 = vadd.f32 %v12951_v49, %v5720_v26  ;;  %5883 = vrot.lane.b32.xlu0 %v14828_v59, %s9234_s12 }
 0x791   : > { %15485 = vst [vmem:[#allocation15_spill] sm:$0xff] %v13144_v8  ;;  %v14832_v52 = vmax.f32 %v13144_v8, 0.0 }
 0x792   : > { %15486 = vst [vmem:[#allocation16_spill] sm:$0xff] %v13150_v44  ;;  %v14833_v16 = vmax.f32 %v13150_v44, 0.0  ;;  %v8989_v37 = vpop.f32.mrb[48].mxu1 }
 0x793   : > { %v13158_v42 = vadd.f32 %v8989_v37, %v12951_v49  ;;  %5889 = vrot.lane.b32.xlu1 %v14832_v52, %s9234_s12  ;;  %v5730_v7 = vpop.f32.mrb[49].mxu1 }
 0x794   : > { %v13164_v26 = vadd.f32 %v12951_v49, %v5730_v7  ;;  %5887 = vrot.lane.b32.xlu0 %v14833_v16, %s9234_s12 }
 0x795   : > { %v14836_v59 = vmax.f32 %v13158_v42, 0.0 }
 0x796   : > { %15487 = vst [vmem:[#allocation17_spill] sm:$0xff] %v13164_v26  ;;  %v14837_v28 = vmax.f32 %v13164_v26, 0.0  ;;  %v8992_v24 = vpop.f32.mrb[50].mxu1 }
 0x797   : > { %v13172_v37 = vadd.f32 %v8992_v24, %v12951_v49  ;;  %5893 = vrot.lane.b32.xlu1 %v14836_v59, %s9234_s12  ;;  %v5740_v52 = vpop.f32.mrb[51].mxu1 }
 0x798   : > { %v13178_v7 = vadd.f32 %v12951_v49, %v5740_v52  ;;  %5891 = vrot.lane.b32.xlu0 %v14837_v28, %s9234_s12 }
 0x799   : > { %15488 = vst [vmem:[#allocation18_spill] sm:$0xff] %v13172_v37  ;;  %v14839_v16 = vmax.f32 %v13172_v37, 0.0 }
 0x79a   : > { %15489 = vst [vmem:[#allocation19_spill] sm:$0xff] %v13178_v7  ;;  %v14840_v44 = vmax.f32 %v13178_v7, 0.0  ;;  %v8995_v8 = vpop.f32.mrb[52].mxu1 }
 0x79b   : > { %v13186_v24 = vadd.f32 %v8995_v8, %v12951_v49  ;;  %5897 = vrot.lane.b32.xlu1 %v14839_v16, %s9234_s12  ;;  %v5750_v59 = vpop.f32.mrb[53].mxu1  ;;  %v6120_v8 = vld [vmem:[#allocation2 + $0x9] sm:$0xff]  ;;  %v6119_v16 = vld [vmem:[#allocation2 + $0x1] sm:$0xff] }
 0x79c   : > { %v13192_v52 = vadd.f32 %v12951_v49, %v5750_v59  ;;  %5895 = vrot.lane.b32.xlu0 %v14840_v44, %s9234_s12  ;;  %v6048_v49 = vld [vmem:[#allocation2 + $0x8] sm:$0xff]  ;;  %v6047_v59 = vld [vmem:[#allocation2] sm:$0xff] }
 0x79d   : > { %15490 = vst [vmem:[#allocation20_spill] sm:$0xff] %v13186_v24  ;;  %v14842_v28 = vmax.f32 %v13186_v24, 0.0  ;;  %6084 = vst.msk [vmem:[#allocation3 + $0x8] sm:$0xff] %vm15492_vm6, %v6048_v49  ;;  %v15494_v24 = vmax.f32 %v12954_v54, 0.0  ;;  %v15500_v49 = vmax.f32 %v12962_v13, 0.0 }
 0x79e   : > { %15491 = vst [vmem:[#allocation21_spill] sm:$0xff] %v13192_v52  ;;  %v14845_v26 = vmax.f32 %v13192_v52, 0.0  ;;  %6083 = vst.msk [vmem:[#allocation3] sm:$0xff] %vm15493_vm3, %v6047_v59  ;;  %v15495_v52 = vmax.f32 %v12957_v3, 0.0 }
 0x79f   : > { %5901 = vrot.lane.b32.xlu1 %v14842_v28, %s9234_s12 }
 0x7a0   : > { %5899 = vrot.lane.b32.xlu0 %v14845_v26, %s9234_s12 }
 0x7a3   : > { %6193 = vrot.lane.b32.xlu1 %v6120_v8, %s9226_s25 }
 0x7a4   : > { %6191 = vrot.lane.b32.xlu0 %v6119_v16, %s9226_s25 }
 0x7cd   : > { %v5834_v44 = vpop.permute.xlu1 %5833 }
 0x7ce   : > { %v5940_v28 = vadd.f32 %v5834_v44, %v15494_v24  ;;  %v5832_v7 = vpop.permute.xlu0 %5831  ;;  %v15501_v44 = vmax.f32 %v12968_v14, 0.0 }
 0x7cf   : > { %v5939_v26 = vadd.f32 %v5832_v7, %v15495_v52 }
 0x7d0   : > { %v5976_v37 = vsel %vm15496_vm0, %v5940_v28, 0.0  ;;  %v15504_v28 = vld [vmem:[#allocation33_spill] sm:$0xff] }
 0x7d1   : > { %6012 = vst.msk [vmem:[#allocation2 + $0x1b] sm:$0xff] %vm15497_vm12, %v5976_v37  ;;  %v5975_v16 = vsel %vm15498_vm4, %v5939_v26, 0.0  ;;  %v5838_v8 = vpop.permute.xlu1 %5837  ;;  %vm15505_vm6 = vnez %v15504_v28  ;;  %v15506_v26 = vmax.f32 %v12976_v61, 0.0  ;;  %vm15508_vm12 = vnez %v14930_v1 }
 0x7d2   : > { %6011 = vst.msk [vmem:[#allocation2 + $0x13] sm:$0xff] %vm15499_vm7, %v5975_v16  ;;  %v5942_v59 = vadd.f32 %v5838_v8, %v15500_v49  ;;  %v5836_v54 = vpop.permute.xlu0 %5835  ;;  %v15507_v16 = vmax.f32 %v12982_v6, 0.0  ;;  %vm15509_vm7 = vmmov %vm15493_vm3  ;;  %v15512_v61 = vmax.f32 %v12990_v36, 0.0 }
 0x7d3   : > { %v5941_v24 = vadd.f32 %v5836_v54, %v15501_v44 }
 0x7d4   : > { %v5978_v3 = vsel %vm15502_vm10, %v5942_v59, 0.0  ;;  %vm15518_vm10 = vmmov %vm15493_vm3 }
 0x7d5   : > { %6014 = vst.msk [vmem:[#allocation2 + $0x2b] sm:$0xff] %vm15503_vm11, %v5978_v3  ;;  %v5977_v37 = vsel %vm15505_vm6, %v5941_v24, 0.0  ;;  %v5842_v7 = vpop.permute.xlu1 %5841  ;;  %vm15510_vm11 = vnez %v14934_v27  ;;  %vm15511_vm6 = vmmov %vm15493_vm3 }
 0x7d6   : > { %6013 = vst.msk [vmem:[#allocation2 + $0x23] sm:$0xff] %vm15493_vm3, %v5977_v37  ;;  %v5944_v52 = vadd.f32 %v5842_v7, %v15506_v26  ;;  %v5840_v13 = vpop.permute.xlu0 %5839  ;;  %v15513_v7 = vmax.f32 %v12996_v2, 0.0  ;;  %v15519_v2 = vmax.f32 %v13004_v35, 0.0 }
 0x7d7   : > { %v5943_v8 = vadd.f32 %v5840_v13, %v15507_v16 }
 0x7d8   : > { %v5980_v14 = vsel %vm15508_vm12, %v5944_v52, 0.0  ;;  %vm15517_vm12 = vnez %v14945_v40 }
 0x7d9   : > { %6016 = vst.msk [vmem:[#allocation2 + $0x3b] sm:$0xff] %vm15509_vm7, %v5980_v14  ;;  %v5979_v49 = vsel %vm15510_vm11, %v5943_v8, 0.0  ;;  %v5846_v59 = vpop.permute.xlu1 %5845  ;;  %v6122_v54 = vld [vmem:[#allocation2 + $0x19] sm:$0xff]  ;;  %v6121_v44 = vld [vmem:[#allocation2 + $0x11] sm:$0xff]  ;;  %vm15514_vm7 = vmmov %vm15493_vm3  ;;  %vm15515_vm11 = vnez %v14940_v20 }
 0x7da   : > { %6015 = vst.msk [vmem:[#allocation2 + $0x33] sm:$0xff] %vm15511_vm6, %v5979_v49  ;;  %v5946_v24 = vadd.f32 %v5846_v59, %v15512_v61  ;;  %6197 = vrot.lane.b32.xlu1 %v6122_v54, %s9226_s25  ;;  %6195 = vrot.lane.b32.xlu0 %v6121_v44, %s9226_s25  ;;  %v5844_v6 = vpop.permute.xlu0 %5843  ;;  %v6050_v3 = vld [vmem:[#allocation2 + $0x18] sm:$0xff]  ;;  %v6049_v37 = vld [vmem:[#allocation2 + $0x10] sm:$0xff]  ;;  %vm15516_vm6 = vmmov %vm15493_vm3  ;;  %v15520_v44 = vmax.f32 %v13010_v39, 0.0  ;;  %v15526_v39 = vmax.f32 %v13018_v56, 0.0 }
 0x7db   : > { %v5945_v26 = vadd.f32 %v5844_v6, %v15513_v7  ;;  %6086 = vst.msk [vmem:[#allocation3 + $0x18] sm:$0xff] %vm15493_vm3, %v6050_v3 }
 0x7dc   : > { %6085 = vst.msk [vmem:[#allocation3 + $0x10] sm:$0xff] %vm15514_vm7, %v6049_v37  ;;  %v5982_v52 = vsel %vm15515_vm11, %v5946_v24, 0.0  ;;  %vm15521_vm7 = vmmov %vm15493_vm3 }
 0x7dd   : > { %6018 = vst.msk [vmem:[#allocation2 + $0x4b] sm:$0xff] %vm15516_vm6, %v5982_v52  ;;  %v5981_v36 = vsel %vm15517_vm12, %v5945_v26, 0.0  ;;  %v5850_v13 = vpop.permute.xlu1 %5849  ;;  %v6124_v16 = vld [vmem:[#allocation2 + $0x29] sm:$0xff]  ;;  %v6123_v8 = vld [vmem:[#allocation2 + $0x21] sm:$0xff]  ;;  %vm15522_vm6 = vnez %v14962_v11  ;;  %vm15524_vm12 = vnez %v14971_v31  ;;  %vm15525_vm11 = vmmov %vm15493_vm3 }
 0x7de   : > { %6017 = vst.msk [vmem:[#allocation2 + $0x43] sm:$0xff] %vm15518_vm10, %v5981_v36  ;;  %v5948_v14 = vadd.f32 %v5850_v13, %v15519_v2  ;;  %6201 = vrot.lane.b32.xlu1 %v6124_v16, %s9226_s25  ;;  %6199 = vrot.lane.b32.xlu0 %v6123_v8, %s9226_s25  ;;  %v5848_v49 = vpop.permute.xlu0 %5847  ;;  %v6052_v59 = vld [vmem:[#allocation2 + $0x28] sm:$0xff]  ;;  %v6051_v54 = vld [vmem:[#allocation2 + $0x20] sm:$0xff]  ;;  %vm15523_vm10 = vmmov %vm15493_vm3  ;;  %v15527_v13 = vmax.f32 %v13024_v29, 0.0  ;;  %v15533_v29 = vmax.f32 %v13032_v48, 0.0 }
 0x7df   : > { %v5947_v61 = vadd.f32 %v5848_v49, %v15520_v44  ;;  %6088 = vst.msk [vmem:[#allocation3 + $0x28] sm:$0xff] %vm15493_vm3, %v6052_v59 }
 0x7e0   : > { %6087 = vst.msk [vmem:[#allocation3 + $0x20] sm:$0xff] %vm15521_vm7, %v6051_v54  ;;  %v5984_v24 = vsel %vm15522_vm6, %v5948_v14, 0.0  ;;  %vm15528_vm7 = vmmov %vm15493_vm3 }
 0x7e1   : > { %6020 = vst.msk [vmem:[#allocation2 + $0x5b] sm:$0xff] %vm15523_vm10, %v5984_v24  ;;  %v5983_v35 = vsel %vm15524_vm12, %v5947_v61, 0.0  ;;  %v5854_v6 = vpop.permute.xlu1 %5853  ;;  %v6126_v3 = vld [vmem:[#allocation2 + $0x39] sm:$0xff]  ;;  %v6125_v37 = vld [vmem:[#allocation2 + $0x31] sm:$0xff]  ;;  %vm15529_vm10 = vnez %v14978_v62  ;;  %vm15531_vm12 = vnez %v14982_v32  ;;  %vm15532_vm6 = vmmov %vm15493_vm3  ;;  %v15534_v24 = vmax.f32 %v13038_v51, 0.0 }
 0x7e2   : > { %6019 = vst.msk [vmem:[#allocation2 + $0x53] sm:$0xff] %vm15525_vm11, %v5983_v35  ;;  %v5950_v7 = vadd.f32 %v5854_v6, %v15526_v39  ;;  %6205 = vrot.lane.b32.xlu1 %v6126_v3, %s9226_s25  ;;  %6203 = vrot.lane.b32.xlu0 %v6125_v37, %s9226_s25  ;;  %v5852_v26 = vpop.permute.xlu0 %5851  ;;  %v6054_v52 = vld [vmem:[#allocation2 + $0x38] sm:$0xff]  ;;  %v6053_v36 = vld [vmem:[#allocation2 + $0x30] sm:$0xff]  ;;  %vm15530_vm11 = vmmov %vm15493_vm3  ;;  %v15540_v51 = vmax.f32 %v13046_v17, 0.0 }
 0x7e3   : > { %v5949_v16 = vadd.f32 %v5852_v26, %v15527_v13  ;;  %6090 = vst.msk [vmem:[#allocation3 + $0x38] sm:$0xff] %vm15493_vm3, %v6054_v52  ;;  %v15541_v13 = vmax.f32 %v13052_v38, 0.0  ;;  %v15545_v38 = vmax.f32 %v13060_v5, 0.0 }
 0x7e4   : > { %6089 = vst.msk [vmem:[#allocation3 + $0x30] sm:$0xff] %vm15528_vm7, %v6053_v36  ;;  %v5986_v8 = vsel %vm15529_vm10, %v5950_v7, 0.0  ;;  %vm15535_vm7 = vmmov %vm15493_vm3 }
 0x7e5   : > { %6022 = vst.msk [vmem:[#allocation2 + $0x6b] sm:$0xff] %vm15530_vm11, %v5986_v8  ;;  %v5985_v56 = vsel %vm15531_vm12, %v5949_v16, 0.0  ;;  %v5858_v2 = vpop.permute.xlu1 %5857  ;;  %v6128_v14 = vld [vmem:[#allocation2 + $0x49] sm:$0xff]  ;;  %v6127_v49 = vld [vmem:[#allocation2 + $0x41] sm:$0xff]  ;;  %vm15536_vm11 = vnez %v14995_v58  ;;  %vm15538_vm12 = vnez %v15002_v45  ;;  %vm15539_vm10 = vmmov %vm15493_vm3 }
 0x7e6   : > { %6021 = vst.msk [vmem:[#allocation2 + $0x63] sm:$0xff] %vm15532_vm6, %v5985_v56  ;;  %v5952_v59 = vadd.f32 %v5858_v2, %v15533_v29  ;;  %6209 = vrot.lane.b32.xlu1 %v6128_v14, %s9226_s25  ;;  %6207 = vrot.lane.b32.xlu0 %v6127_v49, %s9226_s25  ;;  %v5856_v54 = vpop.permute.xlu0 %5855  ;;  %v6056_v44 = vld [vmem:[#allocation2 + $0x48] sm:$0xff]  ;;  %v6055_v61 = vld [vmem:[#allocation2 + $0x40] sm:$0xff]  ;;  %vm15537_vm6 = vmmov %vm15493_vm3 }
 0x7e7   : > { %v5951_v35 = vadd.f32 %v5856_v54, %v15534_v24  ;;  %6092 = vst.msk [vmem:[#allocation3 + $0x48] sm:$0xff] %vm15493_vm3, %v6056_v44  ;;  %v15546_v44 = vmax.f32 %v13066_v46, 0.0  ;;  %v15550_v46 = vmax.f32 %v13074_v19, 0.0 }
 0x7e8   : > { %6091 = vst.msk [vmem:[#allocation3 + $0x40] sm:$0xff] %vm15535_vm7, %v6055_v61  ;;  %v5988_v6 = vsel %vm15536_vm11, %v5952_v59, 0.0  ;;  %vm15542_vm7 = vmmov %vm15493_vm3 }
 0x7e9   : > { %6024 = vst.msk [vmem:[#allocation2 + $0x7b] sm:$0xff] %vm15537_vm6, %v5988_v6  ;;  %v5987_v48 = vsel %vm15538_vm12, %v5951_v35, 0.0  ;;  %v5862_v3 = vpop.permute.xlu1 %5861  ;;  %v6130_v37 = vld [vmem:[#allocation2 + $0x59] sm:$0xff]  ;;  %v6129_v39 = vld [vmem:[#allocation2 + $0x51] sm:$0xff]  ;;  %vm15544_vm6 = vmmov %vm15493_vm3 }
 0x7ea   : > { %6023 = vst.msk [vmem:[#allocation2 + $0x73] sm:$0xff] %vm15539_vm10, %v5987_v48  ;;  %v5954_v7 = vadd.f32 %v5862_v3, %v15540_v51  ;;  %6213 = vrot.lane.b32.xlu1 %v6130_v37, %s9226_s25  ;;  %6211 = vrot.lane.b32.xlu0 %v6129_v39, %s9226_s25  ;;  %v5860_v26 = vpop.permute.xlu0 %5859  ;;  %v6058_v52 = vld [vmem:[#allocation2 + $0x58] sm:$0xff]  ;;  %v6057_v36 = vld [vmem:[#allocation2 + $0x50] sm:$0xff]  ;;  %vm15543_vm10 = vmmov %vm15493_vm3 }
 0x7eb   : > { %v5953_v16 = vadd.f32 %v5860_v26, %v15541_v13  ;;  %6094 = vst.msk [vmem:[#allocation3 + $0x58] sm:$0xff] %vm15493_vm3, %v6058_v52 }
 0x7ec   : > { %6093 = vst.msk [vmem:[#allocation3 + $0x50] sm:$0xff] %vm15542_vm7, %v6057_v36  ;;  %v5990_v8 = vsel %vm11408_vm2, %v5954_v7, 0.0  ;;  %vm15547_vm7 = vmmov %vm15493_vm3  ;;  %v15551_v7 = vmax.f32 %v13080_v50, 0.0  ;;  %v15557_v50 = vmax.f32 %v13088_v41, 0.0 }
 0x7ed   : > { %6026 = vst.msk [vmem:[#allocation2 + $0x8b] sm:$0xff] %vm15543_vm10, %v5990_v8  ;;  %v5989_v17 = vsel %vm11439_vm1, %v5953_v16, 0.0  ;;  %v5866_v56 = vpop.permute.xlu1 %5865  ;;  %v6132_v2 = vld [vmem:[#allocation2 + $0x69] sm:$0xff]  ;;  %v6131_v14 = vld [vmem:[#allocation2 + $0x61] sm:$0xff]  ;;  %vm15548_vm10 = vmmov %vm15493_vm3 }
 0x7ee   : > { %6025 = vst.msk [vmem:[#allocation2 + $0x83] sm:$0xff] %vm15544_vm6, %v5989_v17  ;;  %v5956_v49 = vadd.f32 %v5866_v56, %v15545_v38  ;;  %6217 = vrot.lane.b32.xlu1 %v6132_v2, %s9226_s25  ;;  %6215 = vrot.lane.b32.xlu0 %v6131_v14, %s9226_s25  ;;  %v5864_v29 = vpop.permute.xlu0 %5863  ;;  %v6060_v59 = vld [vmem:[#allocation2 + $0x68] sm:$0xff]  ;;  %v6059_v54 = vld [vmem:[#allocation2 + $0x60] sm:$0xff]  ;;  %vm15549_vm6 = vmmov %vm15493_vm3  ;;  %v15558_v14 = vmax.f32 %v13094_v53, 0.0  ;;  %v15564_v53 = vmax.f32 %v13102_v55, 0.0 }
 0x7ef   : > { %v5955_v61 = vadd.f32 %v5864_v29, %v15546_v44  ;;  %6096 = vst.msk [vmem:[#allocation3 + $0x68] sm:$0xff] %vm15493_vm3, %v6060_v59 }
 0x7f0   : > { %6095 = vst.msk [vmem:[#allocation3 + $0x60] sm:$0xff] %vm15547_vm7, %v6059_v54  ;;  %v5992_v24 = vsel %vm11486_vm9, %v5956_v49, 0.0  ;;  %vm15552_vm7 = vmmov %vm15493_vm3 }
 0x7f1   : > { %6028 = vst.msk [vmem:[#allocation2 + $0x9b] sm:$0xff] %vm15548_vm10, %v5992_v24  ;;  %v5991_v5 = vsel %vm11506_vm15, %v5955_v61, 0.0  ;;  %v5870_v35 = vpop.permute.xlu1 %5869  ;;  %v6134_v6 = vld [vmem:[#allocation2 + $0x79] sm:$0xff]  ;;  %v6133_v48 = vld [vmem:[#allocation2 + $0x71] sm:$0xff]  ;;  %vm15553_vm10 = vnez %v15042_v60  ;;  %vm15555_vm15 = vnez %v15051_v4  ;;  %vm15556_vm9 = vmmov %vm15493_vm3 }
 0x7f2   : > { %6027 = vst.msk [vmem:[#allocation2 + $0x93] sm:$0xff] %vm15549_vm6, %v5991_v5  ;;  %v5958_v3 = vadd.f32 %v5870_v35, %v15550_v46  ;;  %6221 = vrot.lane.b32.xlu1 %v6134_v6, %s9226_s25  ;;  %6219 = vrot.lane.b32.xlu0 %v6133_v48, %s9226_s25  ;;  %v5868_v37 = vpop.permute.xlu0 %5867  ;;  %v6062_v39 = vld [vmem:[#allocation2 + $0x78] sm:$0xff]  ;;  %v6061_v51 = vld [vmem:[#allocation2 + $0x70] sm:$0xff]  ;;  %vm15554_vm6 = vmmov %vm15493_vm3  ;;  %v15565_v35 = vmax.f32 %v13108_v47, 0.0  ;;  %v15570_v47 = vmax.f32 %v13116_v43, 0.0 }
 0x7f3   : > { %v5957_v26 = vadd.f32 %v5868_v37, %v15551_v7  ;;  %6098 = vst.msk [vmem:[#allocation3 + $0x78] sm:$0xff] %vm15493_vm3, %v6062_v39 }
 0x7f4   : > { %6097 = vst.msk [vmem:[#allocation3 + $0x70] sm:$0xff] %vm15552_vm7, %v6061_v51  ;;  %v5994_v52 = vsel %vm15553_vm10, %v5958_v3, 0.0  ;;  %vm15559_vm7 = vmmov %vm15493_vm3 }
 0x7f5   : > { %6030 = vst.msk [vmem:[#allocation2 + $0xab] sm:$0xff] %vm15554_vm6, %v5994_v52  ;;  %v5993_v19 = vsel %vm15555_vm15, %v5957_v26, 0.0  ;;  %v5874_v36 = vpop.permute.xlu1 %5873  ;;  %v6136_v13 = vld [vmem:[#allocation2 + $0x89] sm:$0xff]  ;;  %v6135_v16 = vld [vmem:[#allocation2 + $0x81] sm:$0xff]  ;;  %vm15560_vm6 = vnez %v15065_v0  ;;  %vm15562_vm15 = vnez %v15070_v15  ;;  %vm15563_vm10 = vmmov %vm15493_vm3  ;;  %v15571_v52 = vmax.f32 %v13122_v33, 0.0 }
 0x7f6   : > { %6029 = vst.msk [vmem:[#allocation2 + $0xa3] sm:$0xff] %vm15556_vm9, %v5993_v19  ;;  %v5960_v8 = vadd.f32 %v5874_v36, %v15557_v50  ;;  %6225 = vrot.lane.b32.xlu1 %v6136_v13, %s9226_s25  ;;  %6223 = vrot.lane.b32.xlu0 %v6135_v16, %s9226_s25  ;;  %v5872_v17 = vpop.permute.xlu0 %5871  ;;  %v6064_v56 = vld [vmem:[#allocation2 + $0x88] sm:$0xff]  ;;  %v6063_v2 = vld [vmem:[#allocation2 + $0x80] sm:$0xff]  ;;  %vm15561_vm9 = vmmov %vm15493_vm3  ;;  %v15577_v33 = vmax.f32 %v13130_v57, 0.0 }
 0x7f7   : > { %v5959_v38 = vadd.f32 %v5872_v17, %v15558_v14  ;;  %6100 = vst.msk [vmem:[#allocation3 + $0x88] sm:$0xff] %vm15493_vm3, %v6064_v56  ;;  %v15578_v14 = vld [vmem:[#allocation14_spill] sm:$0xff]  ;;  %v15584_v57 = vld [vmem:[#allocation5_spill] sm:$0xff] }
 0x7f8   : > { %6099 = vst.msk [vmem:[#allocation3 + $0x80] sm:$0xff] %vm15559_vm7, %v6063_v2  ;;  %v5996_v49 = vsel %vm15560_vm6, %v5960_v8, 0.0  ;;  %vm15566_vm7 = vmmov %vm15493_vm3 }
 0x7f9   : > { %6032 = vst.msk [vmem:[#allocation2 + $0xbb] sm:$0xff] %vm15561_vm9, %v5996_v49  ;;  %v5995_v41 = vsel %vm15562_vm15, %v5959_v38, 0.0  ;;  %v5878_v29 = vpop.permute.xlu1 %5877  ;;  %v6138_v59 = vld [vmem:[#allocation2 + $0x99] sm:$0xff]  ;;  %v6137_v54 = vld [vmem:[#allocation2 + $0x91] sm:$0xff]  ;;  %vm15568_vm9 = vnez %v15101_v18  ;;  %vm15569_vm15 = vmmov %vm15493_vm3  ;;  %v15579_v38 = vmax.f32 %v15578_v14, 0.0 }
 0x7fa   : > { %6031 = vst.msk [vmem:[#allocation2 + $0xb3] sm:$0xff] %vm15563_vm10, %v5995_v41  ;;  %v5962_v44 = vadd.f32 %v5878_v29, %v15564_v53  ;;  %6229 = vrot.lane.b32.xlu1 %v6138_v59, %s9226_s25  ;;  %6227 = vrot.lane.b32.xlu0 %v6137_v54, %s9226_s25  ;;  %v5876_v61 = vpop.permute.xlu0 %5875  ;;  %v6066_v24 = vld [vmem:[#allocation2 + $0x98] sm:$0xff]  ;;  %v6065_v5 = vld [vmem:[#allocation2 + $0x90] sm:$0xff]  ;;  %vm15567_vm10 = vmmov %vm15493_vm3 }
 0x7fb   : > { %v5961_v6 = vadd.f32 %v5876_v61, %v15565_v35  ;;  %6102 = vst.msk [vmem:[#allocation3 + $0x98] sm:$0xff] %vm15493_vm3, %v6066_v24  ;;  %v15581_v41 = vld [vmem:[#allocation4_spill] sm:$0xff]  ;;  %v15587_v61 = vld [vmem:[#allocation15_spill] sm:$0xff] }
 0x7fc   : > { %6101 = vst.msk [vmem:[#allocation3 + $0x90] sm:$0xff] %vm15566_vm7, %v6065_v5  ;;  %v5998_v48 = vsel %vm11680_vm8, %v5962_v44, 0.0  ;;  %vm15572_vm7 = vmmov %vm15493_vm3  ;;  %v15588_v24 = vmax.f32 %v15587_v61, 0.0 }
 0x7fd   : > { %6034 = vst.msk [vmem:[#allocation2 + $0xcb] sm:$0xff] %vm15567_vm10, %v5998_v48  ;;  %v5997_v55 = vsel %vm15568_vm9, %v5961_v6, 0.0  ;;  %v5882_v46 = vpop.permute.xlu1 %5881  ;;  %v6140_v3 = vld [vmem:[#allocation2 + $0xa9] sm:$0xff]  ;;  %v6139_v37 = vld [vmem:[#allocation2 + $0xa1] sm:$0xff]  ;;  %vm15573_vm10 = vnez %v15103_v34  ;;  %vm15575_vm9 = vnez %v15107_v22  ;;  %vm15576_vm8 = vmmov %vm15493_vm3 }
 0x7fe   : > { %6033 = vst.msk [vmem:[#allocation2 + $0xc3] sm:$0xff] %vm15569_vm15, %v5997_v55  ;;  %v5964_v39 = vadd.f32 %v5882_v46, %v15570_v47  ;;  %6233 = vrot.lane.b32.xlu1 %v6140_v3, %s9226_s25  ;;  %6231 = vrot.lane.b32.xlu0 %v6139_v37, %s9226_s25  ;;  %v5880_v51 = vpop.permute.xlu0 %5879  ;;  %v6068_v7 = vld [vmem:[#allocation2 + $0xa8] sm:$0xff]  ;;  %v6067_v26 = vld [vmem:[#allocation2 + $0xa0] sm:$0xff]  ;;  %vm15574_vm15 = vmmov %vm15493_vm3 }
 0x7ff   : > { %v5963_v19 = vadd.f32 %v5880_v51, %v15571_v52  ;;  %6104 = vst.msk [vmem:[#allocation3 + $0xa8] sm:$0xff] %vm15493_vm3, %v6068_v7  ;;  %v15589_v55 = vld [vmem:[#allocation16_spill] sm:$0xff] }
 0x800   : > { %6103 = vst.msk [vmem:[#allocation3 + $0xa0] sm:$0xff] %vm15572_vm7, %v6067_v26  ;;  %v6000_v36 = vsel %vm15573_vm10, %v5964_v39, 0.0  ;;  %vm15580_vm7 = vmmov %vm15493_vm3  ;;  %v15590_v46 = vmax.f32 %v15589_v55, 0.0  ;;  %v15594_v39 = vld [vmem:[#allocation7_spill] sm:$0xff] }
 0x801   : > { %6036 = vst.msk [vmem:[#allocation2 + $0xdb] sm:$0xff] %vm15574_vm15, %v6000_v36  ;;  %v5999_v43 = vsel %vm15575_vm9, %v5963_v19, 0.0  ;;  %v5886_v13 = vpop.permute.xlu1 %5885  ;;  %v6142_v16 = vld [vmem:[#allocation2 + $0xb9] sm:$0xff]  ;;  %v6141_v50 = vld [vmem:[#allocation2 + $0xb1] sm:$0xff]  ;;  %vm15582_vm15 = vnez %v15581_v41  ;;  %vm15585_vm9 = vnez %v15584_v57  ;;  %vm15586_vm10 = vmmov %vm15493_vm3  ;;  %v15597_v19 = vmax.f32 %v13158_v42, 0.0 }
 0x802   : > { %6035 = vst.msk [vmem:[#allocation2 + $0xd3] sm:$0xff] %vm15576_vm8, %v5999_v43  ;;  %v5966_v8 = vadd.f32 %v5886_v13, %v15577_v33  ;;  %6237 = vrot.lane.b32.xlu1 %v6142_v16, %s9226_s25  ;;  %6235 = vrot.lane.b32.xlu0 %v6141_v50, %s9226_s25  ;;  %v5884_v17 = vpop.permute.xlu0 %5883  ;;  %v6070_v56 = vld [vmem:[#allocation2 + $0xb8] sm:$0xff]  ;;  %v6069_v2 = vld [vmem:[#allocation2 + $0xb0] sm:$0xff]  ;;  %vm15583_vm8 = vmmov %vm15493_vm3 }
 0x803   : > { %v5965_v49 = vadd.f32 %v5884_v17, %v15579_v38  ;;  %6106 = vst.msk [vmem:[#allocation3 + $0xb8] sm:$0xff] %vm15493_vm3, %v6070_v56  ;;  %v15598_v50 = vld [vmem:[#allocation17_spill] sm:$0xff]  ;;  %v15613_v55 = vld [vmem:[#allocation11_spill] sm:$0xff] }
 0x804   : > { %6105 = vst.msk [vmem:[#allocation3 + $0xb0] sm:$0xff] %vm15580_vm7, %v6069_v2  ;;  %v6002_v29 = vsel %vm15582_vm15, %v5966_v8, 0.0  ;;  %vm15591_vm7 = vmmov %vm15493_vm3  ;;  %v15599_v33 = vmax.f32 %v15598_v50, 0.0 }
 0x805   : > { %6038 = vst.msk [vmem:[#allocation2 + $0xeb] sm:$0xff] %vm15583_vm8, %v6002_v29  ;;  %v6001_v59 = vsel %vm15585_vm9, %v5965_v49, 0.0  ;;  %v5890_v54 = vpop.permute.xlu1 %5889  ;;  %v6144_v53 = vld [vmem:[#allocation2 + $0xc9] sm:$0xff]  ;;  %v6143_v44 = vld [vmem:[#allocation2 + $0xc1] sm:$0xff]  ;;  %vm15595_vm8 = vnez %v15594_v39  ;;  %vm15596_vm9 = vmmov %vm15493_vm3 }
 0x806   : > { %6037 = vst.msk [vmem:[#allocation2 + $0xe3] sm:$0xff] %vm15586_vm10, %v6001_v59  ;;  %v5968_v5 = vadd.f32 %v5890_v54, %v15588_v24  ;;  %6241 = vrot.lane.b32.xlu1 %v6144_v53, %s9226_s25  ;;  %6239 = vrot.lane.b32.xlu0 %v6143_v44, %s9226_s25  ;;  %v5888_v35 = vpop.permute.xlu0 %5887  ;;  %v6072_v6 = vld [vmem:[#allocation2 + $0xc8] sm:$0xff]  ;;  %v6071_v48 = vld [vmem:[#allocation2 + $0xc0] sm:$0xff]  ;;  %vm15593_vm10 = vmmov %vm15493_vm3 }
 0x807   : > { %v5967_v3 = vadd.f32 %v5888_v35, %v15590_v46  ;;  %6108 = vst.msk [vmem:[#allocation3 + $0xc8] sm:$0xff] %vm15493_vm3, %v6072_v6  ;;  %v15605_v29 = vld [vmem:[#allocation18_spill] sm:$0xff]  ;;  %v15607_v24 = vld [vmem:[#allocation19_spill] sm:$0xff] }
 0x808   : > { %6107 = vst.msk [vmem:[#allocation3 + $0xc0] sm:$0xff] %vm15591_vm7, %v6071_v48  ;;  %v6004_v47 = vsel %vm11881_vm13, %v5968_v5, 0.0  ;;  %vm15600_vm7 = vmmov %vm15493_vm3  ;;  %v15606_v59 = vmax.f32 %v15605_v29, 0.0  ;;  %v15608_v5 = vmax.f32 %v15607_v24, 0.0  ;;  %v15610_v6 = vld [vmem:[#allocation10_spill] sm:$0xff] }
 0x809   : > { %6040 = vst.msk [vmem:[#allocation2 + $0xfb] sm:$0xff] %vm15593_vm10, %v6004_v47  ;;  %v6003_v51 = vsel %vm15595_vm8, %v5967_v3, 0.0  ;;  %v5894_v7 = vpop.permute.xlu1 %5893  ;;  %v6146_v26 = vld [vmem:[#allocation2 + $0xd9] sm:$0xff]  ;;  %v6145_v52 = vld [vmem:[#allocation2 + $0xd1] sm:$0xff]  ;;  %vm15604_vm10 = vmmov %vm15493_vm3 }
 0x80a   : > { %6039 = vst.msk [vmem:[#allocation2 + $0xf3] sm:$0xff] %vm15596_vm9, %v6003_v51  ;;  %v5970_v36 = vadd.f32 %v5894_v7, %v15597_v19  ;;  %6245 = vrot.lane.b32.xlu1 %v6146_v26, %s9226_s25  ;;  %6243 = vrot.lane.b32.xlu0 %v6145_v52, %s9226_s25  ;;  %v5892_v43 = vpop.permute.xlu0 %5891  ;;  %v6074_v13 = vld [vmem:[#allocation2 + $0xd8] sm:$0xff]  ;;  %v6073_v16 = vld [vmem:[#allocation2 + $0xd0] sm:$0xff]  ;;  %vm15602_vm9 = vmmov %vm15493_vm3 }
 0x80b   : > { %v5969_v8 = vadd.f32 %v5892_v43, %v15599_v33  ;;  %6110 = vst.msk [vmem:[#allocation3 + $0xd8] sm:$0xff] %vm15493_vm3, %v6074_v13  ;;  %v15616_v7 = vld [vmem:[#allocation20_spill] sm:$0xff]  ;;  %v15618_v13 = vld [vmem:[#allocation21_spill] sm:$0xff] }
 0x80c   : > { %6109 = vst.msk [vmem:[#allocation3 + $0xd0] sm:$0xff] %vm15600_vm7, %v6073_v16  ;;  %v6006_v56 = vsel %vm11966_vm14, %v5970_v36, 0.0  ;;  %vm15609_vm7 = vmmov %vm15493_vm3  ;;  %v15617_v26 = vmax.f32 %v15616_v7, 0.0  ;;  %v15619_v16 = vmax.f32 %v15618_v13, 0.0  ;;  %v15621_v33 = vld [vmem:[#allocation12_spill] sm:$0xff]  ;;  %v13479_v7 = vld [vmem:[#allocation2 + $0x32] sm:$0xff] }
 0x80d   : > { %6042 = vst.msk [vmem:[#allocation2 + $0x10b] sm:$0xff] %vm15602_vm9, %v6006_v56  ;;  %v6005_v2 = vsel %vm11977_vm5, %v5969_v8, 0.0  ;;  %v5898_v14 = vpop.permute.xlu1 %5897  ;;  %v6148_v38 = vld [vmem:[#allocation2 + $0xe9] sm:$0xff]  ;;  %v6147_v49 = vld [vmem:[#allocation2 + $0xe1] sm:$0xff]  ;;  %vm15611_vm9 = vnez %v15610_v6  ;;  %vm15614_vm5 = vnez %v15613_v55  ;;  %vm15615_vm14 = vmmov %vm15493_vm3 }
 0x80e   : > { %6041 = vst.msk [vmem:[#allocation2 + $0x103] sm:$0xff] %vm15604_vm10, %v6005_v2  ;;  %v5972_v54 = vadd.f32 %v5898_v14, %v15606_v59  ;;  %6249 = vrot.lane.b32.xlu1 %v6148_v38, %s9226_s25  ;;  %6247 = vrot.lane.b32.xlu0 %v6147_v49, %s9226_s25  ;;  %v5896_v53 = vpop.permute.xlu0 %5895  ;;  %v6076_v44 = vld [vmem:[#allocation2 + $0xe8] sm:$0xff]  ;;  %v6075_v61 = vld [vmem:[#allocation2 + $0xe0] sm:$0xff]  ;;  %vm15612_vm10 = vmmov %vm15493_vm3 }
 0x80f   : > { %v5971_v35 = vadd.f32 %v5896_v53, %v15608_v5  ;;  %6112 = vst.msk [vmem:[#allocation3 + $0xe8] sm:$0xff] %vm15493_vm3, %v6076_v44  ;;  %v15624_v56 = vld [vmem:[#allocation13_spill] sm:$0xff]  ;;  %v13503_v13 = vld [vmem:[#allocation2 + $0x62] sm:$0xff] }
 0x810   : > { %6111 = vst.msk [vmem:[#allocation3 + $0xe0] sm:$0xff] %vm15609_vm7, %v6075_v61  ;;  %v6008_v48 = vsel %vm15611_vm9, %v5972_v54, 0.0  ;;  %vm15620_vm7 = vmmov %vm15493_vm3  ;;  %v6336_v5 = vld [vmem:[#allocation2 + $0xa] sm:$0xff] }
 0x811   : > { %6044 = vst.msk [vmem:[#allocation2 + $0x11b] sm:$0xff] %vm15612_vm10, %v6008_v48  ;;  %v6007_v46 = vsel %vm15614_vm5, %v5971_v35, 0.0  ;;  %v5902_v3 = vpop.permute.xlu1 %5901  ;;  %v6150_v47 = vld [vmem:[#allocation2 + $0xf9] sm:$0xff]  ;;  %v6149_v51 = vld [vmem:[#allocation2 + $0xf1] sm:$0xff]  ;;  %vm15622_vm10 = vnez %v15621_v33  ;;  %vm15625_vm5 = vnez %v15624_v56  ;;  %vm15626_vm9 = vmmov %vm15493_vm3 }
 0x812   : > { %6043 = vst.msk [vmem:[#allocation2 + $0x113] sm:$0xff] %vm15615_vm14, %v6007_v46  ;;  %v5974_v52 = vadd.f32 %v5902_v3, %v15617_v26  ;;  %6253 = vrot.lane.b32.xlu1 %v6150_v47, %s9226_s25  ;;  %6251 = vrot.lane.b32.xlu0 %v6149_v51, %s9226_s25  ;;  %v5900_v19 = vpop.permute.xlu0 %5899  ;;  %v6078_v36 = vld [vmem:[#allocation2 + $0xf8] sm:$0xff]  ;;  %v6077_v43 = vld [vmem:[#allocation2 + $0xf0] sm:$0xff]  ;;  %vm15623_vm14 = vmmov %vm15493_vm3 }
 0x813   : > { %v5973_v50 = vadd.f32 %v5900_v19, %v15619_v16  ;;  %6114 = vst.msk [vmem:[#allocation3 + $0xf8] sm:$0xff] %vm15493_vm3, %v6078_v36  ;;  %vm15627_vm3 = vcmask 130112   ;;  %v6335_v35 = vld [vmem:[#allocation2 + $0x2] sm:$0xff]  ;;  %v13461_v48 = vld [vmem:[#allocation2 + $0x1a] sm:$0xff]  ;;  %v13463_v46 = vld [vmem:[#allocation2 + $0x12] sm:$0xff] }
 0x814   : > { %6113 = vst.msk [vmem:[#allocation3 + $0xf0] sm:$0xff] %vm15620_vm7, %v6077_v43  ;;  %v6010_v8 = vsel %vm15622_vm10, %v5974_v52, 0.0  ;;  %vm15628_vm7 = vmmov %vm15627_vm3  ;;  %v13469_v3 = vld [vmem:[#allocation2 + $0x2a] sm:$0xff]  ;;  %v13471_v47 = vld [vmem:[#allocation2 + $0x22] sm:$0xff] }
 0x815   : > { %6046 = vst.msk [vmem:[#allocation2 + $0x12b] sm:$0xff] %vm15623_vm14, %v6010_v8  ;;  %v6009_v2 = vsel %vm15625_vm5, %v5973_v50, 0.0  ;;  %v6152_v14 = vld [vmem:[#allocation2 + $0x109] sm:$0xff]  ;;  %v6151_v38 = vld [vmem:[#allocation2 + $0x101] sm:$0xff]  ;;  %v6194_v49 = vpop.permute.xlu1 %6193  ;;  %vm15629_vm14 = vmmov %vm15626_vm9 }
 0x816   : > { %6045 = vst.msk [vmem:[#allocation2 + $0x123] sm:$0xff] %vm15626_vm9, %v6009_v2  ;;  %6257 = vrot.lane.b32.xlu1 %v6152_v14, %s9226_s25  ;;  %6255 = vrot.lane.b32.xlu0 %v6151_v38, %s9226_s25  ;;  %v6192_v29 = vpop.permute.xlu0 %6191  ;;  %v6080_v59 = vld [vmem:[#allocation2 + $0x108] sm:$0xff]  ;;  %v6079_v54 = vld [vmem:[#allocation2 + $0x100] sm:$0xff]  ;;  %vm15630_vm10 = vmmov %vm15626_vm9 }
 0x817   : > { %6300 = vst.msk [vmem:[#allocation3 + $0x8] sm:$0xff] %vm15627_vm3, %v6194_v49  ;;  %vm15631_vm3 = vmmov %vm15626_vm9  ;;  %v13477_v51 = vld [vmem:[#allocation2 + $0x3a] sm:$0xff]  ;;  %v13485_v26 = vld [vmem:[#allocation2 + $0x4a] sm:$0xff] }
 0x818   : > { %6299 = vst.msk [vmem:[#allocation3] sm:$0xff] %vm15628_vm7, %v6192_v29  ;;  %v13487_v52 = vld [vmem:[#allocation2 + $0x42] sm:$0xff]  ;;  %v13493_v19 = vld [vmem:[#allocation2 + $0x5a] sm:$0xff]  ;;  %v13495_v36 = vld [vmem:[#allocation2 + $0x52] sm:$0xff] }
 0x819   : > { %6116 = vst.msk [vmem:[#allocation3 + $0x108] sm:$0xff] %vm15629_vm14, %v6080_v59  ;;  %v6154_v53 = vld [vmem:[#allocation2 + $0x119] sm:$0xff]  ;;  %v6153_v44 = vld [vmem:[#allocation2 + $0x111] sm:$0xff]  ;;  %v13519_v2 = vld [vmem:[#allocation2 + $0x82] sm:$0xff] }
 0x81a   : > { %6115 = vst.msk [vmem:[#allocation3 + $0x100] sm:$0xff] %vm15630_vm10, %v6079_v54  ;;  %6261 = vrot.lane.b32.xlu1 %v6154_v53, %s9226_s25  ;;  %6259 = vrot.lane.b32.xlu0 %v6153_v44, %s9226_s25  ;;  %v6082_v61 = vld [vmem:[#allocation2 + $0x118] sm:$0xff]  ;;  %v6081_v24 = vld [vmem:[#allocation2 + $0x110] sm:$0xff]  ;;  %v13535_v29 = vld [vmem:[#allocation2 + $0xa2] sm:$0xff] }
 0x81b   : > { %6118 = vst.msk [vmem:[#allocation3 + $0x118] sm:$0xff] %vm15626_vm9, %v6082_v61  ;;  %v13501_v43 = vld [vmem:[#allocation2 + $0x6a] sm:$0xff]  ;;  %v13509_v16 = vld [vmem:[#allocation2 + $0x7a] sm:$0xff]  ;;  %v13511_v50 = vld [vmem:[#allocation2 + $0x72] sm:$0xff] }
 0x81c   : > { %6117 = vst.msk [vmem:[#allocation3 + $0x110] sm:$0xff] %vm15631_vm3, %v6081_v24  ;;  %v13517_v8 = vld [vmem:[#allocation2 + $0x8a] sm:$0xff]  ;;  %v13525_v14 = vld [vmem:[#allocation2 + $0x9a] sm:$0xff]  ;;  %v13527_v38 = vld [vmem:[#allocation2 + $0x92] sm:$0xff] }
 0x81d   : > { %v13533_v49 = vld [vmem:[#allocation2 + $0xaa] sm:$0xff]  ;;  %v13541_v59 = vld [vmem:[#allocation2 + $0xba] sm:$0xff]  ;;  %v13543_v54 = vld [vmem:[#allocation2 + $0xb2] sm:$0xff] }
 0x81e   : > { %6409 = vrot.lane.b32.xlu1 %v6336_v5, %s9227_s26  ;;  %6407 = vrot.lane.b32.xlu0 %v6335_v35, %s9227_s26  ;;  %vm15632_vm10 = vmmov %vm15628_vm7  ;;  %v13551_v61 = vld [vmem:[#allocation2 + $0xca] sm:$0xff]  ;;  %v13553_v24 = vld [vmem:[#allocation2 + $0xc2] sm:$0xff] }
 0x81f   : > { %vm15633_vm14 = vmmov %vm15628_vm7  ;;  %v13561_v56 = vld [vmem:[#allocation2 + $0xda] sm:$0xff]  ;;  %v13571_v55 = vld [vmem:[#allocation2 + $0xea] sm:$0xff] }
 0x820   : > { %vm15634_vm9 = vmmov %vm15628_vm7  ;;  %v13581_v42 = vld [vmem:[#allocation2 + $0xfa] sm:$0xff]  ;;  %v13591_v39 = vld [vmem:[#allocation2 + $0x10a] sm:$0xff] }
 0x821   : > { %vm15635_vm3 = vmmov %vm15628_vm7  ;;  %v13601_v57 = vld [vmem:[#allocation2 + $0x11a] sm:$0xff] }
 0x822   : > { %6413 = vrot.lane.b32.xlu1 %v13461_v48, %s9227_s26  ;;  %6411 = vrot.lane.b32.xlu0 %v13463_v46, %s9227_s26 }
 0x826   : > { %6417 = vrot.lane.b32.xlu1 %v13469_v3, %s9227_s26  ;;  %6415 = vrot.lane.b32.xlu0 %v13471_v47, %s9227_s26 }
 0x82a   : > { %6421 = vrot.lane.b32.xlu1 %v13477_v51, %s9227_s26  ;;  %6419 = vrot.lane.b32.xlu0 %v13479_v7, %s9227_s26 }
 0x82e   : > { %6425 = vrot.lane.b32.xlu1 %v13485_v26, %s9227_s26  ;;  %6423 = vrot.lane.b32.xlu0 %v13487_v52, %s9227_s26 }
 0x832   : > { %6429 = vrot.lane.b32.xlu1 %v13493_v19, %s9227_s26  ;;  %6427 = vrot.lane.b32.xlu0 %v13495_v36, %s9227_s26 }
 0x836   : > { %6433 = vrot.lane.b32.xlu1 %v13501_v43, %s9227_s26  ;;  %6431 = vrot.lane.b32.xlu0 %v13503_v13, %s9227_s26 }
 0x83a   : > { %6437 = vrot.lane.b32.xlu1 %v13509_v16, %s9227_s26  ;;  %6435 = vrot.lane.b32.xlu0 %v13511_v50, %s9227_s26 }
 0x83e   : > { %6441 = vrot.lane.b32.xlu1 %v13517_v8, %s9227_s26  ;;  %6439 = vrot.lane.b32.xlu0 %v13519_v2, %s9227_s26 }
 0x842   : > { %6445 = vrot.lane.b32.xlu1 %v13525_v14, %s9227_s26  ;;  %6443 = vrot.lane.b32.xlu0 %v13527_v38, %s9227_s26 }
 0x846   : > { %6449 = vrot.lane.b32.xlu1 %v13533_v49, %s9227_s26  ;;  %6447 = vrot.lane.b32.xlu0 %v13535_v29, %s9227_s26 }
 0x84a   : > { %6453 = vrot.lane.b32.xlu1 %v13541_v59, %s9227_s26  ;;  %6451 = vrot.lane.b32.xlu0 %v13543_v54, %s9227_s26 }
 0x84c   : > { %v6198_v53 = vpop.permute.xlu1 %6197  ;;  %v6196_v44 = vpop.permute.xlu0 %6195 }
 0x84d   : > { %6302 = vst.msk [vmem:[#allocation3 + $0x18] sm:$0xff] %vm15632_vm10, %v6198_v53  ;;  %v13563_v53 = vld [vmem:[#allocation2 + $0xd2] sm:$0xff]  ;;  %vm15636_vm10 = vmmov %vm15635_vm3 }
 0x84e   : > { %6301 = vst.msk [vmem:[#allocation3 + $0x10] sm:$0xff] %vm15628_vm7, %v6196_v44  ;;  %6457 = vrot.lane.b32.xlu1 %v13551_v61, %s9227_s26  ;;  %6455 = vrot.lane.b32.xlu0 %v13553_v24, %s9227_s26  ;;  %vm15637_vm7 = vmmov %vm15635_vm3 }
 0x850   : > { %v6202_v5 = vpop.permute.xlu1 %6201  ;;  %v6200_v35 = vpop.permute.xlu0 %6199 }
 0x851   : > { %6304 = vst.msk [vmem:[#allocation3 + $0x28] sm:$0xff] %vm15633_vm14, %v6202_v5  ;;  %v13573_v5 = vld [vmem:[#allocation2 + $0xe2] sm:$0xff]  ;;  %vm15638_vm14 = vmmov %vm15635_vm3 }
 0x852   : > { %6303 = vst.msk [vmem:[#allocation3 + $0x20] sm:$0xff] %vm15634_vm9, %v6200_v35  ;;  %6461 = vrot.lane.b32.xlu1 %v13561_v56, %s9227_s26  ;;  %6459 = vrot.lane.b32.xlu0 %v13563_v53, %s9227_s26  ;;  %vm15639_vm9 = vmmov %vm15635_vm3 }
 0x854   : > { %v6206_v44 = vpop.permute.xlu1 %6205  ;;  %v6204_v33 = vpop.permute.xlu0 %6203 }
 0x855   : > { %6306 = vst.msk [vmem:[#allocation3 + $0x38] sm:$0xff] %vm15635_vm3, %v6206_v44  ;;  %v13583_v44 = vld [vmem:[#allocation2 + $0xf2] sm:$0xff] }
 0x856   : > { %6305 = vst.msk [vmem:[#allocation3 + $0x30] sm:$0xff] %vm15636_vm10, %v6204_v33  ;;  %6465 = vrot.lane.b32.xlu1 %v13571_v55, %s9227_s26  ;;  %6463 = vrot.lane.b32.xlu0 %v13573_v5, %s9227_s26  ;;  %vm15640_vm10 = vmmov %vm15635_vm3 }
 0x858   : > { %v6210_v35 = vpop.permute.xlu1 %6209  ;;  %v6208_v6 = vpop.permute.xlu0 %6207 }
 0x859   : > { %6308 = vst.msk [vmem:[#allocation3 + $0x48] sm:$0xff] %vm15637_vm7, %v6210_v35  ;;  %v13593_v35 = vld [vmem:[#allocation2 + $0x102] sm:$0xff]  ;;  %vm15641_vm7 = vmmov %vm15635_vm3 }
 0x85a   : > { %6307 = vst.msk [vmem:[#allocation3 + $0x40] sm:$0xff] %vm15638_vm14, %v6208_v6  ;;  %6469 = vrot.lane.b32.xlu1 %v13581_v42, %s9227_s26  ;;  %6467 = vrot.lane.b32.xlu0 %v13583_v44, %s9227_s26  ;;  %vm15642_vm14 = vmmov %vm15635_vm3 }
 0x85c   : > { %v6214_v33 = vpop.permute.xlu1 %6213  ;;  %v6212_v17 = vpop.permute.xlu0 %6211 }
 0x85d   : > { %6310 = vst.msk [vmem:[#allocation3 + $0x58] sm:$0xff] %vm15639_vm9, %v6214_v33  ;;  %v13603_v33 = vld [vmem:[#allocation2 + $0x112] sm:$0xff]  ;;  %vm15643_vm9 = vmmov %vm15635_vm3 }
 0x85e   : > { %6309 = vst.msk [vmem:[#allocation3 + $0x50] sm:$0xff] %vm15635_vm3, %v6212_v17  ;;  %6473 = vrot.lane.b32.xlu1 %v13591_v39, %s9227_s26  ;;  %6471 = vrot.lane.b32.xlu0 %v13593_v35, %s9227_s26 }
 0x860   : > { %v6218_v6 = vpop.permute.xlu1 %6217  ;;  %v6216_v37 = vpop.permute.xlu0 %6215 }
 0x861   : > { %6312 = vst.msk [vmem:[#allocation3 + $0x68] sm:$0xff] %vm15640_vm10, %v6218_v6  ;;  %vm15644_vm10 = vmmov %vm15635_vm3 }
 0x862   : > { %6311 = vst.msk [vmem:[#allocation3 + $0x60] sm:$0xff] %vm15641_vm7, %v6216_v37  ;;  %6477 = vrot.lane.b32.xlu1 %v13601_v57, %s9227_s26  ;;  %6475 = vrot.lane.b32.xlu0 %v13603_v33, %s9227_s26  ;;  %vm15645_vm7 = vmmov %vm15635_vm3 }
 0x864   : > { %v6222_v17 = vpop.permute.xlu1 %6221  ;;  %v6220_v41 = vpop.permute.xlu0 %6219 }
 0x865   : > { %6314 = vst.msk [vmem:[#allocation3 + $0x78] sm:$0xff] %vm15642_vm14, %v6222_v17  ;;  %vm15646_vm14 = vmmov %vm15635_vm3 }
 0x866   : > { %6313 = vst.msk [vmem:[#allocation3 + $0x70] sm:$0xff] %vm15643_vm9, %v6220_v41  ;;  %6625 = vrot.lane.b32.xlu1 %v13461_v48, %s9228_s27  ;;  %6623 = vrot.lane.b32.xlu0 %v13463_v46, %s9228_s27  ;;  %vm15647_vm9 = vmmov %vm15635_vm3 }
 0x868   : > { %v6226_v37 = vpop.permute.xlu1 %6225  ;;  %v6224_v6 = vpop.permute.xlu0 %6223 }
 0x869   : > { %6316 = vst.msk [vmem:[#allocation3 + $0x88] sm:$0xff] %vm15635_vm3, %v6226_v37 }
 0x86a   : > { %6315 = vst.msk [vmem:[#allocation3 + $0x80] sm:$0xff] %vm15644_vm10, %v6224_v6  ;;  %6629 = vrot.lane.b32.xlu1 %v13469_v3, %s9228_s27  ;;  %6627 = vrot.lane.b32.xlu0 %v13471_v47, %s9228_s27  ;;  %vm15648_vm10 = vmmov %vm15635_vm3 }
 0x86c   : > { %v6230_v17 = vpop.permute.xlu1 %6229  ;;  %v6228_v41 = vpop.permute.xlu0 %6227 }
 0x86d   : > { %6318 = vst.msk [vmem:[#allocation3 + $0x98] sm:$0xff] %vm15645_vm7, %v6230_v17  ;;  %vm15649_vm7 = vmmov %vm15635_vm3 }
 0x86e   : > { %6317 = vst.msk [vmem:[#allocation3 + $0x90] sm:$0xff] %vm15646_vm14, %v6228_v41  ;;  %6633 = vrot.lane.b32.xlu1 %v13477_v51, %s9228_s27  ;;  %6631 = vrot.lane.b32.xlu0 %v13479_v7, %s9228_s27  ;;  %vm15650_vm14 = vmmov %vm15635_vm3 }
 0x870   : > { %v6234_v48 = vpop.permute.xlu1 %6233  ;;  %v6232_v46 = vpop.permute.xlu0 %6231 }
 0x871   : > { %6320 = vst.msk [vmem:[#allocation3 + $0xa8] sm:$0xff] %vm15647_vm9, %v6234_v48  ;;  %vm15651_vm9 = vmmov %vm15635_vm3  ;;  %v6770_v48 = vld [vmem:[#allocation2 + $0x2b] sm:$0xff] }
 0x872   : > { %6319 = vst.msk [vmem:[#allocation3 + $0xa0] sm:$0xff] %vm15635_vm3, %v6232_v46  ;;  %6637 = vrot.lane.b32.xlu1 %v13485_v26, %s9228_s27  ;;  %6635 = vrot.lane.b32.xlu0 %v13487_v52, %s9228_s27  ;;  %v6769_v46 = vld [vmem:[#allocation2 + $0x23] sm:$0xff] }
 0x874   : > { %v6238_v3 = vpop.permute.xlu1 %6237  ;;  %v6236_v47 = vpop.permute.xlu0 %6235 }
 0x875   : > { %6322 = vst.msk [vmem:[#allocation3 + $0xb8] sm:$0xff] %vm15648_vm10, %v6238_v3  ;;  %vm15652_vm10 = vmmov %vm15635_vm3 }
 0x876   : > { %6321 = vst.msk [vmem:[#allocation3 + $0xb0] sm:$0xff] %vm15649_vm7, %v6236_v47  ;;  %6641 = vrot.lane.b32.xlu1 %v13493_v19, %s9228_s27  ;;  %6639 = vrot.lane.b32.xlu0 %v13495_v36, %s9228_s27  ;;  %vm15653_vm7 = vmmov %vm15635_vm3 }
 0x878   : > { %v6242_v51 = vpop.permute.xlu1 %6241  ;;  %v6240_v7 = vpop.permute.xlu0 %6239 }
 0x879   : > { %6324 = vst.msk [vmem:[#allocation3 + $0xc8] sm:$0xff] %vm15650_vm14, %v6242_v51  ;;  %vm15654_vm14 = vmmov %vm15635_vm3  ;;  %v6772_v51 = vld [vmem:[#allocation2 + $0x3b] sm:$0xff] }
 0x87a   : > { %6323 = vst.msk [vmem:[#allocation3 + $0xc0] sm:$0xff] %vm15651_vm9, %v6240_v7  ;;  %6645 = vrot.lane.b32.xlu1 %v13501_v43, %s9228_s27  ;;  %6643 = vrot.lane.b32.xlu0 %v13503_v13, %s9228_s27  ;;  %vm15655_vm9 = vmmov %vm15635_vm3  ;;  %v6771_v7 = vld [vmem:[#allocation2 + $0x33] sm:$0xff] }
 0x87c   : > { %v6246_v26 = vpop.permute.xlu1 %6245  ;;  %v6244_v52 = vpop.permute.xlu0 %6243 }
 0x87d   : > { %6326 = vst.msk [vmem:[#allocation3 + $0xd8] sm:$0xff] %vm15635_vm3, %v6246_v26  ;;  %v7883_v26 = vld [vmem:[%s14645_s3] sm:$0xff] }
 0x87e   : > { %6325 = vst.msk [vmem:[#allocation3 + $0xd0] sm:$0xff] %vm15652_vm10, %v6244_v52  ;;  %6649 = vrot.lane.b32.xlu1 %v13509_v16, %s9228_s27  ;;  %6647 = vrot.lane.b32.xlu0 %v13511_v50, %s9228_s27  ;;  %vm15656_vm10 = vmmov %vm15635_vm3  ;;  %v7884_v52 = vld [vmem:[%s14645_s3 + $0x8] sm:$0xff] }
 0x880   : > { %v6250_v19 = vpop.permute.xlu1 %6249  ;;  %v6248_v36 = vpop.permute.xlu0 %6247 }
 0x881   : > { %6328 = vst.msk [vmem:[#allocation3 + $0xe8] sm:$0xff] %vm15653_vm7, %v6250_v19  ;;  %vm15657_vm7 = vmmov %vm15635_vm3  ;;  %v9100_v19 = vpack.c.bf16 %v7884_v52, %v7883_v26  ;;  %v7201_v26 = vld [vmem:[#allocation2 + $0x34] sm:$0xff] }
 0x882   : > { %6327 = vst.msk [vmem:[#allocation3 + $0xe0] sm:$0xff] %vm15654_vm14, %v6248_v36  ;;  %6653 = vrot.lane.b32.xlu1 %v13517_v8, %s9228_s27  ;;  %6651 = vrot.lane.b32.xlu0 %v13519_v2, %s9228_s27  ;;  %vm15658_vm14 = vmmov %vm15635_vm3 }
 0x883   : > { %9101 = vmatprep.subr.bf16.mxu0 %v9100_v19 }
 0x884   : > { %v6254_v43 = vpop.permute.xlu1 %6253  ;;  %v6252_v13 = vpop.permute.xlu0 %6251  ;;  %9103 = vmatpush3.bf16.msra.mxu0 %v9100_v19 }
 0x885   : > { %6330 = vst.msk [vmem:[#allocation3 + $0xf8] sm:$0xff] %vm15655_vm9, %v6254_v43  ;;  %vm15659_vm9 = vmmov %vm15635_vm3 }
 0x886   : > { %6329 = vst.msk [vmem:[#allocation3 + $0xf0] sm:$0xff] %vm15635_vm3, %v6252_v13  ;;  %6657 = vrot.lane.b32.xlu1 %v13525_v14, %s9228_s27  ;;  %6655 = vrot.lane.b32.xlu0 %v13527_v38, %s9228_s27  ;;  %vm15660_vm3 = vcmask 195712   ;;  %v6774_v13 = vld [vmem:[#allocation2 + $0x4b] sm:$0xff] }
 0x888   : > { %v6258_v16 = vpop.permute.xlu1 %6257  ;;  %v6256_v50 = vpop.permute.xlu0 %6255 }
 0x889   : > { %6332 = vst.msk [vmem:[#allocation3 + $0x108] sm:$0xff] %vm15656_vm10, %v6258_v16  ;;  %vm15661_vm10 = vmmov %vm15660_vm3  ;;  %v6773_v16 = vld [vmem:[#allocation2 + $0x43] sm:$0xff] }
 0x88a   : > { %6331 = vst.msk [vmem:[#allocation3 + $0x100] sm:$0xff] %vm15657_vm7, %v6256_v50  ;;  %6661 = vrot.lane.b32.xlu1 %v13533_v49, %s9228_s27  ;;  %6659 = vrot.lane.b32.xlu0 %v13535_v29, %s9228_s27  ;;  %vm15662_vm7 = vmmov %vm15660_vm3  ;;  %v7885_v50 = vld [vmem:[%s14645_s3 + $0x10] sm:$0xff] }
 0x88c   : > { %v6262_v8 = vpop.permute.xlu1 %6261  ;;  %v6260_v2 = vpop.permute.xlu0 %6259 }
 0x88d   : > { %6334 = vst.msk [vmem:[#allocation3 + $0x118] sm:$0xff] %vm15658_vm14, %v6262_v8  ;;  %vm15663_vm14 = vmmov %vm15660_vm3  ;;  %v7886_v8 = vld [vmem:[%s14645_s3 + $0x18] sm:$0xff] }
 0x88e   : > { %6333 = vst.msk [vmem:[#allocation3 + $0x110] sm:$0xff] %vm15659_vm9, %v6260_v2  ;;  %6665 = vrot.lane.b32.xlu1 %v13541_v59, %s9228_s27  ;;  %6663 = vrot.lane.b32.xlu0 %v13543_v54, %s9228_s27  ;;  %vm15664_vm9 = vmmov %vm15660_vm3  ;;  %v9104_v2 = vpack.c.bf16 %v7886_v8, %v7885_v50  ;;  %v7633_v50 = vld [vmem:[#allocation2 + $0x36] sm:$0xff] }
 0x890   : > { %v6410_v14 = vpop.permute.xlu1 %6409  ;;  %v6408_v38 = vpop.permute.xlu0 %6407  ;;  %9105 = vmatprep.subr.bf16.mxu0 %v9104_v2 }
 0x891   : > { %6516 = vst.msk [vmem:[#allocation3 + $0x8] sm:$0xff] %vm15660_vm3, %v6410_v14  ;;  %9107 = vmatpush3.bf16.msra.mxu0 %v9104_v2 }
 0x892   : > { %6515 = vst.msk [vmem:[#allocation3] sm:$0xff] %vm15661_vm10, %v6408_v38  ;;  %6669 = vrot.lane.b32.xlu1 %v13551_v61, %s9228_s27  ;;  %6667 = vrot.lane.b32.xlu0 %v13553_v24, %s9228_s27  ;;  %vm15665_vm10 = vmmov %vm15660_vm3 }
 0x894   : > { %v6414_v49 = vpop.permute.xlu1 %6413  ;;  %v6412_v29 = vpop.permute.xlu0 %6411 }
 0x895   : > { %6518 = vst.msk [vmem:[#allocation3 + $0x18] sm:$0xff] %vm15662_vm7, %v6414_v49  ;;  %vm15666_vm7 = vmmov %vm15660_vm3  ;;  %v6984_v49 = vld [vmem:[#allocation2 + $0x1c] sm:$0xff] }
 0x896   : > { %6517 = vst.msk [vmem:[#allocation3 + $0x10] sm:$0xff] %vm15663_vm14, %v6412_v29  ;;  %6673 = vrot.lane.b32.xlu1 %v13561_v56, %s9228_s27  ;;  %6671 = vrot.lane.b32.xlu0 %v13563_v53, %s9228_s27  ;;  %vm15667_vm14 = vmmov %vm15660_vm3  ;;  %v6983_v29 = vld [vmem:[#allocation2 + $0x14] sm:$0xff] }
 0x898   : > { %v6418_v59 = vpop.permute.xlu1 %6417  ;;  %v6416_v54 = vpop.permute.xlu0 %6415 }
 0x899   : > { %6520 = vst.msk [vmem:[#allocation3 + $0x28] sm:$0xff] %vm15664_vm9, %v6418_v59  ;;  %vm15668_vm9 = vmmov %vm15660_vm3  ;;  %v7887_v59 = vld [vmem:[%s14645_s3 + $0x20] sm:$0xff] }
 0x89a   : > { %6519 = vst.msk [vmem:[#allocation3 + $0x20] sm:$0xff] %vm15660_vm3, %v6416_v54  ;;  %6677 = vrot.lane.b32.xlu1 %v13571_v55, %s9228_s27  ;;  %6675 = vrot.lane.b32.xlu0 %v13573_v5, %s9228_s27  ;;  %v7888_v54 = vld [vmem:[%s14645_s3 + $0x28] sm:$0xff] }
 0x89c   : > { %v6422_v61 = vpop.permute.xlu1 %6421  ;;  %v6420_v24 = vpop.permute.xlu0 %6419 }
 0x89d   : > { %6522 = vst.msk [vmem:[#allocation3 + $0x38] sm:$0xff] %vm15665_vm10, %v6422_v61  ;;  %vm15669_vm10 = vmmov %vm15660_vm3  ;;  %v9108_v61 = vpack.c.bf16 %v7888_v54, %v7887_v59  ;;  %v7203_v59 = vld [vmem:[#allocation2 + $0x44] sm:$0xff] }
 0x89e   : > { %6521 = vst.msk [vmem:[#allocation3 + $0x30] sm:$0xff] %vm15666_vm7, %v6420_v24  ;;  %6681 = vrot.lane.b32.xlu1 %v13581_v42, %s9228_s27  ;;  %6679 = vrot.lane.b32.xlu0 %v13583_v44, %s9228_s27  ;;  %vm15670_vm7 = vmmov %vm15660_vm3 }
 0x89f   : > { %9109 = vmatprep.subr.bf16.mxu0 %v9108_v61 }
 0x8a0   : > { %v6426_v56 = vpop.permute.xlu1 %6425  ;;  %v6424_v53 = vpop.permute.xlu0 %6423  ;;  %9111 = vmatpush3.bf16.msra.mxu0 %v9108_v61 }
 0x8a1   : > { %6524 = vst.msk [vmem:[#allocation3 + $0x48] sm:$0xff] %vm15667_vm14, %v6426_v56  ;;  %vm15671_vm14 = vmmov %vm15660_vm3 }
 0x8a2   : > { %6523 = vst.msk [vmem:[#allocation3 + $0x40] sm:$0xff] %vm15668_vm9, %v6424_v53  ;;  %6685 = vrot.lane.b32.xlu1 %v13591_v39, %s9228_s27  ;;  %6683 = vrot.lane.b32.xlu0 %v13593_v35, %s9228_s27  ;;  %v6586_v39 = vld [vmem:[#allocation2 + $0x12a] sm:$0xff]  ;;  %v6585_v35 = vld [vmem:[#allocation2 + $0x122] sm:$0xff]  ;;  %vm15672_vm9 = vmmov %vm15660_vm3 }
 0x8a3   : > { %v7200_v53 = vld [vmem:[#allocation2 + $0x2c] sm:$0xff] }
 0x8a4   : > { %v6430_v55 = vpop.permute.xlu1 %6429  ;;  %v6428_v5 = vpop.permute.xlu0 %6427 }
 0x8a5   : > { %6526 = vst.msk [vmem:[#allocation3 + $0x58] sm:$0xff] %vm15660_vm3, %v6430_v55  ;;  %v7199_v55 = vld [vmem:[#allocation2 + $0x24] sm:$0xff] }
 0x8a6   : > { %6525 = vst.msk [vmem:[#allocation3 + $0x50] sm:$0xff] %vm15669_vm10, %v6428_v5  ;;  %6689 = vrot.lane.b32.xlu1 %v13601_v57, %s9228_s27  ;;  %6687 = vrot.lane.b32.xlu0 %v13603_v33, %s9228_s27  ;;  %v6768_v57 = vld [vmem:[#allocation2 + $0x1b] sm:$0xff]  ;;  %v6767_v33 = vld [vmem:[#allocation2 + $0x13] sm:$0xff]  ;;  %vm15673_vm10 = vmmov %vm15660_vm3 }
 0x8a7   : > { %v7889_v5 = vld [vmem:[%s14645_s3 + $0x30] sm:$0xff] }
 0x8a8   : > { %v6434_v42 = vpop.permute.xlu1 %6433  ;;  %v6432_v44 = vpop.permute.xlu0 %6431 }
 0x8a9   : > { %6528 = vst.msk [vmem:[#allocation3 + $0x68] sm:$0xff] %vm15670_vm7, %v6434_v42  ;;  %vm15674_vm7 = vmmov %vm15660_vm3  ;;  %v7890_v42 = vld [vmem:[%s14645_s3 + $0x38] sm:$0xff] }
 0x8aa   : > { %6527 = vst.msk [vmem:[#allocation3 + $0x60] sm:$0xff] %vm15671_vm14, %v6432_v44  ;;  %6693 = vrot.lane.b32.xlu1 %v6586_v39, %s9228_s27  ;;  %6691 = vrot.lane.b32.xlu0 %v6585_v35, %s9228_s27  ;;  %vm15675_vm14 = vmmov %vm15660_vm3  ;;  %v9112_v44 = vpack.c.bf16 %v7890_v42, %v7889_v5  ;;  %v7635_v5 = vld [vmem:[#allocation2 + $0x46] sm:$0xff] }
 0x8ac   : > { %v6438_v37 = vpop.permute.xlu1 %6437  ;;  %v6436_v6 = vpop.permute.xlu0 %6435  ;;  %9113 = vmatprep.subr.bf16.mxu0 %v9112_v44 }
 0x8ad   : > { %6530 = vst.msk [vmem:[#allocation3 + $0x78] sm:$0xff] %vm15672_vm9, %v6438_v37  ;;  %vm15676_vm9 = vmmov %vm15660_vm3  ;;  %v7416_v37 = vld [vmem:[#allocation2 + $0x2d] sm:$0xff]  ;;  %9115 = vmatpush3.bf16.msra.mxu0 %v9112_v44 }
 0x8ae   : > { %6529 = vst.msk [vmem:[#allocation3 + $0x70] sm:$0xff] %vm15660_vm3, %v6436_v6  ;;  %6841 = vrot.lane.b32.xlu1 %v6768_v57, %s9229_s28  ;;  %6839 = vrot.lane.b32.xlu0 %v6767_v33, %s9229_s28  ;;  %v7415_v6 = vld [vmem:[#allocation2 + $0x25] sm:$0xff] }
 0x8af   : > { %v7891_v57 = vld [vmem:[%s14645_s3 + $0x40] sm:$0xff] }
 0x8b0   : > { %v6442_v17 = vpop.permute.xlu1 %6441  ;;  %v6440_v41 = vpop.permute.xlu0 %6439  ;;  %9012 = vmatprep.subr.mxu0 %v7891_v57 }
 0x8b1   : > { %6532 = vst.msk [vmem:[#allocation3 + $0x88] sm:$0xff] %vm15673_vm10, %v6442_v17  ;;  %vm15677_vm10 = vmmov %vm15660_vm3  ;;  %9013 = vmatpush3.msra.mxu0 %v7891_v57  ;;  %v7205_v57 = vld [vmem:[#allocation2 + $0x54] sm:$0xff] }
 0x8b2   : > { %6531 = vst.msk [vmem:[#allocation3 + $0x80] sm:$0xff] %vm15674_vm7, %v6440_v41  ;;  %6845 = vrot.lane.b32.xlu1 %v6770_v48, %s9229_s28  ;;  %6843 = vrot.lane.b32.xlu0 %v6769_v46, %s9229_s28  ;;  %vm15678_vm7 = vmmov %vm15660_vm3  ;;  %v7631_v41 = vld [vmem:[#allocation2 + $0x26] sm:$0xff] }
 0x8b4   : > { %v6446_v3 = vpop.permute.xlu1 %6445  ;;  %v6444_v47 = vpop.permute.xlu0 %6443 }
 0x8b5   : > { %6534 = vst.msk [vmem:[#allocation3 + $0x98] sm:$0xff] %vm15675_vm14, %v6446_v3  ;;  %vm15679_vm14 = vmmov %vm15660_vm3  ;;  %v7632_v3 = vld [vmem:[#allocation2 + $0x2e] sm:$0xff] }
 0x8b6   : > { %6533 = vst.msk [vmem:[#allocation3 + $0x90] sm:$0xff] %vm15676_vm9, %v6444_v47  ;;  %6849 = vrot.lane.b32.xlu1 %v6772_v51, %s9229_s28  ;;  %6847 = vrot.lane.b32.xlu0 %v6771_v7, %s9229_s28  ;;  %vm15680_vm9 = vmmov %vm15660_vm3  ;;  %v7202_v7 = vld [vmem:[#allocation2 + $0x3c] sm:$0xff] }
 0x8b8   : > { %v6450_v36 = vpop.permute.xlu1 %6449  ;;  %v6448_v43 = vpop.permute.xlu0 %6447 }
 0x8b9   : > { %6536 = vst.msk [vmem:[#allocation3 + $0xa8] sm:$0xff] %vm15660_vm3, %v6450_v36  ;;  %v7418_v36 = vld [vmem:[#allocation2 + $0x3d] sm:$0xff] }
 0x8ba   : > { %6535 = vst.msk [vmem:[#allocation3 + $0xa0] sm:$0xff] %vm15677_vm10, %v6448_v43  ;;  %6853 = vrot.lane.b32.xlu1 %v6774_v13, %s9229_s28  ;;  %6851 = vrot.lane.b32.xlu0 %v6773_v16, %s9229_s28  ;;  %vm15681_vm10 = vmmov %vm15660_vm3  ;;  %v7417_v43 = vld [vmem:[#allocation2 + $0x35] sm:$0xff] }
 0x8bc   : > { %v6454_v14 = vpop.permute.xlu1 %6453  ;;  %v6452_v38 = vpop.permute.xlu0 %6451 }
 0x8bd   : > { %6538 = vst.msk [vmem:[#allocation3 + $0xb8] sm:$0xff] %vm15678_vm7, %v6454_v14  ;;  %vm15682_vm7 = vmmov %vm15660_vm3  ;;  %v7634_v14 = vld [vmem:[#allocation2 + $0x3e] sm:$0xff] }
 0x8be   : > { %6537 = vst.msk [vmem:[#allocation3 + $0xb0] sm:$0xff] %vm15679_vm14, %v6452_v38  ;;  %7057 = vrot.lane.b32.xlu1 %v6984_v49, %s9230_s29  ;;  %7055 = vrot.lane.b32.xlu0 %v6983_v29, %s9230_s29  ;;  %vm15683_vm14 = vmmov %vm15660_vm3  ;;  %v7204_v29 = vld [vmem:[#allocation2 + $0x4c] sm:$0xff] }
 0x8c0   : > { %v6458_v24 = vpop.permute.xlu1 %6457  ;;  %v6456_v56 = vpop.permute.xlu0 %6455 }
 0x8c1   : > { %6540 = vst.msk [vmem:[#allocation3 + $0xc8] sm:$0xff] %vm15680_vm9, %v6458_v24  ;;  %vm15684_vm9 = vmmov %vm15660_vm3  ;;  %v7420_v24 = vld [vmem:[#allocation2 + $0x4d] sm:$0xff] }
 0x8c2   : > { %6539 = vst.msk [vmem:[#allocation3 + $0xc0] sm:$0xff] %vm15660_vm3, %v6456_v56  ;;  %7273 = vrot.lane.b32.xlu1 %v7200_v53, %s9231_s30  ;;  %7271 = vrot.lane.b32.xlu0 %v7199_v55, %s9231_s30  ;;  %v7419_v56 = vld [vmem:[#allocation2 + $0x45] sm:$0xff] }
 0x8c4   : > { %v6462_v39 = vpop.permute.xlu1 %6461  ;;  %v6460_v35 = vpop.permute.xlu0 %6459 }
 0x8c5   : > { %6542 = vst.msk [vmem:[#allocation3 + $0xd8] sm:$0xff] %vm15681_vm10, %v6462_v39  ;;  %vm15685_vm10 = vmmov %vm15660_vm3  ;;  %v7636_v39 = vld [vmem:[#allocation2 + $0x4e] sm:$0xff] }
 0x8c6   : > { %6541 = vst.msk [vmem:[#allocation3 + $0xd0] sm:$0xff] %vm15682_vm7, %v6460_v35  ;;  %7489 = vrot.lane.b32.xlu1 %v7416_v37, %s9232_s6  ;;  %7487 = vrot.lane.b32.xlu0 %v7415_v6, %s9232_s6  ;;  %vm15686_vm7 = vmmov %vm15660_vm3  ;;  %v7206_v6 = vld [vmem:[#allocation2 + $0x5c] sm:$0xff] }
 0x8c8   : > { %v6466_v33 = vpop.permute.xlu1 %6465  ;;  %v6464_v17 = vpop.permute.xlu0 %6463 }
 0x8c9   : > { %6544 = vst.msk [vmem:[#allocation3 + $0xe8] sm:$0xff] %vm15683_vm14, %v6466_v33  ;;  %vm15687_vm14 = vmmov %vm15660_vm3 }
 0x8ca   : > { %6543 = vst.msk [vmem:[#allocation3 + $0xe0] sm:$0xff] %vm15684_vm9, %v6464_v17  ;;  %7059 = vrot.lane.b32.xlu1 %v7199_v55, %s9230_s29  ;;  %7703 = vrot.lane.b32.xlu0 %v7631_v41, %s9233_s9  ;;  %vm15688_vm9 = vmmov %vm15660_vm3  ;;  %v6775_v41 = vld [vmem:[#allocation2 + $0x53] sm:$0xff] }
 0x8cc   : > { %v6470_v48 = vpop.permute.xlu1 %6469  ;;  %v6468_v46 = vpop.permute.xlu0 %6467 }
 0x8cd   : > { %6546 = vst.msk [vmem:[#allocation3 + $0xf8] sm:$0xff] %vm15660_vm3, %v6470_v48  ;;  %v7421_v48 = vld [vmem:[#allocation2 + $0x55] sm:$0xff] }
 0x8ce   : > { %6545 = vst.msk [vmem:[#allocation3 + $0xf0] sm:$0xff] %vm15685_vm10, %v6468_v46  ;;  %7061 = vrot.lane.b32.xlu1 %v7200_v53, %s9230_s29  ;;  %7705 = vrot.lane.b32.xlu0 %v7632_v3, %s9233_s9  ;;  %vm15689_vm10 = vcmask 261312  }
 0x8d0   : > { %v6474_v47 = vpop.permute.xlu1 %6473  ;;  %v6472_v51 = vpop.permute.xlu0 %6471 }
 0x8d1   : > { %6548 = vst.msk [vmem:[#allocation3 + $0x108] sm:$0xff] %vm15686_vm7, %v6474_v47  ;;  %vm15690_vm7 = vmmov %vm15689_vm10  ;;  %v7637_v47 = vld [vmem:[#allocation2 + $0x56] sm:$0xff] }
 0x8d2   : > { %6547 = vst.msk [vmem:[#allocation3 + $0x100] sm:$0xff] %vm15687_vm14, %v6472_v51  ;;  %7277 = vrot.lane.b32.xlu1 %v7202_v7, %s9231_s30  ;;  %7275 = vrot.lane.b32.xlu0 %v7201_v26, %s9231_s30  ;;  %vm15691_vm14 = vmmov %vm15690_vm7  ;;  %v7422_v51 = vld [vmem:[#allocation2 + $0x5d] sm:$0xff] }
 0x8d4   : > { %v6478_v52 = vpop.permute.xlu1 %6477  ;;  %v6476_v19 = vpop.permute.xlu0 %6475 }
 0x8d5   : > { %6550 = vst.msk [vmem:[#allocation3 + $0x118] sm:$0xff] %vm15688_vm9, %v6478_v52  ;;  %vm15692_vm9 = vmmov %vm15690_vm7  ;;  %v6776_v52 = vld [vmem:[#allocation2 + $0x5b] sm:$0xff] }
 0x8d6   : > { %6549 = vst.msk [vmem:[#allocation3 + $0x110] sm:$0xff] %vm15660_vm3, %v6476_v19  ;;  %7493 = vrot.lane.b32.xlu1 %v7418_v36, %s9232_s6  ;;  %7491 = vrot.lane.b32.xlu0 %v7417_v43, %s9232_s6  ;;  %vm15693_vm3 = vmmov %vm15690_vm7  ;;  %v7638_v43 = vld [vmem:[#allocation2 + $0x5e] sm:$0xff] }
 0x8d8   : > { %v6626_v13 = vpop.permute.xlu1 %6625  ;;  %v6624_v16 = vpop.permute.xlu0 %6623 }
 0x8d9   : > { %6732 = vst.msk [vmem:[#allocation3 + $0x8] sm:$0xff] %vm15689_vm10, %v6626_v13  ;;  %vm15694_vm10 = vmmov %vm15693_vm3 }
 0x8da   : > { %6731 = vst.msk [vmem:[#allocation3] sm:$0xff] %vm15690_vm7, %v6624_v16  ;;  %7063 = vrot.lane.b32.xlu1 %v7201_v26, %s9230_s29  ;;  %7707 = vrot.lane.b32.xlu0 %v7633_v50, %s9233_s9  ;;  %vm15695_vm7 = vmmov %vm15693_vm3  ;;  %v7208_v50 = vld [vmem:[#allocation2 + $0x6c] sm:$0xff] }
 0x8dc   : > { %v6630_v8 = vpop.permute.xlu1 %6629  ;;  %v6628_v2 = vpop.permute.xlu0 %6627 }
 0x8dd   : > { %6734 = vst.msk [vmem:[#allocation3 + $0x18] sm:$0xff] %vm15691_vm14, %v6630_v8  ;;  %vm15696_vm14 = vmmov %vm15693_vm3  ;;  %v7207_v8 = vld [vmem:[#allocation2 + $0x64] sm:$0xff] }
 0x8de   : > { %6733 = vst.msk [vmem:[#allocation3 + $0x10] sm:$0xff] %vm15692_vm9, %v6628_v2  ;;  %7065 = vrot.lane.b32.xlu1 %v7202_v7, %s9230_s29  ;;  %7709 = vrot.lane.b32.xlu0 %v7634_v14, %s9233_s9  ;;  %vm15697_vm9 = vmmov %vm15693_vm3 }
 0x8e0   : > { %v6634_v38 = vpop.permute.xlu1 %6633  ;;  %v6632_v49 = vpop.permute.xlu0 %6631 }
 0x8e1   : > { %6736 = vst.msk [vmem:[#allocation3 + $0x28] sm:$0xff] %vm15693_vm3, %v6634_v38  ;;  %v6777_v38 = vld [vmem:[#allocation2 + $0x63] sm:$0xff] }
 0x8e2   : > { %6735 = vst.msk [vmem:[#allocation3 + $0x20] sm:$0xff] %vm15694_vm10, %v6632_v49  ;;  %7281 = vrot.lane.b32.xlu1 %v7204_v29, %s9231_s30  ;;  %7279 = vrot.lane.b32.xlu0 %v7203_v59, %s9231_s30  ;;  %vm15698_vm10 = vmmov %vm15693_vm3  ;;  %v7423_v49 = vld [vmem:[#allocation2 + $0x65] sm:$0xff] }
 0x8e4   : > { %v6638_v54 = vpop.permute.xlu1 %6637  ;;  %v6636_v61 = vpop.permute.xlu0 %6635 }
 0x8e5   : > { %6738 = vst.msk [vmem:[#allocation3 + $0x38] sm:$0xff] %vm15695_vm7, %v6638_v54  ;;  %vm15699_vm7 = vmmov %vm15693_vm3  ;;  %v7639_v54 = vld [vmem:[#allocation2 + $0x66] sm:$0xff] }
 0x8e6   : > { %6737 = vst.msk [vmem:[#allocation3 + $0x30] sm:$0xff] %vm15696_vm14, %v6636_v61  ;;  %7497 = vrot.lane.b32.xlu1 %v7420_v24, %s9232_s6  ;;  %7495 = vrot.lane.b32.xlu0 %v7419_v56, %s9232_s6  ;;  %vm15700_vm14 = vmmov %vm15693_vm3  ;;  %v7424_v61 = vld [vmem:[#allocation2 + $0x6d] sm:$0xff] }
 0x8e8   : > { %v6642_v53 = vpop.permute.xlu1 %6641  ;;  %v6640_v55 = vpop.permute.xlu0 %6639 }
 0x8e9   : > { %6740 = vst.msk [vmem:[#allocation3 + $0x48] sm:$0xff] %vm15697_vm9, %v6642_v53  ;;  %vm15701_vm9 = vmmov %vm15693_vm3  ;;  %v6778_v53 = vld [vmem:[#allocation2 + $0x6b] sm:$0xff] }
 0x8ea   : > { %6739 = vst.msk [vmem:[#allocation3 + $0x40] sm:$0xff] %vm15693_vm3, %v6640_v55  ;;  %7067 = vrot.lane.b32.xlu1 %v7203_v59, %s9230_s29  ;;  %7711 = vrot.lane.b32.xlu0 %v7635_v5, %s9233_s9 }
 0x8ec   : > { %v6646_v42 = vpop.permute.xlu1 %6645  ;;  %v6644_v44 = vpop.permute.xlu0 %6643 }
 0x8ed   : > { %6742 = vst.msk [vmem:[#allocation3 + $0x58] sm:$0xff] %vm15698_vm10, %v6646_v42  ;;  %vm15702_vm10 = vmmov %vm15693_vm3  ;;  %v7640_v42 = vld [vmem:[#allocation2 + $0x6e] sm:$0xff] }
 0x8ee   : > { %6741 = vst.msk [vmem:[#allocation3 + $0x50] sm:$0xff] %vm15699_vm7, %v6644_v44  ;;  %7069 = vrot.lane.b32.xlu1 %v7204_v29, %s9230_s29  ;;  %7713 = vrot.lane.b32.xlu0 %v7636_v39, %s9233_s9  ;;  %vm15703_vm7 = vmmov %vm15693_vm3 }
 0x8f0   : > { %v6650_v35 = vpop.permute.xlu1 %6649  ;;  %v6648_v37 = vpop.permute.xlu0 %6647 }
 0x8f1   : > { %6744 = vst.msk [vmem:[#allocation3 + $0x68] sm:$0xff] %vm15700_vm14, %v6650_v35  ;;  %vm15704_vm14 = vmmov %vm15693_vm3  ;;  %v7210_v35 = vld [vmem:[#allocation2 + $0x7c] sm:$0xff] }
 0x8f2   : > { %6743 = vst.msk [vmem:[#allocation3 + $0x60] sm:$0xff] %vm15701_vm9, %v6648_v37  ;;  %7285 = vrot.lane.b32.xlu1 %v7206_v6, %s9231_s30  ;;  %7283 = vrot.lane.b32.xlu0 %v7205_v57, %s9231_s30  ;;  %vm15705_vm9 = vmmov %vm15693_vm3  ;;  %v7209_v37 = vld [vmem:[#allocation2 + $0x74] sm:$0xff] }
 0x8f4   : > { %v6654_v33 = vpop.permute.xlu1 %6653  ;;  %v6652_v17 = vpop.permute.xlu0 %6651 }
 0x8f5   : > { %6746 = vst.msk [vmem:[#allocation3 + $0x78] sm:$0xff] %vm15693_vm3, %v6654_v33  ;;  %v6779_v33 = vld [vmem:[#allocation2 + $0x73] sm:$0xff] }
 0x8f6   : > { %6745 = vst.msk [vmem:[#allocation3 + $0x70] sm:$0xff] %vm15702_vm10, %v6652_v17  ;;  %6855 = vrot.lane.b32.xlu1 %v6775_v41, %s9229_s28  ;;  %7499 = vrot.lane.b32.xlu0 %v7421_v48, %s9232_s6  ;;  %vm15706_vm10 = vmmov %vm15693_vm3  ;;  %v7425_v17 = vld [vmem:[#allocation2 + $0x75] sm:$0xff] }
 0x8f8   : > { %v6658_v46 = vpop.permute.xlu1 %6657  ;;  %v6656_v3 = vpop.permute.xlu0 %6655 }
 0x8f9   : > { %6748 = vst.msk [vmem:[#allocation3 + $0x88] sm:$0xff] %vm15703_vm7, %v6658_v46  ;;  %vm15707_vm7 = vmmov %vm15693_vm3  ;;  %v7641_v46 = vld [vmem:[#allocation2 + $0x76] sm:$0xff] }
 0x8fa   : > { %6747 = vst.msk [vmem:[#allocation3 + $0x80] sm:$0xff] %vm15704_vm14, %v6656_v3  ;;  %7715 = vrot.lane.b32.xlu1 %v7637_v47, %s9233_s9  ;;  %7501 = vrot.lane.b32.xlu0 %v7422_v51, %s9232_s6  ;;  %vm15708_vm14 = vmmov %vm15693_vm3  ;;  %v7426_v3 = vld [vmem:[#allocation2 + $0x7d] sm:$0xff] }
 0x8fc   : > { %v6662_v7 = vpop.permute.xlu1 %6661  ;;  %v6660_v26 = vpop.permute.xlu0 %6659 }
 0x8fd   : > { %6750 = vst.msk [vmem:[#allocation3 + $0x98] sm:$0xff] %vm15705_vm9, %v6662_v7  ;;  %vm15709_vm9 = vmmov %vm15693_vm3  ;;  %v6780_v7 = vld [vmem:[#allocation2 + $0x7b] sm:$0xff] }
 0x8fe   : > { %6749 = vst.msk [vmem:[#allocation3 + $0x90] sm:$0xff] %vm15693_vm3, %v6660_v26  ;;  %7071 = vrot.lane.b32.xlu1 %v7205_v57, %s9230_s29  ;;  %6857 = vrot.lane.b32.xlu0 %v6776_v52, %s9229_s28 }
 0x900   : > { %v6666_v19 = vpop.permute.xlu1 %6665  ;;  %v6664_v36 = vpop.permute.xlu0 %6663 }
 0x901   : > { %6752 = vst.msk [vmem:[#allocation3 + $0xa8] sm:$0xff] %vm15706_vm10, %v6666_v19  ;;  %vm15710_vm10 = vmmov %vm15693_vm3  ;;  %v7642_v19 = vld [vmem:[#allocation2 + $0x7e] sm:$0xff] }
 0x902   : > { %6751 = vst.msk [vmem:[#allocation3 + $0xa0] sm:$0xff] %vm15707_vm7, %v6664_v36  ;;  %7073 = vrot.lane.b32.xlu1 %v7206_v6, %s9230_s29  ;;  %7717 = vrot.lane.b32.xlu0 %v7638_v43, %s9233_s9  ;;  %vm15711_vm7 = vmmov %vm15693_vm3 }
 0x904   : > { %v6670_v13 = vpop.permute.xlu1 %6669  ;;  %v6668_v16 = vpop.permute.xlu0 %6667 }
 0x905   : > { %6754 = vst.msk [vmem:[#allocation3 + $0xb8] sm:$0xff] %vm15708_vm14, %v6670_v13  ;;  %vm15712_vm14 = vmmov %vm15693_vm3  ;;  %v7212_v13 = vld [vmem:[#allocation2 + $0x8c] sm:$0xff] }
 0x906   : > { %6753 = vst.msk [vmem:[#allocation3 + $0xb0] sm:$0xff] %vm15709_vm9, %v6668_v16  ;;  %7289 = vrot.lane.b32.xlu1 %v7208_v50, %s9231_s30  ;;  %7287 = vrot.lane.b32.xlu0 %v7207_v8, %s9231_s30  ;;  %vm15713_vm9 = vmmov %vm15693_vm3  ;;  %v7211_v16 = vld [vmem:[#allocation2 + $0x84] sm:$0xff] }
 0x908   : > { %v6674_v2 = vpop.permute.xlu1 %6673  ;;  %v6672_v14 = vpop.permute.xlu0 %6671 }
 0x909   : > { %6756 = vst.msk [vmem:[#allocation3 + $0xc8] sm:$0xff] %vm15693_vm3, %v6674_v2  ;;  %v6781_v2 = vld [vmem:[#allocation2 + $0x83] sm:$0xff] }
 0x90a   : > { %6755 = vst.msk [vmem:[#allocation3 + $0xc0] sm:$0xff] %vm15710_vm10, %v6672_v14  ;;  %6859 = vrot.lane.b32.xlu1 %v6777_v38, %s9229_s28  ;;  %7503 = vrot.lane.b32.xlu0 %v7423_v49, %s9232_s6  ;;  %vm15714_vm10 = vmmov %vm15693_vm3  ;;  %v7427_v14 = vld [vmem:[#allocation2 + $0x85] sm:$0xff] }
 0x90c   : > { %v6678_v29 = vpop.permute.xlu1 %6677  ;;  %v6676_v59 = vpop.permute.xlu0 %6675 }
 0x90d   : > { %6758 = vst.msk [vmem:[#allocation3 + $0xd8] sm:$0xff] %vm15711_vm7, %v6678_v29  ;;  %vm15715_vm7 = vmmov %vm15693_vm3  ;;  %v7643_v29 = vld [vmem:[#allocation2 + $0x86] sm:$0xff] }
 0x90e   : > { %6757 = vst.msk [vmem:[#allocation3 + $0xd0] sm:$0xff] %vm15712_vm14, %v6676_v59  ;;  %7719 = vrot.lane.b32.xlu1 %v7639_v54, %s9233_s9  ;;  %7505 = vrot.lane.b32.xlu0 %v7424_v61, %s9232_s6  ;;  %vm15716_vm14 = vmmov %vm15693_vm3  ;;  %v7428_v59 = vld [vmem:[#allocation2 + $0x8d] sm:$0xff] }
 0x910   : > { %v6682_v24 = vpop.permute.xlu1 %6681  ;;  %v6680_v56 = vpop.permute.xlu0 %6679 }
 0x911   : > { %6760 = vst.msk [vmem:[#allocation3 + $0xe8] sm:$0xff] %vm15713_vm9, %v6682_v24  ;;  %vm15717_vm9 = vmmov %vm15693_vm3  ;;  %v6782_v24 = vld [vmem:[#allocation2 + $0x8b] sm:$0xff] }
 0x912   : > { %6759 = vst.msk [vmem:[#allocation3 + $0xe0] sm:$0xff] %vm15693_vm3, %v6680_v56  ;;  %7075 = vrot.lane.b32.xlu1 %v7207_v8, %s9230_s29  ;;  %6861 = vrot.lane.b32.xlu0 %v6778_v53, %s9229_s28 }
 0x914   : > { %v6686_v55 = vpop.permute.xlu1 %6685  ;;  %v6684_v5 = vpop.permute.xlu0 %6683 }
 0x915   : > { %6762 = vst.msk [vmem:[#allocation3 + $0xf8] sm:$0xff] %vm15714_vm10, %v6686_v55  ;;  %vm15718_vm10 = vmmov %vm15693_vm3  ;;  %v7644_v55 = vld [vmem:[#allocation2 + $0x8e] sm:$0xff] }
 0x916   : > { %6761 = vst.msk [vmem:[#allocation3 + $0xf0] sm:$0xff] %vm15715_vm7, %v6684_v5  ;;  %7077 = vrot.lane.b32.xlu1 %v7208_v50, %s9230_s29  ;;  %7721 = vrot.lane.b32.xlu0 %v7640_v42, %s9233_s9  ;;  %vm15719_vm7 = vcmask 326912  }
 0x918   : > { %v6690_v44 = vpop.permute.xlu1 %6689  ;;  %v6688_v39 = vpop.permute.xlu0 %6687 }
 0x919   : > { %6764 = vst.msk [vmem:[#allocation3 + $0x108] sm:$0xff] %vm15716_vm14, %v6690_v44  ;;  %vm15720_vm14 = vmmov %vm15719_vm7  ;;  %v7214_v44 = vld [vmem:[#allocation2 + $0x9c] sm:$0xff] }
 0x91a   : > { %6763 = vst.msk [vmem:[#allocation3 + $0x100] sm:$0xff] %vm15717_vm9, %v6688_v39  ;;  %7293 = vrot.lane.b32.xlu1 %v7210_v35, %s9231_s30  ;;  %7291 = vrot.lane.b32.xlu0 %v7209_v37, %s9231_s30  ;;  %vm15721_vm9 = vmmov %vm15719_vm7  ;;  %v7213_v39 = vld [vmem:[#allocation2 + $0x94] sm:$0xff] }
 0x91c   : > { %v6694_v6 = vpop.permute.xlu1 %6693  ;;  %v6692_v57 = vpop.permute.xlu0 %6691 }
 0x91d   : > { %6766 = vst.msk [vmem:[#allocation3 + $0x118] sm:$0xff] %vm15693_vm3, %v6694_v6  ;;  %vm15722_vm3 = vmmov %vm15719_vm7 }
 0x91e   : > { %6765 = vst.msk [vmem:[#allocation3 + $0x110] sm:$0xff] %vm15718_vm10, %v6692_v57  ;;  %6863 = vrot.lane.b32.xlu1 %v6779_v33, %s9229_s28  ;;  %7507 = vrot.lane.b32.xlu0 %v7425_v17, %s9232_s6  ;;  %vm15723_vm10 = vmmov %vm15722_vm3  ;;  %v6783_v57 = vld [vmem:[#allocation2 + $0x93] sm:$0xff] }
 0x91f   : > { %v7429_v33 = vld [vmem:[#allocation2 + $0x95] sm:$0xff] }
 0x920   : > { %v6842_v41 = vpop.permute.xlu1 %6841  ;;  %v6840_v48 = vpop.permute.xlu0 %6839 }
 0x921   : > { %6948 = vst.msk [vmem:[#allocation3 + $0x8] sm:$0xff] %vm15719_vm7, %v6842_v41  ;;  %vm15724_vm7 = vmmov %vm15722_vm3 }
 0x922   : > { %6947 = vst.msk [vmem:[#allocation3] sm:$0xff] %vm15720_vm14, %v6840_v48  ;;  %7723 = vrot.lane.b32.xlu1 %v7641_v46, %s9233_s9  ;;  %7509 = vrot.lane.b32.xlu0 %v7426_v3, %s9232_s6  ;;  %vm15725_vm14 = vmmov %vm15722_vm3  ;;  %v7645_v46 = vld [vmem:[#allocation2 + $0x96] sm:$0xff] }
 0x923   : > { %v7430_v3 = vld [vmem:[#allocation2 + $0x9d] sm:$0xff] }
 0x924   : > { %v6846_v47 = vpop.permute.xlu1 %6845  ;;  %v6844_v51 = vpop.permute.xlu0 %6843 }
 0x925   : > { %6950 = vst.msk [vmem:[#allocation3 + $0x18] sm:$0xff] %vm15721_vm9, %v6846_v47  ;;  %vm15726_vm9 = vmmov %vm15722_vm3 }
 0x926   : > { %6949 = vst.msk [vmem:[#allocation3 + $0x10] sm:$0xff] %vm15722_vm3, %v6844_v51  ;;  %7079 = vrot.lane.b32.xlu1 %v7209_v37, %s9230_s29  ;;  %6865 = vrot.lane.b32.xlu0 %v6780_v7, %s9229_s28  ;;  %vm15727_vm3 = vcmask 392512   ;;  %v6784_v7 = vld [vmem:[#allocation2 + $0x9b] sm:$0xff] }
 0x928   : > { %v6850_v26 = vpop.permute.xlu1 %6849  ;;  %v6848_v52 = vpop.permute.xlu0 %6847 }
 0x929   : > { %6952 = vst.msk [vmem:[#allocation3 + $0x28] sm:$0xff] %vm15723_vm10, %v6850_v26  ;;  %vm15728_vm10 = vmmov %vm15727_vm3 }
 0x92a   : > { %6951 = vst.msk [vmem:[#allocation3 + $0x20] sm:$0xff] %vm15724_vm7, %v6848_v52  ;;  %7081 = vrot.lane.b32.xlu1 %v7210_v35, %s9230_s29  ;;  %7725 = vrot.lane.b32.xlu0 %v7642_v19, %s9233_s9  ;;  %vm15729_vm7 = vcmask 458112   ;;  %v7646_v19 = vld [vmem:[#allocation2 + $0x9e] sm:$0xff] }
 0x92c   : > { %v6854_v36 = vpop.permute.xlu1 %6853  ;;  %v6852_v43 = vpop.permute.xlu0 %6851 }
 0x92d   : > { %6954 = vst.msk [vmem:[#allocation3 + $0x38] sm:$0xff] %vm15725_vm14, %v6854_v36  ;;  %vm15730_vm14 = vmmov %vm15729_vm7 }
 0x92e   : > { %6953 = vst.msk [vmem:[#allocation3 + $0x30] sm:$0xff] %vm15726_vm9, %v6852_v43  ;;  %7297 = vrot.lane.b32.xlu1 %v7212_v13, %s9231_s30  ;;  %7295 = vrot.lane.b32.xlu0 %v7211_v16, %s9231_s30  ;;  %vm15731_vm9 = vcmask 523712  }
 0x930   : > { %v7058_v50 = vpop.permute.xlu1 %7057  ;;  %v7056_v8 = vpop.permute.xlu0 %7055 }
 0x931   : > { %7164 = vst.msk [vmem:[#allocation3 + $0x8] sm:$0xff] %vm15727_vm3, %v7058_v50  ;;  %vm15732_vm3 = vmmov %vm15731_vm9  ;;  %v7215_v50 = vld [vmem:[#allocation2 + $0xa4] sm:$0xff] }
 0x932   : > { %7163 = vst.msk [vmem:[#allocation3] sm:$0xff] %vm15728_vm10, %v7056_v8  ;;  %6867 = vrot.lane.b32.xlu1 %v6781_v2, %s9229_s28  ;;  %7511 = vrot.lane.b32.xlu0 %v7427_v14, %s9232_s6 }
 0x934   : > { %v7274_v38 = vpop.permute.xlu1 %7273  ;;  %v7272_v49 = vpop.permute.xlu0 %7271 }
 0x935   : > { %7380 = vst.msk [vmem:[#allocation3 + $0x8] sm:$0xff] %vm15729_vm7, %v7274_v38  ;;  %vm15733_vm7 = vcmask 589312   ;;  %v6785_v38 = vld [vmem:[#allocation2 + $0xa3] sm:$0xff] }
 0x936   : > { %7379 = vst.msk [vmem:[#allocation3] sm:$0xff] %vm15730_vm14, %v7272_v49  ;;  %7727 = vrot.lane.b32.xlu1 %v7643_v29, %s9233_s9  ;;  %7513 = vrot.lane.b32.xlu0 %v7428_v59, %s9232_s6  ;;  %vm15734_vm14 = vmmov %vm15728_vm10  ;;  %v7431_v49 = vld [vmem:[#allocation2 + $0xa5] sm:$0xff] }
 0x938   : > { %v7490_v54 = vpop.permute.xlu1 %7489  ;;  %v7488_v61 = vpop.permute.xlu0 %7487 }
 0x939   : > { %7596 = vst.msk [vmem:[#allocation3 + $0x8] sm:$0xff] %vm15731_vm9, %v7490_v54  ;;  %vm15735_vm9 = vmmov %vm15733_vm7  ;;  %v7647_v54 = vld [vmem:[#allocation2 + $0xa6] sm:$0xff] }
 0x93a   : > { %7595 = vst.msk [vmem:[#allocation3] sm:$0xff] %vm15732_vm3, %v7488_v61  ;;  %7083 = vrot.lane.b32.xlu1 %v7211_v16, %s9230_s29  ;;  %6869 = vrot.lane.b32.xlu0 %v6782_v24, %s9229_s28  ;;  %vm15736_vm3 = vcmask 458112   ;;  %v7216_v16 = vld [vmem:[#allocation2 + $0xac] sm:$0xff] }
 0x93b   : > { %v7432_v61 = vld [vmem:[#allocation2 + $0xad] sm:$0xff] }
 0x93c   : > { %v7060_v56 = vpop.permute.xlu1 %7059  ;;  %v7704_v53 = vpop.permute.xlu0 %7703 }
 0x93d   : > { %7165 = vst.msk [vmem:[#allocation3 + $0x10] sm:$0xff] %vm15728_vm10, %v7060_v56  ;;  %vm15737_vm10 = vmmov %vm15736_vm3 }
 0x93e   : > { %7811 = vst.msk [vmem:[#allocation3] sm:$0xff] %vm15733_vm7, %v7704_v53  ;;  %7085 = vrot.lane.b32.xlu1 %v7212_v13, %s9230_s29  ;;  %7729 = vrot.lane.b32.xlu0 %v7644_v55, %s9233_s9  ;;  %vm15738_vm7 = vcmask 588800   ;;  %v6786_v53 = vld [vmem:[#allocation2 + $0xab] sm:$0xff] }
 0x93f   : > { %vm15741_vm5 = vmmov %vm15738_vm7 }
 0x940   : > { %v7062_v5 = vpop.permute.xlu1 %7061  ;;  %v7706_v42 = vpop.permute.xlu0 %7705 }
 0x941   : > { %7166 = vst.msk [vmem:[#allocation3 + $0x18] sm:$0xff] %vm15734_vm14, %v7062_v5  ;;  %vm15739_vm14 = vcmask 523712  }
 0x942   : > { %7812 = vst.msk [vmem:[#allocation3 + $0x8] sm:$0xff] %vm15735_vm9, %v7706_v42  ;;  %7301 = vrot.lane.b32.xlu1 %v7214_v44, %s9231_s30  ;;  %7299 = vrot.lane.b32.xlu0 %v7213_v39, %s9231_s30  ;;  %vm15740_vm9 = vmmov %vm15739_vm14 }
 0x944   : > { %v7278_v35 = vpop.permute.xlu1 %7277  ;;  %v7276_v37 = vpop.permute.xlu0 %7275 }
 0x945   : > { %v7847_v6 = vld [vmem:[#allocation3] sm:$0xff]  ;;  %7382 = vst.msk [vmem:[#allocation3 + $0x18] sm:$0xff] %vm15736_vm3, %v7278_v35  ;;  %vm15742_vm3 = vcmask 392512  }
 0x946   : > { %7381 = vst.msk [vmem:[#allocation3 + $0x10] sm:$0xff] %vm15737_vm10, %v7276_v37  ;;  %9014 = vmatprep.mubr.msk.f32.mxu0 %vm15738_vm7, %v7847_v6  ;;  %6871 = vrot.lane.b32.xlu1 %v6783_v57, %s9229_s28  ;;  %vm15743_vm10 = vcmask 589312   ;;  %v7218_v6 = vld [vmem:[#allocation2 + $0xbc] sm:$0xff]  ;;  %v7217_v57 = vld [vmem:[#allocation2 + $0xb4] sm:$0xff] }
 0x947   : > { %7515 = vrot.lane.b32.xlu0 %v7429_v33, %s9232_s6  ;;  %vm15745_vm7 = vmmov %vm15743_vm10 }
 0x948   : > { %v7494_v17 = vpop.permute.xlu1 %7493  ;;  %v7492_v41 = vpop.permute.xlu0 %7491 }
 0x949   : > { %v7848_v48 = vld [vmem:[#allocation3 + $0x8] sm:$0xff]  ;;  %7598 = vst.msk [vmem:[#allocation3 + $0x18] sm:$0xff] %vm15739_vm14, %v7494_v17  ;;  %vm15746_vm14 = vcmask 458112  }
 0x94a   : > { %7597 = vst.msk [vmem:[#allocation3 + $0x10] sm:$0xff] %vm15740_vm9, %v7492_v41  ;;  %9015 = vmatmul.mubr.msk.f32.vlgmr.msra.gmra.mrb[18].mxu0 %vm15741_vm5, %v7848_v48  ;;  %7731 = vrot.lane.b32.xlu1 %v7645_v46, %s9233_s9  ;;  %vm15744_vm5 = vmmov %vm15742_vm3  ;;  %v6787_v41 = vld [vmem:[#allocation2 + $0xb3] sm:$0xff] }
 0x94b   : > { %7517 = vrot.lane.b32.xlu0 %v7430_v3, %s9232_s6  ;;  %vm15747_vm9 = vmmov %vm15746_vm14  ;;  %v7433_v48 = vld [vmem:[#allocation2 + $0xb5] sm:$0xff] }
 0x94c   : > { %v7064_v47 = vpop.permute.xlu1 %7063  ;;  %v7708_v51 = vpop.permute.xlu0 %7707 }
 0x94d   : > { %7167 = vst.msk [vmem:[#allocation3 + $0x20] sm:$0xff] %vm15742_vm3, %v7064_v47  ;;  %vm15748_vm3 = vcmask 588800   ;;  %v7649_v47 = vld [vmem:[#allocation2 + $0xb6] sm:$0xff] }
 0x94e   : > { %7813 = vst.msk [vmem:[#allocation3 + $0x10] sm:$0xff] %vm15743_vm10, %v7708_v51  ;;  %7087 = vrot.lane.b32.xlu1 %v7213_v39, %s9230_s29  ;;  %vm15749_vm10 = vcmask 523712   ;;  %v7434_v51 = vld [vmem:[#allocation2 + $0xbd] sm:$0xff] }
 0x94f   : > { %6873 = vrot.lane.b32.xlu0 %v6784_v7, %s9229_s28 }
 0x950   : > { %v7066_v26 = vpop.permute.xlu1 %7065  ;;  %v7710_v52 = vpop.permute.xlu0 %7709 }
 0x951   : > { %7168 = vst.msk [vmem:[#allocation3 + $0x28] sm:$0xff] %vm15744_vm5, %v7066_v26  ;;  %vm15750_vm5 = vmmov %vm15749_vm10 }
 0x952   : > { %7814 = vst.msk [vmem:[#allocation3 + $0x18] sm:$0xff] %vm15745_vm7, %v7710_v52  ;;  %7089 = vrot.lane.b32.xlu1 %v7214_v44, %s9230_s29  ;;  %vm15751_vm7 = vmmov %vm15748_vm3  ;;  %v7648_v44 = vld [vmem:[#allocation2 + $0xae] sm:$0xff] }
 0x953   : > { %7733 = vrot.lane.b32.xlu0 %v7646_v19, %s9233_s9  ;;  %v6788_v19 = vld [vmem:[#allocation2 + $0xbb] sm:$0xff] }
 0x954   : > { %v7282_v36 = vpop.permute.xlu1 %7281  ;;  %v7280_v43 = vpop.permute.xlu0 %7279 }
 0x955   : > { %v7849_v13 = vld [vmem:[#allocation3 + $0x10] sm:$0xff]  ;;  %7384 = vst.msk [vmem:[#allocation3 + $0x28] sm:$0xff] %vm15746_vm14, %v7282_v36  ;;  %vm15752_vm14 = vcmask 392512  }
 0x956   : > { %7383 = vst.msk [vmem:[#allocation3 + $0x20] sm:$0xff] %vm15747_vm9, %v7280_v43  ;;  %9017 = vmatprep.mubr.msk.f32.mxu0 %vm15748_vm3, %v7849_v13  ;;  %7305 = vrot.lane.b32.xlu1 %v7216_v16, %s9231_s30  ;;  %vm15753_vm9 = vcmask 589312   ;;  %vm15754_vm3 = vmmov %vm15752_vm14  ;;  %v7650_v13 = vld [vmem:[#allocation2 + $0xbe] sm:$0xff] }
 0x957   : > { %7303 = vrot.lane.b32.xlu0 %v7215_v50, %s9231_s30 }
 0x958   : > { %v7498_v8 = vpop.permute.xlu1 %7497  ;;  %v7496_v2 = vpop.permute.xlu0 %7495 }
 0x959   : > { %v7850_v14 = vld [vmem:[#allocation3 + $0x18] sm:$0xff]  ;;  %7600 = vst.msk [vmem:[#allocation3 + $0x28] sm:$0xff] %vm15749_vm10, %v7498_v8  ;;  %vm15755_vm10 = vmmov %vm15753_vm9 }
 0x95a   : > { %7599 = vst.msk [vmem:[#allocation3 + $0x20] sm:$0xff] %vm15750_vm5, %v7496_v2  ;;  %9018 = vmatmul.mubr.msk.f32.gmra.mrb[20].mxu0 %vm15751_vm7, %v7850_v14  ;;  %6875 = vrot.lane.b32.xlu1 %v6785_v38, %s9229_s28  ;;  %vm15756_vm5 = vcmask 458112   ;;  %v7220_v2 = vld [vmem:[#allocation2 + $0xcc] sm:$0xff]  ;;  %v7219_v14 = vld [vmem:[#allocation2 + $0xc4] sm:$0xff] }
 0x95b   : > { %7519 = vrot.lane.b32.xlu0 %v7431_v49, %s9232_s6  ;;  %vm15757_vm7 = vmmov %vm15756_vm5 }
 0x95c   : > { %v7068_v29 = vpop.permute.xlu1 %7067  ;;  %v7712_v59 = vpop.permute.xlu0 %7711 }
 0x95d   : > { %7169 = vst.msk [vmem:[#allocation3 + $0x30] sm:$0xff] %vm15752_vm14, %v7068_v29  ;;  %vm15758_vm14 = vcmask 588800   ;;  %v6789_v29 = vld [vmem:[#allocation2 + $0xc3] sm:$0xff] }
 0x95e   : > { %7815 = vst.msk [vmem:[#allocation3 + $0x20] sm:$0xff] %vm15753_vm9, %v7712_v59  ;;  %7735 = vrot.lane.b32.xlu1 %v7647_v54, %s9233_s9  ;;  %vm15759_vm9 = vcmask 326912   ;;  %v7435_v59 = vld [vmem:[#allocation2 + $0xc5] sm:$0xff] }
 0x95f   : > { %7521 = vrot.lane.b32.xlu0 %v7432_v61, %s9232_s6  ;;  %vm15868_vm8 = vmmov %vm15759_vm9 }
 0x960   : > { %v7070_v24 = vpop.permute.xlu1 %7069  ;;  %v7714_v56 = vpop.permute.xlu0 %7713 }
 0x961   : > { %7170 = vst.msk [vmem:[#allocation3 + $0x38] sm:$0xff] %vm15754_vm3, %v7070_v24  ;;  %vm15760_vm3 = vcmask 523712   ;;  %v7651_v24 = vld [vmem:[#allocation2 + $0xc6] sm:$0xff] }
 0x962   : > { %7816 = vst.msk [vmem:[#allocation3 + $0x28] sm:$0xff] %vm15755_vm10, %v7714_v56  ;;  %7091 = vrot.lane.b32.xlu1 %v7215_v50, %s9230_s29  ;;  %vm15761_vm10 = vmmov %vm15758_vm14  ;;  %v7436_v56 = vld [vmem:[#allocation2 + $0xcd] sm:$0xff] }
 0x963   : > { %6877 = vrot.lane.b32.xlu0 %v6786_v53, %s9229_s28 }
 0x964   : > { %v7286_v55 = vpop.permute.xlu1 %7285  ;;  %v7284_v5 = vpop.permute.xlu0 %7283 }
 0x965   : > { %v7851_v42 = vld [vmem:[#allocation3 + $0x20] sm:$0xff]  ;;  %7386 = vst.msk [vmem:[#allocation3 + $0x38] sm:$0xff] %vm15756_vm5, %v7286_v55  ;;  %vm15762_vm5 = vcmask 589312  }
 0x966   : > { %7385 = vst.msk [vmem:[#allocation3 + $0x30] sm:$0xff] %vm15757_vm7, %v7284_v5  ;;  %9020 = vmatprep.mubr.msk.f32.mxu0 %vm15758_vm14, %v7851_v42  ;;  %7093 = vrot.lane.b32.xlu1 %v7216_v16, %s9230_s29  ;;  %vm15763_vm7 = vmmov %vm15760_vm3  ;;  %vm15764_vm14 = vcmask 392512   ;;  %v6790_v42 = vld [vmem:[#allocation2 + $0xcb] sm:$0xff] }
 0x967   : > { %7737 = vrot.lane.b32.xlu0 %v7648_v44, %s9233_s9 }
 0x968   : > { %v6856_v39 = vpop.permute.xlu1 %6855  ;;  %v7500_v35 = vpop.permute.xlu0 %7499 }
 0x969   : > { %v7852_v37 = vld [vmem:[#allocation3 + $0x28] sm:$0xff]  ;;  %6955 = vst.msk [vmem:[#allocation3 + $0x40] sm:$0xff] %vm15759_vm9, %v6856_v39 }
 0x96a   : > { %7601 = vst.msk [vmem:[#allocation3 + $0x30] sm:$0xff] %vm15760_vm3, %v7500_v35  ;;  %9021 = vmatmul.mubr.msk.f32.gmra.mrb[22].mxu0 %vm15761_vm10, %v7852_v37  ;;  %7309 = vrot.lane.b32.xlu1 %v7218_v6, %s9231_s30  ;;  %vm15765_vm3 = vmmov %vm15764_vm14  ;;  %v7652_v35 = vld [vmem:[#allocation2 + $0xce] sm:$0xff] }
 0x96b   : > { %7307 = vrot.lane.b32.xlu0 %v7217_v57, %s9231_s30  ;;  %vm15766_vm10 = vmmov %vm15762_vm5 }
 0x96c   : > { %v7716_v33 = vpop.permute.xlu1 %7715  ;;  %v7502_v17 = vpop.permute.xlu0 %7501 }
 0x96d   : > { %7817 = vst.msk [vmem:[#allocation3 + $0x30] sm:$0xff] %vm15762_vm5, %v7716_v33  ;;  %vm15767_vm5 = vcmask 588800   ;;  %v7222_v33 = vld [vmem:[#allocation2 + $0xdc] sm:$0xff] }
 0x96e   : > { %7602 = vst.msk [vmem:[#allocation3 + $0x38] sm:$0xff] %vm15763_vm7, %v7502_v17  ;;  %6879 = vrot.lane.b32.xlu1 %v6787_v41, %s9229_s28  ;;  %vm15768_vm7 = vcmask 458112   ;;  %v7221_v17 = vld [vmem:[#allocation2 + $0xd4] sm:$0xff] }
 0x96f   : > { %7523 = vrot.lane.b32.xlu0 %v7433_v48, %s9232_s6 }
 0x970   : > { %v7072_v46 = vpop.permute.xlu1 %7071  ;;  %v6858_v3 = vpop.permute.xlu0 %6857 }
 0x971   : > { %7171 = vst.msk [vmem:[#allocation3 + $0x40] sm:$0xff] %vm15764_vm14, %v7072_v46  ;;  %vm15769_vm14 = vmmov %vm15768_vm7  ;;  %v6791_v46 = vld [vmem:[#allocation2 + $0xd3] sm:$0xff] }
 0x972   : > { %6956 = vst.msk [vmem:[#allocation3 + $0x48] sm:$0xff] %vm15759_vm9, %v6858_v3  ;;  %7739 = vrot.lane.b32.xlu1 %v7649_v47, %s9233_s9  ;;  %v7437_v3 = vld [vmem:[#allocation2 + $0xd5] sm:$0xff] }
 0x973   : > { %7525 = vrot.lane.b32.xlu0 %v7434_v51, %s9232_s6 }
 0x974   : > { %v7074_v7 = vpop.permute.xlu1 %7073  ;;  %v7718_v26 = vpop.permute.xlu0 %7717  ;;  %v7853_v52 = vld [vmem:[#allocation3 + $0x30] sm:$0xff] }
 0x975   : > { %7172 = vst.msk [vmem:[#allocation3 + $0x48] sm:$0xff] %vm15765_vm3, %v7074_v7  ;;  %9023 = vmatprep.mubr.msk.f32.mxu0 %vm15767_vm5, %v7853_v52  ;;  %vm15770_vm3 = vcmask 523712   ;;  %v7653_v7 = vld [vmem:[#allocation2 + $0xd6] sm:$0xff] }
 0x976   : > { %7818 = vst.msk [vmem:[#allocation3 + $0x38] sm:$0xff] %vm15766_vm10, %v7718_v26  ;;  %7095 = vrot.lane.b32.xlu1 %v7217_v57, %s9230_s29  ;;  %vm15771_vm10 = vmmov %vm15767_vm5  ;;  %vm15772_vm5 = vcmask 589312   ;;  %v7438_v26 = vld [vmem:[#allocation2 + $0xdd] sm:$0xff] }
 0x977   : > { %6881 = vrot.lane.b32.xlu0 %v6788_v19, %s9229_s28 }
 0x978   : > { %v7290_v36 = vpop.permute.xlu1 %7289  ;;  %v7288_v43 = vpop.permute.xlu0 %7287 }
 0x979   : > { %7388 = vst.msk [vmem:[#allocation3 + $0x48] sm:$0xff] %vm15768_vm7, %v7290_v36  ;;  %vm15773_vm7 = vmmov %vm15770_vm3 }
 0x97a   : > { %7387 = vst.msk [vmem:[#allocation3 + $0x40] sm:$0xff] %vm15769_vm14, %v7288_v43  ;;  %7097 = vrot.lane.b32.xlu1 %v7218_v6, %s9230_s29  ;;  %vm15774_vm14 = vcmask 392512   ;;  %v6792_v43 = vld [vmem:[#allocation2 + $0xdb] sm:$0xff] }
 0x97b   : > { %7741 = vrot.lane.b32.xlu0 %v7650_v13, %s9233_s9 }
 0x97c   : > { %v6860_v16 = vpop.permute.xlu1 %6859  ;;  %v7504_v50 = vpop.permute.xlu0 %7503 }
 0x97d   : > { %v7854_v8 = vld [vmem:[#allocation3 + $0x38] sm:$0xff]  ;;  %6957 = vst.msk [vmem:[#allocation3 + $0x50] sm:$0xff] %vm15759_vm9, %v6860_v16 }
 0x97e   : > { %7603 = vst.msk [vmem:[#allocation3 + $0x40] sm:$0xff] %vm15770_vm3, %v7504_v50  ;;  %9024 = vmatmul.mubr.msk.f32.gmra.mrb[24].mxu0 %vm15771_vm10, %v7854_v8  ;;  %7313 = vrot.lane.b32.xlu1 %v7220_v2, %s9231_s30  ;;  %vm15775_vm3 = vmmov %vm15774_vm14  ;;  %v7654_v50 = vld [vmem:[#allocation2 + $0xde] sm:$0xff] }
 0x97f   : > { %7311 = vrot.lane.b32.xlu0 %v7219_v14, %s9231_s30  ;;  %vm15776_vm10 = vmmov %vm15772_vm5 }
 0x980   : > { %v7720_v38 = vpop.permute.xlu1 %7719  ;;  %v7506_v49 = vpop.permute.xlu0 %7505 }
 0x981   : > { %7819 = vst.msk [vmem:[#allocation3 + $0x40] sm:$0xff] %vm15772_vm5, %v7720_v38  ;;  %vm15777_vm5 = vcmask 588800   ;;  %v7224_v38 = vld [vmem:[#allocation2 + $0xec] sm:$0xff] }
 0x982   : > { %7604 = vst.msk [vmem:[#allocation3 + $0x48] sm:$0xff] %vm15773_vm7, %v7506_v49  ;;  %6883 = vrot.lane.b32.xlu1 %v6789_v29, %s9229_s28  ;;  %vm15778_vm7 = vcmask 458112   ;;  %v7223_v49 = vld [vmem:[#allocation2 + $0xe4] sm:$0xff] }
 0x983   : > { %7527 = vrot.lane.b32.xlu0 %v7435_v59, %s9232_s6 }
 0x984   : > { %v7076_v54 = vpop.permute.xlu1 %7075  ;;  %v6862_v61 = vpop.permute.xlu0 %6861 }
 0x985   : > { %7173 = vst.msk [vmem:[#allocation3 + $0x50] sm:$0xff] %vm15774_vm14, %v7076_v54  ;;  %vm15779_vm14 = vmmov %vm15778_vm7  ;;  %v6793_v54 = vld [vmem:[#allocation2 + $0xe3] sm:$0xff] }
 0x986   : > { %6958 = vst.msk [vmem:[#allocation3 + $0x58] sm:$0xff] %vm15759_vm9, %v6862_v61  ;;  %7743 = vrot.lane.b32.xlu1 %v7651_v24, %s9233_s9  ;;  %v7439_v61 = vld [vmem:[#allocation2 + $0xe5] sm:$0xff] }
 0x987   : > { %7529 = vrot.lane.b32.xlu0 %v7436_v56, %s9232_s6 }
 0x988   : > { %v7078_v53 = vpop.permute.xlu1 %7077  ;;  %v7722_v55 = vpop.permute.xlu0 %7721  ;;  %v7855_v5 = vld [vmem:[#allocation3 + $0x40] sm:$0xff] }
 0x989   : > { %7174 = vst.msk [vmem:[#allocation3 + $0x58] sm:$0xff] %vm15775_vm3, %v7078_v53  ;;  %9026 = vmatprep.mubr.msk.f32.mxu0 %vm15777_vm5, %v7855_v5  ;;  %vm15780_vm3 = vcmask 523712   ;;  %v7655_v53 = vld [vmem:[#allocation2 + $0xe6] sm:$0xff] }
 0x98a   : > { %7820 = vst.msk [vmem:[#allocation3 + $0x48] sm:$0xff] %vm15776_vm10, %v7722_v55  ;;  %7099 = vrot.lane.b32.xlu1 %v7219_v14, %s9230_s29  ;;  %vm15781_vm10 = vmmov %vm15777_vm5  ;;  %vm15782_vm5 = vcmask 589312   ;;  %v7440_v55 = vld [vmem:[#allocation2 + $0xed] sm:$0xff] }
 0x98b   : > { %6885 = vrot.lane.b32.xlu0 %v6790_v42, %s9229_s28 }
 0x98c   : > { %v7294_v44 = vpop.permute.xlu1 %7293  ;;  %v7292_v39 = vpop.permute.xlu0 %7291 }
 0x98d   : > { %7390 = vst.msk [vmem:[#allocation3 + $0x58] sm:$0xff] %vm15778_vm7, %v7294_v44  ;;  %vm15783_vm7 = vmmov %vm15780_vm3 }
 0x98e   : > { %7389 = vst.msk [vmem:[#allocation3 + $0x50] sm:$0xff] %vm15779_vm14, %v7292_v39  ;;  %7101 = vrot.lane.b32.xlu1 %v7220_v2, %s9230_s29  ;;  %vm15784_vm14 = vcmask 392512   ;;  %v6794_v39 = vld [vmem:[#allocation2 + $0xeb] sm:$0xff] }
 0x98f   : > { %7745 = vrot.lane.b32.xlu0 %v7652_v35, %s9233_s9 }
 0x990   : > { %v6864_v37 = vpop.permute.xlu1 %6863  ;;  %v7508_v6 = vpop.permute.xlu0 %7507 }
 0x991   : > { %v7856_v57 = vld [vmem:[#allocation3 + $0x48] sm:$0xff]  ;;  %6959 = vst.msk [vmem:[#allocation3 + $0x60] sm:$0xff] %vm15759_vm9, %v6864_v37 }
 0x992   : > { %7605 = vst.msk [vmem:[#allocation3 + $0x50] sm:$0xff] %vm15780_vm3, %v7508_v6  ;;  %9027 = vmatmul.mubr.msk.f32.gmra.mrb[26].mxu0 %vm15781_vm10, %v7856_v57  ;;  %7317 = vrot.lane.b32.xlu1 %v7222_v33, %s9231_s30  ;;  %vm15785_vm3 = vmmov %vm15784_vm14  ;;  %v7656_v6 = vld [vmem:[#allocation2 + $0xee] sm:$0xff] }
 0x993   : > { %7315 = vrot.lane.b32.xlu0 %v7221_v17, %s9231_s30  ;;  %vm15786_vm10 = vmmov %vm15782_vm5 }
 0x994   : > { %v7724_v41 = vpop.permute.xlu1 %7723  ;;  %v7510_v48 = vpop.permute.xlu0 %7509 }
 0x995   : > { %7821 = vst.msk [vmem:[#allocation3 + $0x50] sm:$0xff] %vm15782_vm5, %v7724_v41  ;;  %vm15787_vm5 = vcmask 588800   ;;  %v7226_v41 = vld [vmem:[#allocation2 + $0xfc] sm:$0xff] }
 0x996   : > { %7606 = vst.msk [vmem:[#allocation3 + $0x58] sm:$0xff] %vm15783_vm7, %v7510_v48  ;;  %6887 = vrot.lane.b32.xlu1 %v6791_v46, %s9229_s28  ;;  %vm15788_vm7 = vcmask 458112   ;;  %v7225_v48 = vld [vmem:[#allocation2 + $0xf4] sm:$0xff] }
 0x997   : > { %7531 = vrot.lane.b32.xlu0 %v7437_v3, %s9232_s6 }
 0x998   : > { %v7080_v47 = vpop.permute.xlu1 %7079  ;;  %v6866_v51 = vpop.permute.xlu0 %6865 }
 0x999   : > { %7175 = vst.msk [vmem:[#allocation3 + $0x60] sm:$0xff] %vm15784_vm14, %v7080_v47  ;;  %vm15789_vm14 = vmmov %vm15788_vm7  ;;  %v6795_v47 = vld [vmem:[#allocation2 + $0xf3] sm:$0xff] }
 0x99a   : > { %6960 = vst.msk [vmem:[#allocation3 + $0x68] sm:$0xff] %vm15759_vm9, %v6866_v51  ;;  %7747 = vrot.lane.b32.xlu1 %v7653_v7, %s9233_s9  ;;  %v7441_v51 = vld [vmem:[#allocation2 + $0xf5] sm:$0xff] }
 0x99b   : > { %7533 = vrot.lane.b32.xlu0 %v7438_v26, %s9232_s6 }
 0x99c   : > { %v7082_v52 = vpop.permute.xlu1 %7081  ;;  %v7726_v19 = vpop.permute.xlu0 %7725  ;;  %v7857_v36 = vld [vmem:[#allocation3 + $0x50] sm:$0xff] }
 0x99d   : > { %7176 = vst.msk [vmem:[#allocation3 + $0x68] sm:$0xff] %vm15785_vm3, %v7082_v52  ;;  %9029 = vmatprep.mubr.msk.f32.mxu0 %vm15787_vm5, %v7857_v36  ;;  %vm15790_vm3 = vcmask 523712   ;;  %v7657_v52 = vld [vmem:[#allocation2 + $0xf6] sm:$0xff] }
 0x99e   : > { %7822 = vst.msk [vmem:[#allocation3 + $0x58] sm:$0xff] %vm15786_vm10, %v7726_v19  ;;  %7103 = vrot.lane.b32.xlu1 %v7221_v17, %s9230_s29  ;;  %vm15791_vm10 = vmmov %vm15787_vm5  ;;  %vm15792_vm5 = vcmask 589312   ;;  %v7442_v19 = vld [vmem:[#allocation2 + $0xfd] sm:$0xff] }
 0x99f   : > { %6889 = vrot.lane.b32.xlu0 %v6792_v43, %s9229_s28 }
 0x9a0   : > { %v7298_v13 = vpop.permute.xlu1 %7297  ;;  %v7296_v16 = vpop.permute.xlu0 %7295 }
 0x9a1   : > { %7392 = vst.msk [vmem:[#allocation3 + $0x68] sm:$0xff] %vm15788_vm7, %v7298_v13  ;;  %vm15793_vm7 = vmmov %vm15790_vm3 }
 0x9a2   : > { %7391 = vst.msk [vmem:[#allocation3 + $0x60] sm:$0xff] %vm15789_vm14, %v7296_v16  ;;  %7105 = vrot.lane.b32.xlu1 %v7222_v33, %s9230_s29  ;;  %vm15794_vm14 = vcmask 392512   ;;  %v6796_v16 = vld [vmem:[#allocation2 + $0xfb] sm:$0xff] }
 0x9a3   : > { %7749 = vrot.lane.b32.xlu0 %v7654_v50, %s9233_s9 }
 0x9a4   : > { %v6868_v8 = vpop.permute.xlu1 %6867  ;;  %v7512_v2 = vpop.permute.xlu0 %7511 }
 0x9a5   : > { %v7858_v14 = vld [vmem:[#allocation3 + $0x58] sm:$0xff]  ;;  %6961 = vst.msk [vmem:[#allocation3 + $0x70] sm:$0xff] %vm15759_vm9, %v6868_v8 }
 0x9a6   : > { %7607 = vst.msk [vmem:[#allocation3 + $0x60] sm:$0xff] %vm15790_vm3, %v7512_v2  ;;  %9030 = vmatmul.mubr.msk.f32.gmra.mrb[28].mxu0 %vm15791_vm10, %v7858_v14  ;;  %7321 = vrot.lane.b32.xlu1 %v7224_v38, %s9231_s30  ;;  %vm15795_vm3 = vmmov %vm15794_vm14  ;;  %v7658_v2 = vld [vmem:[#allocation2 + $0xfe] sm:$0xff] }
 0x9a7   : > { %7319 = vrot.lane.b32.xlu0 %v7223_v49, %s9231_s30  ;;  %vm15796_vm10 = vmmov %vm15792_vm5 }
 0x9a8   : > { %v7728_v29 = vpop.permute.xlu1 %7727  ;;  %v7514_v59 = vpop.permute.xlu0 %7513 }
 0x9a9   : > { %7823 = vst.msk [vmem:[#allocation3 + $0x60] sm:$0xff] %vm15792_vm5, %v7728_v29  ;;  %vm15797_vm5 = vcmask 588800   ;;  %v7228_v29 = vld [vmem:[#allocation2 + $0x10c] sm:$0xff] }
 0x9aa   : > { %7608 = vst.msk [vmem:[#allocation3 + $0x68] sm:$0xff] %vm15793_vm7, %v7514_v59  ;;  %6891 = vrot.lane.b32.xlu1 %v6793_v54, %s9229_s28  ;;  %vm15798_vm7 = vcmask 458112   ;;  %v7227_v59 = vld [vmem:[#allocation2 + $0x104] sm:$0xff] }
 0x9ab   : > { %7535 = vrot.lane.b32.xlu0 %v7439_v61, %s9232_s6 }
 0x9ac   : > { %v7084_v24 = vpop.permute.xlu1 %7083  ;;  %v6870_v56 = vpop.permute.xlu0 %6869 }
 0x9ad   : > { %7177 = vst.msk [vmem:[#allocation3 + $0x70] sm:$0xff] %vm15794_vm14, %v7084_v24  ;;  %vm15799_vm14 = vmmov %vm15798_vm7  ;;  %v6797_v24 = vld [vmem:[#allocation2 + $0x103] sm:$0xff] }
 0x9ae   : > { %6962 = vst.msk [vmem:[#allocation3 + $0x78] sm:$0xff] %vm15759_vm9, %v6870_v56  ;;  %7751 = vrot.lane.b32.xlu1 %v7655_v53, %s9233_s9  ;;  %v7443_v56 = vld [vmem:[#allocation2 + $0x105] sm:$0xff] }
 0x9af   : > { %7537 = vrot.lane.b32.xlu0 %v7440_v55, %s9232_s6 }
 0x9b0   : > { %v7086_v5 = vpop.permute.xlu1 %7085  ;;  %v7730_v42 = vpop.permute.xlu0 %7729  ;;  %v7859_v44 = vld [vmem:[#allocation3 + $0x60] sm:$0xff] }
 0x9b1   : > { %7178 = vst.msk [vmem:[#allocation3 + $0x78] sm:$0xff] %vm15795_vm3, %v7086_v5  ;;  %9032 = vmatprep.mubr.msk.f32.mxu0 %vm15797_vm5, %v7859_v44  ;;  %vm15800_vm3 = vcmask 523712   ;;  %v7659_v5 = vld [vmem:[#allocation2 + $0x106] sm:$0xff] }
 0x9b2   : > { %7824 = vst.msk [vmem:[#allocation3 + $0x68] sm:$0xff] %vm15796_vm10, %v7730_v42  ;;  %7107 = vrot.lane.b32.xlu1 %v7223_v49, %s9230_s29  ;;  %vm15801_vm10 = vmmov %vm15797_vm5  ;;  %vm15802_vm5 = vcmask 589312   ;;  %v7444_v42 = vld [vmem:[#allocation2 + $0x10d] sm:$0xff] }
 0x9b3   : > { %6893 = vrot.lane.b32.xlu0 %v6794_v39, %s9229_s28 }
 0x9b4   : > { %v7302_v35 = vpop.permute.xlu1 %7301  ;;  %v7300_v37 = vpop.permute.xlu0 %7299 }
 0x9b5   : > { %7394 = vst.msk [vmem:[#allocation3 + $0x78] sm:$0xff] %vm15798_vm7, %v7302_v35  ;;  %vm15803_vm7 = vmmov %vm15800_vm3 }
 0x9b6   : > { %7393 = vst.msk [vmem:[#allocation3 + $0x70] sm:$0xff] %vm15799_vm14, %v7300_v37  ;;  %7109 = vrot.lane.b32.xlu1 %v7224_v38, %s9230_s29  ;;  %vm15804_vm14 = vcmask 392512   ;;  %v6798_v37 = vld [vmem:[#allocation2 + $0x10b] sm:$0xff] }
 0x9b7   : > { %7753 = vrot.lane.b32.xlu0 %v7656_v6, %s9233_s9 }
 0x9b8   : > { %v6872_v57 = vpop.permute.xlu1 %6871 }
 0x9b9   : > { %v7516_v33 = vpop.permute.xlu0 %7515  ;;  %v7860_v17 = vld [vmem:[#allocation3 + $0x68] sm:$0xff]  ;;  %6963 = vst.msk [vmem:[#allocation3 + $0x80] sm:$0xff] %vm15759_vm9, %v6872_v57 }
 0x9ba   : > { %7609 = vst.msk [vmem:[#allocation3 + $0x70] sm:$0xff] %vm15800_vm3, %v7516_v33  ;;  %9033 = vmatmul.mubr.msk.f32.gmra.mrb[30].mxu0 %vm15801_vm10, %v7860_v17  ;;  %7325 = vrot.lane.b32.xlu1 %v7226_v41, %s9231_s30  ;;  %vm15805_vm3 = vmmov %vm15804_vm14  ;;  %v7660_v33 = vld [vmem:[#allocation2 + $0x10e] sm:$0xff] }
 0x9bb   : > { %7323 = vrot.lane.b32.xlu0 %v7225_v48, %s9231_s30  ;;  %vm15806_vm10 = vmmov %vm15802_vm5 }
 0x9bc   : > { %v7732_v46 = vpop.permute.xlu1 %7731 }
 0x9bd   : > { %v7518_v3 = vpop.permute.xlu0 %7517  ;;  %7825 = vst.msk [vmem:[#allocation3 + $0x70] sm:$0xff] %vm15802_vm5, %v7732_v46  ;;  %vm15807_vm5 = vcmask 588800   ;;  %v7230_v46 = vld [vmem:[#allocation2 + $0x11c] sm:$0xff] }
 0x9be   : > { %7610 = vst.msk [vmem:[#allocation3 + $0x78] sm:$0xff] %vm15803_vm7, %v7518_v3  ;;  %6895 = vrot.lane.b32.xlu1 %v6795_v47, %s9229_s28  ;;  %vm15808_vm7 = vcmask 458112   ;;  %v7229_v3 = vld [vmem:[#allocation2 + $0x114] sm:$0xff] }
 0x9bf   : > { %7539 = vrot.lane.b32.xlu0 %v7441_v51, %s9232_s6 }
 0x9c0   : > { %v7088_v7 = vpop.permute.xlu1 %7087 }
 0x9c1   : > { %v6874_v26 = vpop.permute.xlu0 %6873  ;;  %7179 = vst.msk [vmem:[#allocation3 + $0x80] sm:$0xff] %vm15804_vm14, %v7088_v7  ;;  %vm15809_vm14 = vmmov %vm15808_vm7  ;;  %v6799_v7 = vld [vmem:[#allocation2 + $0x113] sm:$0xff] }
 0x9c2   : > { %6964 = vst.msk [vmem:[#allocation3 + $0x88] sm:$0xff] %vm15759_vm9, %v6874_v26  ;;  %7755 = vrot.lane.b32.xlu1 %v7657_v52, %s9233_s9  ;;  %v7445_v26 = vld [vmem:[#allocation2 + $0x115] sm:$0xff] }
 0x9c3   : > { %7541 = vrot.lane.b32.xlu0 %v7442_v19, %s9232_s6 }
 0x9c4   : > { %v7090_v36 = vpop.permute.xlu1 %7089  ;;  %v7861_v13 = vld [vmem:[#allocation3 + $0x70] sm:$0xff] }
 0x9c5   : > { %v7734_v43 = vpop.permute.xlu0 %7733  ;;  %7180 = vst.msk [vmem:[#allocation3 + $0x88] sm:$0xff] %vm15805_vm3, %v7090_v36  ;;  %9035 = vmatprep.mubr.msk.f32.mxu0 %vm15807_vm5, %v7861_v13  ;;  %vm15810_vm3 = vcmask 523712   ;;  %v7661_v36 = vld [vmem:[#allocation2 + $0x116] sm:$0xff] }
 0x9c6   : > { %7826 = vst.msk [vmem:[#allocation3 + $0x78] sm:$0xff] %vm15806_vm10, %v7734_v43  ;;  %7111 = vrot.lane.b32.xlu1 %v7225_v48, %s9230_s29  ;;  %vm15811_vm10 = vmmov %vm15807_vm5  ;;  %vm15812_vm5 = vcmask 589312   ;;  %v7446_v43 = vld [vmem:[#allocation2 + $0x11d] sm:$0xff] }
 0x9c7   : > { %6897 = vrot.lane.b32.xlu0 %v6796_v16, %s9229_s28 }
 0x9c8   : > { %v7306_v50 = vpop.permute.xlu1 %7305 }
 0x9c9   : > { %v7304_v8 = vpop.permute.xlu0 %7303  ;;  %7396 = vst.msk [vmem:[#allocation3 + $0x88] sm:$0xff] %vm15808_vm7, %v7306_v50  ;;  %vm15813_vm7 = vmmov %vm15810_vm3 }
 0x9ca   : > { %7395 = vst.msk [vmem:[#allocation3 + $0x80] sm:$0xff] %vm15809_vm14, %v7304_v8  ;;  %7113 = vrot.lane.b32.xlu1 %v7226_v41, %s9230_s29  ;;  %vm15814_vm14 = vcmask 392512   ;;  %v6800_v8 = vld [vmem:[#allocation2 + $0x11b] sm:$0xff] }
 0x9cb   : > { %7757 = vrot.lane.b32.xlu0 %v7658_v2, %s9233_s9 }
 0x9cc   : > { %v6876_v14 = vpop.permute.xlu1 %6875 }
 0x9cd   : > { %v7520_v38 = vpop.permute.xlu0 %7519  ;;  %v7862_v49 = vld [vmem:[#allocation3 + $0x78] sm:$0xff]  ;;  %6965 = vst.msk [vmem:[#allocation3 + $0x90] sm:$0xff] %vm15759_vm9, %v6876_v14 }
 0x9ce   : > { %7611 = vst.msk [vmem:[#allocation3 + $0x80] sm:$0xff] %vm15810_vm3, %v7520_v38  ;;  %9036 = vmatmul.mubr.msk.f32.gmra.mrb[32].mxu0 %vm15811_vm10, %v7862_v49  ;;  %7329 = vrot.lane.b32.xlu1 %v7228_v29, %s9231_s30  ;;  %vm15815_vm3 = vmmov %vm15814_vm14  ;;  %v7662_v38 = vld [vmem:[#allocation2 + $0x11e] sm:$0xff] }
 0x9cf   : > { %7327 = vrot.lane.b32.xlu0 %v7227_v59, %s9231_s30  ;;  %vm15816_vm10 = vmmov %vm15812_vm5 }
 0x9d0   : > { %v7736_v54 = vpop.permute.xlu1 %7735 }
 0x9d1   : > { %v7522_v61 = vpop.permute.xlu0 %7521  ;;  %7827 = vst.msk [vmem:[#allocation3 + $0x80] sm:$0xff] %vm15812_vm5, %v7736_v54  ;;  %vm15817_vm5 = vcmask 588800   ;;  %v7232_v54 = vld [vmem:[#allocation2 + $0x12c] sm:$0xff] }
 0x9d2   : > { %7612 = vst.msk [vmem:[#allocation3 + $0x88] sm:$0xff] %vm15813_vm7, %v7522_v61  ;;  %6899 = vrot.lane.b32.xlu1 %v6797_v24, %s9229_s28  ;;  %vm15818_vm7 = vcmask 458112   ;;  %v7231_v61 = vld [vmem:[#allocation2 + $0x124] sm:$0xff] }
 0x9d3   : > { %7543 = vrot.lane.b32.xlu0 %v7443_v56, %s9232_s6 }
 0x9d4   : > { %v7092_v53 = vpop.permute.xlu1 %7091 }
 0x9d5   : > { %v6878_v55 = vpop.permute.xlu0 %6877  ;;  %7181 = vst.msk [vmem:[#allocation3 + $0x90] sm:$0xff] %vm15814_vm14, %v7092_v53  ;;  %vm15819_vm14 = vmmov %vm15818_vm7  ;;  %v6801_v53 = vld [vmem:[#allocation2 + $0x123] sm:$0xff] }
 0x9d6   : > { %6966 = vst.msk [vmem:[#allocation3 + $0x98] sm:$0xff] %vm15759_vm9, %v6878_v55  ;;  %7759 = vrot.lane.b32.xlu1 %v7659_v5, %s9233_s9  ;;  %v7447_v55 = vld [vmem:[#allocation2 + $0x125] sm:$0xff] }
 0x9d7   : > { %7545 = vrot.lane.b32.xlu0 %v7444_v42, %s9232_s6 }
 0x9d8   : > { %v7094_v44 = vpop.permute.xlu1 %7093  ;;  %v7863_v35 = vld [vmem:[#allocation3 + $0x80] sm:$0xff] }
 0x9d9   : > { %v7738_v39 = vpop.permute.xlu0 %7737  ;;  %7182 = vst.msk [vmem:[#allocation3 + $0x98] sm:$0xff] %vm15815_vm3, %v7094_v44  ;;  %9038 = vmatprep.mubr.msk.f32.mxu0 %vm15817_vm5, %v7863_v35  ;;  %vm15820_vm3 = vcmask 523712   ;;  %v7663_v44 = vld [vmem:[#allocation2 + $0x126] sm:$0xff] }
 0x9da   : > { %7828 = vst.msk [vmem:[#allocation3 + $0x88] sm:$0xff] %vm15816_vm10, %v7738_v39  ;;  %7115 = vrot.lane.b32.xlu1 %v7227_v59, %s9230_s29  ;;  %vm15821_vm10 = vmmov %vm15817_vm5  ;;  %vm15822_vm5 = vcmask 589312   ;;  %v7448_v39 = vld [vmem:[#allocation2 + $0x12d] sm:$0xff] }
 0x9db   : > { %6901 = vrot.lane.b32.xlu0 %v6798_v37, %s9229_s28 }
 0x9dc   : > { %v7310_v6 = vpop.permute.xlu1 %7309 }
 0x9dd   : > { %v7308_v57 = vpop.permute.xlu0 %7307  ;;  %7398 = vst.msk [vmem:[#allocation3 + $0x98] sm:$0xff] %vm15818_vm7, %v7310_v6  ;;  %vm15823_vm7 = vmmov %vm15820_vm3 }
 0x9de   : > { %7397 = vst.msk [vmem:[#allocation3 + $0x90] sm:$0xff] %vm15819_vm14, %v7308_v57  ;;  %7117 = vrot.lane.b32.xlu1 %v7228_v29, %s9230_s29  ;;  %vm15824_vm14 = vcmask 392512   ;;  %v6802_v57 = vld [vmem:[#allocation2 + $0x12b] sm:$0xff] }
 0x9df   : > { %7761 = vrot.lane.b32.xlu0 %v7660_v33, %s9233_s9 }
 0x9e0   : > { %v6880_v17 = vpop.permute.xlu1 %6879 }
 0x9e1   : > { %v7524_v41 = vpop.permute.xlu0 %7523  ;;  %v7864_v48 = vld [vmem:[#allocation3 + $0x88] sm:$0xff]  ;;  %6967 = vst.msk [vmem:[#allocation3 + $0xa0] sm:$0xff] %vm15759_vm9, %v6880_v17 }
 0x9e2   : > { %7613 = vst.msk [vmem:[#allocation3 + $0x90] sm:$0xff] %vm15820_vm3, %v7524_v41  ;;  %9039 = vmatmul.mubr.msk.f32.gmra.mrb[34].mxu0 %vm15821_vm10, %v7864_v48  ;;  %7333 = vrot.lane.b32.xlu1 %v7230_v46, %s9231_s30  ;;  %vm15825_vm3 = vmmov %vm15824_vm14  ;;  %v7664_v41 = vld [vmem:[#allocation2 + $0x12e] sm:$0xff] }
 0x9e3   : > { %7331 = vrot.lane.b32.xlu0 %v7229_v3, %s9231_s30  ;;  %vm15826_vm10 = vmmov %vm15822_vm5  ;;  %v7233_v48 = vld [vmem:[#allocation2 + $0x134] sm:$0xff] }
 0x9e4   : > { %v7740_v47 = vpop.permute.xlu1 %7739 }
 0x9e5   : > { %v7526_v51 = vpop.permute.xlu0 %7525  ;;  %7829 = vst.msk [vmem:[#allocation3 + $0x90] sm:$0xff] %vm15822_vm5, %v7740_v47  ;;  %vm15827_vm5 = vcmask 588800  }
 0x9e6   : > { %7614 = vst.msk [vmem:[#allocation3 + $0x98] sm:$0xff] %vm15823_vm7, %v7526_v51  ;;  %6903 = vrot.lane.b32.xlu1 %v6799_v7, %s9229_s28  ;;  %vm15828_vm7 = vcmask 458112   ;;  %v7449_v7 = vld [vmem:[#allocation2 + $0x135] sm:$0xff] }
 0x9e7   : > { %7547 = vrot.lane.b32.xlu0 %v7445_v26, %s9232_s6  ;;  %v7450_v26 = vld [vmem:[#allocation2 + $0x13d] sm:$0xff] }
 0x9e8   : > { %v7096_v52 = vpop.permute.xlu1 %7095 }
 0x9e9   : > { %v6882_v19 = vpop.permute.xlu0 %6881  ;;  %7183 = vst.msk [vmem:[#allocation3 + $0xa0] sm:$0xff] %vm15824_vm14, %v7096_v52  ;;  %vm15829_vm14 = vmmov %vm15828_vm7 }
 0x9ea   : > { %6968 = vst.msk [vmem:[#allocation3 + $0xa8] sm:$0xff] %vm15759_vm9, %v6882_v19  ;;  %7763 = vrot.lane.b32.xlu1 %v7661_v36, %s9233_s9  ;;  %v7665_v36 = vld [vmem:[#allocation2 + $0x136] sm:$0xff] }
 0x9eb   : > { %7549 = vrot.lane.b32.xlu0 %v7446_v43, %s9232_s6  ;;  %v7666_v43 = vld [vmem:[#allocation2 + $0x13e] sm:$0xff] }
 0x9ec   : > { %v7098_v13 = vpop.permute.xlu1 %7097  ;;  %v7865_v50 = vld [vmem:[#allocation3 + $0x90] sm:$0xff] }
 0x9ed   : > { %v7742_v16 = vpop.permute.xlu0 %7741  ;;  %7184 = vst.msk [vmem:[#allocation3 + $0xa8] sm:$0xff] %vm15825_vm3, %v7098_v13  ;;  %9041 = vmatprep.mubr.msk.f32.mxu0 %vm15827_vm5, %v7865_v50  ;;  %vm15830_vm3 = vcmask 523712  }
 0x9ee   : > { %7830 = vst.msk [vmem:[#allocation3 + $0x98] sm:$0xff] %vm15826_vm10, %v7742_v16  ;;  %7119 = vrot.lane.b32.xlu1 %v7229_v3, %s9230_s29  ;;  %vm15831_vm10 = vmmov %vm15827_vm5  ;;  %vm15832_vm5 = vcmask 589312  }
 0x9ef   : > { %6905 = vrot.lane.b32.xlu0 %v6800_v8, %s9229_s28 }
 0x9f0   : > { %v7314_v2 = vpop.permute.xlu1 %7313 }
 0x9f1   : > { %v7312_v14 = vpop.permute.xlu0 %7311  ;;  %7400 = vst.msk [vmem:[#allocation3 + $0xa8] sm:$0xff] %vm15828_vm7, %v7314_v2  ;;  %vm15833_vm7 = vmmov %vm15830_vm3 }
 0x9f2   : > { %7399 = vst.msk [vmem:[#allocation3 + $0xa0] sm:$0xff] %vm15829_vm14, %v7312_v14  ;;  %7121 = vrot.lane.b32.xlu1 %v7230_v46, %s9230_s29  ;;  %vm15834_vm14 = vcmask 392512   ;;  %v7234_v46 = vld [vmem:[#allocation2 + $0x13c] sm:$0xff] }
 0x9f3   : > { %7765 = vrot.lane.b32.xlu0 %v7662_v38, %s9233_s9 }
 0x9f4   : > { %v6884_v49 = vpop.permute.xlu1 %6883 }
 0x9f5   : > { %v7528_v29 = vpop.permute.xlu0 %7527  ;;  %v7866_v59 = vld [vmem:[#allocation3 + $0x98] sm:$0xff]  ;;  %6969 = vst.msk [vmem:[#allocation3 + $0xb0] sm:$0xff] %vm15759_vm9, %v6884_v49 }
 0x9f6   : > { %7615 = vst.msk [vmem:[#allocation3 + $0xa0] sm:$0xff] %vm15830_vm3, %v7528_v29  ;;  %9042 = vmatmul.mubr.msk.f32.gmra.mrb[36].mxu0 %vm15831_vm10, %v7866_v59  ;;  %7337 = vrot.lane.b32.xlu1 %v7232_v54, %s9231_s30  ;;  %vm15835_vm3 = vmmov %vm15834_vm14  ;;  %v14132_v49 = vld [vmem:[%s14646_s4] ss:$0 sm:$0xff] }
 0x9f7   : > { %7335 = vrot.lane.b32.xlu0 %v7231_v61, %s9231_s30  ;;  %vm15836_vm10 = vmmov %vm15832_vm5 }
 0x9f8   : > { %v7744_v24 = vpop.permute.xlu1 %7743 }
 0x9f9   : > { %v7530_v56 = vpop.permute.xlu0 %7529  ;;  %7831 = vst.msk [vmem:[#allocation3 + $0xa0] sm:$0xff] %vm15832_vm5, %v7744_v24  ;;  %vm15837_vm5 = vcmask 588800  }
 0x9fa   : > { %7616 = vst.msk [vmem:[#allocation3 + $0xa8] sm:$0xff] %vm15833_vm7, %v7530_v56  ;;  %6907 = vrot.lane.b32.xlu1 %v6801_v53, %s9229_s28  ;;  %vm15838_vm7 = vcmask 458112  }
 0x9fb   : > { %7551 = vrot.lane.b32.xlu0 %v7447_v55, %s9232_s6 }
 0x9fc   : > { %v7100_v5 = vpop.permute.xlu1 %7099 }
 0x9fd   : > { %v6886_v42 = vpop.permute.xlu0 %6885  ;;  %7185 = vst.msk [vmem:[#allocation3 + $0xb0] sm:$0xff] %vm15834_vm14, %v7100_v5  ;;  %vm15839_vm14 = vmmov %vm15838_vm7 }
 0x9fe   : > { %6970 = vst.msk [vmem:[#allocation3 + $0xb8] sm:$0xff] %vm15759_vm9, %v6886_v42  ;;  %7767 = vrot.lane.b32.xlu1 %v7663_v44, %s9233_s9 }
 0x9ff   : > { %7553 = vrot.lane.b32.xlu0 %v7448_v39, %s9232_s6 }
 0xa00   : > { %v7102_v35 = vpop.permute.xlu1 %7101  ;;  %v7867_v6 = vld [vmem:[#allocation3 + $0xa0] sm:$0xff] }
 0xa01   : > { %v7746_v37 = vpop.permute.xlu0 %7745  ;;  %7186 = vst.msk [vmem:[#allocation3 + $0xb8] sm:$0xff] %vm15835_vm3, %v7102_v35  ;;  %9044 = vmatprep.mubr.msk.f32.mxu0 %vm15837_vm5, %v7867_v6  ;;  %vm15840_vm3 = vcmask 523712  }
 0xa02   : > { %7832 = vst.msk [vmem:[#allocation3 + $0xa8] sm:$0xff] %vm15836_vm10, %v7746_v37  ;;  %7123 = vrot.lane.b32.xlu1 %v7231_v61, %s9230_s29  ;;  %vm15841_vm10 = vmmov %vm15837_vm5  ;;  %vm15842_vm5 = vcmask 589312  }
 0xa03   : > { %6909 = vrot.lane.b32.xlu0 %v6802_v57, %s9229_s28 }
 0xa04   : > { %v7318_v33 = vpop.permute.xlu1 %7317 }
 0xa05   : > { %v7316_v17 = vpop.permute.xlu0 %7315  ;;  %7402 = vst.msk [vmem:[#allocation3 + $0xb8] sm:$0xff] %vm15838_vm7, %v7318_v33  ;;  %vm15843_vm7 = vmmov %vm15840_vm3 }
 0xa06   : > { %7401 = vst.msk [vmem:[#allocation3 + $0xb0] sm:$0xff] %vm15839_vm14, %v7316_v17  ;;  %7125 = vrot.lane.b32.xlu1 %v7232_v54, %s9230_s29  ;;  %vm15844_vm14 = vcmask 392512  }
 0xa07   : > { %7769 = vrot.lane.b32.xlu0 %v7664_v41, %s9233_s9 }
 0xa08   : > { %v6888_v3 = vpop.permute.xlu1 %6887 }
 0xa09   : > { %v7532_v47 = vpop.permute.xlu0 %7531  ;;  %v7868_v51 = vld [vmem:[#allocation3 + $0xa8] sm:$0xff]  ;;  %6971 = vst.msk [vmem:[#allocation3 + $0xc0] sm:$0xff] %vm15759_vm9, %v6888_v3 }
 0xa0a   : > { %7617 = vst.msk [vmem:[#allocation3 + $0xb0] sm:$0xff] %vm15840_vm3, %v7532_v47  ;;  %9045 = vmatmul.mubr.msk.f32.gmra.mrb[38].mxu0 %vm15841_vm10, %v7868_v51  ;;  %7341 = vrot.lane.b32.xlu1 %v7234_v46, %s9231_s30  ;;  %vm15845_vm3 = vmmov %vm15844_vm14 }
 0xa0b   : > { %7339 = vrot.lane.b32.xlu0 %v7233_v48, %s9231_s30  ;;  %vm15846_vm10 = vmmov %vm15842_vm5  ;;  %s9126_s30 = smul.u32 288, %s15977_s19 }
 0xa0c   : > { %v7748_v52 = vpop.permute.xlu1 %7747 }
 0xa0d   : > { %v7534_v19 = vpop.permute.xlu0 %7533  ;;  %7833 = vst.msk [vmem:[#allocation3 + $0xb0] sm:$0xff] %vm15842_vm5, %v7748_v52  ;;  %vm15847_vm5 = vcmask 588800   ;;  %s14303_s26 = scalar_lea.vmem %s14647_s5, %s9126_s30 }
 0xa0e   : > { %7618 = vst.msk [vmem:[#allocation3 + $0xb8] sm:$0xff] %vm15843_vm7, %v7534_v19  ;;  %7557 = vrot.lane.b32.xlu1 %v7450_v26, %s9232_s6  ;;  %vm15848_vm7 = vcmask 458112  }
 0xa0f   : > { %7555 = vrot.lane.b32.xlu0 %v7449_v7, %s9232_s6 }
 0xa10   : > { %v7104_v13 = vpop.permute.xlu1 %7103 }
 0xa11   : > { %v6890_v16 = vpop.permute.xlu0 %6889  ;;  %7187 = vst.msk [vmem:[#allocation3 + $0xc0] sm:$0xff] %vm15844_vm14, %v7104_v13  ;;  %vm15849_vm14 = vmmov %vm15848_vm7 }
 0xa12   : > { %6972 = vst.msk [vmem:[#allocation3 + $0xc8] sm:$0xff] %vm15759_vm9, %v6890_v16  ;;  %7773 = vrot.lane.b32.xlu1 %v7666_v43, %s9233_s9 }
 0xa13   : > { %7771 = vrot.lane.b32.xlu0 %v7665_v36, %s9233_s9 }
 0xa14   : > { %v7106_v50 = vpop.permute.xlu1 %7105  ;;  %v7869_v2 = vld [vmem:[#allocation3 + $0xb0] sm:$0xff] }
 0xa15   : > { %v7750_v8 = vpop.permute.xlu0 %7749  ;;  %7188 = vst.msk [vmem:[#allocation3 + $0xc8] sm:$0xff] %vm15845_vm3, %v7106_v50  ;;  %9047 = vmatprep.mubr.msk.f32.mxu0 %vm15847_vm5, %v7869_v2  ;;  %vm15850_vm3 = vmmov %vm15847_vm5  ;;  %vm15852_vm5 = vcmask 589312  }
 0xa16   : > { %7834 = vst.msk [vmem:[#allocation3 + $0xb8] sm:$0xff] %vm15846_vm10, %v7750_v8  ;;  %vm15851_vm10 = vcmask 523712  }
 0xa18   : > { %v7322_v14 = vpop.permute.xlu1 %7321 }
 0xa19   : > { %v7320_v38 = vpop.permute.xlu0 %7319  ;;  %7404 = vst.msk [vmem:[#allocation3 + $0xc8] sm:$0xff] %vm15848_vm7, %v7322_v14  ;;  %vm15853_vm7 = vmmov %vm15851_vm10 }
 0xa1a   : > { %7403 = vst.msk [vmem:[#allocation3 + $0xc0] sm:$0xff] %vm15849_vm14, %v7320_v38  ;;  %vm15854_vm14 = vcmask 392512  }
 0xa1c   : > { %v6892_v29 = vpop.permute.xlu1 %6891 }
 0xa1d   : > { %v9016_v59 = vpop.f32.mrb[18].mxu0  ;;  %v7870_v54 = vld [vmem:[#allocation3 + $0xb8] sm:$0xff]  ;;  %6973 = vst.msk [vmem:[#allocation3 + $0xd0] sm:$0xff] %vm15759_vm9, %v6892_v29  ;;  %v7536_v24 = vpop.permute.xlu0 %7535 }
 0xa1e   : > { %v14136_v61 = vadd.f32 %v9016_v59, %v14132_v49  ;;  %v8073_v56 = vpop.f32.mrb[19].mxu0  ;;  %9048 = vmatmul.mubr.msk.f32.gmra.mrb[40].mxu0 %vm15850_vm3, %v7870_v54  ;;  %7619 = vst.msk [vmem:[#allocation3 + $0xc0] sm:$0xff] %vm15851_vm10, %v7536_v24  ;;  %vm15855_vm3 = vmmov %vm15854_vm14  ;;  %vm15856_vm10 = vcmask 588800  }
 0xa1f   : > { %v14141_v53 = vadd.f32 %v14132_v49, %v8073_v56 }
 0xa20   : > { %v8253_v55 = vmax.f32 %v14136_v61, 0.0  ;;  %v7752_v42 = vpop.permute.xlu1 %7751 }
 0xa21   : > { %v8252_v5 = vmax.f32 %v14141_v53, 0.0  ;;  %7835 = vst.msk [vmem:[#allocation3 + $0xc0] sm:$0xff] %vm15852_vm5, %v7752_v42  ;;  %v7538_v44 = vpop.permute.xlu0 %7537 }
 0xa22   : > { %8326 = vrot.lane.b32.xlu1 %v8253_v55, %s9234_s12  ;;  %7620 = vst.msk [vmem:[#allocation3 + $0xc8] sm:$0xff] %vm15853_vm7, %v7538_v44  ;;  %vm15857_vm7 = vcmask 458112  }
 0xa23   : > { %8324 = vrot.lane.b32.xlu0 %v8252_v5, %s9234_s12 }
 0xa24   : > { %v7108_v39 = vpop.permute.xlu1 %7107 }
 0xa25   : > { %7189 = vst.msk [vmem:[#allocation3 + $0xd0] sm:$0xff] %vm15854_vm14, %v7108_v39  ;;  %v6894_v35 = vpop.permute.xlu0 %6893  ;;  %vm15858_vm14 = vmmov %vm15857_vm7 }
 0xa26   : > { %6974 = vst.msk [vmem:[#allocation3 + $0xd8] sm:$0xff] %vm15759_vm9, %v6894_v35 }
 0xa28   : > { %v7110_v37 = vpop.permute.xlu1 %7109  ;;  %v7871_v6 = vld [vmem:[#allocation3 + $0xc0] sm:$0xff] }
 0xa29   : > { %7190 = vst.msk [vmem:[#allocation3 + $0xd8] sm:$0xff] %vm15855_vm3, %v7110_v37  ;;  %v7754_v57 = vpop.permute.xlu0 %7753  ;;  %9050 = vmatprep.mubr.msk.f32.mxu0 %vm15856_vm10, %v7871_v6  ;;  %vm15859_vm3 = vcmask 523712  }
 0xa2a   : > { %7836 = vst.msk [vmem:[#allocation3 + $0xc8] sm:$0xff] %vm15852_vm5, %v7754_v57 }
 0xa2c   : > { %v7326_v33 = vpop.permute.xlu1 %7325 }
 0xa2d   : > { %v9019_v17 = vpop.f32.mrb[20].mxu0  ;;  %7406 = vst.msk [vmem:[#allocation3 + $0xd8] sm:$0xff] %vm15857_vm7, %v7326_v33  ;;  %v7324_v48 = vpop.permute.xlu0 %7323  ;;  %vm15860_vm7 = vmmov %vm15859_vm3 }
 0xa2e   : > { %v14160_v41 = vadd.f32 %v9019_v17, %v14132_v49  ;;  %v8083_v46 = vpop.f32.mrb[21].mxu0  ;;  %7405 = vst.msk [vmem:[#allocation3 + $0xd0] sm:$0xff] %vm15858_vm14, %v7324_v48  ;;  %vm15861_vm14 = vcmask 392512  }
 0xa2f   : > { %v14164_v3 = vadd.f32 %v14132_v49, %v8083_v46 }
 0xa30   : > { %v8255_v47 = vmax.f32 %v14160_v41, 0.0  ;;  %v6896_v7 = vpop.permute.xlu1 %6895 }
 0xa31   : > { %v8254_v51 = vmax.f32 %v14164_v3, 0.0  ;;  %6975 = vst.msk [vmem:[#allocation3 + $0xe0] sm:$0xff] %vm15759_vm9, %v6896_v7  ;;  %v7540_v26 = vpop.permute.xlu0 %7539  ;;  %v7872_v52 = vld [vmem:[#allocation3 + $0xc8] sm:$0xff] }
 0xa32   : > { %8330 = vrot.lane.b32.xlu1 %v8255_v47, %s9234_s12  ;;  %7621 = vst.msk [vmem:[#allocation3 + $0xd0] sm:$0xff] %vm15859_vm3, %v7540_v26  ;;  %9051 = vmatmul.mubr.msk.f32.gmra.mrb[42].mxu0 %vm15856_vm10, %v7872_v52  ;;  %vm15862_vm3 = vmmov %vm15861_vm14 }
 0xa33   : > { %8328 = vrot.lane.b32.xlu0 %v8254_v51, %s9234_s12 }
 0xa34   : > { %v7756_v19 = vpop.permute.xlu1 %7755 }
 0xa35   : > { %7837 = vst.msk [vmem:[#allocation3 + $0xd0] sm:$0xff] %vm15852_vm5, %v7756_v19  ;;  %v7542_v36 = vpop.permute.xlu0 %7541 }
 0xa36   : > { %7622 = vst.msk [vmem:[#allocation3 + $0xd8] sm:$0xff] %vm15860_vm7, %v7542_v36  ;;  %vm15863_vm7 = vcmask 458112  }
 0xa38   : > { %v7112_v43 = vpop.permute.xlu1 %7111 }
 0xa39   : > { %7191 = vst.msk [vmem:[#allocation3 + $0xe0] sm:$0xff] %vm15861_vm14, %v7112_v43  ;;  %v6898_v13 = vpop.permute.xlu0 %6897  ;;  %vm15864_vm14 = vmmov %vm15863_vm7 }
 0xa3a   : > { %6976 = vst.msk [vmem:[#allocation3 + $0xe8] sm:$0xff] %vm15759_vm9, %v6898_v13 }
 0xa3c   : > { %v7114_v16 = vpop.permute.xlu1 %7113  ;;  %v7873_v8 = vld [vmem:[#allocation3 + $0xd0] sm:$0xff] }
 0xa3d   : > { %v9022_v50 = vpop.f32.mrb[22].mxu0  ;;  %7192 = vst.msk [vmem:[#allocation3 + $0xe8] sm:$0xff] %vm15862_vm3, %v7114_v16  ;;  %v7758_v14 = vpop.permute.xlu0 %7757  ;;  %9053 = vmatprep.mubr.msk.f32.mxu0 %vm15856_vm10, %v7873_v8  ;;  %vm15865_vm3 = vcmask 523712  }
 0xa3e   : > { %v14183_v2 = vadd.f32 %v9022_v50, %v14132_v49  ;;  %v8093_v38 = vpop.f32.mrb[23].mxu0  ;;  %7838 = vst.msk [vmem:[#allocation3 + $0xd8] sm:$0xff] %vm15852_vm5, %v7758_v14 }
 0xa3f   : > { %v14188_v29 = vadd.f32 %v14132_v49, %v8093_v38 }
 0xa40   : > { %v8257_v59 = vmax.f32 %v14183_v2, 0.0  ;;  %v7330_v24 = vpop.permute.xlu1 %7329 }
 0xa41   : > { %v8256_v54 = vmax.f32 %v14188_v29, 0.0  ;;  %7408 = vst.msk [vmem:[#allocation3 + $0xe8] sm:$0xff] %vm15863_vm7, %v7330_v24  ;;  %v7328_v56 = vpop.permute.xlu0 %7327  ;;  %vm15866_vm7 = vmmov %vm15865_vm3 }
 0xa42   : > { %8334 = vrot.lane.b32.xlu1 %v8257_v59, %s9234_s12  ;;  %7407 = vst.msk [vmem:[#allocation3 + $0xe0] sm:$0xff] %vm15864_vm14, %v7328_v56  ;;  %vm15867_vm14 = vcmask 392512  }
 0xa43   : > { %8332 = vrot.lane.b32.xlu0 %v8256_v54, %s9234_s12 }
 0xa44   : > { %v6900_v42 = vpop.permute.xlu1 %6899 }
 0xa45   : > { %6977 = vst.msk [vmem:[#allocation3 + $0xf0] sm:$0xff] %vm15759_vm9, %v6900_v42  ;;  %v7544_v44 = vpop.permute.xlu0 %7543  ;;  %v7874_v39 = vld [vmem:[#allocation3 + $0xd8] sm:$0xff]  ;;  %vm15869_vm9 = vmmov %vm15867_vm14 }
 0xa46   : > { %7623 = vst.msk [vmem:[#allocation3 + $0xe0] sm:$0xff] %vm15865_vm3, %v7544_v44  ;;  %9054 = vmatmul.mubr.msk.f32.gmra.mrb[44].mxu0 %vm15856_vm10, %v7874_v39  ;;  %vm15870_vm3 = vmmov %vm15856_vm10 }
 0xa47   : > { %vm15871_vm10 = vmmov %vm15852_vm5 }
 0xa48   : > { %v7760_v35 = vpop.permute.xlu1 %7759 }
 0xa49   : > { %7839 = vst.msk [vmem:[#allocation3 + $0xe0] sm:$0xff] %vm15852_vm5, %v7760_v35  ;;  %v7546_v37 = vpop.permute.xlu0 %7545 }
 0xa4a   : > { %7624 = vst.msk [vmem:[#allocation3 + $0xe8] sm:$0xff] %vm15866_vm7, %v7546_v37  ;;  %vm15874_vm7 = vcmask 326912  }
 0xa4c   : > { %v7116_v6 = vpop.permute.xlu1 %7115 }
 0xa4d   : > { %7193 = vst.msk [vmem:[#allocation3 + $0xf0] sm:$0xff] %vm15867_vm14, %v7116_v6  ;;  %v6902_v57 = vpop.permute.xlu0 %6901  ;;  %vm15875_vm14 = vcmask 523712  }
 0xa4e   : > { %6978 = vst.msk [vmem:[#allocation3 + $0xf8] sm:$0xff] %vm15868_vm8, %v6902_v57  ;;  %vm15872_vm8 = vcmask 458112  }
 0xa4f   : > { %vm15873_vm5 = vmmov %vm15872_vm8 }
 0xa50   : > { %v7118_v33 = vpop.permute.xlu1 %7117  ;;  %v7875_v48 = vld [vmem:[#allocation3 + $0xe0] sm:$0xff] }
 0xa51   : > { %v9025_v17 = vpop.f32.mrb[24].mxu0  ;;  %7194 = vst.msk [vmem:[#allocation3 + $0xf8] sm:$0xff] %vm15869_vm9, %v7118_v33  ;;  %v7762_v7 = vpop.permute.xlu0 %7761  ;;  %9056 = vmatprep.mubr.msk.f32.mxu0 %vm15870_vm3, %v7875_v48  ;;  %vm15876_vm9 = vmmov %vm15870_vm3 }
 0xa52   : > { %v14209_v46 = vadd.f32 %v9025_v17, %v14132_v49  ;;  %v8103_v26 = vpop.f32.mrb[25].mxu0  ;;  %7840 = vst.msk [vmem:[#allocation3 + $0xe8] sm:$0xff] %vm15871_vm10, %v7762_v7  ;;  %vm15877_vm3 = vmmov %vm15871_vm10 }
 0xa53   : > { %v14214_v52 = vadd.f32 %v14132_v49, %v8103_v26  ;;  %vm15878_vm10 = vmmov %vm15875_vm14 }
 0xa54   : > { %v8259_v19 = vmax.f32 %v14209_v46, 0.0  ;;  %v7334_v43 = vpop.permute.xlu1 %7333 }
 0xa55   : > { %v8258_v36 = vmax.f32 %v14214_v52, 0.0  ;;  %7410 = vst.msk [vmem:[#allocation3 + $0xf8] sm:$0xff] %vm15872_vm8, %v7334_v43  ;;  %v7332_v13 = vpop.permute.xlu0 %7331  ;;  %vm15879_vm8 = vcmask 392512  }
 0xa56   : > { %8338 = vrot.lane.b32.xlu1 %v8259_v19, %s9234_s12  ;;  %7409 = vst.msk [vmem:[#allocation3 + $0xf0] sm:$0xff] %vm15873_vm5, %v7332_v13  ;;  %vm15880_vm5 = vmmov %vm15874_vm7 }
 0xa57   : > { %8336 = vrot.lane.b32.xlu0 %v8258_v36, %s9234_s12 }
 0xa58   : > { %v6904_v16 = vpop.permute.xlu1 %6903 }
 0xa59   : > { %6979 = vst.msk [vmem:[#allocation3 + $0x100] sm:$0xff] %vm15874_vm7, %v6904_v16  ;;  %v7548_v50 = vpop.permute.xlu0 %7547  ;;  %v7876_v8 = vld [vmem:[#allocation3 + $0xe8] sm:$0xff]  ;;  %vm15881_vm7 = vmmov %vm15879_vm8 }
 0xa5a   : > { %7625 = vst.msk [vmem:[#allocation3 + $0xf0] sm:$0xff] %vm15875_vm14, %v7548_v50  ;;  %9057 = vmatmul.mubr.msk.f32.gmra.mrb[46].mxu0 %vm15876_vm9, %v7876_v8  ;;  %vm15882_vm14 = vmmov %vm15876_vm9 }
 0xa5b   : > { %vm15883_vm9 = vmmov %vm15877_vm3 }
 0xa5c   : > { %v7764_v14 = vpop.permute.xlu1 %7763 }
 0xa5d   : > { %7841 = vst.msk [vmem:[#allocation3 + $0xf0] sm:$0xff] %vm15877_vm3, %v7764_v14  ;;  %v7550_v38 = vpop.permute.xlu0 %7549  ;;  %vm15884_vm3 = vcmask 458112  }
 0xa5e   : > { %7626 = vst.msk [vmem:[#allocation3 + $0xf8] sm:$0xff] %vm15878_vm10, %v7550_v38  ;;  %vm15885_vm10 = vmmov %vm15884_vm3 }
 0xa60   : > { %v7120_v24 = vpop.permute.xlu1 %7119 }
 0xa61   : > { %7195 = vst.msk [vmem:[#allocation3 + $0x100] sm:$0xff] %vm15879_vm8, %v7120_v24  ;;  %v6906_v56 = vpop.permute.xlu0 %6905  ;;  %vm15886_vm8 = vmmov %vm15880_vm5 }
 0xa62   : > { %6980 = vst.msk [vmem:[#allocation3 + $0x108] sm:$0xff] %vm15880_vm5, %v6906_v56  ;;  %vm15887_vm5 = vcmask 523712  }
 0xa64   : > { %v7122_v42 = vpop.permute.xlu1 %7121  ;;  %v7877_v39 = vld [vmem:[#allocation3 + $0xf0] sm:$0xff] }
 0xa65   : > { %v9028_v44 = vpop.f32.mrb[26].mxu0  ;;  %7196 = vst.msk [vmem:[#allocation3 + $0x108] sm:$0xff] %vm15881_vm7, %v7122_v42  ;;  %v7766_v37 = vpop.permute.xlu0 %7765  ;;  %9059 = vmatprep.mubr.msk.f32.mxu0 %vm15882_vm14, %v7877_v39  ;;  %vm15888_vm7 = vmmov %vm15882_vm14 }
 0xa66   : > { %v14235_v35 = vadd.f32 %v9028_v44, %v14132_v49  ;;  %v8113_v6 = vpop.f32.mrb[27].mxu0  ;;  %7842 = vst.msk [vmem:[#allocation3 + $0xf8] sm:$0xff] %vm15883_vm9, %v7766_v37  ;;  %vm15889_vm14 = vmmov %vm15883_vm9 }
 0xa67   : > { %v14240_v57 = vadd.f32 %v14132_v49, %v8113_v6  ;;  %vm15890_vm9 = vmmov %vm15887_vm5 }
 0xa68   : > { %v8261_v33 = vmax.f32 %v14235_v35, 0.0  ;;  %v7338_v48 = vpop.permute.xlu1 %7337 }
 0xa69   : > { %v8260_v17 = vmax.f32 %v14240_v57, 0.0  ;;  %7412 = vst.msk [vmem:[#allocation3 + $0x108] sm:$0xff] %vm15884_vm3, %v7338_v48  ;;  %v7336_v7 = vpop.permute.xlu0 %7335  ;;  %vm15891_vm3 = vcmask 392512  }
 0xa6a   : > { %8342 = vrot.lane.b32.xlu1 %v8261_v33, %s9234_s12  ;;  %7411 = vst.msk [vmem:[#allocation3 + $0x100] sm:$0xff] %vm15885_vm10, %v7336_v7  ;;  %vm15892_vm10 = vmmov %vm15886_vm8 }
 0xa6b   : > { %8340 = vrot.lane.b32.xlu0 %v8260_v17, %s9234_s12 }
 0xa6c   : > { %v6908_v26 = vpop.permute.xlu1 %6907 }
 0xa6d   : > { %6981 = vst.msk [vmem:[#allocation3 + $0x110] sm:$0xff] %vm15886_vm8, %v6908_v26  ;;  %v7552_v43 = vpop.permute.xlu0 %7551  ;;  %v7878_v13 = vld [vmem:[#allocation3 + $0xf8] sm:$0xff]  ;;  %vm15893_vm8 = vmmov %vm15891_vm3 }
 0xa6e   : > { %7627 = vst.msk [vmem:[#allocation3 + $0x100] sm:$0xff] %vm15887_vm5, %v7552_v43  ;;  %9060 = vmatmul.mubr.msk.f32.gmra.mrb[48].mxu0 %vm15888_vm7, %v7878_v13  ;;  %vm15894_vm5 = vmmov %vm15888_vm7 }
 0xa6f   : > { %vm15895_vm7 = vmmov %vm15889_vm14 }
 0xa70   : > { %v7768_v16 = vpop.permute.xlu1 %7767 }
 0xa71   : > { %7843 = vst.msk [vmem:[#allocation3 + $0x100] sm:$0xff] %vm15889_vm14, %v7768_v16  ;;  %v7554_v50 = vpop.permute.xlu0 %7553  ;;  %vm15896_vm14 = vcmask 458112  }
 0xa72   : > { %7628 = vst.msk [vmem:[#allocation3 + $0x108] sm:$0xff] %vm15890_vm9, %v7554_v50  ;;  %vm15897_vm9 = vmmov %vm15896_vm14 }
 0xa74   : > { %v7124_v8 = vpop.permute.xlu1 %7123 }
 0xa75   : > { %7197 = vst.msk [vmem:[#allocation3 + $0x110] sm:$0xff] %vm15891_vm3, %v7124_v8  ;;  %v6910_v14 = vpop.permute.xlu0 %6909  ;;  %vm15898_vm3 = vcmask 523712  }
 0xa76   : > { %6982 = vst.msk [vmem:[#allocation3 + $0x118] sm:$0xff] %vm15892_vm10, %v6910_v14  ;;  %vm15899_vm10 = vmmov %vm15898_vm3 }
 0xa78   : > { %v7126_v38 = vpop.permute.xlu1 %7125  ;;  %v7879_v56 = vld [vmem:[#allocation3 + $0x100] sm:$0xff] }
 0xa79   : > { %v9031_v24 = vpop.f32.mrb[28].mxu0  ;;  %7198 = vst.msk [vmem:[#allocation3 + $0x118] sm:$0xff] %vm15893_vm8, %v7126_v38  ;;  %v7770_v44 = vpop.permute.xlu0 %7769  ;;  %9062 = vmatprep.mubr.msk.f32.mxu0 %vm15894_vm5, %v7879_v56  ;;  %vm15900_vm8 = vmmov %vm15894_vm5 }
 0xa7a   : > { %v14261_v42 = vadd.f32 %v9031_v24, %v14132_v49  ;;  %v8123_v39 = vpop.f32.mrb[29].mxu0  ;;  %7844 = vst.msk [vmem:[#allocation3 + $0x108] sm:$0xff] %vm15895_vm7, %v7770_v44  ;;  %vm15901_vm5 = vmmov %vm15895_vm7 }
 0xa7b   : > { %v14266_v37 = vadd.f32 %v14132_v49, %v8123_v39  ;;  %vm15902_vm7 = vmmov %vm15901_vm5 }
 0xa7c   : > { %v8263_v6 = vmax.f32 %v14261_v42, 0.0  ;;  %v7342_v7 = vpop.permute.xlu1 %7341 }
 0xa7d   : > { %v8262_v48 = vmax.f32 %v14266_v37, 0.0  ;;  %v7340_v26 = vpop.permute.xlu0 %7339  ;;  %7414 = vst.msk [vmem:[#allocation3 + $0x118] sm:$0xff] %vm15896_vm14, %v7342_v7  ;;  %vm15903_vm14 = vmmov %vm15900_vm8 }
 0xa7e   : > { %8346 = vrot.lane.b32.xlu1 %v8263_v6, %s9234_s12  ;;  %7413 = vst.msk [vmem:[#allocation3 + $0x110] sm:$0xff] %vm15897_vm9, %v7340_v26  ;;  %vm15904_vm9 = vmmov %vm15900_vm8 }
 0xa7f   : > { %8344 = vrot.lane.b32.xlu0 %v8262_v48, %s9234_s12 }
 0xa80   : > { %v7558_v43 = vpop.permute.xlu1 %7557 }
 0xa81   : > { %v7556_v13 = vpop.permute.xlu0 %7555  ;;  %7630 = vst.msk [vmem:[#allocation3 + $0x118] sm:$0xff] %vm15898_vm3, %v7558_v43  ;;  %v7880_v16 = vld [vmem:[#allocation3 + $0x108] sm:$0xff]  ;;  %vm15905_vm3 = vcmask 64512  }
 0xa82   : > { %7629 = vst.msk [vmem:[#allocation3 + $0x110] sm:$0xff] %vm15899_vm10, %v7556_v13  ;;  %9063 = vmatmul.mubr.msk.f32.gmra.mrb[50].mxu0 %vm15900_vm8, %v7880_v16  ;;  %vm15906_vm10 = vmmov %vm15905_vm3  ;;  %vm15909_vm8 = vnez %v15504_v28 }
 0xa84   : > { %v7774_v50 = vpop.permute.xlu1 %7773 }
 0xa85   : > { %v7772_v8 = vpop.permute.xlu0 %7771  ;;  %7846 = vst.msk [vmem:[#allocation3 + $0x118] sm:$0xff] %vm15901_vm5, %v7774_v50  ;;  %vm15910_vm5 = vmmov %vm15905_vm3 }
 0xa86   : > { %7845 = vst.msk [vmem:[#allocation3 + $0x110] sm:$0xff] %vm15902_vm7, %v7772_v8  ;;  %vm15911_vm7 = vnez %v14930_v1 }
 0xa8c   : > { %v7882_v38 = vld [vmem:[#allocation3 + $0x118] sm:$0xff] }
 0xa8d   : > { %v9034_v14 = vpop.f32.mrb[30].mxu0  ;;  %v7881_v44 = vld [vmem:[#allocation3 + $0x110] sm:$0xff] }
 0xa8e   : > { %v14284_v24 = vadd.f32 %v9034_v14, %v14132_v49  ;;  %v8133_v56 = vpop.f32.mrb[31].mxu0  ;;  %9065 = vmatprep.mubr.msk.f32.mxu0 %vm15903_vm14, %v7881_v44  ;;  %vm15912_vm14 = vmmov %vm15905_vm3 }
 0xa8f   : > { %v14287_v39 = vadd.f32 %v14132_v49, %v8133_v56  ;;  %9066 = vmatmul.mubr.msk.f32.gmra.mrb[52].mxu0 %vm15904_vm9, %v7882_v38  ;;  %vm15913_vm9 = vnez %v14934_v27 }
 0xa90   : > { %v8265_v7 = vmax.f32 %v14284_v24, 0.0 }
 0xa91   : > { %v8264_v26 = vmax.f32 %v14287_v39, 0.0 }
 0xa92   : > { %8350 = vrot.lane.b32.xlu1 %v8265_v7, %s9234_s12 }
 0xa93   : > { %8348 = vrot.lane.b32.xlu0 %v8264_v26, %s9234_s12 }
 0xa94   : > { %v8327_v43 = vpop.permute.xlu1 %8326 }
 0xa95   : > { %v8433_v13 = vadd.f32 %v8327_v43, %v8253_v55  ;;  %v8325_v16 = vpop.permute.xlu0 %8324 }
 0xa96   : > { %v8432_v50 = vadd.f32 %v8325_v16, %v8252_v5 }
 0xa97   : > { %v8469_v8 = vsel %vm15496_vm0, %v8433_v13, 0.0  ;;  %vm15907_vm0 = vnez %v14921_v10 }
 0xa98   : > { %8505 = vst.msk [vmem:[%s14303_s26 + $0x8] sm:$0xff] %vm15905_vm3, %v8469_v8  ;;  %v8468_v14 = vsel %vm15498_vm4, %v8432_v50, 0.0  ;;  %vm15908_vm4 = vmmov %vm15905_vm3 }
 0xa99   : > { %8504 = vst.msk [vmem:[%s14303_s26] sm:$0xff] %vm15906_vm10, %v8468_v14  ;;  %vm15914_vm10 = vnez %v14940_v20 }
 0xaa1   : > { %v9037_v61 = vpop.f32.mrb[32].mxu0 }
 0xaa2   : > { %v14318_v38 = vadd.f32 %v9037_v61, %v14132_v49  ;;  %v8143_v55 = vpop.f32.mrb[33].mxu0 }
 0xaa3   : > { %v14321_v53 = vadd.f32 %v14132_v49, %v8143_v55 }
 0xaa4   : > { %v8267_v30 = vmax.f32 %v14318_v38, 0.0  ;;  %v8331_v5 = vpop.permute.xlu1 %8330 }
 0xaa5   : > { %v8266_v56 = vmax.f32 %v14321_v53, 0.0  ;;  %v8435_v23 = vadd.f32 %v8331_v5, %v8255_v47  ;;  %v8329_v44 = vpop.permute.xlu0 %8328 }
 0xaa6   : > { %v8434_v43 = vadd.f32 %v8329_v44, %v8254_v51  ;;  %8354 = vrot.lane.b32.xlu1 %v8267_v30, %s9234_s12 }
 0xaa7   : > { %v8471_v13 = vsel %vm15907_vm0, %v8435_v23, 0.0  ;;  %8352 = vrot.lane.b32.xlu0 %v8266_v56, %s9234_s12  ;;  %vm15915_vm0 = vmmov %vm15905_vm3 }
 0xaa8   : > { %8507 = vst.msk [vmem:[%s14303_s26 + $0x18] sm:$0xff] %vm15908_vm4, %v8471_v13  ;;  %v8470_v41 = vsel %vm15909_vm8, %v8434_v43, 0.0  ;;  %vm15916_vm4 = vnez %v14945_v40  ;;  %vm15917_vm8 = vmmov %vm15915_vm0 }
 0xaa9   : > { %8506 = vst.msk [vmem:[%s14303_s26 + $0x10] sm:$0xff] %vm15910_vm5, %v8470_v41  ;;  %vm15918_vm5 = vnez %v14962_v11 }
 0xab4   : > { %v8335_v3 = vpop.permute.xlu1 %8334 }
 0xab5   : > { %v8437_v47 = vadd.f32 %v8335_v3, %v8257_v59  ;;  %v9040_v51 = vpop.f32.mrb[34].mxu0  ;;  %v8333_v16 = vpop.permute.xlu0 %8332 }
 0xab6   : > { %v14346_v10 = vadd.f32 %v9040_v51, %v14132_v49  ;;  %v8436_v50 = vadd.f32 %v8333_v16, %v8256_v54  ;;  %v8153_v8 = vpop.f32.mrb[35].mxu0 }
 0xab7   : > { %v8473_v14 = vsel %vm15911_vm7, %v8437_v47, 0.0  ;;  %v14353_v28 = vadd.f32 %v14132_v49, %v8153_v8  ;;  %vm15919_vm7 = vmmov %vm15915_vm0 }
 0xab8   : > { %8509 = vst.msk [vmem:[%s14303_s26 + $0x28] sm:$0xff] %vm15912_vm14, %v8473_v14  ;;  %v8269_v2 = vmax.f32 %v14346_v10, 0.0  ;;  %v8472_v59 = vsel %vm15913_vm9, %v8436_v50, 0.0  ;;  %vm15920_vm14 = vnez %v14971_v31  ;;  %vm15921_vm9 = vmmov %vm15915_vm0 }
 0xab9   : > { %8508 = vst.msk [vmem:[%s14303_s26 + $0x20] sm:$0xff] %vm15905_vm3, %v8472_v59  ;;  %v8268_v29 = vmax.f32 %v14353_v28, 0.0  ;;  %vm15922_vm3 = vnez %v14978_v62 }
 0xaba   : > { %8358 = vrot.lane.b32.xlu1 %v8269_v2, %s9234_s12 }
 0xabb   : > { %8356 = vrot.lane.b32.xlu0 %v8268_v29, %s9234_s12 }
 0xac8   : > { %v8339_v1 = vpop.permute.xlu1 %8338 }
 0xac9   : > { %v8439_v54 = vadd.f32 %v8339_v1, %v8259_v19  ;;  %v9043_v61 = vpop.f32.mrb[36].mxu0  ;;  %v8337_v27 = vpop.permute.xlu0 %8336 }
 0xaca   : > { %v14372_v55 = vadd.f32 %v9043_v61, %v14132_v49  ;;  %v8438_v5 = vadd.f32 %v8337_v27, %v8258_v36  ;;  %v8163_v23 = vpop.f32.mrb[37].mxu0 }
 0xacb   : > { %v8475_v44 = vsel %vm15914_vm10, %v8439_v54, 0.0  ;;  %v14379_v43 = vadd.f32 %v14132_v49, %v8163_v23  ;;  %vm15923_vm10 = vmmov %vm15915_vm0 }
 0xacc   : > { %8511 = vst.msk [vmem:[%s14303_s26 + $0x38] sm:$0xff] %vm15915_vm0, %v8475_v44  ;;  %v8271_v46 = vmax.f32 %v14372_v55, 0.0  ;;  %v8474_v19 = vsel %vm15916_vm4, %v8438_v5, 0.0  ;;  %vm15924_vm0 = vnez %v14982_v32  ;;  %vm15925_vm4 = vmmov %vm15919_vm7 }
 0xacd   : > { %8510 = vst.msk [vmem:[%s14303_s26 + $0x30] sm:$0xff] %vm15917_vm8, %v8474_v19  ;;  %v8270_v52 = vmax.f32 %v14379_v43, 0.0  ;;  %vm15926_vm8 = vmmov %vm15925_vm4 }
 0xace   : > { %8362 = vrot.lane.b32.xlu1 %v8271_v46, %s9234_s12 }
 0xacf   : > { %8360 = vrot.lane.b32.xlu0 %v8270_v52, %s9234_s12 }
 0xadc   : > { %v8343_v20 = vpop.permute.xlu1 %8342 }
 0xadd   : > { %v8441_v36 = vadd.f32 %v8343_v20, %v8261_v33  ;;  %v9046_v13 = vpop.f32.mrb[38].mxu0  ;;  %v8341_v40 = vpop.permute.xlu0 %8340 }
 0xade   : > { %v14398_v41 = vadd.f32 %v9046_v13, %v14132_v49  ;;  %v8440_v3 = vadd.f32 %v8341_v40, %v8260_v17  ;;  %v8173_v47 = vpop.f32.mrb[39].mxu0 }
 0xadf   : > { %v8477_v51 = vsel %vm15918_vm5, %v8441_v36, 0.0  ;;  %v14405_v16 = vadd.f32 %v14132_v49, %v8173_v47  ;;  %vm15927_vm5 = vmmov %vm15925_vm4 }
 0xae0   : > { %8513 = vst.msk [vmem:[%s14303_s26 + $0x48] sm:$0xff] %vm15919_vm7, %v8477_v51  ;;  %v8273_v35 = vmax.f32 %v14398_v41, 0.0  ;;  %v8476_v33 = vsel %vm15920_vm14, %v8440_v3, 0.0  ;;  %vm15932_vm7 = vnez %v15033_v25 }
 0xae1   : > { %8512 = vst.msk [vmem:[%s14303_s26 + $0x40] sm:$0xff] %vm15921_vm9, %v8476_v33  ;;  %v8272_v57 = vmax.f32 %v14405_v16, 0.0  ;;  %vm15934_vm9 = vnez %v15042_v60 }
 0xae2   : > { %8366 = vrot.lane.b32.xlu1 %v8273_v35, %s9234_s12 }
 0xae3   : > { %8364 = vrot.lane.b32.xlu0 %v8272_v57, %s9234_s12 }
 0xaf0   : > { %v8347_v11 = vpop.permute.xlu1 %8346 }
 0xaf1   : > { %v8443_v17 = vadd.f32 %v8347_v11, %v8263_v6  ;;  %v9049_v50 = vpop.f32.mrb[40].mxu0  ;;  %v8345_v31 = vpop.permute.xlu0 %8344 }
 0xaf2   : > { %v14424_v8 = vadd.f32 %v9049_v50, %v14132_v49  ;;  %v8442_v14 = vadd.f32 %v8345_v31, %v8262_v48  ;;  %v8183_v59 = vpop.f32.mrb[41].mxu0 }
 0xaf3   : > { %v8479_v1 = vsel %vm15922_vm3, %v8443_v17, 0.0  ;;  %v14431_v54 = vadd.f32 %v14132_v49, %v8183_v59 }
 0xaf4   : > { %8515 = vst.msk [vmem:[%s14303_s26 + $0x58] sm:$0xff] %vm15923_vm10, %v8479_v1  ;;  %v8275_v42 = vmax.f32 %v14424_v8, 0.0  ;;  %v8478_v6 = vsel %vm15924_vm0, %v8442_v14, 0.0  ;;  %vm15936_vm10 = vnez %v15051_v4 }
 0xaf5   : > { %8514 = vst.msk [vmem:[%s14303_s26 + $0x50] sm:$0xff] %vm15925_vm4, %v8478_v6  ;;  %v8274_v37 = vmax.f32 %v14431_v54, 0.0 }
 0xaf6   : > { %8370 = vrot.lane.b32.xlu1 %v8275_v42, %s9234_s12 }
 0xaf7   : > { %8368 = vrot.lane.b32.xlu0 %v8274_v37, %s9234_s12 }
 0xb04   : > { %v8351_v62 = vpop.permute.xlu1 %8350 }
 0xb05   : > { %v8445_v48 = vadd.f32 %v8351_v62, %v8265_v7  ;;  %v8349_v61 = vpop.permute.xlu0 %8348  ;;  %v9052_v32 = vpop.f32.mrb[42].mxu0 }
 0xb06   : > { %v8444_v27 = vadd.f32 %v8349_v61, %v8264_v26  ;;  %v14454_v23 = vadd.f32 %v9052_v32, %v14132_v49  ;;  %v8193_v44 = vpop.f32.mrb[43].mxu0 }
 0xb07   : > { %v8481_v5 = vsel %vm15536_vm11, %v8445_v48, 0.0  ;;  %v14461_v24 = vadd.f32 %v14132_v49, %v8193_v44  ;;  %vm15929_vm11 = vmmov %vm15925_vm4 }
 0xb08   : > { %8517 = vst.msk [vmem:[%s14303_s26 + $0x68] sm:$0xff] %vm15926_vm8, %v8481_v5  ;;  %v8480_v19 = vsel %vm15538_vm12, %v8444_v27, 0.0  ;;  %v8277_v7 = vmax.f32 %v14454_v23, 0.0  ;;  %vm15928_vm12 = vmmov %vm15925_vm4  ;;  %vm15939_vm8 = vnez %v15070_v15 }
 0xb09   : > { %8516 = vst.msk [vmem:[%s14303_s26 + $0x60] sm:$0xff] %vm15927_vm5, %v8480_v19  ;;  %v8276_v58 = vmax.f32 %v14461_v24, 0.0 }
 0xb0a   : > { %8374 = vrot.lane.b32.xlu1 %v8277_v7, %s9234_s12 }
 0xb0b   : > { %8372 = vrot.lane.b32.xlu0 %v8276_v58, %s9234_s12 }
 0xb18   : > { %v8355_v45 = vpop.permute.xlu1 %8354 }
 0xb19   : > { %v8447_v39 = vadd.f32 %v8355_v45, %v8267_v30  ;;  %v8353_v26 = vpop.permute.xlu0 %8352  ;;  %v9055_v20 = vpop.f32.mrb[44].mxu0 }
 0xb1a   : > { %v8446_v36 = vadd.f32 %v8353_v26, %v8266_v56  ;;  %v14480_v40 = vadd.f32 %v9055_v20, %v14132_v49  ;;  %v8203_v3 = vpop.f32.mrb[45].mxu0 }
 0xb1b   : > { %v8483_v13 = vsel %vm11408_vm2, %v8447_v39, 0.0  ;;  %v14487_v38 = vadd.f32 %v14132_v49, %v8203_v3  ;;  %vm15930_vm2 = vnez %v15028_v63 }
 0xb1c   : > { %8519 = vst.msk [vmem:[%s14303_s26 + $0x78] sm:$0xff] %vm15928_vm12, %v8483_v13  ;;  %v8482_v47 = vsel %vm11439_vm1, %v8446_v36, 0.0  ;;  %v8279_v30 = vmax.f32 %v14480_v40, 0.0  ;;  %vm15931_vm1 = vmmov %vm15925_vm4 }
 0xb1d   : > { %8518 = vst.msk [vmem:[%s14303_s26 + $0x70] sm:$0xff] %vm15929_vm11, %v8482_v47  ;;  %v8278_v21 = vmax.f32 %v14487_v38, 0.0  ;;  %vm15933_vm14 = vmmov %vm15931_vm1  ;;  %vm15943_vm11 = vnez %v15101_v18 }
 0xb1e   : > { %8378 = vrot.lane.b32.xlu1 %v8279_v30, %s9234_s12  ;;  %vm15935_vm3 = vmmov %vm15931_vm1 }
 0xb1f   : > { %8376 = vrot.lane.b32.xlu0 %v8278_v21, %s9234_s12  ;;  %vm15937_vm0 = vmmov %vm15931_vm1 }
 0xb20   : > { %vm15938_vm4 = vmmov %vm15937_vm0 }
 0xb21   : > { %vm15940_vm5 = vmmov %vm15937_vm0 }
 0xb22   : > { %vm15942_vm12 = vmmov %vm15937_vm0 }
 0xb2c   : > { %v8359_v9 = vpop.permute.xlu1 %8358 }
 0xb2d   : > { %v8449_v53 = vadd.f32 %v8359_v9, %v8269_v2  ;;  %v8357_v56 = vpop.permute.xlu0 %8356  ;;  %v9058_v51 = vpop.f32.mrb[46].mxu0 }
 0xb2e   : > { %v8448_v33 = vadd.f32 %v8357_v56, %v8268_v29  ;;  %v14506_v17 = vadd.f32 %v9058_v51, %v14132_v49  ;;  %v8213_v50 = vpop.f32.mrb[47].mxu0 }
 0xb2f   : > { %v8485_v11 = vsel %vm15930_vm2, %v8449_v53, 0.0  ;;  %v14513_v10 = vadd.f32 %v14132_v49, %v8213_v50  ;;  %vm15944_vm2 = vmmov %vm15937_vm0  ;;  %v15951_v53 = vld [vmem:[#allocation5_spill] sm:$0xff] }
 0xb30   : > { %8521 = vst.msk [vmem:[%s14303_s26 + $0x88] sm:$0xff] %vm15931_vm1, %v8485_v11  ;;  %v8484_v31 = vsel %vm15932_vm7, %v8448_v33, 0.0  ;;  %v8281_v2 = vmax.f32 %v14506_v17, 0.0  ;;  %vm15945_vm1 = vnez %v15103_v34  ;;  %vm15946_vm7 = vmmov %vm15937_vm0  ;;  %v15955_v33 = vld [vmem:[#allocation7_spill] sm:$0xff] }
 0xb31   : > { %8520 = vst.msk [vmem:[%s14303_s26 + $0x80] sm:$0xff] %vm15933_vm14, %v8484_v31  ;;  %v8280_v63 = vmax.f32 %v14513_v10, 0.0  ;;  %vm15947_vm14 = vnez %v15107_v22 }
 0xb32   : > { %8382 = vrot.lane.b32.xlu1 %v8281_v2, %s9234_s12 }
 0xb33   : > { %8380 = vrot.lane.b32.xlu0 %v8280_v63, %s9234_s12 }
 0xb40   : > { %v8363_v25 = vpop.permute.xlu1 %8362 }
 0xb41   : > { %v8451_v28 = vadd.f32 %v8363_v25, %v8271_v46  ;;  %v8361_v29 = vpop.permute.xlu0 %8360  ;;  %v9061_v14 = vpop.f32.mrb[48].mxu0  ;;  %v15958_v25 = vld [vmem:[#allocation8_spill] sm:$0xff] }
 0xb42   : > { %v8450_v59 = vadd.f32 %v8361_v29, %v8270_v52  ;;  %v14532_v6 = vadd.f32 %v9061_v14, %v14132_v49  ;;  %v8223_v62 = vpop.f32.mrb[49].mxu0 }
 0xb43   : > { %v8487_v1 = vsel %vm15934_vm9, %v8451_v28, 0.0  ;;  %v14539_v55 = vadd.f32 %v14132_v49, %v8223_v62  ;;  %vm15948_vm9 = vmmov %vm15937_vm0 }
 0xb44   : > { %8523 = vst.msk [vmem:[%s14303_s26 + $0x98] sm:$0xff] %vm15935_vm3, %v8487_v1  ;;  %v8486_v48 = vsel %vm15936_vm10, %v8450_v59, 0.0  ;;  %v8283_v46 = vmax.f32 %v14532_v6, 0.0  ;;  %vm15950_vm3 = vmmov %vm15937_vm0  ;;  %vm15952_vm10 = vnez %v15951_v53  ;;  %v15964_v6 = vld [vmem:[#allocation10_spill] sm:$0xff] }
 0xb45   : > { %8522 = vst.msk [vmem:[%s14303_s26 + $0x90] sm:$0xff] %vm15937_vm0, %v8486_v48  ;;  %v8282_v60 = vmax.f32 %v14539_v55, 0.0  ;;  %v15967_v48 = vld [vmem:[#allocation11_spill] sm:$0xff] }
 0xb46   : > { %8386 = vrot.lane.b32.xlu1 %v8283_v46, %s9234_s12 }
 0xb47   : > { %8384 = vrot.lane.b32.xlu0 %v8282_v60, %s9234_s12 }
 0xb54   : > { %v8367_v43 = vpop.permute.xlu1 %8366 }
 0xb55   : > { %v8453_v4 = vadd.f32 %v8367_v43, %v8273_v35  ;;  %v8365_v52 = vpop.permute.xlu0 %8364  ;;  %v9064_v61 = vpop.f32.mrb[50].mxu0 }
 0xb56   : > { %v8452_v32 = vadd.f32 %v8365_v52, %v8272_v57  ;;  %v8239_v5 = vadd.f32 %v9064_v61, %v14132_v49  ;;  %v8233_v44 = vpop.f32.mrb[51].mxu0  ;;  %v15970_v52 = vld [vmem:[#allocation12_spill] sm:$0xff] }
 0xb57   : > { %v8489_v27 = vsel %vm15560_vm6, %v8453_v4, 0.0  ;;  %v8234_v45 = vadd.f32 %v14132_v49, %v8233_v44  ;;  %vm15941_vm6 = vnez %v15080_v12 }
 0xb58   : > { %8525 = vst.msk [vmem:[%s14303_s26 + $0xa8] sm:$0xff] %vm15938_vm4, %v8489_v27  ;;  %v8488_v19 = vsel %vm15939_vm8, %v8452_v32, 0.0  ;;  %v8285_v41 = vmax.f32 %v8239_v5, 0.0  ;;  %vm15956_vm4 = vnez %v15955_v33  ;;  %vm15957_vm8 = vmmov %vm15937_vm0  ;;  %v15973_v32 = vld [vmem:[#allocation13_spill] sm:$0xff] }
 0xb59   : > { %8524 = vst.msk [vmem:[%s14303_s26 + $0xa0] sm:$0xff] %vm15940_vm5, %v8488_v19  ;;  %v8284_v35 = vmax.f32 %v8234_v45, 0.0  ;;  %vm15959_vm5 = vnez %v15958_v25 }
 0xb5a   : > { %8390 = vrot.lane.b32.xlu1 %v8285_v41, %s9234_s12 }
 0xb5b   : > { %8388 = vrot.lane.b32.xlu0 %v8284_v35, %s9234_s12 }
 0xb62   : > { %v9067_v0 = vpop.f32.mrb[52].mxu0 }
 0xb63   : > { %v8249_v16 = vadd.f32 %v9067_v0, %v14132_v49  ;;  %v8243_v57 = vpop.f32.mrb[53].mxu0 }
 0xb64   : > { %v8244_v39 = vadd.f32 %v14132_v49, %v8243_v57 }
 0xb65   : > { %v8287_v15 = vmax.f32 %v8249_v16, 0.0 }
 0xb66   : > { %v8286_v26 = vmax.f32 %v8244_v39, 0.0 }
 0xb67   : > { %8394 = vrot.lane.b32.xlu1 %v8287_v15, %s9234_s12 }
 0xb68   : > { %v8371_v20 = vpop.permute.xlu1 %8370  ;;  %8392 = vrot.lane.b32.xlu0 %v8286_v26, %s9234_s12 }
 0xb69   : > { %v8455_v36 = vadd.f32 %v8371_v20, %v8275_v42  ;;  %v8369_v13 = vpop.permute.xlu0 %8368 }
 0xb6a   : > { %v8454_v3 = vadd.f32 %v8369_v13, %v8274_v37 }
 0xb6b   : > { %v8491_v47 = vsel %vm15941_vm6, %v8455_v36, 0.0  ;;  %vm15960_vm6 = vmmov %vm15937_vm0 }
 0xb6c   : > { %8527 = vst.msk [vmem:[%s14303_s26 + $0xb8] sm:$0xff] %vm15942_vm12, %v8491_v47  ;;  %v8490_v49 = vsel %vm15943_vm11, %v8454_v3, 0.0  ;;  %vm15963_vm12 = vmmov %vm15937_vm0  ;;  %vm15965_vm11 = vnez %v15964_v6 }
 0xb6d   : > { %8526 = vst.msk [vmem:[%s14303_s26 + $0xb0] sm:$0xff] %vm15944_vm2, %v8490_v49  ;;  %vm15966_vm2 = vmmov %vm15937_vm0 }
 0xb7c   : > { %v8375_v8 = vpop.permute.xlu1 %8374 }
 0xb7d   : > { %v8457_v42 = vadd.f32 %v8375_v8, %v8277_v7  ;;  %v8373_v9 = vpop.permute.xlu0 %8372 }
 0xb7e   : > { %v8456_v54 = vadd.f32 %v8373_v9, %v8276_v58 }
 0xb7f   : > { %v8493_v12 = vsel %vm15945_vm1, %v8457_v42, 0.0  ;;  %vm15968_vm1 = vnez %v15967_v48 }
 0xb80   : > { %8529 = vst.msk [vmem:[%s14303_s26 + $0xc8] sm:$0xff] %vm15946_vm7, %v8493_v12  ;;  %v8492_v18 = vsel %vm15947_vm14, %v8456_v54, 0.0  ;;  %vm15969_vm7 = vmmov %vm15937_vm0  ;;  %vm15971_vm14 = vnez %v15970_v52 }
 0xb81   : > { %8528 = vst.msk [vmem:[%s14303_s26 + $0xc0] sm:$0xff] %vm15948_vm9, %v8492_v18  ;;  %vm15972_vm9 = vmmov %vm15937_vm0 }
 0xb90   : > { %v8379_v37 = vpop.permute.xlu1 %8378 }
 0xb91   : > { %v8459_v23 = vadd.f32 %v8379_v37, %v8279_v30  ;;  %v8377_v7 = vpop.permute.xlu0 %8376 }
 0xb92   : > { %v8458_v24 = vadd.f32 %v8377_v7, %v8278_v21 }
 0xb93   : > { %v8495_v34 = vsel %vm15582_vm15, %v8459_v23, 0.0  ;;  %vm15954_vm15 = vmmov %vm15937_vm0 }
 0xb94   : > { %8531 = vst.msk [vmem:[%s14303_s26 + $0xd8] sm:$0xff] %vm15950_vm3, %v8495_v34  ;;  %v8494_v22 = vsel %vm15952_vm10, %v8458_v24, 0.0  ;;  %vm15974_vm3 = vnez %v15973_v32  ;;  %vm15975_vm10 = vmmov %vm15937_vm0 }
 0xb95   : > { %8530 = vst.msk [vmem:[%s14303_s26 + $0xd0] sm:$0xff] %vm15937_vm0, %v8494_v22 }
 0xba4   : > { %v8383_v56 = vpop.permute.xlu1 %8382 }
 0xba5   : > { %v8461_v40 = vadd.f32 %v8383_v56, %v8281_v2  ;;  %v8381_v30 = vpop.permute.xlu0 %8380 }
 0xba6   : > { %v8460_v38 = vadd.f32 %v8381_v30, %v8280_v63  ;;  %v15961_v63 = vld [vmem:[#allocation9_spill] sm:$0xff] }
 0xba7   : > { %v8497_v51 = vsel %vm11881_vm13, %v8461_v40, 0.0  ;;  %vm15962_vm13 = vnez %v15961_v63 }
 0xba8   : > { %8533 = vst.msk [vmem:[%s14303_s26 + $0xe8] sm:$0xff] %vm15954_vm15, %v8497_v51  ;;  %v8496_v11 = vsel %vm15956_vm4, %v8460_v38, 0.0 }
 0xba9   : > { %8532 = vst.msk [vmem:[%s14303_s26 + $0xe0] sm:$0xff] %vm15957_vm8, %v8496_v11 }
 0xbb8   : > { %v8387_v50 = vpop.permute.xlu1 %8386 }
 0xbb9   : > { %v8463_v31 = vadd.f32 %v8387_v50, %v8283_v46  ;;  %v8385_v17 = vpop.permute.xlu0 %8384 }
 0xbba   : > { %v8462_v2 = vadd.f32 %v8385_v17, %v8282_v60 }
 0xbbb   : > { %v8499_v10 = vsel %vm15959_vm5, %v8463_v31, 0.0 }
 0xbbc   : > { %8535 = vst.msk [vmem:[%s14303_s26 + $0xf8] sm:$0xff] %vm15960_vm6, %v8499_v10  ;;  %v8498_v28 = vsel %vm15962_vm13, %v8462_v2, 0.0 }
 0xbbd   : > { %8534 = vst.msk [vmem:[%s14303_s26 + $0xf0] sm:$0xff] %vm15963_vm12, %v8498_v28 }
 0xbcc   : > { %v8391_v29 = vpop.permute.xlu1 %8390 }
 0xbcd   : > { %v8465_v14 = vadd.f32 %v8391_v29, %v8285_v41  ;;  %v8389_v59 = vpop.permute.xlu0 %8388 }
 0xbce   : > { %v8464_v1 = vadd.f32 %v8389_v59, %v8284_v35 }
 0xbcf   : > { %v8501_v62 = vsel %vm15965_vm11, %v8465_v14, 0.0 }
 0xbd0   : > { %8537 = vst.msk [vmem:[%s14303_s26 + $0x108] sm:$0xff] %vm15966_vm2, %v8501_v62  ;;  %v8500_v55 = vsel %vm15968_vm1, %v8464_v1, 0.0 }
 0xbd1   : > { %8536 = vst.msk [vmem:[%s14303_s26 + $0x100] sm:$0xff] %vm15969_vm7, %v8500_v55 }
 0xbd9   : > { %v8395_v46 = vpop.permute.xlu1 %8394 }
 0xbda   : > { %v8467_v60 = vadd.f32 %v8395_v46, %v8287_v15  ;;  %v8393_v43 = vpop.permute.xlu0 %8392 }
 0xbdb   : > { %v8466_v4 = vadd.f32 %v8393_v43, %v8286_v26 }
 0xbdc   : > { %v8503_v61 = vsel %vm15971_vm14, %v8467_v60, 0.0 }
 0xbdd   : > { %8539 = vst.msk [vmem:[%s14303_s26 + $0x118] sm:$0xff] %vm15972_vm9, %v8503_v61  ;;  %v8502_v27 = vsel %vm15974_vm3, %v8466_v4, 0.0 }
 0xbde   : > { %8538 = vst.msk [vmem:[%s14303_s26 + $0x110] sm:$0xff] %vm15975_vm10, %v8502_v27 }
 0xbdf PF: > { %s15_s18 = sadd.s32 1, %s9223_s18  }
 0xbe0   : > { %p12_p4 = scmp.ge.s32.totalorder %s15_s18, 4  }
 0xbe2   :  { %14 = sbr.rel (!%p12_p4) target bundleno = 1 (0x1), region = 70 }

</bundles_post_ra>
